<compile_context>
chip_gen: v6e
topology: v6e:2x2x1
jax: 0.10.0
libtpu: 0.0.40
codegen_flags: <defaults>
</compile_context>

<pallas_src>
import functools

import jax
import jax.numpy as jnp
from jax.experimental import pallas as pl
from jax.experimental.pallas import tpu as pltpu


_LEAKY_SLOPE = 0.2
_IN_EPS = 1e-5  # PyTorch InstanceNorm2d default


def _round_up(x, m):
    return (x + m - 1) // m * m


# ----------------------------------------------------------------------------
# Pallas kernel: one grid step per sample.  Single-K-step GEMM (bf16 inputs,
# f32 accumulation on the MXU) with the layer's activation / InstanceNorm
# fused into the epilogue.  No scratch accumulator, no pl.when phases.
# ----------------------------------------------------------------------------
def _conv_gemm_kernel(p_ref, w_ref, o_ref, *, epilogue, hw):
    acc = jnp.dot(p_ref[...], w_ref[...], preferred_element_type=jnp.float32)
    if epilogue == "leaky_relu":
        y = jnp.where(acc >= 0.0, acc, _LEAKY_SLOPE * acc)
    elif epilogue == "instnorm_leaky":
        # InstanceNorm2d(affine=False): per-sample, per-channel stats over the
        # hw real rows.  Rows >= hw hold zero-padded patches -> zero GEMM rows,
        # so the E[x^2] - E[x]^2 form needs no masking.
        inv_hw = 1.0 / hw
        mean = jnp.sum(acc, axis=0, keepdims=True) * inv_hw
        ex2 = jnp.sum(acc * acc, axis=0, keepdims=True) * inv_hw
        var = jnp.maximum(ex2 - mean * mean, 0.0)        # biased, like PyTorch
        y = (acc - mean) * jax.lax.rsqrt(var + _IN_EPS)
        y = jnp.where(y >= 0.0, y, _LEAKY_SLOPE * y)
    elif epilogue == "sigmoid":
        y = 1.0 / (1.0 + jnp.exp(-acc))                  # exact sigmoid
    else:
        y = acc
    o_ref[...] = y.astype(o_ref.dtype)


def conv_gemm(patches, w_packed, *, epilogue, batch, hw, hw_pad, out_dtype):
    """patches: (batch*hw_pad, kp) bf16, w_packed: (kp, coutp) bf16."""
    kp, coutp = w_packed.shape
    kernel = functools.partial(_conv_gemm_kernel, epilogue=epilogue, hw=hw)
    return pl.pallas_call(
        kernel,
        out_shape=jax.ShapeDtypeStruct((batch * hw_pad, coutp), out_dtype),
        grid=(batch,),
        in_specs=[
            pl.BlockSpec((hw_pad, kp), lambda b: (b, 0)),
            pl.BlockSpec((kp, coutp), lambda b: (0, 0)),
        ],
        out_specs=pl.BlockSpec((hw_pad, coutp), lambda b: (b, 0)),
        compiler_params=pltpu.CompilerParams(
            dimension_semantics=("parallel",),   # one sample tile per TC on v7x
            vmem_limit_bytes=32 * 1024 * 1024,   # above v5e's 16 MiB default
        ),
    )(patches, w_packed)


# ----------------------------------------------------------------------------
# JAX glue: im2col (bf16) + per-layer wrapper.  Real channel counts only; K is
# padded to a multiple of 128 just for the GEMM.
# ----------------------------------------------------------------------------
def _im2col(x_nhwc, kh, kw, stride, pad):
    if pad:
        x_nhwc = jnp.pad(x_nhwc, ((0, 0), (pad, pad), (pad, pad), (0, 0)))
    n, h, w, c = x_nhwc.shape
    oh = (h - kh) // stride + 1
    ow = (w - kw) // stride + 1
    cols = []
    for i in range(kh):
        for j in range(kw):
            cols.append(
                x_nhwc[:, i:i + stride * oh:stride, j:j + stride * ow:stride, :]
            )
    # K index = (i*kw + j)*C + c  (matches the packed weight layout).
    p = jnp.stack(cols, axis=3).reshape(n, oh * ow, kh * kw * c)
    return p, oh, ow


def conv_layer(x_nhwc, w_packed, *, cout, kh, kw, stride, pad, epilogue,
               out_dtype=jnp.bfloat16):
    # TODO(synk): for the small late layers the whole activation fits one VMEM
    # block; im2col could move inside the kernel to avoid the HBM patch matrix.
    n = x_nhwc.shape[0]
    kp, coutp = w_packed.shape
    patches, oh, ow = _im2col(x_nhwc.astype(jnp.bfloat16), kh, kw, stride, pad)
    hw = oh * ow
    hw_pad = _round_up(hw, 16)                           # bf16 sublane multiple
    k_real = patches.shape[-1]
    patches = jnp.pad(patches, ((0, 0), (0, hw_pad - hw), (0, kp - k_real)))
    patches = patches.reshape(n * hw_pad, kp)
    out = conv_gemm(patches, w_packed, epilogue=epilogue, batch=n, hw=hw,
                    hw_pad=hw_pad, out_dtype=out_dtype)
    out = out.reshape(n, hw_pad, coutp)[:, :hw, :cout]   # drop pad rows/chans
    return out.reshape(n, oh, ow, cout)


# ----------------------------------------------------------------------------
# netD forward
# ----------------------------------------------------------------------------
_LAYER_STATIC = (
    dict(stride=3, pad=1, epilogue="leaky_relu"),
    dict(stride=2, pad=1, epilogue="instnorm_leaky"),
    dict(stride=2, pad=1, epilogue="instnorm_leaky"),
    dict(stride=2, pad=0, epilogue="instnorm_leaky"),
    dict(stride=1, pad=0, epilogue="sigmoid"),
)


def _pack_weight(w_oihw):
    """(Cout, Cin, KH, KW) f32 -> (Kpad, Coutpad) bf16 GEMM matrix."""
    cout, cin, kh, kw = w_oihw.shape
    k_real = kh * kw * cin
    kp = _round_up(k_real, 128)
    coutp = _round_up(cout, 128)
    w = jnp.transpose(w_oihw, (2, 3, 1, 0)).reshape(k_real, cout)
    w = jnp.pad(w, ((0, kp - k_real), (0, coutp - cout)))
    return w.astype(jnp.bfloat16)


def pack_params(params):
    """One-time weight repack, done OUTSIDE the per-forward path."""
    weights, cfg = [], []
    for i, static in enumerate(_LAYER_STATIC):
        w = params[f"w{i + 1}"]
        cout, _, kh, kw = w.shape
        weights.append(_pack_weight(w))
        cfg.append(dict(cout=int(cout), kh=int(kh), kw=int(kw), **static))
    return tuple(weights), tuple(cfg)


def netd_forward(x_nchw, weights, cfg):
    x = jnp.transpose(x_nchw, (0, 2, 3, 1))              # NCHW -> NHWC
    for w, c in zip(weights, cfg):
        out_dtype = jnp.float32 if c["epilogue"] == "sigmoid" else jnp.bfloat16
        x = conv_layer(x, w, cout=c["cout"], kh=c["kh"], kw=c["kw"],
                       stride=c["stride"], pad=c["pad"],
                       epilogue=c["epilogue"], out_dtype=out_dtype)
    # Final x is (N, 1, 1, 1); matches PyTorch (N, 1, OH, OW).view(-1).
    return x.reshape(-1)


def init_params(key, ndf):
    ks = jax.random.split(key, 5)
    shapes = [
        (ndf, 3, 5, 5),
        (ndf * 2, ndf, 4, 4),
        (ndf * 4, ndf * 2, 5, 5),
        (ndf * 8, ndf * 4, 6, 6),
        (1, ndf * 8, 4, 4),
    ]
    return {
        f"w{i + 1}": 0.02 * jax.random.normal(ks[i], s, dtype=jnp.float32)
        for i, s in enumerate(shapes)
    }


if __name__ == "__main__":
    ndf = 8
    batch = 2
    # 150x150 is the smallest spatial size for which every conv in the stack
    # produces a valid (>=1) output; the final conv output is (N, 1, 1, 1).
    key = jax.random.PRNGKey(0)
    k_in, k_par = jax.random.split(key)
    x = jax.random.normal(k_in, (batch, 3, 150, 150), dtype=jnp.float32)
    params = init_params(k_par, ndf)

    weights, cfg = pack_params(params)                   # one-time repack
    fwd = jax.jit(functools.partial(netd_forward, cfg=cfg))
    out = jax.block_until_ready(fwd(x, weights))

    assert out.shape == (batch,), out.shape
    assert bool(jnp.all(jnp.isfinite(out)))
    assert bool(jnp.all((out >= 0.0) & (out <= 1.0)))
    print("KERNEL_OK")
</pallas_src>

<mosaic_0001>
module attributes {stable_mosaic.version = 11 : i64} {
  func.func @_conv_gemm_kernel(%arg0: i32, %arg1: memref<2512x128xbf16, #tpu.memory_space<vmem>>, %arg2: memref<128x128xbf16, #tpu.memory_space<vmem>>, %arg3: memref<2512x128xbf16, #tpu.memory_space<vmem>>) attributes {dimension_semantics = [#tpu.dimension_semantics<parallel>], iteration_bounds = array<i64: 2>, scalar_prefetch = 0 : i64, scratch_operands = 0 : i64, tpu.core_type = #tpu.core_type<tc>, window_params = [{transform_indices = @transform_0, window_bounds = array<i64: 2512, 128>}, {pipeline_mode = #tpu.pipeline_mode<synchronous>, transform_indices = @transform_1, window_bounds = array<i64: 128, 128>}, {transform_indices = @transform_2, window_bounds = array<i64: 2512, 128>}]} {
    %c0 = arith.constant 0 : index
    %c0_0 = arith.constant 0 : index
    %0 = vector.load %arg1[%c0, %c0_0] : memref<2512x128xbf16, #tpu.memory_space<vmem>>, vector<2512x128xbf16>
    %c0_1 = arith.constant 0 : index
    %c0_2 = arith.constant 0 : index
    %1 = vector.load %arg2[%c0_1, %c0_2] : memref<128x128xbf16, #tpu.memory_space<vmem>>, vector<128x128xbf16>
    %cst = arith.constant dense<0.000000e+00> : vector<2512x128xf32>
    %2 = tpu.matmul %0, %1, %cst {dimension_numbers = #tpu.dot_dimension_numbers<[1], [0], [0], [1], [0, 0, 1, 1], [], []>} : vector<2512x128xbf16>, vector<128x128xbf16>, vector<2512x128xf32> -> vector<2512x128xf32>
    %cst_3 = arith.constant 0.000000e+00 : f32
    %3 = vector.broadcast %cst_3 : f32 to vector<2512x128xf32>
    %4 = arith.cmpf oge, %2, %3 : vector<2512x128xf32>
    %cst_4 = arith.constant 2.000000e-01 : f32
    %5 = vector.broadcast %cst_4 : f32 to vector<2512x128xf32>
    %6 = arith.mulf %5, %2 : vector<2512x128xf32>
    %7 = arith.select %4, %2, %6 : vector<2512x128xi1>, vector<2512x128xf32>
    %8 = arith.truncf %7 : vector<2512x128xf32> to vector<2512x128xbf16>
    %c0_5 = arith.constant 0 : index
    %c0_6 = arith.constant 0 : index
    %9 = vector.load %arg3[%c0_5, %c0_6] : memref<2512x128xbf16, #tpu.memory_space<vmem>>, vector<2512x128xbf16>
    tpu.vector_store %arg3[%c0_5, %c0_6], %8 {strides = array<i32>} : memref<2512x128xbf16, #tpu.memory_space<vmem>>, vector<2512x128xbf16>,
    return
  }
  func.func @transform_0(%arg0: i32) -> (i32, i32) {
    %c0_i32 = arith.constant 0 : i32
    %c0_i32_0 = arith.constant 0 : i32
    return %arg0, %c0_i32 : i32, i32
  }
  func.func @transform_1(%arg0: i32) -> (i32, i32) {
    %c0_i32 = arith.constant 0 : i32
    %c0_i32_0 = arith.constant 0 : i32
    %c0_i32_1 = arith.constant 0 : i32
    return %c0_i32, %c0_i32_0 : i32, i32
  }
  func.func @transform_2(%arg0: i32) -> (i32, i32) {
    %c0_i32 = arith.constant 0 : i32
    %c0_i32_0 = arith.constant 0 : i32
    return %arg0, %c0_i32 : i32, i32
  }
}

module attributes {stable_mosaic.version = 11 : i64} {
  func.func @_conv_gemm_kernel(%arg0: i32, %arg1: memref<640x128xbf16, #tpu.memory_space<vmem>>, %arg2: memref<128x128xbf16, #tpu.memory_space<vmem>>, %arg3: memref<640x128xbf16, #tpu.memory_space<vmem>>) attributes {dimension_semantics = [#tpu.dimension_semantics<parallel>], iteration_bounds = array<i64: 2>, scalar_prefetch = 0 : i64, scratch_operands = 0 : i64, tpu.core_type = #tpu.core_type<tc>, window_params = [{transform_indices = @transform_0, window_bounds = array<i64: 640, 128>}, {pipeline_mode = #tpu.pipeline_mode<synchronous>, transform_indices = @transform_1, window_bounds = array<i64: 128, 128>}, {transform_indices = @transform_2, window_bounds = array<i64: 640, 128>}]} {
    %c0 = arith.constant 0 : index
    %c0_0 = arith.constant 0 : index
    %0 = vector.load %arg1[%c0, %c0_0] : memref<640x128xbf16, #tpu.memory_space<vmem>>, vector<640x128xbf16>
    %c0_1 = arith.constant 0 : index
    %c0_2 = arith.constant 0 : index
    %1 = vector.load %arg2[%c0_1, %c0_2] : memref<128x128xbf16, #tpu.memory_space<vmem>>, vector<128x128xbf16>
    %cst = arith.constant dense<0.000000e+00> : vector<640x128xf32>
    %2 = tpu.matmul %0, %1, %cst {dimension_numbers = #tpu.dot_dimension_numbers<[1], [0], [0], [1], [0, 0, 1, 1], [], []>} : vector<640x128xbf16>, vector<128x128xbf16>, vector<640x128xf32> -> vector<640x128xf32>
    %cst_3 = arith.constant dense<0.000000e+00> : vector<128xf32>
    %3 = vector.multi_reduction <add>, %2, %cst_3 [0] : vector<640x128xf32> to vector<128xf32>
    %4 = vector.shape_cast %3 : vector<128xf32> to vector<1x128xf32>
    %cst_4 = arith.constant 1.600000e-03 : f32
    %5 = vector.broadcast %cst_4 : f32 to vector<1x128xf32>
    %6 = arith.mulf %4, %5 : vector<1x128xf32>
    %7 = arith.mulf %2, %2 : vector<640x128xf32>
    %cst_5 = arith.constant dense<0.000000e+00> : vector<128xf32>
    %8 = vector.multi_reduction <add>, %7, %cst_5 [0] : vector<640x128xf32> to vector<128xf32>
    %9 = vector.shape_cast %8 : vector<128xf32> to vector<1x128xf32>
    %cst_6 = arith.constant 1.600000e-03 : f32
    %10 = vector.broadcast %cst_6 : f32 to vector<1x128xf32>
    %11 = arith.mulf %9, %10 : vector<1x128xf32>
    %12 = arith.mulf %6, %6 : vector<1x128xf32>
    %13 = arith.subf %11, %12 : vector<1x128xf32>
    %cst_7 = arith.constant 0.000000e+00 : f32
    %14 = vector.broadcast %cst_7 : f32 to vector<1x128xf32>
    %15 = arith.maximumf %13, %14 : vector<1x128xf32>
    %16 = vector.broadcast %6 : vector<1x128xf32> to vector<640x128xf32>
    %17 = arith.subf %2, %16 : vector<640x128xf32>
    %cst_8 = arith.constant 9.99999974E-6 : f32
    %18 = vector.broadcast %cst_8 : f32 to vector<1x128xf32>
    %19 = arith.addf %15, %18 : vector<1x128xf32>
    %20 = math.rsqrt %19 : vector<1x128xf32>
    %21 = vector.broadcast %20 : vector<1x128xf32> to vector<640x128xf32>
    %22 = arith.mulf %17, %21 : vector<640x128xf32>
    %cst_9 = arith.constant 0.000000e+00 : f32
    %23 = vector.broadcast %cst_9 : f32 to vector<640x128xf32>
    %24 = arith.cmpf oge, %22, %23 : vector<640x128xf32>
    %cst_10 = arith.constant 2.000000e-01 : f32
    %25 = vector.broadcast %cst_10 : f32 to vector<640x128xf32>
    %26 = arith.mulf %25, %22 : vector<640x128xf32>
    %27 = arith.select %24, %22, %26 : vector<640x128xi1>, vector<640x128xf32>
    %28 = arith.truncf %27 : vector<640x128xf32> to vector<640x128xbf16>
    %c0_11 = arith.constant 0 : index
    %c0_12 = arith.constant 0 : index
    %29 = vector.load %arg3[%c0_11, %c0_12] : memref<640x128xbf16, #tpu.memory_space<vmem>>, vector<640x128xbf16>
    tpu.vector_store %arg3[%c0_11, %c0_12], %28 {strides = array<i32>} : memref<640x128xbf16, #tpu.memory_space<vmem>>, vector<640x128xbf16>,
    return
  }
  func.func @transform_0(%arg0: i32) -> (i32, i32) {
    %c0_i32 = arith.constant 0 : i32
    %c0_i32_0 = arith.constant 0 : i32
    return %arg0, %c0_i32 : i32, i32
  }
  func.func @transform_1(%arg0: i32) -> (i32, i32) {
    %c0_i32 = arith.constant 0 : i32
    %c0_i32_0 = arith.constant 0 : i32
    %c0_i32_1 = arith.constant 0 : i32
    return %c0_i32, %c0_i32_0 : i32, i32
  }
  func.func @transform_2(%arg0: i32) -> (i32, i32) {
    %c0_i32 = arith.constant 0 : i32
    %c0_i32_0 = arith.constant 0 : i32
    return %arg0, %c0_i32 : i32, i32
  }
}

module attributes {stable_mosaic.version = 11 : i64} {
  func.func @_conv_gemm_kernel(%arg0: i32, %arg1: memref<144x512xbf16, #tpu.memory_space<vmem>>, %arg2: memref<512x128xbf16, #tpu.memory_space<vmem>>, %arg3: memref<144x128xbf16, #tpu.memory_space<vmem>>) attributes {dimension_semantics = [#tpu.dimension_semantics<parallel>], iteration_bounds = array<i64: 2>, scalar_prefetch = 0 : i64, scratch_operands = 0 : i64, tpu.core_type = #tpu.core_type<tc>, window_params = [{transform_indices = @transform_0, window_bounds = array<i64: 144, 512>}, {pipeline_mode = #tpu.pipeline_mode<synchronous>, transform_indices = @transform_1, window_bounds = array<i64: 512, 128>}, {transform_indices = @transform_2, window_bounds = array<i64: 144, 128>}]} {
    %c0 = arith.constant 0 : index
    %c0_0 = arith.constant 0 : index
    %0 = vector.load %arg1[%c0, %c0_0] : memref<144x512xbf16, #tpu.memory_space<vmem>>, vector<144x512xbf16>
    %c0_1 = arith.constant 0 : index
    %c0_2 = arith.constant 0 : index
    %1 = vector.load %arg2[%c0_1, %c0_2] : memref<512x128xbf16, #tpu.memory_space<vmem>>, vector<512x128xbf16>
    %cst = arith.constant dense<0.000000e+00> : vector<144x128xf32>
    %2 = tpu.matmul %0, %1, %cst {dimension_numbers = #tpu.dot_dimension_numbers<[1], [0], [0], [1], [0, 0, 1, 1], [], []>} : vector<144x512xbf16>, vector<512x128xbf16>, vector<144x128xf32> -> vector<144x128xf32>
    %cst_3 = arith.constant dense<0.000000e+00> : vector<128xf32>
    %3 = vector.multi_reduction <add>, %2, %cst_3 [0] : vector<144x128xf32> to vector<128xf32>
    %4 = vector.shape_cast %3 : vector<128xf32> to vector<1x128xf32>
    %cst_4 = arith.constant 0.0069444445 : f32
    %5 = vector.broadcast %cst_4 : f32 to vector<1x128xf32>
    %6 = arith.mulf %4, %5 : vector<1x128xf32>
    %7 = arith.mulf %2, %2 : vector<144x128xf32>
    %cst_5 = arith.constant dense<0.000000e+00> : vector<128xf32>
    %8 = vector.multi_reduction <add>, %7, %cst_5 [0] : vector<144x128xf32> to vector<128xf32>
    %9 = vector.shape_cast %8 : vector<128xf32> to vector<1x128xf32>
    %cst_6 = arith.constant 0.0069444445 : f32
    %10 = vector.broadcast %cst_6 : f32 to vector<1x128xf32>
    %11 = arith.mulf %9, %10 : vector<1x128xf32>
    %12 = arith.mulf %6, %6 : vector<1x128xf32>
    %13 = arith.subf %11, %12 : vector<1x128xf32>
    %cst_7 = arith.constant 0.000000e+00 : f32
    %14 = vector.broadcast %cst_7 : f32 to vector<1x128xf32>
    %15 = arith.maximumf %13, %14 : vector<1x128xf32>
    %16 = vector.broadcast %6 : vector<1x128xf32> to vector<144x128xf32>
    %17 = arith.subf %2, %16 : vector<144x128xf32>
    %cst_8 = arith.constant 9.99999974E-6 : f32
    %18 = vector.broadcast %cst_8 : f32 to vector<1x128xf32>
    %19 = arith.addf %15, %18 : vector<1x128xf32>
    %20 = math.rsqrt %19 : vector<1x128xf32>
    %21 = vector.broadcast %20 : vector<1x128xf32> to vector<144x128xf32>
    %22 = arith.mulf %17, %21 : vector<144x128xf32>
    %cst_9 = arith.constant 0.000000e+00 : f32
    %23 = vector.broadcast %cst_9 : f32 to vector<144x128xf32>
    %24 = arith.cmpf oge, %22, %23 : vector<144x128xf32>
    %cst_10 = arith.constant 2.000000e-01 : f32
    %25 = vector.broadcast %cst_10 : f32 to vector<144x128xf32>
    %26 = arith.mulf %25, %22 : vector<144x128xf32>
    %27 = arith.select %24, %22, %26 : vector<144x128xi1>, vector<144x128xf32>
    %28 = arith.truncf %27 : vector<144x128xf32> to vector<144x128xbf16>
    %c0_11 = arith.constant 0 : index
    %c0_12 = arith.constant 0 : index
    %29 = vector.load %arg3[%c0_11, %c0_12] : memref<144x128xbf16, #tpu.memory_space<vmem>>, vector<144x128xbf16>
    tpu.vector_store %arg3[%c0_11, %c0_12], %28 {strides = array<i32>} : memref<144x128xbf16, #tpu.memory_space<vmem>>, vector<144x128xbf16>,
    return
  }
  func.func @transform_0(%arg0: i32) -> (i32, i32) {
    %c0_i32 = arith.constant 0 : i32
    %c0_i32_0 = arith.constant 0 : i32
    return %arg0, %c0_i32 : i32, i32
  }
  func.func @transform_1(%arg0: i32) -> (i32, i32) {
    %c0_i32 = arith.constant 0 : i32
    %c0_i32_0 = arith.constant 0 : i32
    %c0_i32_1 = arith.constant 0 : i32
    return %c0_i32, %c0_i32_0 : i32, i32
  }
  func.func @transform_2(%arg0: i32) -> (i32, i32) {
    %c0_i32 = arith.constant 0 : i32
    %c0_i32_0 = arith.constant 0 : i32
    return %arg0, %c0_i32 : i32, i32
  }
}

module attributes {stable_mosaic.version = 11 : i64} {
  func.func @_conv_gemm_kernel(%arg0: i32, %arg1: memref<16x1152xbf16, #tpu.memory_space<vmem>>, %arg2: memref<1152x128xbf16, #tpu.memory_space<vmem>>, %arg3: memref<16x128xbf16, #tpu.memory_space<vmem>>) attributes {dimension_semantics = [#tpu.dimension_semantics<parallel>], iteration_bounds = array<i64: 2>, scalar_prefetch = 0 : i64, scratch_operands = 0 : i64, tpu.core_type = #tpu.core_type<tc>, window_params = [{transform_indices = @transform_0, window_bounds = array<i64: 16, 1152>}, {pipeline_mode = #tpu.pipeline_mode<synchronous>, transform_indices = @transform_1, window_bounds = array<i64: 1152, 128>}, {transform_indices = @transform_2, window_bounds = array<i64: 16, 128>}]} {
    %c0 = arith.constant 0 : index
    %c0_0 = arith.constant 0 : index
    %0 = vector.load %arg1[%c0, %c0_0] : memref<16x1152xbf16, #tpu.memory_space<vmem>>, vector<16x1152xbf16>
    %c0_1 = arith.constant 0 : index
    %c0_2 = arith.constant 0 : index
    %1 = vector.load %arg2[%c0_1, %c0_2] : memref<1152x128xbf16, #tpu.memory_space<vmem>>, vector<1152x128xbf16>
    %cst = arith.constant dense<0.000000e+00> : vector<16x128xf32>
    %2 = tpu.matmul %0, %1, %cst {dimension_numbers = #tpu.dot_dimension_numbers<[1], [0], [0], [1], [0, 0, 1, 1], [], []>} : vector<16x1152xbf16>, vector<1152x128xbf16>, vector<16x128xf32> -> vector<16x128xf32>
    %cst_3 = arith.constant dense<0.000000e+00> : vector<128xf32>
    %3 = vector.multi_reduction <add>, %2, %cst_3 [0] : vector<16x128xf32> to vector<128xf32>
    %4 = vector.shape_cast %3 : vector<128xf32> to vector<1x128xf32>
    %cst_4 = arith.constant 6.250000e-02 : f32
    %5 = vector.broadcast %cst_4 : f32 to vector<1x128xf32>
    %6 = arith.mulf %4, %5 : vector<1x128xf32>
    %7 = arith.mulf %2, %2 : vector<16x128xf32>
    %cst_5 = arith.constant dense<0.000000e+00> : vector<128xf32>
    %8 = vector.multi_reduction <add>, %7, %cst_5 [0] : vector<16x128xf32> to vector<128xf32>
    %9 = vector.shape_cast %8 : vector<128xf32> to vector<1x128xf32>
    %cst_6 = arith.constant 6.250000e-02 : f32
    %10 = vector.broadcast %cst_6 : f32 to vector<1x128xf32>
    %11 = arith.mulf %9, %10 : vector<1x128xf32>
    %12 = arith.mulf %6, %6 : vector<1x128xf32>
    %13 = arith.subf %11, %12 : vector<1x128xf32>
    %cst_7 = arith.constant 0.000000e+00 : f32
    %14 = vector.broadcast %cst_7 : f32 to vector<1x128xf32>
    %15 = arith.maximumf %13, %14 : vector<1x128xf32>
    %16 = vector.broadcast %6 : vector<1x128xf32> to vector<16x128xf32>
    %17 = arith.subf %2, %16 : vector<16x128xf32>
    %cst_8 = arith.constant 9.99999974E-6 : f32
    %18 = vector.broadcast %cst_8 : f32 to vector<1x128xf32>
    %19 = arith.addf %15, %18 : vector<1x128xf32>
    %20 = math.rsqrt %19 : vector<1x128xf32>
    %21 = vector.broadcast %20 : vector<1x128xf32> to vector<16x128xf32>
    %22 = arith.mulf %17, %21 : vector<16x128xf32>
    %cst_9 = arith.constant 0.000000e+00 : f32
    %23 = vector.broadcast %cst_9 : f32 to vector<16x128xf32>
    %24 = arith.cmpf oge, %22, %23 : vector<16x128xf32>
    %cst_10 = arith.constant 2.000000e-01 : f32
    %25 = vector.broadcast %cst_10 : f32 to vector<16x128xf32>
    %26 = arith.mulf %25, %22 : vector<16x128xf32>
    %27 = arith.select %24, %22, %26 : vector<16x128xi1>, vector<16x128xf32>
    %28 = arith.truncf %27 : vector<16x128xf32> to vector<16x128xbf16>
    %c0_11 = arith.constant 0 : index
    %c0_12 = arith.constant 0 : index
    %29 = vector.load %arg3[%c0_11, %c0_12] : memref<16x128xbf16, #tpu.memory_space<vmem>>, vector<16x128xbf16>
    tpu.vector_store %arg3[%c0_11, %c0_12], %28 {strides = array<i32>} : memref<16x128xbf16, #tpu.memory_space<vmem>>, vector<16x128xbf16>,
    return
  }
  func.func @transform_0(%arg0: i32) -> (i32, i32) {
    %c0_i32 = arith.constant 0 : i32
    %c0_i32_0 = arith.constant 0 : i32
    return %arg0, %c0_i32 : i32, i32
  }
  func.func @transform_1(%arg0: i32) -> (i32, i32) {
    %c0_i32 = arith.constant 0 : i32
    %c0_i32_0 = arith.constant 0 : i32
    %c0_i32_1 = arith.constant 0 : i32
    return %c0_i32, %c0_i32_0 : i32, i32
  }
  func.func @transform_2(%arg0: i32) -> (i32, i32) {
    %c0_i32 = arith.constant 0 : i32
    %c0_i32_0 = arith.constant 0 : i32
    return %arg0, %c0_i32 : i32, i32
  }
}

module attributes {stable_mosaic.version = 11 : i64} {
  func.func @_conv_gemm_kernel(%arg0: i32, %arg1: memref<16x1024xbf16, #tpu.memory_space<vmem>>, %arg2: memref<1024x128xbf16, #tpu.memory_space<vmem>>, %arg3: memref<16x128xf32, #tpu.memory_space<vmem>>) attributes {dimension_semantics = [#tpu.dimension_semantics<parallel>], iteration_bounds = array<i64: 2>, scalar_prefetch = 0 : i64, scratch_operands = 0 : i64, tpu.core_type = #tpu.core_type<tc>, window_params = [{transform_indices = @transform_0, window_bounds = array<i64: 16, 1024>}, {pipeline_mode = #tpu.pipeline_mode<synchronous>, transform_indices = @transform_1, window_bounds = array<i64: 1024, 128>}, {transform_indices = @transform_2, window_bounds = array<i64: 16, 128>}]} {
    %c0 = arith.constant 0 : index
    %c0_0 = arith.constant 0 : index
    %0 = vector.load %arg1[%c0, %c0_0] : memref<16x1024xbf16, #tpu.memory_space<vmem>>, vector<16x1024xbf16>
    %c0_1 = arith.constant 0 : index
    %c0_2 = arith.constant 0 : index
    %1 = vector.load %arg2[%c0_1, %c0_2] : memref<1024x128xbf16, #tpu.memory_space<vmem>>, vector<1024x128xbf16>
    %cst = arith.constant dense<0.000000e+00> : vector<16x128xf32>
    %2 = tpu.matmul %0, %1, %cst {dimension_numbers = #tpu.dot_dimension_numbers<[1], [0], [0], [1], [0, 0, 1, 1], [], []>} : vector<16x1024xbf16>, vector<1024x128xbf16>, vector<16x128xf32> -> vector<16x128xf32>
    %cst_3 = arith.constant 0.000000e+00 : f32
    %3 = vector.broadcast %cst_3 : f32 to vector<16x128xf32>
    %4 = arith.subf %3, %2 : vector<16x128xf32>
    %5 = math.exp %4 : vector<16x128xf32>
    %cst_4 = arith.constant 1.000000e+00 : f32
    %6 = vector.broadcast %cst_4 : f32 to vector<16x128xf32>
    %7 = arith.addf %6, %5 : vector<16x128xf32>
    %cst_5 = arith.constant 1.000000e+00 : f32
    %8 = vector.broadcast %cst_5 : f32 to vector<16x128xf32>
    %9 = arith.divf %8, %7 : vector<16x128xf32>
    %c0_6 = arith.constant 0 : index
    %c0_7 = arith.constant 0 : index
    %10 = vector.load %arg3[%c0_6, %c0_7] : memref<16x128xf32, #tpu.memory_space<vmem>>, vector<16x128xf32>
    tpu.vector_store %arg3[%c0_6, %c0_7], %9 {strides = array<i32>} : memref<16x128xf32, #tpu.memory_space<vmem>>, vector<16x128xf32>,
    return
  }
  func.func @transform_0(%arg0: i32) -> (i32, i32) {
    %c0_i32 = arith.constant 0 : i32
    %c0_i32_0 = arith.constant 0 : i32
    return %arg0, %c0_i32 : i32, i32
  }
  func.func @transform_1(%arg0: i32) -> (i32, i32) {
    %c0_i32 = arith.constant 0 : i32
    %c0_i32_0 = arith.constant 0 : i32
    %c0_i32_1 = arith.constant 0 : i32
    return %c0_i32, %c0_i32_0 : i32, i32
  }
  func.func @transform_2(%arg0: i32) -> (i32, i32) {
    %c0_i32 = arith.constant 0 : i32
    %c0_i32_0 = arith.constant 0 : i32
    return %arg0, %c0_i32 : i32, i32
  }
}

</mosaic_0001>

<bundles_post_ra>
// kernel: netd_forward.5
= control target key start
LH: loop header
LB: loop body
LE: loop exit
PB: predicated region body
PF: predicated region fallthrough
CT: control target
= control target key end

     0   :  { %s8093_s9 = smov 0   ;;  %s8789_s0 = inlined_call_operand.vmem [shape: bf16[5024,128], index: 0, kind: input, shape index: {}]   ;;  %s8790_s1 = inlined_call_operand.vmem [shape: bf16[128,128], index: 1, kind: input, shape index: {}]   ;;  %s8791_s2 = inlined_call_operand.vmem [shape: bf16[5024,128], index: 2, kind: output, shape index: {}]  }
   0x1 LB: > { %s5325_s10 = sadd.s32 4294967295, %s8074_s9   ;;  %p5329_p0 = scmp.ge.s32.totalorder %s8074_s9, 1  ;;  %s8074_s9 = sphi %s8093_s9, %s12_s9  }
   0x2   : > { %p113_p1 = scmp.lt.s32.totalorder %s8074_s9, 3 }
   0x4   : > { %p114_p2 = pnand %p5329_p0, %p113_p1 }
   0x5   : > { %s135_s15 = smul.u32 (!%p114_p2), 314, %s5325_s10 }
   0x6   : > { %117 = sbr.rel (%p114_p2) target bundleno = 871 (0x367), region = 28 }
   0x7   : > { %p136_p3 = scmp.lt.s32.totalorder (!%p114_p2), %s135_s15, 627 }
   0xb   : > { %v7903_v0 = vld [vmem:[%s8790_s1 + $0x38] sm:$0xff]   ;;  %v8076_v1 = vmov 0.0   ;;  %v7904_v2 = vld [vmem:[%s8790_s1 + $0x30] sm:$0xff]   ;;  %vm8077_vm0 = vmmov 0   ;;  %v7905_v3 = vld [vmem:[%s8790_s1 + $0x28] sm:$0xff]   ;;  %s8793_s15 = smov (!%p136_p3, %s135_s15), 627 }
   0xc   : > { %7233 = vmatprep.subr.bf16.mxu0 %v8076_v1  ;;  %7877 = vmatprep.subr.bf16.mxu1 %v8076_v1  ;;  %s5330_s18 = sshll.u32 %s8793_s15, 2  ;;  %v7906_v4 = vld [vmem:[%s8790_s1 + $0x20] sm:$0xff]   ;;  %v7907_v5 = vld [vmem:[%s8790_s1 + $0x18] sm:$0xff]   ;;  %v7908_v6 = vld [vmem:[%s8790_s1 + $0x10] sm:$0xff]  }
   0xd   : > { %7234 = vmatpush3.bf16.msra.mxu0 %v7903_v0  ;;  %7885 = vmatpush3.bf16.msra.mxu1 %v7903_v0  ;;  %s8128_s21 = scalar_lea.vmem %s8789_s0, %s5330_s18  ;;  %v7909_v7 = vld [vmem:[%s8790_s1 + $0x8] sm:$0xff]   ;;  %v7910_v8 = vld [vmem:[%s8790_s1] sm:$0xff]   ;;  %s8312_s6 = scalar_lea.vmem %s8791_s2, %s5330_s18 }
   0xe   : > { %7235 = vmatprep.subr.bf16.mxu0 %v8076_v1  ;;  %7878 = vmatprep.subr.bf16.mxu1 %v8076_v1  ;;  %v7911_v9 = vld [vmem:[%s8128_s21] sm:$0xff]   ;;  %v7912_v10 = vld [vmem:[%s8128_s21 + $0x278] sm:$0xff]   ;;  %v7913_v11 = vld [vmem:[%s8128_s21 + $0x8] sm:$0xff]  }
   0xf   : > { %7249 = vmatprep.mubr.msk.bf16.mxu0 %vm8077_vm0, %v8076_v1  ;;  %7565 = vmatprep.mubr.msk.bf16.mxu1 %vm8077_vm0, %v8076_v1  ;;  %v7914_v12 = vld [vmem:[%s8128_s21 + $0x280] sm:$0xff]   ;;  %v7915_v13 = vld [vmem:[%s8128_s21 + $0x10] sm:$0xff]   ;;  %v7916_v14 = vld [vmem:[%s8128_s21 + $0x288] sm:$0xff]  }
  0x10   : > { %v7917_v15 = vld [vmem:[%s8128_s21 + $0x18] sm:$0xff]   ;;  %v7918_v16 = vld [vmem:[%s8128_s21 + $0x290] sm:$0xff]   ;;  %v7919_v17 = vld [vmem:[%s8128_s21 + $0x20] sm:$0xff]  }
  0x11   : > { %7236 = vmatpush3.bf16.msra.mxu0 %v7904_v2  ;;  %7886 = vmatpush3.bf16.msra.mxu1 %v7904_v2  ;;  %v7920_v18 = vld [vmem:[%s8128_s21 + $0x298] sm:$0xff]   ;;  %v7921_v19 = vld [vmem:[%s8128_s21 + $0x28] sm:$0xff]   ;;  %v7922_v20 = vld [vmem:[%s8128_s21 + $0x2a0] sm:$0xff]  }
  0x12   : > { %7237 = vmatprep.subr.bf16.mxu0 %v8076_v1  ;;  %7879 = vmatprep.subr.bf16.mxu1 %v8076_v1  ;;  %v7923_v21 = vld [vmem:[%s8128_s21 + $0x30] sm:$0xff]   ;;  %v7924_v22 = vld [vmem:[%s8128_s21 + $0x2a8] sm:$0xff]   ;;  %v7925_v23 = vld [vmem:[%s8128_s21 + $0x38] sm:$0xff]  }
  0x13   : > { %v7926_v24 = vld [vmem:[%s8128_s21 + $0x2b0] sm:$0xff]   ;;  %v7927_v25 = vld [vmem:[%s8128_s21 + $0x40] sm:$0xff]   ;;  %v7928_v26 = vld [vmem:[%s8128_s21 + $0x2b8] sm:$0xff]  }
  0x14   : > { %v7929_v27 = vld [vmem:[%s8128_s21 + $0x48] sm:$0xff]   ;;  %v7930_v28 = vld [vmem:[%s8128_s21 + $0x2c0] sm:$0xff]   ;;  %v7931_v29 = vld [vmem:[%s8128_s21 + $0x50] sm:$0xff]  }
  0x15   : > { %7238 = vmatpush3.bf16.msra.mxu0 %v7905_v3  ;;  %7887 = vmatpush3.bf16.msra.mxu1 %v7905_v3  ;;  %v7932_v30 = vld [vmem:[%s8128_s21 + $0x2c8] sm:$0xff]   ;;  %v7933_v31 = vld [vmem:[%s8128_s21 + $0x58] sm:$0xff]   ;;  %v7934_v32 = vld [vmem:[%s8128_s21 + $0x2d0] sm:$0xff]  }
  0x16   : > { %7239 = vmatprep.subr.bf16.mxu0 %v8076_v1  ;;  %7880 = vmatprep.subr.bf16.mxu1 %v8076_v1  ;;  %v7935_v33 = vld [vmem:[%s8128_s21 + $0x60] sm:$0xff]   ;;  %v7936_v34 = vld [vmem:[%s8128_s21 + $0x2d8] sm:$0xff]   ;;  %v7937_v35 = vld [vmem:[%s8128_s21 + $0x68] sm:$0xff]  }
  0x17   : > { %v7938_v36 = vld [vmem:[%s8128_s21 + $0x2e0] sm:$0xff]   ;;  %v7939_v37 = vld [vmem:[%s8128_s21 + $0x70] sm:$0xff]   ;;  %v7940_v38 = vld [vmem:[%s8128_s21 + $0x2e8] sm:$0xff]  }
  0x18   : > { %v7941_v39 = vld [vmem:[%s8128_s21 + $0x78] sm:$0xff]   ;;  %v7942_v40 = vld [vmem:[%s8128_s21 + $0x2f0] sm:$0xff]   ;;  %v7943_v41 = vld [vmem:[%s8128_s21 + $0x80] sm:$0xff]  }
  0x19   : > { %7240 = vmatpush3.bf16.msra.mxu0 %v7906_v4  ;;  %7888 = vmatpush3.bf16.msra.mxu1 %v7906_v4  ;;  %v7944_v42 = vld [vmem:[%s8128_s21 + $0x2f8] sm:$0xff]   ;;  %v7945_v43 = vld [vmem:[%s8128_s21 + $0x88] sm:$0xff]   ;;  %v7946_v44 = vld [vmem:[%s8128_s21 + $0x300] sm:$0xff]  }
  0x1a   : > { %7241 = vmatprep.subr.bf16.mxu0 %v8076_v1  ;;  %7881 = vmatprep.subr.bf16.mxu1 %v8076_v1  ;;  %v7947_v45 = vld [vmem:[%s8128_s21 + $0x90] sm:$0xff]   ;;  %v7948_v46 = vld [vmem:[%s8128_s21 + $0x308] sm:$0xff]   ;;  %v7949_v47 = vld [vmem:[%s8128_s21 + $0x98] sm:$0xff]  }
  0x1b   : > { %v7950_v48 = vld [vmem:[%s8128_s21 + $0x310] sm:$0xff]   ;;  %v7951_v49 = vld [vmem:[%s8128_s21 + $0xa0] sm:$0xff]   ;;  %v7952_v50 = vld [vmem:[%s8128_s21 + $0x318] sm:$0xff]  }
  0x1c   : > { %v7953_v51 = vld [vmem:[%s8128_s21 + $0xa8] sm:$0xff]   ;;  %v7954_v52 = vld [vmem:[%s8128_s21 + $0x320] sm:$0xff]   ;;  %v7955_v53 = vld [vmem:[%s8128_s21 + $0xb0] sm:$0xff]  }
  0x1d   : > { %7242 = vmatpush3.bf16.msra.mxu0 %v7907_v5  ;;  %7889 = vmatpush3.bf16.msra.mxu1 %v7907_v5  ;;  %v7956_v54 = vld [vmem:[%s8128_s21 + $0x328] sm:$0xff]   ;;  %v7957_v55 = vld [vmem:[%s8128_s21 + $0xb8] sm:$0xff]   ;;  %v7958_v56 = vld [vmem:[%s8128_s21 + $0x330] sm:$0xff]  }
  0x1e   : > { %7243 = vmatprep.subr.bf16.mxu0 %v8076_v1  ;;  %7882 = vmatprep.subr.bf16.mxu1 %v8076_v1  ;;  %v7959_v57 = vld [vmem:[%s8128_s21 + $0xc0] sm:$0xff]   ;;  %v7960_v58 = vld [vmem:[%s8128_s21 + $0x338] sm:$0xff]   ;;  %v7961_v5 = vld [vmem:[%s8128_s21 + $0xc8] sm:$0xff]  }
  0x21   : > { %7244 = vmatpush3.bf16.msra.mxu0 %v7908_v6  ;;  %7890 = vmatpush3.bf16.msra.mxu1 %v7908_v6  ;;  %v7962_v6 = vld [vmem:[%s8128_s21 + $0x340] sm:$0xff]  }
  0x22   : > { %7245 = vmatprep.subr.bf16.mxu0 %v8076_v1  ;;  %7883 = vmatprep.subr.bf16.mxu1 %v8076_v1 }
  0x25   : > { %7246 = vmatpush3.bf16.msra.mxu0 %v7909_v7  ;;  %7891 = vmatpush3.bf16.msra.mxu1 %v7909_v7 }
  0x26   : > { %7247 = vmatprep.subr.bf16.mxu0 %v8076_v1  ;;  %7884 = vmatprep.subr.bf16.mxu1 %v8076_v1 }
  0x29   : > { %7248 = vmatpush3.bf16.msra.mxu0 %v7910_v8  ;;  %7892 = vmatpush3.bf16.msra.mxu1 %v7910_v8 }
  0x2c   : > { %7250 = vmatmul.mubr.bf16.vlgmr.msra.gmra.mxu0 %v7911_v9  ;;  %7566 = vmatmul.mubr.bf16.vlgmr.msra.gmra.mxu1 %v7912_v10 }
  0x2d   : > { %7253 = vmatprep.mubr.msk.bf16.mxu0 %vm8077_vm0, %v8076_v1  ;;  %7569 = vmatprep.mubr.msk.bf16.mxu1 %vm8077_vm0, %v8076_v1 }
  0x34   : > { %7254 = vmatmul.mubr.bf16.gmra.mxu0 %v7913_v11  ;;  %7570 = vmatmul.mubr.bf16.gmra.mxu1 %v7914_v12 }
  0x35   : > { %7257 = vmatprep.mubr.msk.bf16.mxu0 %vm8077_vm0, %v8076_v1  ;;  %7573 = vmatprep.mubr.msk.bf16.mxu1 %vm8077_vm0, %v8076_v1 }
  0x3c   : > { %7258 = vmatmul.mubr.bf16.gmra.mxu0 %v7915_v13  ;;  %7574 = vmatmul.mubr.bf16.gmra.mxu1 %v7916_v14 }
  0x3d   : > { %7261 = vmatprep.mubr.msk.bf16.mxu0 %vm8077_vm0, %v8076_v1  ;;  %7577 = vmatprep.mubr.msk.bf16.mxu1 %vm8077_vm0, %v8076_v1 }
  0x44   : > { %7262 = vmatmul.mubr.bf16.gmra.mxu0 %v7917_v15  ;;  %7578 = vmatmul.mubr.bf16.gmra.mxu1 %v7918_v16 }
  0x45   : > { %7265 = vmatprep.mubr.msk.bf16.mxu0 %vm8077_vm0, %v8076_v1  ;;  %7581 = vmatprep.mubr.msk.bf16.mxu1 %vm8077_vm0, %v8076_v1 }
  0x4c   : > { %7266 = vmatmul.mubr.bf16.gmra.mxu0 %v7919_v17  ;;  %7582 = vmatmul.mubr.bf16.gmra.mxu1 %v7920_v18 }
  0x4d   : > { %7269 = vmatprep.mubr.msk.bf16.mxu0 %vm8077_vm0, %v8076_v1  ;;  %7585 = vmatprep.mubr.msk.bf16.mxu1 %vm8077_vm0, %v8076_v1 }
  0x54   : > { %7270 = vmatmul.mubr.bf16.gmra.mxu0 %v7921_v19  ;;  %7586 = vmatmul.mubr.bf16.gmra.mxu1 %v7922_v20 }
  0x55   : > { %7273 = vmatprep.mubr.msk.bf16.mxu0 %vm8077_vm0, %v8076_v1  ;;  %7589 = vmatprep.mubr.msk.bf16.mxu1 %vm8077_vm0, %v8076_v1 }
  0x5c   : > { %7274 = vmatmul.mubr.bf16.gmra.mxu0 %v7923_v21  ;;  %7590 = vmatmul.mubr.bf16.gmra.mxu1 %v7924_v22 }
  0x5d   : > { %7277 = vmatprep.mubr.msk.bf16.mxu0 %vm8077_vm0, %v8076_v1  ;;  %7593 = vmatprep.mubr.msk.bf16.mxu1 %vm8077_vm0, %v8076_v1 }
  0x64   : > { %7278 = vmatmul.mubr.bf16.gmra.mxu0 %v7925_v23  ;;  %7594 = vmatmul.mubr.bf16.gmra.mxu1 %v7926_v24 }
  0x65   : > { %7281 = vmatprep.mubr.msk.bf16.mxu0 %vm8077_vm0, %v8076_v1  ;;  %7597 = vmatprep.mubr.msk.bf16.mxu1 %vm8077_vm0, %v8076_v1 }
  0x6c   : > { %7282 = vmatmul.mubr.bf16.gmra.mxu0 %v7927_v25  ;;  %7598 = vmatmul.mubr.bf16.gmra.mxu1 %v7928_v26  ;;  %v7963_v25 = vld [vmem:[%s8128_s21 + $0xd0] sm:$0xff]   ;;  %v7964_v26 = vld [vmem:[%s8128_s21 + $0x348] sm:$0xff]  }
  0x6d   : > { %7285 = vmatprep.mubr.msk.bf16.mxu0 %vm8077_vm0, %v8076_v1  ;;  %7601 = vmatprep.mubr.msk.bf16.mxu1 %vm8077_vm0, %v8076_v1 }
  0x74   : > { %7286 = vmatmul.mubr.bf16.gmra.mxu0 %v7929_v27  ;;  %7602 = vmatmul.mubr.bf16.gmra.mxu1 %v7930_v28 }
  0x75   : > { %7289 = vmatprep.mubr.msk.bf16.mxu0 %vm8077_vm0, %v8076_v1  ;;  %7605 = vmatprep.mubr.msk.bf16.mxu1 %vm8077_vm0, %v8076_v1 }
  0x7c   : > { %7290 = vmatmul.mubr.bf16.gmra.mxu0 %v7931_v29  ;;  %7606 = vmatmul.mubr.bf16.gmra.mxu1 %v7932_v30 }
  0x7d   : > { %7293 = vmatprep.mubr.msk.bf16.mxu0 %vm8077_vm0, %v8076_v1  ;;  %7609 = vmatprep.mubr.msk.bf16.mxu1 %vm8077_vm0, %v8076_v1 }
  0x84   : > { %7294 = vmatmul.mubr.bf16.gmra.mxu0 %v7933_v31  ;;  %7610 = vmatmul.mubr.bf16.gmra.mxu1 %v7934_v32 }
  0x85   : > { %7297 = vmatprep.mubr.msk.bf16.mxu0 %vm8077_vm0, %v8076_v1  ;;  %7613 = vmatprep.mubr.msk.bf16.mxu1 %vm8077_vm0, %v8076_v1 }
  0x8c   : > { %7298 = vmatmul.mubr.bf16.gmra.mxu0 %v7935_v33  ;;  %7614 = vmatmul.mubr.bf16.gmra.mxu1 %v7936_v34 }
  0x8d   : > { %7301 = vmatprep.mubr.msk.bf16.mxu0 %vm8077_vm0, %v8076_v1  ;;  %7617 = vmatprep.mubr.msk.bf16.mxu1 %vm8077_vm0, %v8076_v1 }
  0x94   : > { %7302 = vmatmul.mubr.bf16.gmra.mxu0 %v7937_v35  ;;  %7618 = vmatmul.mubr.bf16.gmra.mxu1 %v7938_v36 }
  0x95   : > { %7305 = vmatprep.mubr.msk.bf16.mxu0 %vm8077_vm0, %v8076_v1  ;;  %7621 = vmatprep.mubr.msk.bf16.mxu1 %vm8077_vm0, %v8076_v1 }
  0x9c   : > { %7306 = vmatmul.mubr.bf16.gmra.mxu0 %v7939_v37  ;;  %7622 = vmatmul.mubr.bf16.gmra.mxu1 %v7940_v38 }
  0x9d   : > { %7309 = vmatprep.mubr.msk.bf16.mxu0 %vm8077_vm0, %v8076_v1  ;;  %7625 = vmatprep.mubr.msk.bf16.mxu1 %vm8077_vm0, %v8076_v1 }
  0xa4   : > { %7310 = vmatmul.mubr.bf16.gmra.mxu0 %v7941_v39  ;;  %7626 = vmatmul.mubr.bf16.gmra.mxu1 %v7942_v40 }
  0xa5   : > { %7313 = vmatprep.mubr.msk.bf16.mxu0 %vm8077_vm0, %v8076_v1  ;;  %7629 = vmatprep.mubr.msk.bf16.mxu1 %vm8077_vm0, %v8076_v1 }
  0xac   : > { %7314 = vmatmul.mubr.bf16.gmra.mxu0 %v7943_v41  ;;  %7630 = vmatmul.mubr.bf16.gmra.mxu1 %v7944_v42 }
  0xad   : > { %7317 = vmatprep.mubr.msk.bf16.mxu0 %vm8077_vm0, %v8076_v1  ;;  %7633 = vmatprep.mubr.msk.bf16.mxu1 %vm8077_vm0, %v8076_v1 }
  0xb4   : > { %7318 = vmatmul.mubr.bf16.gmra.mxu0 %v7945_v43  ;;  %7634 = vmatmul.mubr.bf16.gmra.mxu1 %v7946_v44 }
  0xb5   : > { %7321 = vmatprep.mubr.msk.bf16.mxu0 %vm8077_vm0, %v8076_v1  ;;  %7637 = vmatprep.mubr.msk.bf16.mxu1 %vm8077_vm0, %v8076_v1 }
  0xbc   : > { %7322 = vmatmul.mubr.bf16.gmra.mxu0 %v7947_v45  ;;  %7638 = vmatmul.mubr.bf16.gmra.mxu1 %v7948_v46  ;;  %v7965_v45 = vld [vmem:[%s8128_s21 + $0xd8] sm:$0xff]   ;;  %v7966_v46 = vld [vmem:[%s8128_s21 + $0x350] sm:$0xff]  }
  0xbd   : > { %7325 = vmatprep.mubr.msk.bf16.mxu0 %vm8077_vm0, %v8076_v1  ;;  %7641 = vmatprep.mubr.msk.bf16.mxu1 %vm8077_vm0, %v8076_v1 }
  0xc4   : > { %7326 = vmatmul.mubr.bf16.gmra.mxu0 %v7949_v47  ;;  %7642 = vmatmul.mubr.bf16.gmra.mxu1 %v7950_v48 }
  0xc5   : > { %7329 = vmatprep.mubr.msk.bf16.mxu0 %vm8077_vm0, %v8076_v1  ;;  %7645 = vmatprep.mubr.msk.bf16.mxu1 %vm8077_vm0, %v8076_v1 }
  0xcc   : > { %7330 = vmatmul.mubr.bf16.gmra.mxu0 %v7951_v49  ;;  %7646 = vmatmul.mubr.bf16.gmra.mxu1 %v7952_v50 }
  0xcd   : > { %7333 = vmatprep.mubr.msk.bf16.mxu0 %vm8077_vm0, %v8076_v1  ;;  %7649 = vmatprep.mubr.msk.bf16.mxu1 %vm8077_vm0, %v8076_v1 }
  0xd4   : > { %7334 = vmatmul.mubr.bf16.gmra.mxu0 %v7953_v51  ;;  %7650 = vmatmul.mubr.bf16.gmra.mxu1 %v7954_v52 }
  0xd5   : > { %7337 = vmatprep.mubr.msk.bf16.mxu0 %vm8077_vm0, %v8076_v1  ;;  %7653 = vmatprep.mubr.msk.bf16.mxu1 %vm8077_vm0, %v8076_v1 }
  0xdc   : > { %7338 = vmatmul.mubr.bf16.gmra.mxu0 %v7955_v53  ;;  %7654 = vmatmul.mubr.bf16.gmra.mxu1 %v7956_v54 }
  0xdd   : > { %7341 = vmatprep.mubr.msk.bf16.mxu0 %vm8077_vm0, %v8076_v1  ;;  %7657 = vmatprep.mubr.msk.bf16.mxu1 %vm8077_vm0, %v8076_v1 }
  0xe4   : > { %7342 = vmatmul.mubr.bf16.gmra.mxu0 %v7957_v55  ;;  %7658 = vmatmul.mubr.bf16.gmra.mxu1 %v7958_v56 }
  0xe5   : > { %7345 = vmatprep.mubr.msk.bf16.mxu0 %vm8077_vm0, %v8076_v1  ;;  %7661 = vmatprep.mubr.msk.bf16.mxu1 %vm8077_vm0, %v8076_v1 }
  0xec   : > { %v1502_v59 = vpop.f32.mrf.mxu0  ;;  %7346 = vmatmul.mubr.bf16.gmra.mxu0 %v7959_v57  ;;  %v2134_v60 = vpop.f32.mrf.mxu1  ;;  %7662 = vmatmul.mubr.bf16.gmra.mxu1 %v7960_v58 }
  0xed   : > { %vm2915_vm1 = vcmp.ge.f32.partialorder %v2134_v60, 0.0  ;;  %v3229_v61 = vmul.f32 0.2, %v2134_v60  ;;  %7349 = vmatprep.mubr.msk.bf16.mxu0 %vm8077_vm0, %v8076_v1  ;;  %7665 = vmatprep.mubr.msk.bf16.mxu1 %vm8077_vm0, %v8076_v1  ;;  %v3071_v0 = vmul.f32 0.2, %v1502_v59  ;;  %vm2757_vm2 = vcmp.ge.f32.partialorder %v1502_v59, 0.0 }
  0xee   : > { %v7251_v62 = vpop.f32.mrf.mxu0  ;;  %v7567_v63 = vpop.f32.mrf.mxu1 }
  0xef   : > { %v3543_v2 = vsel %vm2915_vm1, %v2134_v60, %v3229_v61  ;;  %v3385_v11 = vsel %vm2757_vm2, %v1502_v59, %v3071_v0 }
  0xf0   : > { %v1505_v3 = vpop.f32.mrf.mxu0  ;;  %v2137_v4 = vpop.f32.mrf.mxu1 }
  0xf1   : > { %vm2758_vm3 = vcmp.ge.f32.partialorder %v1505_v3, 0.0  ;;  %v3072_v7 = vmul.f32 0.2, %v1505_v3  ;;  %vm2916_vm4 = vcmp.ge.f32.partialorder %v2137_v4, 0.0  ;;  %v3230_v8 = vmul.f32 0.2, %v2137_v4 }
  0xf2   : > { %v7252_v9 = vpop.f32.mrf.mxu0  ;;  %v7568_v10 = vpop.f32.mrf.mxu1 }
  0xf3   : > { %v3386_v12 = vsel %vm2758_vm3, %v1505_v3, %v3072_v7  ;;  %v3544_v13 = vsel %vm2916_vm4, %v2137_v4, %v3230_v8  ;;  %v7968_v3 = vld [vmem:[%s8128_s21 + $0x358] sm:$0xff]  }
  0xf4   : > { %v6130_v14 = vpack.c.bf16 %v3386_v12, %v3385_v11  ;;  %v6525_v15 = vpack.c.bf16 %v3544_v13, %v3543_v2  ;;  %v1510_v16 = vpop.f32.mrf.mxu0  ;;  %7350 = vmatmul.mubr.bf16.gmra.mxu0 %v7961_v5  ;;  %v2142_v17 = vpop.f32.mrf.mxu1  ;;  %7666 = vmatmul.mubr.bf16.gmra.mxu1 %v7962_v6  ;;  %v7967_v2 = vld [vmem:[%s8128_s21 + $0xe0] sm:$0xff]  }
  0xf5   : > { %vm2917_vm5 = vcmp.ge.f32.partialorder %v2142_v17, 0.0  ;;  %v3231_v18 = vmul.f32 0.2, %v2142_v17  ;;  %7353 = vmatprep.mubr.msk.bf16.mxu0 %vm8077_vm0, %v8076_v1  ;;  %7669 = vmatprep.mubr.msk.bf16.mxu1 %vm8077_vm0, %v8076_v1  ;;  %v3073_v21 = vmul.f32 0.2, %v1510_v16  ;;  %vm2759_vm6 = vcmp.ge.f32.partialorder %v1510_v16, 0.0 }
  0xf6   : > { %6131 = vst [vmem:[%s8312_s6] sm:$0xff] %v6130_v14   ;;  %6990 = vst [vmem:[%s8312_s6 + $0x278] sm:$0xff] %v6525_v15   ;;  %v7255_v19 = vpop.f32.mrf.mxu0  ;;  %v7571_v20 = vpop.f32.mrf.mxu1 }
  0xf7   : > { %v3545_v22 = vsel %vm2917_vm5, %v2142_v17, %v3231_v18  ;;  %v3387_v31 = vsel %vm2759_vm6, %v1510_v16, %v3073_v21 }
  0xf8   : > { %v1513_v23 = vpop.f32.mrf.mxu0  ;;  %v2145_v24 = vpop.f32.mrf.mxu1 }
  0xf9   : > { %vm2760_vm7 = vcmp.ge.f32.partialorder %v1513_v23, 0.0  ;;  %v3074_v27 = vmul.f32 0.2, %v1513_v23  ;;  %vm2918_vm8 = vcmp.ge.f32.partialorder %v2145_v24, 0.0  ;;  %v3232_v28 = vmul.f32 0.2, %v2145_v24 }
  0xfa   : > { %v7256_v29 = vpop.f32.mrf.mxu0  ;;  %v7572_v30 = vpop.f32.mrf.mxu1 }
  0xfb   : > { %v3388_v32 = vsel %vm2760_vm7, %v1513_v23, %v3074_v27  ;;  %v3546_v33 = vsel %vm2918_vm8, %v2145_v24, %v3232_v28  ;;  %v7970_v23 = vld [vmem:[%s8128_s21 + $0x360] sm:$0xff]  }
  0xfc   : > { %v6135_v34 = vpack.c.bf16 %v3388_v32, %v3387_v31  ;;  %v6530_v35 = vpack.c.bf16 %v3546_v33, %v3545_v22  ;;  %v1518_v36 = vpop.f32.mrf.mxu0  ;;  %7354 = vmatmul.mubr.bf16.gmra.mxu0 %v7963_v25  ;;  %v2150_v37 = vpop.f32.mrf.mxu1  ;;  %7670 = vmatmul.mubr.bf16.gmra.mxu1 %v7964_v26  ;;  %v7969_v22 = vld [vmem:[%s8128_s21 + $0xe8] sm:$0xff]  }
  0xfd   : > { %vm2919_vm9 = vcmp.ge.f32.partialorder %v2150_v37, 0.0  ;;  %v3233_v38 = vmul.f32 0.2, %v2150_v37  ;;  %7357 = vmatprep.mubr.msk.bf16.mxu0 %vm8077_vm0, %v8076_v1  ;;  %7673 = vmatprep.mubr.msk.bf16.mxu1 %vm8077_vm0, %v8076_v1  ;;  %v3075_v41 = vmul.f32 0.2, %v1518_v36  ;;  %vm2761_vm10 = vcmp.ge.f32.partialorder %v1518_v36, 0.0 }
  0xfe   : > { %6912 = vst [vmem:[%s8312_s6 + $0x8] sm:$0xff] %v6135_v34   ;;  %6991 = vst [vmem:[%s8312_s6 + $0x280] sm:$0xff] %v6530_v35   ;;  %v7259_v39 = vpop.f32.mrf.mxu0  ;;  %v7575_v40 = vpop.f32.mrf.mxu1 }
  0xff   : > { %v3547_v42 = vsel %vm2919_vm9, %v2150_v37, %v3233_v38  ;;  %v3389_v51 = vsel %vm2761_vm10, %v1518_v36, %v3075_v41 }
 0x100   : > { %v1521_v43 = vpop.f32.mrf.mxu0  ;;  %v2153_v44 = vpop.f32.mrf.mxu1 }
 0x101   : > { %vm2762_vm11 = vcmp.ge.f32.partialorder %v1521_v43, 0.0  ;;  %v3076_v47 = vmul.f32 0.2, %v1521_v43  ;;  %vm2920_vm12 = vcmp.ge.f32.partialorder %v2153_v44, 0.0  ;;  %v3234_v48 = vmul.f32 0.2, %v2153_v44 }
 0x102   : > { %v7260_v49 = vpop.f32.mrf.mxu0  ;;  %v7576_v50 = vpop.f32.mrf.mxu1 }
 0x103   : > { %v3390_v52 = vsel %vm2762_vm11, %v1521_v43, %v3076_v47  ;;  %v3548_v53 = vsel %vm2920_vm12, %v2153_v44, %v3234_v48  ;;  %v7972_v43 = vld [vmem:[%s8128_s21 + $0x368] sm:$0xff]  }
 0x104   : > { %v6140_v54 = vpack.c.bf16 %v3390_v52, %v3389_v51  ;;  %v6535_v55 = vpack.c.bf16 %v3548_v53, %v3547_v42  ;;  %v1526_v56 = vpop.f32.mrf.mxu0  ;;  %7358 = vmatmul.mubr.bf16.gmra.mxu0 %v7965_v45  ;;  %v2158_v57 = vpop.f32.mrf.mxu1  ;;  %7674 = vmatmul.mubr.bf16.gmra.mxu1 %v7966_v46  ;;  %v7971_v42 = vld [vmem:[%s8128_s21 + $0xf0] sm:$0xff]  }
 0x105   : > { %vm2921_vm13 = vcmp.ge.f32.partialorder %v2158_v57, 0.0  ;;  %v3235_v58 = vmul.f32 0.2, %v2158_v57  ;;  %7361 = vmatprep.mubr.msk.bf16.mxu0 %vm8077_vm0, %v8076_v1  ;;  %7677 = vmatprep.mubr.msk.bf16.mxu1 %vm8077_vm0, %v8076_v1  ;;  %v3077_v61 = vmul.f32 0.2, %v1526_v56  ;;  %vm2763_vm14 = vcmp.ge.f32.partialorder %v1526_v56, 0.0 }
 0x106   : > { %6913 = vst [vmem:[%s8312_s6 + $0x10] sm:$0xff] %v6140_v54   ;;  %6992 = vst [vmem:[%s8312_s6 + $0x288] sm:$0xff] %v6535_v55   ;;  %v7263_v59 = vpop.f32.mrf.mxu0  ;;  %v7579_v60 = vpop.f32.mrf.mxu1 }
 0x107   : > { %v3549_v62 = vsel %vm2921_vm13, %v2158_v57, %v3235_v58  ;;  %v3391_v8 = vsel %vm2763_vm14, %v1526_v56, %v3077_v61 }
 0x108   : > { %v1529_v63 = vpop.f32.mrf.mxu0  ;;  %v2161_v0 = vpop.f32.mrf.mxu1 }
 0x109   : > { %vm2764_vm15 = vcmp.ge.f32.partialorder %v1529_v63, 0.0  ;;  %v3078_v4 = vmul.f32 0.2, %v1529_v63  ;;  %vm2922_vm1 = vcmp.ge.f32.partialorder %v2161_v0, 0.0  ;;  %v3236_v5 = vmul.f32 0.2, %v2161_v0 }
 0x10a   : > { %v7264_v6 = vpop.f32.mrf.mxu0  ;;  %v7580_v7 = vpop.f32.mrf.mxu1 }
 0x10b   : > { %v3392_v9 = vsel %vm2764_vm15, %v1529_v63, %v3078_v4  ;;  %v3550_v10 = vsel %vm2922_vm1, %v2161_v0, %v3236_v5  ;;  %v7974_v63 = vld [vmem:[%s8128_s21 + $0x370] sm:$0xff]  }
 0x10c   : > { %v6145_v11 = vpack.c.bf16 %v3392_v9, %v3391_v8  ;;  %v6540_v12 = vpack.c.bf16 %v3550_v10, %v3549_v62  ;;  %v1534_v13 = vpop.f32.mrf.mxu0  ;;  %7362 = vmatmul.mubr.bf16.gmra.mxu0 %v7967_v2  ;;  %v2166_v14 = vpop.f32.mrf.mxu1  ;;  %7678 = vmatmul.mubr.bf16.gmra.mxu1 %v7968_v3  ;;  %v7973_v62 = vld [vmem:[%s8128_s21 + $0xf8] sm:$0xff]  }
 0x10d   : > { %vm2923_vm2 = vcmp.ge.f32.partialorder %v2166_v14, 0.0  ;;  %v3237_v15 = vmul.f32 0.2, %v2166_v14  ;;  %7365 = vmatprep.mubr.msk.bf16.mxu0 %vm8077_vm0, %v8076_v1  ;;  %7681 = vmatprep.mubr.msk.bf16.mxu1 %vm8077_vm0, %v8076_v1  ;;  %v3079_v18 = vmul.f32 0.2, %v1534_v13  ;;  %vm2765_vm3 = vcmp.ge.f32.partialorder %v1534_v13, 0.0 }
 0x10e   : > { %6914 = vst [vmem:[%s8312_s6 + $0x18] sm:$0xff] %v6145_v11   ;;  %6993 = vst [vmem:[%s8312_s6 + $0x290] sm:$0xff] %v6540_v12   ;;  %v7267_v16 = vpop.f32.mrf.mxu0  ;;  %v7583_v17 = vpop.f32.mrf.mxu1 }
 0x10f   : > { %v3551_v19 = vsel %vm2923_vm2, %v2166_v14, %v3237_v15  ;;  %v3393_v28 = vsel %vm2765_vm3, %v1534_v13, %v3079_v18 }
 0x110   : > { %v1537_v20 = vpop.f32.mrf.mxu0  ;;  %v2169_v21 = vpop.f32.mrf.mxu1 }
 0x111   : > { %vm2766_vm4 = vcmp.ge.f32.partialorder %v1537_v20, 0.0  ;;  %v3080_v24 = vmul.f32 0.2, %v1537_v20  ;;  %vm2924_vm5 = vcmp.ge.f32.partialorder %v2169_v21, 0.0  ;;  %v3238_v25 = vmul.f32 0.2, %v2169_v21 }
 0x112   : > { %v7268_v26 = vpop.f32.mrf.mxu0  ;;  %v7584_v27 = vpop.f32.mrf.mxu1 }
 0x113   : > { %v3394_v29 = vsel %vm2766_vm4, %v1537_v20, %v3080_v24  ;;  %v3552_v30 = vsel %vm2924_vm5, %v2169_v21, %v3238_v25  ;;  %v7976_v20 = vld [vmem:[%s8128_s21 + $0x378] sm:$0xff]  }
 0x114   : > { %v6150_v31 = vpack.c.bf16 %v3394_v29, %v3393_v28  ;;  %v6545_v32 = vpack.c.bf16 %v3552_v30, %v3551_v19  ;;  %v1542_v33 = vpop.f32.mrf.mxu0  ;;  %7366 = vmatmul.mubr.bf16.gmra.mxu0 %v7969_v22  ;;  %v2174_v34 = vpop.f32.mrf.mxu1  ;;  %7682 = vmatmul.mubr.bf16.gmra.mxu1 %v7970_v23  ;;  %v7975_v19 = vld [vmem:[%s8128_s21 + $0x100] sm:$0xff]  }
 0x115   : > { %vm2925_vm6 = vcmp.ge.f32.partialorder %v2174_v34, 0.0  ;;  %v3239_v35 = vmul.f32 0.2, %v2174_v34  ;;  %7369 = vmatprep.mubr.msk.bf16.mxu0 %vm8077_vm0, %v8076_v1  ;;  %7685 = vmatprep.mubr.msk.bf16.mxu1 %vm8077_vm0, %v8076_v1  ;;  %v3081_v38 = vmul.f32 0.2, %v1542_v33  ;;  %vm2767_vm7 = vcmp.ge.f32.partialorder %v1542_v33, 0.0 }
 0x116   : > { %6915 = vst [vmem:[%s8312_s6 + $0x20] sm:$0xff] %v6150_v31   ;;  %6994 = vst [vmem:[%s8312_s6 + $0x298] sm:$0xff] %v6545_v32   ;;  %v7271_v36 = vpop.f32.mrf.mxu0  ;;  %v7587_v37 = vpop.f32.mrf.mxu1 }
 0x117   : > { %v3553_v39 = vsel %vm2925_vm6, %v2174_v34, %v3239_v35  ;;  %v3395_v48 = vsel %vm2767_vm7, %v1542_v33, %v3081_v38 }
 0x118   : > { %v1545_v40 = vpop.f32.mrf.mxu0  ;;  %v2177_v41 = vpop.f32.mrf.mxu1 }
 0x119   : > { %vm2768_vm8 = vcmp.ge.f32.partialorder %v1545_v40, 0.0  ;;  %v3082_v44 = vmul.f32 0.2, %v1545_v40  ;;  %vm2926_vm9 = vcmp.ge.f32.partialorder %v2177_v41, 0.0  ;;  %v3240_v45 = vmul.f32 0.2, %v2177_v41 }
 0x11a   : > { %v7272_v46 = vpop.f32.mrf.mxu0  ;;  %v7588_v47 = vpop.f32.mrf.mxu1 }
 0x11b   : > { %v3396_v49 = vsel %vm2768_vm8, %v1545_v40, %v3082_v44  ;;  %v3554_v50 = vsel %vm2926_vm9, %v2177_v41, %v3240_v45  ;;  %v7978_v40 = vld [vmem:[%s8128_s21 + $0x380] sm:$0xff]  }
 0x11c   : > { %v6155_v51 = vpack.c.bf16 %v3396_v49, %v3395_v48  ;;  %v6550_v52 = vpack.c.bf16 %v3554_v50, %v3553_v39  ;;  %v1550_v53 = vpop.f32.mrf.mxu0  ;;  %7370 = vmatmul.mubr.bf16.gmra.mxu0 %v7971_v42  ;;  %v2182_v54 = vpop.f32.mrf.mxu1  ;;  %7686 = vmatmul.mubr.bf16.gmra.mxu1 %v7972_v43  ;;  %v7977_v39 = vld [vmem:[%s8128_s21 + $0x108] sm:$0xff]  }
 0x11d   : > { %vm2927_vm10 = vcmp.ge.f32.partialorder %v2182_v54, 0.0  ;;  %v3241_v55 = vmul.f32 0.2, %v2182_v54  ;;  %7373 = vmatprep.mubr.msk.bf16.mxu0 %vm8077_vm0, %v8076_v1  ;;  %7689 = vmatprep.mubr.msk.bf16.mxu1 %vm8077_vm0, %v8076_v1  ;;  %v3083_v58 = vmul.f32 0.2, %v1550_v53  ;;  %vm2769_vm11 = vcmp.ge.f32.partialorder %v1550_v53, 0.0 }
 0x11e   : > { %6916 = vst [vmem:[%s8312_s6 + $0x28] sm:$0xff] %v6155_v51   ;;  %6995 = vst [vmem:[%s8312_s6 + $0x2a0] sm:$0xff] %v6550_v52   ;;  %v7275_v56 = vpop.f32.mrf.mxu0  ;;  %v7591_v57 = vpop.f32.mrf.mxu1 }
 0x11f   : > { %v3555_v59 = vsel %vm2927_vm10, %v2182_v54, %v3241_v55  ;;  %v3397_v5 = vsel %vm2769_vm11, %v1550_v53, %v3083_v58 }
 0x120   : > { %v1553_v60 = vpop.f32.mrf.mxu0  ;;  %v2185_v61 = vpop.f32.mrf.mxu1 }
 0x121   : > { %vm2770_vm12 = vcmp.ge.f32.partialorder %v1553_v60, 0.0  ;;  %v3084_v0 = vmul.f32 0.2, %v1553_v60  ;;  %vm2928_vm13 = vcmp.ge.f32.partialorder %v2185_v61, 0.0  ;;  %v3242_v2 = vmul.f32 0.2, %v2185_v61 }
 0x122   : > { %v7276_v3 = vpop.f32.mrf.mxu0  ;;  %v7592_v4 = vpop.f32.mrf.mxu1 }
 0x123   : > { %v3398_v6 = vsel %vm2770_vm12, %v1553_v60, %v3084_v0  ;;  %v3556_v7 = vsel %vm2928_vm13, %v2185_v61, %v3242_v2  ;;  %v7980_v60 = vld [vmem:[%s8128_s21 + $0x388] sm:$0xff]  }
 0x124   : > { %v6160_v8 = vpack.c.bf16 %v3398_v6, %v3397_v5  ;;  %v6555_v9 = vpack.c.bf16 %v3556_v7, %v3555_v59  ;;  %v1558_v10 = vpop.f32.mrf.mxu0  ;;  %7374 = vmatmul.mubr.bf16.gmra.mxu0 %v7973_v62  ;;  %v2190_v11 = vpop.f32.mrf.mxu1  ;;  %7690 = vmatmul.mubr.bf16.gmra.mxu1 %v7974_v63  ;;  %v7979_v59 = vld [vmem:[%s8128_s21 + $0x110] sm:$0xff]  }
 0x125   : > { %vm2929_vm14 = vcmp.ge.f32.partialorder %v2190_v11, 0.0  ;;  %v3243_v12 = vmul.f32 0.2, %v2190_v11  ;;  %7377 = vmatprep.mubr.msk.bf16.mxu0 %vm8077_vm0, %v8076_v1  ;;  %7693 = vmatprep.mubr.msk.bf16.mxu1 %vm8077_vm0, %v8076_v1  ;;  %v3085_v15 = vmul.f32 0.2, %v1558_v10  ;;  %vm2771_vm15 = vcmp.ge.f32.partialorder %v1558_v10, 0.0 }
 0x126   : > { %6917 = vst [vmem:[%s8312_s6 + $0x30] sm:$0xff] %v6160_v8   ;;  %6996 = vst [vmem:[%s8312_s6 + $0x2a8] sm:$0xff] %v6555_v9   ;;  %v7279_v13 = vpop.f32.mrf.mxu0  ;;  %v7595_v14 = vpop.f32.mrf.mxu1 }
 0x127   : > { %v3557_v16 = vsel %vm2929_vm14, %v2190_v11, %v3243_v12  ;;  %v3399_v25 = vsel %vm2771_vm15, %v1558_v10, %v3085_v15 }
 0x128   : > { %v1561_v17 = vpop.f32.mrf.mxu0  ;;  %v2193_v18 = vpop.f32.mrf.mxu1 }
 0x129   : > { %vm2772_vm1 = vcmp.ge.f32.partialorder %v1561_v17, 0.0  ;;  %v3086_v21 = vmul.f32 0.2, %v1561_v17  ;;  %vm2930_vm2 = vcmp.ge.f32.partialorder %v2193_v18, 0.0  ;;  %v3244_v22 = vmul.f32 0.2, %v2193_v18 }
 0x12a   : > { %v7280_v23 = vpop.f32.mrf.mxu0  ;;  %v7596_v24 = vpop.f32.mrf.mxu1 }
 0x12b   : > { %v3400_v26 = vsel %vm2772_vm1, %v1561_v17, %v3086_v21  ;;  %v3558_v27 = vsel %vm2930_vm2, %v2193_v18, %v3244_v22  ;;  %v7982_v17 = vld [vmem:[%s8128_s21 + $0x390] sm:$0xff]  }
 0x12c   : > { %v6165_v28 = vpack.c.bf16 %v3400_v26, %v3399_v25  ;;  %v6560_v29 = vpack.c.bf16 %v3558_v27, %v3557_v16  ;;  %v1566_v30 = vpop.f32.mrf.mxu0  ;;  %7378 = vmatmul.mubr.bf16.gmra.mxu0 %v7975_v19  ;;  %v2198_v31 = vpop.f32.mrf.mxu1  ;;  %7694 = vmatmul.mubr.bf16.gmra.mxu1 %v7976_v20  ;;  %v7981_v16 = vld [vmem:[%s8128_s21 + $0x118] sm:$0xff]  }
 0x12d   : > { %vm2931_vm3 = vcmp.ge.f32.partialorder %v2198_v31, 0.0  ;;  %v3245_v32 = vmul.f32 0.2, %v2198_v31  ;;  %7381 = vmatprep.mubr.msk.bf16.mxu0 %vm8077_vm0, %v8076_v1  ;;  %7697 = vmatprep.mubr.msk.bf16.mxu1 %vm8077_vm0, %v8076_v1  ;;  %v3087_v35 = vmul.f32 0.2, %v1566_v30  ;;  %vm2773_vm4 = vcmp.ge.f32.partialorder %v1566_v30, 0.0 }
 0x12e   : > { %6918 = vst [vmem:[%s8312_s6 + $0x38] sm:$0xff] %v6165_v28   ;;  %6997 = vst [vmem:[%s8312_s6 + $0x2b0] sm:$0xff] %v6560_v29   ;;  %v7283_v33 = vpop.f32.mrf.mxu0  ;;  %v7599_v34 = vpop.f32.mrf.mxu1 }
 0x12f   : > { %v3559_v36 = vsel %vm2931_vm3, %v2198_v31, %v3245_v32  ;;  %v3401_v45 = vsel %vm2773_vm4, %v1566_v30, %v3087_v35 }
 0x130   : > { %v1569_v37 = vpop.f32.mrf.mxu0  ;;  %v2201_v38 = vpop.f32.mrf.mxu1 }
 0x131   : > { %vm2774_vm5 = vcmp.ge.f32.partialorder %v1569_v37, 0.0  ;;  %v3088_v41 = vmul.f32 0.2, %v1569_v37  ;;  %vm2932_vm6 = vcmp.ge.f32.partialorder %v2201_v38, 0.0  ;;  %v3246_v42 = vmul.f32 0.2, %v2201_v38 }
 0x132   : > { %v7284_v43 = vpop.f32.mrf.mxu0  ;;  %v7600_v44 = vpop.f32.mrf.mxu1 }
 0x133   : > { %v3402_v46 = vsel %vm2774_vm5, %v1569_v37, %v3088_v41  ;;  %v3560_v47 = vsel %vm2932_vm6, %v2201_v38, %v3246_v42  ;;  %v7984_v37 = vld [vmem:[%s8128_s21 + $0x398] sm:$0xff]  }
 0x134   : > { %v6170_v48 = vpack.c.bf16 %v3402_v46, %v3401_v45  ;;  %v6565_v49 = vpack.c.bf16 %v3560_v47, %v3559_v36  ;;  %v1574_v50 = vpop.f32.mrf.mxu0  ;;  %7382 = vmatmul.mubr.bf16.gmra.mxu0 %v7977_v39  ;;  %v2206_v51 = vpop.f32.mrf.mxu1  ;;  %7698 = vmatmul.mubr.bf16.gmra.mxu1 %v7978_v40  ;;  %v7983_v36 = vld [vmem:[%s8128_s21 + $0x120] sm:$0xff]  }
 0x135   : > { %vm2933_vm7 = vcmp.ge.f32.partialorder %v2206_v51, 0.0  ;;  %v3247_v52 = vmul.f32 0.2, %v2206_v51  ;;  %7385 = vmatprep.mubr.msk.bf16.mxu0 %vm8077_vm0, %v8076_v1  ;;  %7701 = vmatprep.mubr.msk.bf16.mxu1 %vm8077_vm0, %v8076_v1  ;;  %v3089_v55 = vmul.f32 0.2, %v1574_v50  ;;  %vm2775_vm8 = vcmp.ge.f32.partialorder %v1574_v50, 0.0 }
 0x136   : > { %6919 = vst [vmem:[%s8312_s6 + $0x40] sm:$0xff] %v6170_v48   ;;  %6998 = vst [vmem:[%s8312_s6 + $0x2b8] sm:$0xff] %v6565_v49   ;;  %v7287_v53 = vpop.f32.mrf.mxu0  ;;  %v7603_v54 = vpop.f32.mrf.mxu1 }
 0x137   : > { %v3561_v56 = vsel %vm2933_vm7, %v2206_v51, %v3247_v52  ;;  %v3403_v2 = vsel %vm2775_vm8, %v1574_v50, %v3089_v55 }
 0x138   : > { %v1577_v57 = vpop.f32.mrf.mxu0  ;;  %v2209_v58 = vpop.f32.mrf.mxu1 }
 0x139   : > { %vm2776_vm9 = vcmp.ge.f32.partialorder %v1577_v57, 0.0  ;;  %v3090_v61 = vmul.f32 0.2, %v1577_v57  ;;  %vm2934_vm10 = vcmp.ge.f32.partialorder %v2209_v58, 0.0  ;;  %v3248_v62 = vmul.f32 0.2, %v2209_v58 }
 0x13a   : > { %v7288_v63 = vpop.f32.mrf.mxu0  ;;  %v7604_v0 = vpop.f32.mrf.mxu1 }
 0x13b   : > { %v3404_v3 = vsel %vm2776_vm9, %v1577_v57, %v3090_v61  ;;  %v3562_v4 = vsel %vm2934_vm10, %v2209_v58, %v3248_v62  ;;  %v7986_v57 = vld [vmem:[%s8128_s21 + $0x3a0] sm:$0xff]  }
 0x13c   : > { %v6175_v5 = vpack.c.bf16 %v3404_v3, %v3403_v2  ;;  %v6570_v6 = vpack.c.bf16 %v3562_v4, %v3561_v56  ;;  %v1582_v7 = vpop.f32.mrf.mxu0  ;;  %7386 = vmatmul.mubr.bf16.gmra.mxu0 %v7979_v59  ;;  %v2214_v8 = vpop.f32.mrf.mxu1  ;;  %7702 = vmatmul.mubr.bf16.gmra.mxu1 %v7980_v60  ;;  %v7985_v56 = vld [vmem:[%s8128_s21 + $0x128] sm:$0xff]  }
 0x13d   : > { %vm2935_vm11 = vcmp.ge.f32.partialorder %v2214_v8, 0.0  ;;  %v3249_v9 = vmul.f32 0.2, %v2214_v8  ;;  %7389 = vmatprep.mubr.msk.bf16.mxu0 %vm8077_vm0, %v8076_v1  ;;  %7705 = vmatprep.mubr.msk.bf16.mxu1 %vm8077_vm0, %v8076_v1  ;;  %v3091_v12 = vmul.f32 0.2, %v1582_v7  ;;  %vm2777_vm12 = vcmp.ge.f32.partialorder %v1582_v7, 0.0 }
 0x13e   : > { %6920 = vst [vmem:[%s8312_s6 + $0x48] sm:$0xff] %v6175_v5   ;;  %6999 = vst [vmem:[%s8312_s6 + $0x2c0] sm:$0xff] %v6570_v6   ;;  %v7291_v10 = vpop.f32.mrf.mxu0  ;;  %v7607_v11 = vpop.f32.mrf.mxu1 }
 0x13f   : > { %v3563_v13 = vsel %vm2935_vm11, %v2214_v8, %v3249_v9  ;;  %v3405_v22 = vsel %vm2777_vm12, %v1582_v7, %v3091_v12 }
 0x140   : > { %v1585_v14 = vpop.f32.mrf.mxu0  ;;  %v2217_v15 = vpop.f32.mrf.mxu1 }
 0x141   : > { %vm2778_vm13 = vcmp.ge.f32.partialorder %v1585_v14, 0.0  ;;  %v3092_v18 = vmul.f32 0.2, %v1585_v14  ;;  %vm2936_vm14 = vcmp.ge.f32.partialorder %v2217_v15, 0.0  ;;  %v3250_v19 = vmul.f32 0.2, %v2217_v15 }
 0x142   : > { %v7292_v20 = vpop.f32.mrf.mxu0  ;;  %v7608_v21 = vpop.f32.mrf.mxu1 }
 0x143   : > { %v3406_v23 = vsel %vm2778_vm13, %v1585_v14, %v3092_v18  ;;  %v3564_v24 = vsel %vm2936_vm14, %v2217_v15, %v3250_v19  ;;  %v7988_v14 = vld [vmem:[%s8128_s21 + $0x3a8] sm:$0xff]  }
 0x144   : > { %v6180_v25 = vpack.c.bf16 %v3406_v23, %v3405_v22  ;;  %v6575_v26 = vpack.c.bf16 %v3564_v24, %v3563_v13  ;;  %v1590_v27 = vpop.f32.mrf.mxu0  ;;  %7390 = vmatmul.mubr.bf16.gmra.mxu0 %v7981_v16  ;;  %v2222_v28 = vpop.f32.mrf.mxu1  ;;  %7706 = vmatmul.mubr.bf16.gmra.mxu1 %v7982_v17  ;;  %v7987_v13 = vld [vmem:[%s8128_s21 + $0x130] sm:$0xff]  }
 0x145   : > { %vm2937_vm15 = vcmp.ge.f32.partialorder %v2222_v28, 0.0  ;;  %v3251_v29 = vmul.f32 0.2, %v2222_v28  ;;  %7393 = vmatprep.mubr.msk.bf16.mxu0 %vm8077_vm0, %v8076_v1  ;;  %7709 = vmatprep.mubr.msk.bf16.mxu1 %vm8077_vm0, %v8076_v1  ;;  %v3093_v32 = vmul.f32 0.2, %v1590_v27  ;;  %vm2779_vm1 = vcmp.ge.f32.partialorder %v1590_v27, 0.0 }
 0x146   : > { %6921 = vst [vmem:[%s8312_s6 + $0x50] sm:$0xff] %v6180_v25   ;;  %7000 = vst [vmem:[%s8312_s6 + $0x2c8] sm:$0xff] %v6575_v26   ;;  %v7295_v30 = vpop.f32.mrf.mxu0  ;;  %v7611_v31 = vpop.f32.mrf.mxu1 }
 0x147   : > { %v3565_v33 = vsel %vm2937_vm15, %v2222_v28, %v3251_v29  ;;  %v3407_v42 = vsel %vm2779_vm1, %v1590_v27, %v3093_v32 }
 0x148   : > { %v1593_v34 = vpop.f32.mrf.mxu0  ;;  %v2225_v35 = vpop.f32.mrf.mxu1 }
 0x149   : > { %vm2780_vm2 = vcmp.ge.f32.partialorder %v1593_v34, 0.0  ;;  %v3094_v38 = vmul.f32 0.2, %v1593_v34  ;;  %vm2938_vm3 = vcmp.ge.f32.partialorder %v2225_v35, 0.0  ;;  %v3252_v39 = vmul.f32 0.2, %v2225_v35 }
 0x14a   : > { %v7296_v40 = vpop.f32.mrf.mxu0  ;;  %v7612_v41 = vpop.f32.mrf.mxu1 }
 0x14b   : > { %v3408_v43 = vsel %vm2780_vm2, %v1593_v34, %v3094_v38  ;;  %v3566_v44 = vsel %vm2938_vm3, %v2225_v35, %v3252_v39  ;;  %v7990_v34 = vld [vmem:[%s8128_s21 + $0x3b0] sm:$0xff]  }
 0x14c   : > { %v6185_v45 = vpack.c.bf16 %v3408_v43, %v3407_v42  ;;  %v6580_v46 = vpack.c.bf16 %v3566_v44, %v3565_v33  ;;  %v1598_v47 = vpop.f32.mrf.mxu0  ;;  %7394 = vmatmul.mubr.bf16.gmra.mxu0 %v7983_v36  ;;  %v2230_v48 = vpop.f32.mrf.mxu1  ;;  %7710 = vmatmul.mubr.bf16.gmra.mxu1 %v7984_v37  ;;  %v7989_v33 = vld [vmem:[%s8128_s21 + $0x138] sm:$0xff]  }
 0x14d   : > { %vm2939_vm4 = vcmp.ge.f32.partialorder %v2230_v48, 0.0  ;;  %v3253_v49 = vmul.f32 0.2, %v2230_v48  ;;  %7397 = vmatprep.mubr.msk.bf16.mxu0 %vm8077_vm0, %v8076_v1  ;;  %7713 = vmatprep.mubr.msk.bf16.mxu1 %vm8077_vm0, %v8076_v1  ;;  %v3095_v52 = vmul.f32 0.2, %v1598_v47  ;;  %vm2781_vm5 = vcmp.ge.f32.partialorder %v1598_v47, 0.0 }
 0x14e   : > { %6922 = vst [vmem:[%s8312_s6 + $0x58] sm:$0xff] %v6185_v45   ;;  %7001 = vst [vmem:[%s8312_s6 + $0x2d0] sm:$0xff] %v6580_v46   ;;  %v7299_v50 = vpop.f32.mrf.mxu0  ;;  %v7615_v51 = vpop.f32.mrf.mxu1 }
 0x14f   : > { %v3567_v53 = vsel %vm2939_vm4, %v2230_v48, %v3253_v49  ;;  %v3409_v62 = vsel %vm2781_vm5, %v1598_v47, %v3095_v52 }
 0x150   : > { %v1601_v54 = vpop.f32.mrf.mxu0  ;;  %v2233_v55 = vpop.f32.mrf.mxu1 }
 0x151   : > { %vm2782_vm6 = vcmp.ge.f32.partialorder %v1601_v54, 0.0  ;;  %v3096_v58 = vmul.f32 0.2, %v1601_v54  ;;  %vm2940_vm7 = vcmp.ge.f32.partialorder %v2233_v55, 0.0  ;;  %v3254_v59 = vmul.f32 0.2, %v2233_v55 }
 0x152   : > { %v7300_v60 = vpop.f32.mrf.mxu0  ;;  %v7616_v61 = vpop.f32.mrf.mxu1 }
 0x153   : > { %v3410_v63 = vsel %vm2782_vm6, %v1601_v54, %v3096_v58  ;;  %v3568_v0 = vsel %vm2940_vm7, %v2233_v55, %v3254_v59  ;;  %v7992_v54 = vld [vmem:[%s8128_s21 + $0x3b8] sm:$0xff]  }
 0x154   : > { %v6190_v2 = vpack.c.bf16 %v3410_v63, %v3409_v62  ;;  %v6585_v3 = vpack.c.bf16 %v3568_v0, %v3567_v53  ;;  %v1606_v4 = vpop.f32.mrf.mxu0  ;;  %7398 = vmatmul.mubr.bf16.gmra.mxu0 %v7985_v56  ;;  %v2238_v5 = vpop.f32.mrf.mxu1  ;;  %7714 = vmatmul.mubr.bf16.gmra.mxu1 %v7986_v57  ;;  %v7991_v53 = vld [vmem:[%s8128_s21 + $0x140] sm:$0xff]  }
 0x155   : > { %vm2941_vm8 = vcmp.ge.f32.partialorder %v2238_v5, 0.0  ;;  %v3255_v6 = vmul.f32 0.2, %v2238_v5  ;;  %7401 = vmatprep.mubr.msk.bf16.mxu0 %vm8077_vm0, %v8076_v1  ;;  %7717 = vmatprep.mubr.msk.bf16.mxu1 %vm8077_vm0, %v8076_v1  ;;  %v3097_v9 = vmul.f32 0.2, %v1606_v4  ;;  %vm2783_vm9 = vcmp.ge.f32.partialorder %v1606_v4, 0.0 }
 0x156   : > { %6923 = vst [vmem:[%s8312_s6 + $0x60] sm:$0xff] %v6190_v2   ;;  %7002 = vst [vmem:[%s8312_s6 + $0x2d8] sm:$0xff] %v6585_v3   ;;  %v7303_v7 = vpop.f32.mrf.mxu0  ;;  %v7619_v8 = vpop.f32.mrf.mxu1 }
 0x157   : > { %v3569_v10 = vsel %vm2941_vm8, %v2238_v5, %v3255_v6  ;;  %v3411_v19 = vsel %vm2783_vm9, %v1606_v4, %v3097_v9 }
 0x158   : > { %v1609_v11 = vpop.f32.mrf.mxu0  ;;  %v2241_v12 = vpop.f32.mrf.mxu1 }
 0x159   : > { %vm2784_vm10 = vcmp.ge.f32.partialorder %v1609_v11, 0.0  ;;  %v3098_v15 = vmul.f32 0.2, %v1609_v11  ;;  %vm2942_vm11 = vcmp.ge.f32.partialorder %v2241_v12, 0.0  ;;  %v3256_v16 = vmul.f32 0.2, %v2241_v12 }
 0x15a   : > { %v7304_v17 = vpop.f32.mrf.mxu0  ;;  %v7620_v18 = vpop.f32.mrf.mxu1 }
 0x15b   : > { %v3412_v20 = vsel %vm2784_vm10, %v1609_v11, %v3098_v15  ;;  %v3570_v21 = vsel %vm2942_vm11, %v2241_v12, %v3256_v16  ;;  %v7994_v11 = vld [vmem:[%s8128_s21 + $0x3c0] sm:$0xff]  }
 0x15c   : > { %v6195_v22 = vpack.c.bf16 %v3412_v20, %v3411_v19  ;;  %v6590_v23 = vpack.c.bf16 %v3570_v21, %v3569_v10  ;;  %v1614_v24 = vpop.f32.mrf.mxu0  ;;  %7402 = vmatmul.mubr.bf16.gmra.mxu0 %v7987_v13  ;;  %v2246_v25 = vpop.f32.mrf.mxu1  ;;  %7718 = vmatmul.mubr.bf16.gmra.mxu1 %v7988_v14  ;;  %v7993_v10 = vld [vmem:[%s8128_s21 + $0x148] sm:$0xff]  }
 0x15d   : > { %vm2943_vm12 = vcmp.ge.f32.partialorder %v2246_v25, 0.0  ;;  %v3257_v26 = vmul.f32 0.2, %v2246_v25  ;;  %7405 = vmatprep.mubr.msk.bf16.mxu0 %vm8077_vm0, %v8076_v1  ;;  %7721 = vmatprep.mubr.msk.bf16.mxu1 %vm8077_vm0, %v8076_v1  ;;  %v3099_v29 = vmul.f32 0.2, %v1614_v24  ;;  %vm2785_vm13 = vcmp.ge.f32.partialorder %v1614_v24, 0.0 }
 0x15e   : > { %6924 = vst [vmem:[%s8312_s6 + $0x68] sm:$0xff] %v6195_v22   ;;  %7003 = vst [vmem:[%s8312_s6 + $0x2e0] sm:$0xff] %v6590_v23   ;;  %v7307_v27 = vpop.f32.mrf.mxu0  ;;  %v7623_v28 = vpop.f32.mrf.mxu1 }
 0x15f   : > { %v3571_v30 = vsel %vm2943_vm12, %v2246_v25, %v3257_v26  ;;  %v3413_v39 = vsel %vm2785_vm13, %v1614_v24, %v3099_v29 }
 0x160   : > { %v1617_v31 = vpop.f32.mrf.mxu0  ;;  %v2249_v32 = vpop.f32.mrf.mxu1 }
 0x161   : > { %vm2786_vm14 = vcmp.ge.f32.partialorder %v1617_v31, 0.0  ;;  %v3100_v35 = vmul.f32 0.2, %v1617_v31  ;;  %vm2944_vm15 = vcmp.ge.f32.partialorder %v2249_v32, 0.0  ;;  %v3258_v36 = vmul.f32 0.2, %v2249_v32 }
 0x162   : > { %v7308_v37 = vpop.f32.mrf.mxu0  ;;  %v7624_v38 = vpop.f32.mrf.mxu1 }
 0x163   : > { %v3414_v40 = vsel %vm2786_vm14, %v1617_v31, %v3100_v35  ;;  %v3572_v41 = vsel %vm2944_vm15, %v2249_v32, %v3258_v36  ;;  %v7996_v31 = vld [vmem:[%s8128_s21 + $0x3c8] sm:$0xff]  }
 0x164   : > { %v6200_v42 = vpack.c.bf16 %v3414_v40, %v3413_v39  ;;  %v6595_v43 = vpack.c.bf16 %v3572_v41, %v3571_v30  ;;  %v1622_v44 = vpop.f32.mrf.mxu0  ;;  %7406 = vmatmul.mubr.bf16.gmra.mxu0 %v7989_v33  ;;  %v2254_v45 = vpop.f32.mrf.mxu1  ;;  %7722 = vmatmul.mubr.bf16.gmra.mxu1 %v7990_v34  ;;  %v7995_v30 = vld [vmem:[%s8128_s21 + $0x150] sm:$0xff]  }
 0x165   : > { %vm2945_vm1 = vcmp.ge.f32.partialorder %v2254_v45, 0.0  ;;  %v3259_v46 = vmul.f32 0.2, %v2254_v45  ;;  %7409 = vmatprep.mubr.msk.bf16.mxu0 %vm8077_vm0, %v8076_v1  ;;  %7725 = vmatprep.mubr.msk.bf16.mxu1 %vm8077_vm0, %v8076_v1  ;;  %v3101_v49 = vmul.f32 0.2, %v1622_v44  ;;  %vm2787_vm2 = vcmp.ge.f32.partialorder %v1622_v44, 0.0 }
 0x166   : > { %6925 = vst [vmem:[%s8312_s6 + $0x70] sm:$0xff] %v6200_v42   ;;  %7004 = vst [vmem:[%s8312_s6 + $0x2e8] sm:$0xff] %v6595_v43   ;;  %v7311_v47 = vpop.f32.mrf.mxu0  ;;  %v7627_v48 = vpop.f32.mrf.mxu1 }
 0x167   : > { %v3573_v50 = vsel %vm2945_vm1, %v2254_v45, %v3259_v46  ;;  %v3415_v59 = vsel %vm2787_vm2, %v1622_v44, %v3101_v49 }
 0x168   : > { %v1625_v51 = vpop.f32.mrf.mxu0  ;;  %v2257_v52 = vpop.f32.mrf.mxu1 }
 0x169   : > { %vm2788_vm3 = vcmp.ge.f32.partialorder %v1625_v51, 0.0  ;;  %v3102_v55 = vmul.f32 0.2, %v1625_v51  ;;  %vm2946_vm4 = vcmp.ge.f32.partialorder %v2257_v52, 0.0  ;;  %v3260_v56 = vmul.f32 0.2, %v2257_v52 }
 0x16a   : > { %v7312_v57 = vpop.f32.mrf.mxu0  ;;  %v7628_v58 = vpop.f32.mrf.mxu1 }
 0x16b   : > { %v3416_v60 = vsel %vm2788_vm3, %v1625_v51, %v3102_v55  ;;  %v3574_v61 = vsel %vm2946_vm4, %v2257_v52, %v3260_v56  ;;  %v7998_v51 = vld [vmem:[%s8128_s21 + $0x3d0] sm:$0xff]  }
 0x16c   : > { %v6205_v62 = vpack.c.bf16 %v3416_v60, %v3415_v59  ;;  %v6600_v63 = vpack.c.bf16 %v3574_v61, %v3573_v50  ;;  %v1630_v0 = vpop.f32.mrf.mxu0  ;;  %7410 = vmatmul.mubr.bf16.gmra.mxu0 %v7991_v53  ;;  %v2262_v2 = vpop.f32.mrf.mxu1  ;;  %7726 = vmatmul.mubr.bf16.gmra.mxu1 %v7992_v54  ;;  %v7997_v50 = vld [vmem:[%s8128_s21 + $0x158] sm:$0xff]  }
 0x16d   : > { %vm2947_vm5 = vcmp.ge.f32.partialorder %v2262_v2, 0.0  ;;  %v3261_v3 = vmul.f32 0.2, %v2262_v2  ;;  %7413 = vmatprep.mubr.msk.bf16.mxu0 %vm8077_vm0, %v8076_v1  ;;  %7729 = vmatprep.mubr.msk.bf16.mxu1 %vm8077_vm0, %v8076_v1  ;;  %v3103_v6 = vmul.f32 0.2, %v1630_v0  ;;  %vm2789_vm6 = vcmp.ge.f32.partialorder %v1630_v0, 0.0 }
 0x16e   : > { %6926 = vst [vmem:[%s8312_s6 + $0x78] sm:$0xff] %v6205_v62   ;;  %7005 = vst [vmem:[%s8312_s6 + $0x2f0] sm:$0xff] %v6600_v63   ;;  %v7315_v4 = vpop.f32.mrf.mxu0  ;;  %v7631_v5 = vpop.f32.mrf.mxu1 }
 0x16f   : > { %v3575_v7 = vsel %vm2947_vm5, %v2262_v2, %v3261_v3  ;;  %v3417_v16 = vsel %vm2789_vm6, %v1630_v0, %v3103_v6 }
 0x170   : > { %v1633_v8 = vpop.f32.mrf.mxu0  ;;  %v2265_v9 = vpop.f32.mrf.mxu1 }
 0x171   : > { %vm2790_vm7 = vcmp.ge.f32.partialorder %v1633_v8, 0.0  ;;  %v3104_v12 = vmul.f32 0.2, %v1633_v8  ;;  %vm2948_vm8 = vcmp.ge.f32.partialorder %v2265_v9, 0.0  ;;  %v3262_v13 = vmul.f32 0.2, %v2265_v9 }
 0x172   : > { %v7316_v14 = vpop.f32.mrf.mxu0  ;;  %v7632_v15 = vpop.f32.mrf.mxu1 }
 0x173   : > { %v3418_v17 = vsel %vm2790_vm7, %v1633_v8, %v3104_v12  ;;  %v3576_v18 = vsel %vm2948_vm8, %v2265_v9, %v3262_v13  ;;  %v8000_v8 = vld [vmem:[%s8128_s21 + $0x3d8] sm:$0xff]  }
 0x174   : > { %v6210_v19 = vpack.c.bf16 %v3418_v17, %v3417_v16  ;;  %v6605_v20 = vpack.c.bf16 %v3576_v18, %v3575_v7  ;;  %v1638_v21 = vpop.f32.mrf.mxu0  ;;  %7414 = vmatmul.mubr.bf16.gmra.mxu0 %v7993_v10  ;;  %v2270_v22 = vpop.f32.mrf.mxu1  ;;  %7730 = vmatmul.mubr.bf16.gmra.mxu1 %v7994_v11  ;;  %v7999_v7 = vld [vmem:[%s8128_s21 + $0x160] sm:$0xff]  }
 0x175   : > { %vm2949_vm9 = vcmp.ge.f32.partialorder %v2270_v22, 0.0  ;;  %v3263_v23 = vmul.f32 0.2, %v2270_v22  ;;  %7417 = vmatprep.mubr.msk.bf16.mxu0 %vm8077_vm0, %v8076_v1  ;;  %7733 = vmatprep.mubr.msk.bf16.mxu1 %vm8077_vm0, %v8076_v1  ;;  %v3105_v26 = vmul.f32 0.2, %v1638_v21  ;;  %vm2791_vm10 = vcmp.ge.f32.partialorder %v1638_v21, 0.0 }
 0x176   : > { %6927 = vst [vmem:[%s8312_s6 + $0x80] sm:$0xff] %v6210_v19   ;;  %7006 = vst [vmem:[%s8312_s6 + $0x2f8] sm:$0xff] %v6605_v20   ;;  %v7319_v24 = vpop.f32.mrf.mxu0  ;;  %v7635_v25 = vpop.f32.mrf.mxu1 }
 0x177   : > { %v3577_v27 = vsel %vm2949_vm9, %v2270_v22, %v3263_v23  ;;  %v3419_v36 = vsel %vm2791_vm10, %v1638_v21, %v3105_v26 }
 0x178   : > { %v1641_v28 = vpop.f32.mrf.mxu0  ;;  %v2273_v29 = vpop.f32.mrf.mxu1 }
 0x179   : > { %vm2792_vm11 = vcmp.ge.f32.partialorder %v1641_v28, 0.0  ;;  %v3106_v32 = vmul.f32 0.2, %v1641_v28  ;;  %vm2950_vm12 = vcmp.ge.f32.partialorder %v2273_v29, 0.0  ;;  %v3264_v33 = vmul.f32 0.2, %v2273_v29 }
 0x17a   : > { %v7320_v34 = vpop.f32.mrf.mxu0  ;;  %v7636_v35 = vpop.f32.mrf.mxu1 }
 0x17b   : > { %v3420_v37 = vsel %vm2792_vm11, %v1641_v28, %v3106_v32  ;;  %v3578_v38 = vsel %vm2950_vm12, %v2273_v29, %v3264_v33  ;;  %v8002_v28 = vld [vmem:[%s8128_s21 + $0x3e0] sm:$0xff]  }
 0x17c   : > { %v6215_v39 = vpack.c.bf16 %v3420_v37, %v3419_v36  ;;  %v6610_v40 = vpack.c.bf16 %v3578_v38, %v3577_v27  ;;  %v1646_v41 = vpop.f32.mrf.mxu0  ;;  %7418 = vmatmul.mubr.bf16.gmra.mxu0 %v7995_v30  ;;  %v2278_v42 = vpop.f32.mrf.mxu1  ;;  %7734 = vmatmul.mubr.bf16.gmra.mxu1 %v7996_v31  ;;  %v8001_v27 = vld [vmem:[%s8128_s21 + $0x168] sm:$0xff]  }
 0x17d   : > { %vm2951_vm13 = vcmp.ge.f32.partialorder %v2278_v42, 0.0  ;;  %v3265_v43 = vmul.f32 0.2, %v2278_v42  ;;  %7421 = vmatprep.mubr.msk.bf16.mxu0 %vm8077_vm0, %v8076_v1  ;;  %7737 = vmatprep.mubr.msk.bf16.mxu1 %vm8077_vm0, %v8076_v1  ;;  %v3107_v46 = vmul.f32 0.2, %v1646_v41  ;;  %vm2793_vm14 = vcmp.ge.f32.partialorder %v1646_v41, 0.0 }
 0x17e   : > { %6928 = vst [vmem:[%s8312_s6 + $0x88] sm:$0xff] %v6215_v39   ;;  %7007 = vst [vmem:[%s8312_s6 + $0x300] sm:$0xff] %v6610_v40   ;;  %v7323_v44 = vpop.f32.mrf.mxu0  ;;  %v7639_v45 = vpop.f32.mrf.mxu1 }
 0x17f   : > { %v3579_v47 = vsel %vm2951_vm13, %v2278_v42, %v3265_v43  ;;  %v3421_v56 = vsel %vm2793_vm14, %v1646_v41, %v3107_v46 }
 0x180   : > { %v1649_v48 = vpop.f32.mrf.mxu0  ;;  %v2281_v49 = vpop.f32.mrf.mxu1 }
 0x181   : > { %vm2794_vm15 = vcmp.ge.f32.partialorder %v1649_v48, 0.0  ;;  %v3108_v52 = vmul.f32 0.2, %v1649_v48  ;;  %vm2952_vm1 = vcmp.ge.f32.partialorder %v2281_v49, 0.0  ;;  %v3266_v53 = vmul.f32 0.2, %v2281_v49 }
 0x182   : > { %v7324_v54 = vpop.f32.mrf.mxu0  ;;  %v7640_v55 = vpop.f32.mrf.mxu1 }
 0x183   : > { %v3422_v57 = vsel %vm2794_vm15, %v1649_v48, %v3108_v52  ;;  %v3580_v58 = vsel %vm2952_vm1, %v2281_v49, %v3266_v53  ;;  %v8004_v48 = vld [vmem:[%s8128_s21 + $0x3e8] sm:$0xff]  }
 0x184   : > { %v6220_v59 = vpack.c.bf16 %v3422_v57, %v3421_v56  ;;  %v6615_v60 = vpack.c.bf16 %v3580_v58, %v3579_v47  ;;  %v1654_v61 = vpop.f32.mrf.mxu0  ;;  %7422 = vmatmul.mubr.bf16.gmra.mxu0 %v7997_v50  ;;  %v2286_v62 = vpop.f32.mrf.mxu1  ;;  %7738 = vmatmul.mubr.bf16.gmra.mxu1 %v7998_v51  ;;  %v8003_v47 = vld [vmem:[%s8128_s21 + $0x170] sm:$0xff]  }
 0x185   : > { %vm2953_vm2 = vcmp.ge.f32.partialorder %v2286_v62, 0.0  ;;  %v3267_v63 = vmul.f32 0.2, %v2286_v62  ;;  %7425 = vmatprep.mubr.msk.bf16.mxu0 %vm8077_vm0, %v8076_v1  ;;  %7741 = vmatprep.mubr.msk.bf16.mxu1 %vm8077_vm0, %v8076_v1  ;;  %v3109_v3 = vmul.f32 0.2, %v1654_v61  ;;  %vm2795_vm3 = vcmp.ge.f32.partialorder %v1654_v61, 0.0 }
 0x186   : > { %6929 = vst [vmem:[%s8312_s6 + $0x90] sm:$0xff] %v6220_v59   ;;  %7008 = vst [vmem:[%s8312_s6 + $0x308] sm:$0xff] %v6615_v60   ;;  %v7327_v0 = vpop.f32.mrf.mxu0  ;;  %v7643_v2 = vpop.f32.mrf.mxu1 }
 0x187   : > { %v3581_v4 = vsel %vm2953_vm2, %v2286_v62, %v3267_v63  ;;  %v3423_v13 = vsel %vm2795_vm3, %v1654_v61, %v3109_v3 }
 0x188   : > { %v1657_v5 = vpop.f32.mrf.mxu0  ;;  %v2289_v6 = vpop.f32.mrf.mxu1 }
 0x189   : > { %vm2796_vm4 = vcmp.ge.f32.partialorder %v1657_v5, 0.0  ;;  %v3110_v9 = vmul.f32 0.2, %v1657_v5  ;;  %vm2954_vm5 = vcmp.ge.f32.partialorder %v2289_v6, 0.0  ;;  %v3268_v10 = vmul.f32 0.2, %v2289_v6 }
 0x18a   : > { %v7328_v11 = vpop.f32.mrf.mxu0  ;;  %v7644_v12 = vpop.f32.mrf.mxu1 }
 0x18b   : > { %v3424_v14 = vsel %vm2796_vm4, %v1657_v5, %v3110_v9  ;;  %v3582_v15 = vsel %vm2954_vm5, %v2289_v6, %v3268_v10  ;;  %v8006_v5 = vld [vmem:[%s8128_s21 + $0x3f0] sm:$0xff]  }
 0x18c   : > { %v6225_v16 = vpack.c.bf16 %v3424_v14, %v3423_v13  ;;  %v6620_v17 = vpack.c.bf16 %v3582_v15, %v3581_v4  ;;  %v1662_v18 = vpop.f32.mrf.mxu0  ;;  %7426 = vmatmul.mubr.bf16.gmra.mxu0 %v7999_v7  ;;  %v2294_v19 = vpop.f32.mrf.mxu1  ;;  %7742 = vmatmul.mubr.bf16.gmra.mxu1 %v8000_v8  ;;  %v8005_v4 = vld [vmem:[%s8128_s21 + $0x178] sm:$0xff]  }
 0x18d   : > { %vm2955_vm6 = vcmp.ge.f32.partialorder %v2294_v19, 0.0  ;;  %v3269_v20 = vmul.f32 0.2, %v2294_v19  ;;  %7429 = vmatprep.mubr.msk.bf16.mxu0 %vm8077_vm0, %v8076_v1  ;;  %7745 = vmatprep.mubr.msk.bf16.mxu1 %vm8077_vm0, %v8076_v1  ;;  %v3111_v23 = vmul.f32 0.2, %v1662_v18  ;;  %vm2797_vm7 = vcmp.ge.f32.partialorder %v1662_v18, 0.0 }
 0x18e   : > { %6930 = vst [vmem:[%s8312_s6 + $0x98] sm:$0xff] %v6225_v16   ;;  %7009 = vst [vmem:[%s8312_s6 + $0x310] sm:$0xff] %v6620_v17   ;;  %v7331_v21 = vpop.f32.mrf.mxu0  ;;  %v7647_v22 = vpop.f32.mrf.mxu1 }
 0x18f   : > { %v3583_v24 = vsel %vm2955_vm6, %v2294_v19, %v3269_v20  ;;  %v3425_v33 = vsel %vm2797_vm7, %v1662_v18, %v3111_v23 }
 0x190   : > { %v1665_v25 = vpop.f32.mrf.mxu0  ;;  %v2297_v26 = vpop.f32.mrf.mxu1 }
 0x191   : > { %vm2798_vm8 = vcmp.ge.f32.partialorder %v1665_v25, 0.0  ;;  %v3112_v29 = vmul.f32 0.2, %v1665_v25  ;;  %vm2956_vm9 = vcmp.ge.f32.partialorder %v2297_v26, 0.0  ;;  %v3270_v30 = vmul.f32 0.2, %v2297_v26 }
 0x192   : > { %v7332_v31 = vpop.f32.mrf.mxu0  ;;  %v7648_v32 = vpop.f32.mrf.mxu1 }
 0x193   : > { %v3426_v34 = vsel %vm2798_vm8, %v1665_v25, %v3112_v29  ;;  %v3584_v35 = vsel %vm2956_vm9, %v2297_v26, %v3270_v30  ;;  %v8008_v25 = vld [vmem:[%s8128_s21 + $0x3f8] sm:$0xff]  }
 0x194   : > { %v6230_v36 = vpack.c.bf16 %v3426_v34, %v3425_v33  ;;  %v6625_v37 = vpack.c.bf16 %v3584_v35, %v3583_v24  ;;  %v1670_v38 = vpop.f32.mrf.mxu0  ;;  %7430 = vmatmul.mubr.bf16.gmra.mxu0 %v8001_v27  ;;  %v2302_v39 = vpop.f32.mrf.mxu1  ;;  %7746 = vmatmul.mubr.bf16.gmra.mxu1 %v8002_v28  ;;  %v8007_v24 = vld [vmem:[%s8128_s21 + $0x180] sm:$0xff]  }
 0x195   : > { %vm2957_vm10 = vcmp.ge.f32.partialorder %v2302_v39, 0.0  ;;  %v3271_v40 = vmul.f32 0.2, %v2302_v39  ;;  %7433 = vmatprep.mubr.msk.bf16.mxu0 %vm8077_vm0, %v8076_v1  ;;  %7749 = vmatprep.mubr.msk.bf16.mxu1 %vm8077_vm0, %v8076_v1  ;;  %v3113_v43 = vmul.f32 0.2, %v1670_v38  ;;  %vm2799_vm11 = vcmp.ge.f32.partialorder %v1670_v38, 0.0 }
 0x196   : > { %6931 = vst [vmem:[%s8312_s6 + $0xa0] sm:$0xff] %v6230_v36   ;;  %7010 = vst [vmem:[%s8312_s6 + $0x318] sm:$0xff] %v6625_v37   ;;  %v7335_v41 = vpop.f32.mrf.mxu0  ;;  %v7651_v42 = vpop.f32.mrf.mxu1 }
 0x197   : > { %v3585_v44 = vsel %vm2957_vm10, %v2302_v39, %v3271_v40  ;;  %v3427_v53 = vsel %vm2799_vm11, %v1670_v38, %v3113_v43 }
 0x198   : > { %v1673_v45 = vpop.f32.mrf.mxu0  ;;  %v2305_v46 = vpop.f32.mrf.mxu1 }
 0x199   : > { %vm2800_vm12 = vcmp.ge.f32.partialorder %v1673_v45, 0.0  ;;  %v3114_v49 = vmul.f32 0.2, %v1673_v45  ;;  %vm2958_vm13 = vcmp.ge.f32.partialorder %v2305_v46, 0.0  ;;  %v3272_v50 = vmul.f32 0.2, %v2305_v46 }
 0x19a   : > { %v7336_v51 = vpop.f32.mrf.mxu0  ;;  %v7652_v52 = vpop.f32.mrf.mxu1 }
 0x19b   : > { %v3428_v54 = vsel %vm2800_vm12, %v1673_v45, %v3114_v49  ;;  %v3586_v55 = vsel %vm2958_vm13, %v2305_v46, %v3272_v50  ;;  %v8010_v45 = vld [vmem:[%s8128_s21 + $0x400] sm:$0xff]  }
 0x19c   : > { %v6235_v56 = vpack.c.bf16 %v3428_v54, %v3427_v53  ;;  %v6630_v57 = vpack.c.bf16 %v3586_v55, %v3585_v44  ;;  %v1678_v58 = vpop.f32.mrf.mxu0  ;;  %7434 = vmatmul.mubr.bf16.gmra.mxu0 %v8003_v47  ;;  %v2310_v59 = vpop.f32.mrf.mxu1  ;;  %7750 = vmatmul.mubr.bf16.gmra.mxu1 %v8004_v48  ;;  %v8009_v44 = vld [vmem:[%s8128_s21 + $0x188] sm:$0xff]  }
 0x19d   : > { %vm2959_vm14 = vcmp.ge.f32.partialorder %v2310_v59, 0.0  ;;  %v3273_v60 = vmul.f32 0.2, %v2310_v59  ;;  %7437 = vmatprep.mubr.msk.bf16.mxu0 %vm8077_vm0, %v8076_v1  ;;  %7753 = vmatprep.mubr.msk.bf16.mxu1 %vm8077_vm0, %v8076_v1  ;;  %v3115_v63 = vmul.f32 0.2, %v1678_v58  ;;  %vm2801_vm15 = vcmp.ge.f32.partialorder %v1678_v58, 0.0 }
 0x19e   : > { %6932 = vst [vmem:[%s8312_s6 + $0xa8] sm:$0xff] %v6235_v56   ;;  %7011 = vst [vmem:[%s8312_s6 + $0x320] sm:$0xff] %v6630_v57   ;;  %v7339_v61 = vpop.f32.mrf.mxu0  ;;  %v7655_v62 = vpop.f32.mrf.mxu1 }
 0x19f   : > { %v3587_v0 = vsel %vm2959_vm14, %v2310_v59, %v3273_v60  ;;  %v3429_v10 = vsel %vm2801_vm15, %v1678_v58, %v3115_v63 }
 0x1a0   : > { %v1681_v2 = vpop.f32.mrf.mxu0  ;;  %v2313_v3 = vpop.f32.mrf.mxu1 }
 0x1a1   : > { %vm2802_vm1 = vcmp.ge.f32.partialorder %v1681_v2, 0.0  ;;  %v3116_v6 = vmul.f32 0.2, %v1681_v2  ;;  %vm2960_vm2 = vcmp.ge.f32.partialorder %v2313_v3, 0.0  ;;  %v3274_v7 = vmul.f32 0.2, %v2313_v3 }
 0x1a2   : > { %v7340_v8 = vpop.f32.mrf.mxu0  ;;  %v7656_v9 = vpop.f32.mrf.mxu1 }
 0x1a3   : > { %v3430_v11 = vsel %vm2802_vm1, %v1681_v2, %v3116_v6  ;;  %v3588_v12 = vsel %vm2960_vm2, %v2313_v3, %v3274_v7  ;;  %v8012_v2 = vld [vmem:[%s8128_s21 + $0x408] sm:$0xff]  }
 0x1a4   : > { %v6240_v13 = vpack.c.bf16 %v3430_v11, %v3429_v10  ;;  %v6635_v14 = vpack.c.bf16 %v3588_v12, %v3587_v0  ;;  %v1686_v15 = vpop.f32.mrf.mxu0  ;;  %7438 = vmatmul.mubr.bf16.gmra.mxu0 %v8005_v4  ;;  %v2318_v16 = vpop.f32.mrf.mxu1  ;;  %7754 = vmatmul.mubr.bf16.gmra.mxu1 %v8006_v5  ;;  %v8011_v0 = vld [vmem:[%s8128_s21 + $0x190] sm:$0xff]  }
 0x1a5   : > { %vm2961_vm3 = vcmp.ge.f32.partialorder %v2318_v16, 0.0  ;;  %v3275_v17 = vmul.f32 0.2, %v2318_v16  ;;  %7441 = vmatprep.mubr.msk.bf16.mxu0 %vm8077_vm0, %v8076_v1  ;;  %7757 = vmatprep.mubr.msk.bf16.mxu1 %vm8077_vm0, %v8076_v1  ;;  %v3117_v20 = vmul.f32 0.2, %v1686_v15  ;;  %vm2803_vm4 = vcmp.ge.f32.partialorder %v1686_v15, 0.0 }
 0x1a6   : > { %6933 = vst [vmem:[%s8312_s6 + $0xb0] sm:$0xff] %v6240_v13   ;;  %7012 = vst [vmem:[%s8312_s6 + $0x328] sm:$0xff] %v6635_v14   ;;  %v7343_v18 = vpop.f32.mrf.mxu0  ;;  %v7659_v19 = vpop.f32.mrf.mxu1 }
 0x1a7   : > { %v3589_v21 = vsel %vm2961_vm3, %v2318_v16, %v3275_v17  ;;  %v3431_v30 = vsel %vm2803_vm4, %v1686_v15, %v3117_v20 }
 0x1a8   : > { %v1689_v22 = vpop.f32.mrf.mxu0  ;;  %v2321_v23 = vpop.f32.mrf.mxu1 }
 0x1a9   : > { %vm2804_vm5 = vcmp.ge.f32.partialorder %v1689_v22, 0.0  ;;  %v3118_v26 = vmul.f32 0.2, %v1689_v22  ;;  %vm2962_vm6 = vcmp.ge.f32.partialorder %v2321_v23, 0.0  ;;  %v3276_v27 = vmul.f32 0.2, %v2321_v23 }
 0x1aa   : > { %v7344_v28 = vpop.f32.mrf.mxu0  ;;  %v7660_v29 = vpop.f32.mrf.mxu1 }
 0x1ab   : > { %v3432_v31 = vsel %vm2804_vm5, %v1689_v22, %v3118_v26  ;;  %v3590_v32 = vsel %vm2962_vm6, %v2321_v23, %v3276_v27  ;;  %v8014_v22 = vld [vmem:[%s8128_s21 + $0x410] sm:$0xff]  }
 0x1ac   : > { %v6245_v33 = vpack.c.bf16 %v3432_v31, %v3431_v30  ;;  %v6640_v34 = vpack.c.bf16 %v3590_v32, %v3589_v21  ;;  %v1694_v35 = vpop.f32.mrf.mxu0  ;;  %7442 = vmatmul.mubr.bf16.gmra.mxu0 %v8007_v24  ;;  %v2326_v36 = vpop.f32.mrf.mxu1  ;;  %7758 = vmatmul.mubr.bf16.gmra.mxu1 %v8008_v25  ;;  %v8013_v21 = vld [vmem:[%s8128_s21 + $0x198] sm:$0xff]  }
 0x1ad   : > { %vm2963_vm7 = vcmp.ge.f32.partialorder %v2326_v36, 0.0  ;;  %v3277_v37 = vmul.f32 0.2, %v2326_v36  ;;  %7445 = vmatprep.mubr.msk.bf16.mxu0 %vm8077_vm0, %v8076_v1  ;;  %7761 = vmatprep.mubr.msk.bf16.mxu1 %vm8077_vm0, %v8076_v1  ;;  %v3119_v40 = vmul.f32 0.2, %v1694_v35  ;;  %vm2805_vm8 = vcmp.ge.f32.partialorder %v1694_v35, 0.0 }
 0x1ae   : > { %6934 = vst [vmem:[%s8312_s6 + $0xb8] sm:$0xff] %v6245_v33   ;;  %7013 = vst [vmem:[%s8312_s6 + $0x330] sm:$0xff] %v6640_v34   ;;  %v7347_v38 = vpop.f32.mrf.mxu0  ;;  %v7663_v39 = vpop.f32.mrf.mxu1 }
 0x1af   : > { %v3591_v41 = vsel %vm2963_vm7, %v2326_v36, %v3277_v37  ;;  %v3433_v50 = vsel %vm2805_vm8, %v1694_v35, %v3119_v40 }
 0x1b0   : > { %v1697_v42 = vpop.f32.mrf.mxu0  ;;  %v2329_v43 = vpop.f32.mrf.mxu1 }
 0x1b1   : > { %vm2806_vm9 = vcmp.ge.f32.partialorder %v1697_v42, 0.0  ;;  %v3120_v46 = vmul.f32 0.2, %v1697_v42  ;;  %vm2964_vm10 = vcmp.ge.f32.partialorder %v2329_v43, 0.0  ;;  %v3278_v47 = vmul.f32 0.2, %v2329_v43 }
 0x1b2   : > { %v7348_v48 = vpop.f32.mrf.mxu0  ;;  %v7664_v49 = vpop.f32.mrf.mxu1 }
 0x1b3   : > { %v3434_v51 = vsel %vm2806_vm9, %v1697_v42, %v3120_v46  ;;  %v3592_v52 = vsel %vm2964_vm10, %v2329_v43, %v3278_v47  ;;  %v8016_v42 = vld [vmem:[%s8128_s21 + $0x418] sm:$0xff]  }
 0x1b4   : > { %v6250_v53 = vpack.c.bf16 %v3434_v51, %v3433_v50  ;;  %v6645_v54 = vpack.c.bf16 %v3592_v52, %v3591_v41  ;;  %v1702_v55 = vpop.f32.mrf.mxu0  ;;  %7446 = vmatmul.mubr.bf16.gmra.mxu0 %v8009_v44  ;;  %v2334_v56 = vpop.f32.mrf.mxu1  ;;  %7762 = vmatmul.mubr.bf16.gmra.mxu1 %v8010_v45  ;;  %v8015_v41 = vld [vmem:[%s8128_s21 + $0x1a0] sm:$0xff]  }
 0x1b5   : > { %vm2965_vm11 = vcmp.ge.f32.partialorder %v2334_v56, 0.0  ;;  %v3279_v57 = vmul.f32 0.2, %v2334_v56  ;;  %7449 = vmatprep.mubr.msk.bf16.mxu0 %vm8077_vm0, %v8076_v1  ;;  %7765 = vmatprep.mubr.msk.bf16.mxu1 %vm8077_vm0, %v8076_v1  ;;  %v3121_v60 = vmul.f32 0.2, %v1702_v55  ;;  %vm2807_vm12 = vcmp.ge.f32.partialorder %v1702_v55, 0.0 }
 0x1b6   : > { %6935 = vst [vmem:[%s8312_s6 + $0xc0] sm:$0xff] %v6250_v53   ;;  %7014 = vst [vmem:[%s8312_s6 + $0x338] sm:$0xff] %v6645_v54   ;;  %v7351_v58 = vpop.f32.mrf.mxu0  ;;  %v7667_v59 = vpop.f32.mrf.mxu1 }
 0x1b7   : > { %v3593_v61 = vsel %vm2965_vm11, %v2334_v56, %v3279_v57  ;;  %v3435_v7 = vsel %vm2807_vm12, %v1702_v55, %v3121_v60 }
 0x1b8   : > { %v1705_v62 = vpop.f32.mrf.mxu0  ;;  %v2337_v63 = vpop.f32.mrf.mxu1 }
 0x1b9   : > { %vm2808_vm13 = vcmp.ge.f32.partialorder %v1705_v62, 0.0  ;;  %v3122_v3 = vmul.f32 0.2, %v1705_v62  ;;  %vm2966_vm14 = vcmp.ge.f32.partialorder %v2337_v63, 0.0  ;;  %v3280_v4 = vmul.f32 0.2, %v2337_v63 }
 0x1ba   : > { %v7352_v5 = vpop.f32.mrf.mxu0  ;;  %v7668_v6 = vpop.f32.mrf.mxu1 }
 0x1bb   : > { %v3436_v8 = vsel %vm2808_vm13, %v1705_v62, %v3122_v3  ;;  %v3594_v9 = vsel %vm2966_vm14, %v2337_v63, %v3280_v4  ;;  %v8018_v62 = vld [vmem:[%s8128_s21 + $0x420] sm:$0xff]  }
 0x1bc   : > { %v6255_v10 = vpack.c.bf16 %v3436_v8, %v3435_v7  ;;  %v6650_v11 = vpack.c.bf16 %v3594_v9, %v3593_v61  ;;  %v1710_v12 = vpop.f32.mrf.mxu0  ;;  %7450 = vmatmul.mubr.bf16.gmra.mxu0 %v8011_v0  ;;  %v2342_v13 = vpop.f32.mrf.mxu1  ;;  %7766 = vmatmul.mubr.bf16.gmra.mxu1 %v8012_v2  ;;  %v8017_v61 = vld [vmem:[%s8128_s21 + $0x1a8] sm:$0xff]  }
 0x1bd   : > { %vm2967_vm15 = vcmp.ge.f32.partialorder %v2342_v13, 0.0  ;;  %v3281_v14 = vmul.f32 0.2, %v2342_v13  ;;  %7453 = vmatprep.mubr.msk.bf16.mxu0 %vm8077_vm0, %v8076_v1  ;;  %7769 = vmatprep.mubr.msk.bf16.mxu1 %vm8077_vm0, %v8076_v1  ;;  %v3123_v17 = vmul.f32 0.2, %v1710_v12  ;;  %vm2809_vm1 = vcmp.ge.f32.partialorder %v1710_v12, 0.0 }
 0x1be   : > { %6936 = vst [vmem:[%s8312_s6 + $0xc8] sm:$0xff] %v6255_v10   ;;  %7015 = vst [vmem:[%s8312_s6 + $0x340] sm:$0xff] %v6650_v11   ;;  %v7355_v15 = vpop.f32.mrf.mxu0  ;;  %v7671_v16 = vpop.f32.mrf.mxu1 }
 0x1bf   : > { %v3595_v18 = vsel %vm2967_vm15, %v2342_v13, %v3281_v14  ;;  %v3437_v27 = vsel %vm2809_vm1, %v1710_v12, %v3123_v17 }
 0x1c0   : > { %v1713_v19 = vpop.f32.mrf.mxu0  ;;  %v2345_v20 = vpop.f32.mrf.mxu1 }
 0x1c1   : > { %vm2810_vm2 = vcmp.ge.f32.partialorder %v1713_v19, 0.0  ;;  %v3124_v23 = vmul.f32 0.2, %v1713_v19  ;;  %vm2968_vm3 = vcmp.ge.f32.partialorder %v2345_v20, 0.0  ;;  %v3282_v24 = vmul.f32 0.2, %v2345_v20 }
 0x1c2   : > { %v7356_v25 = vpop.f32.mrf.mxu0  ;;  %v7672_v26 = vpop.f32.mrf.mxu1 }
 0x1c3   : > { %v3438_v28 = vsel %vm2810_vm2, %v1713_v19, %v3124_v23  ;;  %v3596_v29 = vsel %vm2968_vm3, %v2345_v20, %v3282_v24  ;;  %v8020_v19 = vld [vmem:[%s8128_s21 + $0x428] sm:$0xff]  }
 0x1c4   : > { %v6260_v30 = vpack.c.bf16 %v3438_v28, %v3437_v27  ;;  %v6655_v31 = vpack.c.bf16 %v3596_v29, %v3595_v18  ;;  %v1718_v32 = vpop.f32.mrf.mxu0  ;;  %7454 = vmatmul.mubr.bf16.gmra.mxu0 %v8013_v21  ;;  %v2350_v33 = vpop.f32.mrf.mxu1  ;;  %7770 = vmatmul.mubr.bf16.gmra.mxu1 %v8014_v22  ;;  %v8019_v18 = vld [vmem:[%s8128_s21 + $0x1b0] sm:$0xff]  }
 0x1c5   : > { %vm2969_vm4 = vcmp.ge.f32.partialorder %v2350_v33, 0.0  ;;  %v3283_v34 = vmul.f32 0.2, %v2350_v33  ;;  %7457 = vmatprep.mubr.msk.bf16.mxu0 %vm8077_vm0, %v8076_v1  ;;  %7773 = vmatprep.mubr.msk.bf16.mxu1 %vm8077_vm0, %v8076_v1  ;;  %v3125_v37 = vmul.f32 0.2, %v1718_v32  ;;  %vm2811_vm5 = vcmp.ge.f32.partialorder %v1718_v32, 0.0 }
 0x1c6   : > { %6937 = vst [vmem:[%s8312_s6 + $0xd0] sm:$0xff] %v6260_v30   ;;  %7016 = vst [vmem:[%s8312_s6 + $0x348] sm:$0xff] %v6655_v31   ;;  %v7359_v35 = vpop.f32.mrf.mxu0  ;;  %v7675_v36 = vpop.f32.mrf.mxu1 }
 0x1c7   : > { %v3597_v38 = vsel %vm2969_vm4, %v2350_v33, %v3283_v34  ;;  %v3439_v47 = vsel %vm2811_vm5, %v1718_v32, %v3125_v37 }
 0x1c8   : > { %v1721_v39 = vpop.f32.mrf.mxu0  ;;  %v2353_v40 = vpop.f32.mrf.mxu1 }
 0x1c9   : > { %vm2812_vm6 = vcmp.ge.f32.partialorder %v1721_v39, 0.0  ;;  %v3126_v43 = vmul.f32 0.2, %v1721_v39  ;;  %vm2970_vm7 = vcmp.ge.f32.partialorder %v2353_v40, 0.0  ;;  %v3284_v44 = vmul.f32 0.2, %v2353_v40 }
 0x1ca   : > { %v7360_v45 = vpop.f32.mrf.mxu0  ;;  %v7676_v46 = vpop.f32.mrf.mxu1 }
 0x1cb   : > { %v3440_v48 = vsel %vm2812_vm6, %v1721_v39, %v3126_v43  ;;  %v3598_v49 = vsel %vm2970_vm7, %v2353_v40, %v3284_v44  ;;  %v8022_v39 = vld [vmem:[%s8128_s21 + $0x430] sm:$0xff]  }
 0x1cc   : > { %v6265_v50 = vpack.c.bf16 %v3440_v48, %v3439_v47  ;;  %v6660_v51 = vpack.c.bf16 %v3598_v49, %v3597_v38  ;;  %v1726_v52 = vpop.f32.mrf.mxu0  ;;  %7458 = vmatmul.mubr.bf16.gmra.mxu0 %v8015_v41  ;;  %v2358_v53 = vpop.f32.mrf.mxu1  ;;  %7774 = vmatmul.mubr.bf16.gmra.mxu1 %v8016_v42  ;;  %v8021_v38 = vld [vmem:[%s8128_s21 + $0x1b8] sm:$0xff]  }
 0x1cd   : > { %vm2971_vm8 = vcmp.ge.f32.partialorder %v2358_v53, 0.0  ;;  %v3285_v54 = vmul.f32 0.2, %v2358_v53  ;;  %7461 = vmatprep.mubr.msk.bf16.mxu0 %vm8077_vm0, %v8076_v1  ;;  %7777 = vmatprep.mubr.msk.bf16.mxu1 %vm8077_vm0, %v8076_v1  ;;  %v3127_v57 = vmul.f32 0.2, %v1726_v52  ;;  %vm2813_vm9 = vcmp.ge.f32.partialorder %v1726_v52, 0.0 }
 0x1ce   : > { %6938 = vst [vmem:[%s8312_s6 + $0xd8] sm:$0xff] %v6265_v50   ;;  %7017 = vst [vmem:[%s8312_s6 + $0x350] sm:$0xff] %v6660_v51   ;;  %v7363_v55 = vpop.f32.mrf.mxu0  ;;  %v7679_v56 = vpop.f32.mrf.mxu1 }
 0x1cf   : > { %v3599_v58 = vsel %vm2971_vm8, %v2358_v53, %v3285_v54  ;;  %v3441_v4 = vsel %vm2813_vm9, %v1726_v52, %v3127_v57 }
 0x1d0   : > { %v1729_v59 = vpop.f32.mrf.mxu0  ;;  %v2361_v60 = vpop.f32.mrf.mxu1 }
 0x1d1   : > { %vm2814_vm10 = vcmp.ge.f32.partialorder %v1729_v59, 0.0  ;;  %v3128_v63 = vmul.f32 0.2, %v1729_v59  ;;  %vm2972_vm11 = vcmp.ge.f32.partialorder %v2361_v60, 0.0  ;;  %v3286_v0 = vmul.f32 0.2, %v2361_v60 }
 0x1d2   : > { %v7364_v2 = vpop.f32.mrf.mxu0  ;;  %v7680_v3 = vpop.f32.mrf.mxu1 }
 0x1d3   : > { %v3442_v5 = vsel %vm2814_vm10, %v1729_v59, %v3128_v63  ;;  %v3600_v6 = vsel %vm2972_vm11, %v2361_v60, %v3286_v0  ;;  %v8024_v59 = vld [vmem:[%s8128_s21 + $0x438] sm:$0xff]  }
 0x1d4   : > { %v6270_v7 = vpack.c.bf16 %v3442_v5, %v3441_v4  ;;  %v6665_v8 = vpack.c.bf16 %v3600_v6, %v3599_v58  ;;  %v1734_v9 = vpop.f32.mrf.mxu0  ;;  %7462 = vmatmul.mubr.bf16.gmra.mxu0 %v8017_v61  ;;  %v2366_v10 = vpop.f32.mrf.mxu1  ;;  %7778 = vmatmul.mubr.bf16.gmra.mxu1 %v8018_v62  ;;  %v8023_v58 = vld [vmem:[%s8128_s21 + $0x1c0] sm:$0xff]  }
 0x1d5   : > { %vm2973_vm12 = vcmp.ge.f32.partialorder %v2366_v10, 0.0  ;;  %v3287_v11 = vmul.f32 0.2, %v2366_v10  ;;  %7465 = vmatprep.mubr.msk.bf16.mxu0 %vm8077_vm0, %v8076_v1  ;;  %7781 = vmatprep.mubr.msk.bf16.mxu1 %vm8077_vm0, %v8076_v1  ;;  %v3129_v14 = vmul.f32 0.2, %v1734_v9  ;;  %vm2815_vm13 = vcmp.ge.f32.partialorder %v1734_v9, 0.0 }
 0x1d6   : > { %6939 = vst [vmem:[%s8312_s6 + $0xe0] sm:$0xff] %v6270_v7   ;;  %7018 = vst [vmem:[%s8312_s6 + $0x358] sm:$0xff] %v6665_v8   ;;  %v7367_v12 = vpop.f32.mrf.mxu0  ;;  %v7683_v13 = vpop.f32.mrf.mxu1 }
 0x1d7   : > { %v3601_v15 = vsel %vm2973_vm12, %v2366_v10, %v3287_v11  ;;  %v3443_v24 = vsel %vm2815_vm13, %v1734_v9, %v3129_v14 }
 0x1d8   : > { %v1737_v16 = vpop.f32.mrf.mxu0  ;;  %v2369_v17 = vpop.f32.mrf.mxu1 }
 0x1d9   : > { %vm2816_vm14 = vcmp.ge.f32.partialorder %v1737_v16, 0.0  ;;  %v3130_v20 = vmul.f32 0.2, %v1737_v16  ;;  %vm2974_vm15 = vcmp.ge.f32.partialorder %v2369_v17, 0.0  ;;  %v3288_v21 = vmul.f32 0.2, %v2369_v17 }
 0x1da   : > { %v7368_v22 = vpop.f32.mrf.mxu0  ;;  %v7684_v23 = vpop.f32.mrf.mxu1 }
 0x1db   : > { %v3444_v25 = vsel %vm2816_vm14, %v1737_v16, %v3130_v20  ;;  %v3602_v26 = vsel %vm2974_vm15, %v2369_v17, %v3288_v21  ;;  %v8026_v16 = vld [vmem:[%s8128_s21 + $0x440] sm:$0xff]  }
 0x1dc   : > { %v6275_v27 = vpack.c.bf16 %v3444_v25, %v3443_v24  ;;  %v6670_v28 = vpack.c.bf16 %v3602_v26, %v3601_v15  ;;  %v1742_v29 = vpop.f32.mrf.mxu0  ;;  %7466 = vmatmul.mubr.bf16.gmra.mxu0 %v8019_v18  ;;  %v2374_v30 = vpop.f32.mrf.mxu1  ;;  %7782 = vmatmul.mubr.bf16.gmra.mxu1 %v8020_v19  ;;  %v8025_v15 = vld [vmem:[%s8128_s21 + $0x1c8] sm:$0xff]  }
 0x1dd   : > { %vm2975_vm1 = vcmp.ge.f32.partialorder %v2374_v30, 0.0  ;;  %v3289_v31 = vmul.f32 0.2, %v2374_v30  ;;  %7469 = vmatprep.mubr.msk.bf16.mxu0 %vm8077_vm0, %v8076_v1  ;;  %7785 = vmatprep.mubr.msk.bf16.mxu1 %vm8077_vm0, %v8076_v1  ;;  %v3131_v34 = vmul.f32 0.2, %v1742_v29  ;;  %vm2817_vm2 = vcmp.ge.f32.partialorder %v1742_v29, 0.0 }
 0x1de   : > { %6940 = vst [vmem:[%s8312_s6 + $0xe8] sm:$0xff] %v6275_v27   ;;  %7019 = vst [vmem:[%s8312_s6 + $0x360] sm:$0xff] %v6670_v28   ;;  %v7371_v32 = vpop.f32.mrf.mxu0  ;;  %v7687_v33 = vpop.f32.mrf.mxu1 }
 0x1df   : > { %v3603_v35 = vsel %vm2975_vm1, %v2374_v30, %v3289_v31  ;;  %v3445_v44 = vsel %vm2817_vm2, %v1742_v29, %v3131_v34 }
 0x1e0   : > { %v1745_v36 = vpop.f32.mrf.mxu0  ;;  %v2377_v37 = vpop.f32.mrf.mxu1 }
 0x1e1   : > { %vm2818_vm3 = vcmp.ge.f32.partialorder %v1745_v36, 0.0  ;;  %v3132_v40 = vmul.f32 0.2, %v1745_v36  ;;  %vm2976_vm4 = vcmp.ge.f32.partialorder %v2377_v37, 0.0  ;;  %v3290_v41 = vmul.f32 0.2, %v2377_v37 }
 0x1e2   : > { %v7372_v42 = vpop.f32.mrf.mxu0  ;;  %v7688_v43 = vpop.f32.mrf.mxu1 }
 0x1e3   : > { %v3446_v45 = vsel %vm2818_vm3, %v1745_v36, %v3132_v40  ;;  %v3604_v46 = vsel %vm2976_vm4, %v2377_v37, %v3290_v41  ;;  %v8028_v36 = vld [vmem:[%s8128_s21 + $0x448] sm:$0xff]  }
 0x1e4   : > { %v6280_v47 = vpack.c.bf16 %v3446_v45, %v3445_v44  ;;  %v6675_v48 = vpack.c.bf16 %v3604_v46, %v3603_v35  ;;  %v1750_v49 = vpop.f32.mrf.mxu0  ;;  %7470 = vmatmul.mubr.bf16.gmra.mxu0 %v8021_v38  ;;  %v2382_v50 = vpop.f32.mrf.mxu1  ;;  %7786 = vmatmul.mubr.bf16.gmra.mxu1 %v8022_v39  ;;  %v8027_v35 = vld [vmem:[%s8128_s21 + $0x1d0] sm:$0xff]  }
 0x1e5   : > { %vm2977_vm5 = vcmp.ge.f32.partialorder %v2382_v50, 0.0  ;;  %v3291_v51 = vmul.f32 0.2, %v2382_v50  ;;  %7473 = vmatprep.mubr.msk.bf16.mxu0 %vm8077_vm0, %v8076_v1  ;;  %7789 = vmatprep.mubr.msk.bf16.mxu1 %vm8077_vm0, %v8076_v1  ;;  %v3133_v54 = vmul.f32 0.2, %v1750_v49  ;;  %vm2819_vm6 = vcmp.ge.f32.partialorder %v1750_v49, 0.0 }
 0x1e6   : > { %6941 = vst [vmem:[%s8312_s6 + $0xf0] sm:$0xff] %v6280_v47   ;;  %7020 = vst [vmem:[%s8312_s6 + $0x368] sm:$0xff] %v6675_v48   ;;  %v7375_v52 = vpop.f32.mrf.mxu0  ;;  %v7691_v53 = vpop.f32.mrf.mxu1 }
 0x1e7   : > { %v3605_v55 = vsel %vm2977_vm5, %v2382_v50, %v3291_v51  ;;  %v3447_v0 = vsel %vm2819_vm6, %v1750_v49, %v3133_v54 }
 0x1e8   : > { %v1753_v56 = vpop.f32.mrf.mxu0  ;;  %v2385_v57 = vpop.f32.mrf.mxu1 }
 0x1e9   : > { %vm2820_vm7 = vcmp.ge.f32.partialorder %v1753_v56, 0.0  ;;  %v3134_v60 = vmul.f32 0.2, %v1753_v56  ;;  %vm2978_vm8 = vcmp.ge.f32.partialorder %v2385_v57, 0.0  ;;  %v3292_v61 = vmul.f32 0.2, %v2385_v57 }
 0x1ea   : > { %v7376_v62 = vpop.f32.mrf.mxu0  ;;  %v7692_v63 = vpop.f32.mrf.mxu1 }
 0x1eb   : > { %v3448_v2 = vsel %vm2820_vm7, %v1753_v56, %v3134_v60  ;;  %v3606_v3 = vsel %vm2978_vm8, %v2385_v57, %v3292_v61  ;;  %v8030_v56 = vld [vmem:[%s8128_s21 + $0x450] sm:$0xff]  }
 0x1ec   : > { %v6285_v4 = vpack.c.bf16 %v3448_v2, %v3447_v0  ;;  %v6680_v5 = vpack.c.bf16 %v3606_v3, %v3605_v55  ;;  %v1758_v6 = vpop.f32.mrf.mxu0  ;;  %7474 = vmatmul.mubr.bf16.gmra.mxu0 %v8023_v58  ;;  %v2390_v7 = vpop.f32.mrf.mxu1  ;;  %7790 = vmatmul.mubr.bf16.gmra.mxu1 %v8024_v59  ;;  %v8029_v55 = vld [vmem:[%s8128_s21 + $0x1d8] sm:$0xff]  }
 0x1ed   : > { %vm2979_vm9 = vcmp.ge.f32.partialorder %v2390_v7, 0.0  ;;  %v3293_v8 = vmul.f32 0.2, %v2390_v7  ;;  %7477 = vmatprep.mubr.msk.bf16.mxu0 %vm8077_vm0, %v8076_v1  ;;  %7793 = vmatprep.mubr.msk.bf16.mxu1 %vm8077_vm0, %v8076_v1  ;;  %v3135_v11 = vmul.f32 0.2, %v1758_v6  ;;  %vm2821_vm10 = vcmp.ge.f32.partialorder %v1758_v6, 0.0 }
 0x1ee   : > { %6942 = vst [vmem:[%s8312_s6 + $0xf8] sm:$0xff] %v6285_v4   ;;  %7021 = vst [vmem:[%s8312_s6 + $0x370] sm:$0xff] %v6680_v5   ;;  %v7379_v9 = vpop.f32.mrf.mxu0  ;;  %v7695_v10 = vpop.f32.mrf.mxu1 }
 0x1ef   : > { %v3607_v12 = vsel %vm2979_vm9, %v2390_v7, %v3293_v8  ;;  %v3449_v21 = vsel %vm2821_vm10, %v1758_v6, %v3135_v11 }
 0x1f0   : > { %v1761_v13 = vpop.f32.mrf.mxu0  ;;  %v2393_v14 = vpop.f32.mrf.mxu1 }
 0x1f1   : > { %vm2822_vm11 = vcmp.ge.f32.partialorder %v1761_v13, 0.0  ;;  %v3136_v17 = vmul.f32 0.2, %v1761_v13  ;;  %vm2980_vm12 = vcmp.ge.f32.partialorder %v2393_v14, 0.0  ;;  %v3294_v18 = vmul.f32 0.2, %v2393_v14 }
 0x1f2   : > { %v7380_v19 = vpop.f32.mrf.mxu0  ;;  %v7696_v20 = vpop.f32.mrf.mxu1 }
 0x1f3   : > { %v3450_v22 = vsel %vm2822_vm11, %v1761_v13, %v3136_v17  ;;  %v3608_v23 = vsel %vm2980_vm12, %v2393_v14, %v3294_v18  ;;  %v8032_v13 = vld [vmem:[%s8128_s21 + $0x458] sm:$0xff]  }
 0x1f4   : > { %v6290_v24 = vpack.c.bf16 %v3450_v22, %v3449_v21  ;;  %v6685_v25 = vpack.c.bf16 %v3608_v23, %v3607_v12  ;;  %v1766_v26 = vpop.f32.mrf.mxu0  ;;  %7478 = vmatmul.mubr.bf16.gmra.mxu0 %v8025_v15  ;;  %v2398_v27 = vpop.f32.mrf.mxu1  ;;  %7794 = vmatmul.mubr.bf16.gmra.mxu1 %v8026_v16  ;;  %v8031_v12 = vld [vmem:[%s8128_s21 + $0x1e0] sm:$0xff]  }
 0x1f5   : > { %vm2981_vm13 = vcmp.ge.f32.partialorder %v2398_v27, 0.0  ;;  %v3295_v28 = vmul.f32 0.2, %v2398_v27  ;;  %7481 = vmatprep.mubr.msk.bf16.mxu0 %vm8077_vm0, %v8076_v1  ;;  %7797 = vmatprep.mubr.msk.bf16.mxu1 %vm8077_vm0, %v8076_v1  ;;  %v3137_v31 = vmul.f32 0.2, %v1766_v26  ;;  %vm2823_vm14 = vcmp.ge.f32.partialorder %v1766_v26, 0.0 }
 0x1f6   : > { %6943 = vst [vmem:[%s8312_s6 + $0x100] sm:$0xff] %v6290_v24   ;;  %7022 = vst [vmem:[%s8312_s6 + $0x378] sm:$0xff] %v6685_v25   ;;  %v7383_v29 = vpop.f32.mrf.mxu0  ;;  %v7699_v30 = vpop.f32.mrf.mxu1 }
 0x1f7   : > { %v3609_v32 = vsel %vm2981_vm13, %v2398_v27, %v3295_v28  ;;  %v3451_v41 = vsel %vm2823_vm14, %v1766_v26, %v3137_v31 }
 0x1f8   : > { %v1769_v33 = vpop.f32.mrf.mxu0  ;;  %v2401_v34 = vpop.f32.mrf.mxu1 }
 0x1f9   : > { %vm2824_vm15 = vcmp.ge.f32.partialorder %v1769_v33, 0.0  ;;  %v3138_v37 = vmul.f32 0.2, %v1769_v33  ;;  %vm2982_vm1 = vcmp.ge.f32.partialorder %v2401_v34, 0.0  ;;  %v3296_v38 = vmul.f32 0.2, %v2401_v34 }
 0x1fa   : > { %v7384_v39 = vpop.f32.mrf.mxu0  ;;  %v7700_v40 = vpop.f32.mrf.mxu1 }
 0x1fb   : > { %v3452_v42 = vsel %vm2824_vm15, %v1769_v33, %v3138_v37  ;;  %v3610_v43 = vsel %vm2982_vm1, %v2401_v34, %v3296_v38  ;;  %v8034_v33 = vld [vmem:[%s8128_s21 + $0x460] sm:$0xff]  }
 0x1fc   : > { %v6295_v44 = vpack.c.bf16 %v3452_v42, %v3451_v41  ;;  %v6690_v45 = vpack.c.bf16 %v3610_v43, %v3609_v32  ;;  %v1774_v46 = vpop.f32.mrf.mxu0  ;;  %7482 = vmatmul.mubr.bf16.gmra.mxu0 %v8027_v35  ;;  %v2406_v47 = vpop.f32.mrf.mxu1  ;;  %7798 = vmatmul.mubr.bf16.gmra.mxu1 %v8028_v36  ;;  %v8033_v32 = vld [vmem:[%s8128_s21 + $0x1e8] sm:$0xff]  }
 0x1fd   : > { %vm2983_vm2 = vcmp.ge.f32.partialorder %v2406_v47, 0.0  ;;  %v3297_v48 = vmul.f32 0.2, %v2406_v47  ;;  %7485 = vmatprep.mubr.msk.bf16.mxu0 %vm8077_vm0, %v8076_v1  ;;  %7801 = vmatprep.mubr.msk.bf16.mxu1 %vm8077_vm0, %v8076_v1  ;;  %v3139_v51 = vmul.f32 0.2, %v1774_v46  ;;  %vm2825_vm3 = vcmp.ge.f32.partialorder %v1774_v46, 0.0 }
 0x1fe   : > { %6944 = vst [vmem:[%s8312_s6 + $0x108] sm:$0xff] %v6295_v44   ;;  %7023 = vst [vmem:[%s8312_s6 + $0x380] sm:$0xff] %v6690_v45   ;;  %v7387_v49 = vpop.f32.mrf.mxu0  ;;  %v7703_v50 = vpop.f32.mrf.mxu1 }
 0x1ff   : > { %v3611_v52 = vsel %vm2983_vm2, %v2406_v47, %v3297_v48  ;;  %v3453_v61 = vsel %vm2825_vm3, %v1774_v46, %v3139_v51 }
 0x200   : > { %v1777_v53 = vpop.f32.mrf.mxu0  ;;  %v2409_v54 = vpop.f32.mrf.mxu1 }
 0x201   : > { %vm2826_vm4 = vcmp.ge.f32.partialorder %v1777_v53, 0.0  ;;  %v3140_v57 = vmul.f32 0.2, %v1777_v53  ;;  %vm2984_vm5 = vcmp.ge.f32.partialorder %v2409_v54, 0.0  ;;  %v3298_v58 = vmul.f32 0.2, %v2409_v54 }
 0x202   : > { %v7388_v59 = vpop.f32.mrf.mxu0  ;;  %v7704_v60 = vpop.f32.mrf.mxu1 }
 0x203   : > { %v3454_v62 = vsel %vm2826_vm4, %v1777_v53, %v3140_v57  ;;  %v3612_v63 = vsel %vm2984_vm5, %v2409_v54, %v3298_v58  ;;  %v8036_v53 = vld [vmem:[%s8128_s21 + $0x468] sm:$0xff]  }
 0x204   : > { %v6300_v0 = vpack.c.bf16 %v3454_v62, %v3453_v61  ;;  %v6695_v2 = vpack.c.bf16 %v3612_v63, %v3611_v52  ;;  %v1782_v3 = vpop.f32.mrf.mxu0  ;;  %7486 = vmatmul.mubr.bf16.gmra.mxu0 %v8029_v55  ;;  %v2414_v4 = vpop.f32.mrf.mxu1  ;;  %7802 = vmatmul.mubr.bf16.gmra.mxu1 %v8030_v56  ;;  %v8035_v52 = vld [vmem:[%s8128_s21 + $0x1f0] sm:$0xff]  }
 0x205   : > { %vm2985_vm6 = vcmp.ge.f32.partialorder %v2414_v4, 0.0  ;;  %v3299_v5 = vmul.f32 0.2, %v2414_v4  ;;  %7489 = vmatprep.mubr.msk.bf16.mxu0 %vm8077_vm0, %v8076_v1  ;;  %7805 = vmatprep.mubr.msk.bf16.mxu1 %vm8077_vm0, %v8076_v1  ;;  %v3141_v8 = vmul.f32 0.2, %v1782_v3  ;;  %vm2827_vm7 = vcmp.ge.f32.partialorder %v1782_v3, 0.0 }
 0x206   : > { %6945 = vst [vmem:[%s8312_s6 + $0x110] sm:$0xff] %v6300_v0   ;;  %7024 = vst [vmem:[%s8312_s6 + $0x388] sm:$0xff] %v6695_v2   ;;  %v7391_v6 = vpop.f32.mrf.mxu0  ;;  %v7707_v7 = vpop.f32.mrf.mxu1 }
 0x207   : > { %v3613_v9 = vsel %vm2985_vm6, %v2414_v4, %v3299_v5  ;;  %v3455_v18 = vsel %vm2827_vm7, %v1782_v3, %v3141_v8 }
 0x208   : > { %v1785_v10 = vpop.f32.mrf.mxu0  ;;  %v2417_v11 = vpop.f32.mrf.mxu1 }
 0x209   : > { %vm2828_vm8 = vcmp.ge.f32.partialorder %v1785_v10, 0.0  ;;  %v3142_v14 = vmul.f32 0.2, %v1785_v10  ;;  %vm2986_vm9 = vcmp.ge.f32.partialorder %v2417_v11, 0.0  ;;  %v3300_v15 = vmul.f32 0.2, %v2417_v11 }
 0x20a   : > { %v7392_v16 = vpop.f32.mrf.mxu0  ;;  %v7708_v17 = vpop.f32.mrf.mxu1 }
 0x20b   : > { %v3456_v19 = vsel %vm2828_vm8, %v1785_v10, %v3142_v14  ;;  %v3614_v20 = vsel %vm2986_vm9, %v2417_v11, %v3300_v15  ;;  %v8038_v10 = vld [vmem:[%s8128_s21 + $0x470] sm:$0xff]  }
 0x20c   : > { %v6305_v21 = vpack.c.bf16 %v3456_v19, %v3455_v18  ;;  %v6700_v22 = vpack.c.bf16 %v3614_v20, %v3613_v9  ;;  %v1790_v23 = vpop.f32.mrf.mxu0  ;;  %7490 = vmatmul.mubr.bf16.gmra.mxu0 %v8031_v12  ;;  %v2422_v24 = vpop.f32.mrf.mxu1  ;;  %7806 = vmatmul.mubr.bf16.gmra.mxu1 %v8032_v13  ;;  %v8037_v9 = vld [vmem:[%s8128_s21 + $0x1f8] sm:$0xff]  }
 0x20d   : > { %vm2987_vm10 = vcmp.ge.f32.partialorder %v2422_v24, 0.0  ;;  %v3301_v25 = vmul.f32 0.2, %v2422_v24  ;;  %7493 = vmatprep.mubr.msk.bf16.mxu0 %vm8077_vm0, %v8076_v1  ;;  %7809 = vmatprep.mubr.msk.bf16.mxu1 %vm8077_vm0, %v8076_v1  ;;  %v3143_v28 = vmul.f32 0.2, %v1790_v23  ;;  %vm2829_vm11 = vcmp.ge.f32.partialorder %v1790_v23, 0.0 }
 0x20e   : > { %6946 = vst [vmem:[%s8312_s6 + $0x118] sm:$0xff] %v6305_v21   ;;  %7025 = vst [vmem:[%s8312_s6 + $0x390] sm:$0xff] %v6700_v22   ;;  %v7395_v26 = vpop.f32.mrf.mxu0  ;;  %v7711_v27 = vpop.f32.mrf.mxu1 }
 0x20f   : > { %v3615_v29 = vsel %vm2987_vm10, %v2422_v24, %v3301_v25  ;;  %v3457_v38 = vsel %vm2829_vm11, %v1790_v23, %v3143_v28 }
 0x210   : > { %v1793_v30 = vpop.f32.mrf.mxu0  ;;  %v2425_v31 = vpop.f32.mrf.mxu1 }
 0x211   : > { %vm2830_vm12 = vcmp.ge.f32.partialorder %v1793_v30, 0.0  ;;  %v3144_v34 = vmul.f32 0.2, %v1793_v30  ;;  %vm2988_vm13 = vcmp.ge.f32.partialorder %v2425_v31, 0.0  ;;  %v3302_v35 = vmul.f32 0.2, %v2425_v31 }
 0x212   : > { %v7396_v36 = vpop.f32.mrf.mxu0  ;;  %v7712_v37 = vpop.f32.mrf.mxu1 }
 0x213   : > { %v3458_v39 = vsel %vm2830_vm12, %v1793_v30, %v3144_v34  ;;  %v3616_v40 = vsel %vm2988_vm13, %v2425_v31, %v3302_v35  ;;  %v8040_v30 = vld [vmem:[%s8128_s21 + $0x478] sm:$0xff]  }
 0x214   : > { %v6310_v41 = vpack.c.bf16 %v3458_v39, %v3457_v38  ;;  %v6705_v42 = vpack.c.bf16 %v3616_v40, %v3615_v29  ;;  %v1798_v43 = vpop.f32.mrf.mxu0  ;;  %7494 = vmatmul.mubr.bf16.gmra.mxu0 %v8033_v32  ;;  %v2430_v44 = vpop.f32.mrf.mxu1  ;;  %7810 = vmatmul.mubr.bf16.gmra.mxu1 %v8034_v33  ;;  %v8039_v29 = vld [vmem:[%s8128_s21 + $0x200] sm:$0xff]  }
 0x215   : > { %vm2989_vm14 = vcmp.ge.f32.partialorder %v2430_v44, 0.0  ;;  %v3303_v45 = vmul.f32 0.2, %v2430_v44  ;;  %7497 = vmatprep.mubr.msk.bf16.mxu0 %vm8077_vm0, %v8076_v1  ;;  %7813 = vmatprep.mubr.msk.bf16.mxu1 %vm8077_vm0, %v8076_v1  ;;  %v3145_v48 = vmul.f32 0.2, %v1798_v43  ;;  %vm2831_vm15 = vcmp.ge.f32.partialorder %v1798_v43, 0.0 }
 0x216   : > { %6947 = vst [vmem:[%s8312_s6 + $0x120] sm:$0xff] %v6310_v41   ;;  %7026 = vst [vmem:[%s8312_s6 + $0x398] sm:$0xff] %v6705_v42   ;;  %v7399_v46 = vpop.f32.mrf.mxu0  ;;  %v7715_v47 = vpop.f32.mrf.mxu1 }
 0x217   : > { %v3617_v49 = vsel %vm2989_vm14, %v2430_v44, %v3303_v45  ;;  %v3459_v58 = vsel %vm2831_vm15, %v1798_v43, %v3145_v48 }
 0x218   : > { %v1801_v50 = vpop.f32.mrf.mxu0  ;;  %v2433_v51 = vpop.f32.mrf.mxu1 }
 0x219   : > { %vm2832_vm1 = vcmp.ge.f32.partialorder %v1801_v50, 0.0  ;;  %v3146_v54 = vmul.f32 0.2, %v1801_v50  ;;  %vm2990_vm2 = vcmp.ge.f32.partialorder %v2433_v51, 0.0  ;;  %v3304_v55 = vmul.f32 0.2, %v2433_v51 }
 0x21a   : > { %v7400_v56 = vpop.f32.mrf.mxu0  ;;  %v7716_v57 = vpop.f32.mrf.mxu1 }
 0x21b   : > { %v3460_v59 = vsel %vm2832_vm1, %v1801_v50, %v3146_v54  ;;  %v3618_v60 = vsel %vm2990_vm2, %v2433_v51, %v3304_v55  ;;  %v8042_v50 = vld [vmem:[%s8128_s21 + $0x480] sm:$0xff]  }
 0x21c   : > { %v6315_v61 = vpack.c.bf16 %v3460_v59, %v3459_v58  ;;  %v6710_v62 = vpack.c.bf16 %v3618_v60, %v3617_v49  ;;  %v1806_v63 = vpop.f32.mrf.mxu0  ;;  %7498 = vmatmul.mubr.bf16.gmra.mxu0 %v8035_v52  ;;  %v2438_v0 = vpop.f32.mrf.mxu1  ;;  %7814 = vmatmul.mubr.bf16.gmra.mxu1 %v8036_v53  ;;  %v8041_v49 = vld [vmem:[%s8128_s21 + $0x208] sm:$0xff]  }
 0x21d   : > { %vm2991_vm3 = vcmp.ge.f32.partialorder %v2438_v0, 0.0  ;;  %v3305_v2 = vmul.f32 0.2, %v2438_v0  ;;  %7501 = vmatprep.mubr.msk.bf16.mxu0 %vm8077_vm0, %v8076_v1  ;;  %7817 = vmatprep.mubr.msk.bf16.mxu1 %vm8077_vm0, %v8076_v1  ;;  %v3147_v5 = vmul.f32 0.2, %v1806_v63  ;;  %vm2833_vm4 = vcmp.ge.f32.partialorder %v1806_v63, 0.0 }
 0x21e   : > { %6948 = vst [vmem:[%s8312_s6 + $0x128] sm:$0xff] %v6315_v61   ;;  %7027 = vst [vmem:[%s8312_s6 + $0x3a0] sm:$0xff] %v6710_v62   ;;  %v7403_v3 = vpop.f32.mrf.mxu0  ;;  %v7719_v4 = vpop.f32.mrf.mxu1 }
 0x21f   : > { %v3619_v6 = vsel %vm2991_vm3, %v2438_v0, %v3305_v2  ;;  %v3461_v15 = vsel %vm2833_vm4, %v1806_v63, %v3147_v5 }
 0x220   : > { %v1809_v7 = vpop.f32.mrf.mxu0  ;;  %v2441_v8 = vpop.f32.mrf.mxu1 }
 0x221   : > { %vm2834_vm5 = vcmp.ge.f32.partialorder %v1809_v7, 0.0  ;;  %v3148_v11 = vmul.f32 0.2, %v1809_v7  ;;  %vm2992_vm6 = vcmp.ge.f32.partialorder %v2441_v8, 0.0  ;;  %v3306_v12 = vmul.f32 0.2, %v2441_v8 }
 0x222   : > { %v7404_v13 = vpop.f32.mrf.mxu0  ;;  %v7720_v14 = vpop.f32.mrf.mxu1 }
 0x223   : > { %v3462_v16 = vsel %vm2834_vm5, %v1809_v7, %v3148_v11  ;;  %v3620_v17 = vsel %vm2992_vm6, %v2441_v8, %v3306_v12  ;;  %v8044_v7 = vld [vmem:[%s8128_s21 + $0x488] sm:$0xff]  }
 0x224   : > { %v6320_v18 = vpack.c.bf16 %v3462_v16, %v3461_v15  ;;  %v6715_v19 = vpack.c.bf16 %v3620_v17, %v3619_v6  ;;  %v1814_v20 = vpop.f32.mrf.mxu0  ;;  %7502 = vmatmul.mubr.bf16.gmra.mxu0 %v8037_v9  ;;  %v2446_v21 = vpop.f32.mrf.mxu1  ;;  %7818 = vmatmul.mubr.bf16.gmra.mxu1 %v8038_v10  ;;  %v8043_v6 = vld [vmem:[%s8128_s21 + $0x210] sm:$0xff]  }
 0x225   : > { %vm2993_vm7 = vcmp.ge.f32.partialorder %v2446_v21, 0.0  ;;  %v3307_v22 = vmul.f32 0.2, %v2446_v21  ;;  %7505 = vmatprep.mubr.msk.bf16.mxu0 %vm8077_vm0, %v8076_v1  ;;  %7821 = vmatprep.mubr.msk.bf16.mxu1 %vm8077_vm0, %v8076_v1  ;;  %v3149_v25 = vmul.f32 0.2, %v1814_v20  ;;  %vm2835_vm8 = vcmp.ge.f32.partialorder %v1814_v20, 0.0 }
 0x226   : > { %6949 = vst [vmem:[%s8312_s6 + $0x130] sm:$0xff] %v6320_v18   ;;  %7028 = vst [vmem:[%s8312_s6 + $0x3a8] sm:$0xff] %v6715_v19   ;;  %v7407_v23 = vpop.f32.mrf.mxu0  ;;  %v7723_v24 = vpop.f32.mrf.mxu1 }
 0x227   : > { %v3621_v26 = vsel %vm2993_vm7, %v2446_v21, %v3307_v22  ;;  %v3463_v35 = vsel %vm2835_vm8, %v1814_v20, %v3149_v25 }
 0x228   : > { %v1817_v27 = vpop.f32.mrf.mxu0  ;;  %v2449_v28 = vpop.f32.mrf.mxu1 }
 0x229   : > { %vm2836_vm9 = vcmp.ge.f32.partialorder %v1817_v27, 0.0  ;;  %v3150_v31 = vmul.f32 0.2, %v1817_v27  ;;  %vm2994_vm10 = vcmp.ge.f32.partialorder %v2449_v28, 0.0  ;;  %v3308_v32 = vmul.f32 0.2, %v2449_v28 }
 0x22a   : > { %v7408_v33 = vpop.f32.mrf.mxu0  ;;  %v7724_v34 = vpop.f32.mrf.mxu1 }
 0x22b   : > { %v3464_v36 = vsel %vm2836_vm9, %v1817_v27, %v3150_v31  ;;  %v3622_v37 = vsel %vm2994_vm10, %v2449_v28, %v3308_v32  ;;  %v8046_v27 = vld [vmem:[%s8128_s21 + $0x490] sm:$0xff]  }
 0x22c   : > { %v6325_v38 = vpack.c.bf16 %v3464_v36, %v3463_v35  ;;  %v6720_v39 = vpack.c.bf16 %v3622_v37, %v3621_v26  ;;  %v1822_v40 = vpop.f32.mrf.mxu0  ;;  %7506 = vmatmul.mubr.bf16.gmra.mxu0 %v8039_v29  ;;  %v2454_v41 = vpop.f32.mrf.mxu1  ;;  %7822 = vmatmul.mubr.bf16.gmra.mxu1 %v8040_v30  ;;  %v8045_v26 = vld [vmem:[%s8128_s21 + $0x218] sm:$0xff]  }
 0x22d   : > { %vm2995_vm11 = vcmp.ge.f32.partialorder %v2454_v41, 0.0  ;;  %v3309_v42 = vmul.f32 0.2, %v2454_v41  ;;  %7509 = vmatprep.mubr.msk.bf16.mxu0 %vm8077_vm0, %v8076_v1  ;;  %7825 = vmatprep.mubr.msk.bf16.mxu1 %vm8077_vm0, %v8076_v1  ;;  %v3151_v45 = vmul.f32 0.2, %v1822_v40  ;;  %vm2837_vm12 = vcmp.ge.f32.partialorder %v1822_v40, 0.0 }
 0x22e   : > { %6950 = vst [vmem:[%s8312_s6 + $0x138] sm:$0xff] %v6325_v38   ;;  %7029 = vst [vmem:[%s8312_s6 + $0x3b0] sm:$0xff] %v6720_v39   ;;  %v7411_v43 = vpop.f32.mrf.mxu0  ;;  %v7727_v44 = vpop.f32.mrf.mxu1 }
 0x22f   : > { %v3623_v46 = vsel %vm2995_vm11, %v2454_v41, %v3309_v42  ;;  %v3465_v55 = vsel %vm2837_vm12, %v1822_v40, %v3151_v45 }
 0x230   : > { %v1825_v47 = vpop.f32.mrf.mxu0  ;;  %v2457_v48 = vpop.f32.mrf.mxu1 }
 0x231   : > { %vm2838_vm13 = vcmp.ge.f32.partialorder %v1825_v47, 0.0  ;;  %v3152_v51 = vmul.f32 0.2, %v1825_v47  ;;  %vm2996_vm14 = vcmp.ge.f32.partialorder %v2457_v48, 0.0  ;;  %v3310_v52 = vmul.f32 0.2, %v2457_v48 }
 0x232   : > { %v7412_v53 = vpop.f32.mrf.mxu0  ;;  %v7728_v54 = vpop.f32.mrf.mxu1 }
 0x233   : > { %v3466_v56 = vsel %vm2838_vm13, %v1825_v47, %v3152_v51  ;;  %v3624_v57 = vsel %vm2996_vm14, %v2457_v48, %v3310_v52  ;;  %v8048_v47 = vld [vmem:[%s8128_s21 + $0x498] sm:$0xff]  }
 0x234   : > { %v6330_v58 = vpack.c.bf16 %v3466_v56, %v3465_v55  ;;  %v6725_v59 = vpack.c.bf16 %v3624_v57, %v3623_v46  ;;  %v1830_v60 = vpop.f32.mrf.mxu0  ;;  %7510 = vmatmul.mubr.bf16.gmra.mxu0 %v8041_v49  ;;  %v2462_v61 = vpop.f32.mrf.mxu1  ;;  %7826 = vmatmul.mubr.bf16.gmra.mxu1 %v8042_v50  ;;  %v8047_v46 = vld [vmem:[%s8128_s21 + $0x220] sm:$0xff]  }
 0x235   : > { %vm2997_vm15 = vcmp.ge.f32.partialorder %v2462_v61, 0.0  ;;  %v3311_v62 = vmul.f32 0.2, %v2462_v61  ;;  %7513 = vmatprep.mubr.msk.bf16.mxu0 %vm8077_vm0, %v8076_v1  ;;  %7829 = vmatprep.mubr.msk.bf16.mxu1 %vm8077_vm0, %v8076_v1  ;;  %v3153_v2 = vmul.f32 0.2, %v1830_v60  ;;  %vm2839_vm1 = vcmp.ge.f32.partialorder %v1830_v60, 0.0 }
 0x236   : > { %6951 = vst [vmem:[%s8312_s6 + $0x140] sm:$0xff] %v6330_v58   ;;  %7030 = vst [vmem:[%s8312_s6 + $0x3b8] sm:$0xff] %v6725_v59   ;;  %v7415_v63 = vpop.f32.mrf.mxu0  ;;  %v7731_v0 = vpop.f32.mrf.mxu1 }
 0x237   : > { %v3625_v3 = vsel %vm2997_vm15, %v2462_v61, %v3311_v62  ;;  %v3467_v12 = vsel %vm2839_vm1, %v1830_v60, %v3153_v2 }
 0x238   : > { %v1833_v4 = vpop.f32.mrf.mxu0  ;;  %v2465_v5 = vpop.f32.mrf.mxu1 }
 0x239   : > { %vm2840_vm2 = vcmp.ge.f32.partialorder %v1833_v4, 0.0  ;;  %v3154_v8 = vmul.f32 0.2, %v1833_v4  ;;  %vm2998_vm3 = vcmp.ge.f32.partialorder %v2465_v5, 0.0  ;;  %v3312_v9 = vmul.f32 0.2, %v2465_v5 }
 0x23a   : > { %v7416_v10 = vpop.f32.mrf.mxu0  ;;  %v7732_v11 = vpop.f32.mrf.mxu1 }
 0x23b   : > { %v3468_v13 = vsel %vm2840_vm2, %v1833_v4, %v3154_v8  ;;  %v3626_v14 = vsel %vm2998_vm3, %v2465_v5, %v3312_v9  ;;  %v8050_v4 = vld [vmem:[%s8128_s21 + $0x4a0] sm:$0xff]  }
 0x23c   : > { %v6335_v15 = vpack.c.bf16 %v3468_v13, %v3467_v12  ;;  %v6730_v16 = vpack.c.bf16 %v3626_v14, %v3625_v3  ;;  %v1838_v17 = vpop.f32.mrf.mxu0  ;;  %7514 = vmatmul.mubr.bf16.gmra.mxu0 %v8043_v6  ;;  %v2470_v18 = vpop.f32.mrf.mxu1  ;;  %7830 = vmatmul.mubr.bf16.gmra.mxu1 %v8044_v7  ;;  %v8049_v3 = vld [vmem:[%s8128_s21 + $0x228] sm:$0xff]  }
 0x23d   : > { %vm2999_vm4 = vcmp.ge.f32.partialorder %v2470_v18, 0.0  ;;  %v3313_v19 = vmul.f32 0.2, %v2470_v18  ;;  %7517 = vmatprep.mubr.msk.bf16.mxu0 %vm8077_vm0, %v8076_v1  ;;  %7833 = vmatprep.mubr.msk.bf16.mxu1 %vm8077_vm0, %v8076_v1  ;;  %v3155_v22 = vmul.f32 0.2, %v1838_v17  ;;  %vm2841_vm5 = vcmp.ge.f32.partialorder %v1838_v17, 0.0 }
 0x23e   : > { %6952 = vst [vmem:[%s8312_s6 + $0x148] sm:$0xff] %v6335_v15   ;;  %7031 = vst [vmem:[%s8312_s6 + $0x3c0] sm:$0xff] %v6730_v16   ;;  %v7419_v20 = vpop.f32.mrf.mxu0  ;;  %v7735_v21 = vpop.f32.mrf.mxu1 }
 0x23f   : > { %v3627_v23 = vsel %vm2999_vm4, %v2470_v18, %v3313_v19  ;;  %v3469_v32 = vsel %vm2841_vm5, %v1838_v17, %v3155_v22 }
 0x240   : > { %v1841_v24 = vpop.f32.mrf.mxu0  ;;  %v2473_v25 = vpop.f32.mrf.mxu1 }
 0x241   : > { %vm2842_vm6 = vcmp.ge.f32.partialorder %v1841_v24, 0.0  ;;  %v3156_v28 = vmul.f32 0.2, %v1841_v24  ;;  %vm3000_vm7 = vcmp.ge.f32.partialorder %v2473_v25, 0.0  ;;  %v3314_v29 = vmul.f32 0.2, %v2473_v25 }
 0x242   : > { %v7420_v30 = vpop.f32.mrf.mxu0  ;;  %v7736_v31 = vpop.f32.mrf.mxu1 }
 0x243   : > { %v3470_v33 = vsel %vm2842_vm6, %v1841_v24, %v3156_v28  ;;  %v3628_v34 = vsel %vm3000_vm7, %v2473_v25, %v3314_v29  ;;  %v8052_v24 = vld [vmem:[%s8128_s21 + $0x4a8] sm:$0xff]  }
 0x244   : > { %v6340_v35 = vpack.c.bf16 %v3470_v33, %v3469_v32  ;;  %v6735_v36 = vpack.c.bf16 %v3628_v34, %v3627_v23  ;;  %v1846_v37 = vpop.f32.mrf.mxu0  ;;  %7518 = vmatmul.mubr.bf16.gmra.mxu0 %v8045_v26  ;;  %v2478_v38 = vpop.f32.mrf.mxu1  ;;  %7834 = vmatmul.mubr.bf16.gmra.mxu1 %v8046_v27  ;;  %v8051_v23 = vld [vmem:[%s8128_s21 + $0x230] sm:$0xff]  }
 0x245   : > { %vm3001_vm8 = vcmp.ge.f32.partialorder %v2478_v38, 0.0  ;;  %v3315_v39 = vmul.f32 0.2, %v2478_v38  ;;  %7521 = vmatprep.mubr.msk.bf16.mxu0 %vm8077_vm0, %v8076_v1  ;;  %7837 = vmatprep.mubr.msk.bf16.mxu1 %vm8077_vm0, %v8076_v1  ;;  %v3157_v42 = vmul.f32 0.2, %v1846_v37  ;;  %vm2843_vm9 = vcmp.ge.f32.partialorder %v1846_v37, 0.0 }
 0x246   : > { %6953 = vst [vmem:[%s8312_s6 + $0x150] sm:$0xff] %v6340_v35   ;;  %7032 = vst [vmem:[%s8312_s6 + $0x3c8] sm:$0xff] %v6735_v36   ;;  %v7423_v40 = vpop.f32.mrf.mxu0  ;;  %v7739_v41 = vpop.f32.mrf.mxu1 }
 0x247   : > { %v3629_v43 = vsel %vm3001_vm8, %v2478_v38, %v3315_v39  ;;  %v3471_v52 = vsel %vm2843_vm9, %v1846_v37, %v3157_v42 }
 0x248   : > { %v1849_v44 = vpop.f32.mrf.mxu0  ;;  %v2481_v45 = vpop.f32.mrf.mxu1 }
 0x249   : > { %vm2844_vm10 = vcmp.ge.f32.partialorder %v1849_v44, 0.0  ;;  %v3158_v48 = vmul.f32 0.2, %v1849_v44  ;;  %vm3002_vm11 = vcmp.ge.f32.partialorder %v2481_v45, 0.0  ;;  %v3316_v49 = vmul.f32 0.2, %v2481_v45 }
 0x24a   : > { %v7424_v50 = vpop.f32.mrf.mxu0  ;;  %v7740_v51 = vpop.f32.mrf.mxu1 }
 0x24b   : > { %v3472_v53 = vsel %vm2844_vm10, %v1849_v44, %v3158_v48  ;;  %v3630_v54 = vsel %vm3002_vm11, %v2481_v45, %v3316_v49  ;;  %v8054_v44 = vld [vmem:[%s8128_s21 + $0x4b0] sm:$0xff]  }
 0x24c   : > { %v6345_v55 = vpack.c.bf16 %v3472_v53, %v3471_v52  ;;  %v6740_v56 = vpack.c.bf16 %v3630_v54, %v3629_v43  ;;  %v1854_v57 = vpop.f32.mrf.mxu0  ;;  %7522 = vmatmul.mubr.bf16.gmra.mxu0 %v8047_v46  ;;  %v2486_v58 = vpop.f32.mrf.mxu1  ;;  %7838 = vmatmul.mubr.bf16.gmra.mxu1 %v8048_v47  ;;  %v8053_v43 = vld [vmem:[%s8128_s21 + $0x238] sm:$0xff]  }
 0x24d   : > { %vm3003_vm12 = vcmp.ge.f32.partialorder %v2486_v58, 0.0  ;;  %v3317_v59 = vmul.f32 0.2, %v2486_v58  ;;  %7525 = vmatprep.mubr.msk.bf16.mxu0 %vm8077_vm0, %v8076_v1  ;;  %7841 = vmatprep.mubr.msk.bf16.mxu1 %vm8077_vm0, %v8076_v1  ;;  %v3159_v62 = vmul.f32 0.2, %v1854_v57  ;;  %vm2845_vm13 = vcmp.ge.f32.partialorder %v1854_v57, 0.0 }
 0x24e   : > { %6954 = vst [vmem:[%s8312_s6 + $0x158] sm:$0xff] %v6345_v55   ;;  %7033 = vst [vmem:[%s8312_s6 + $0x3d0] sm:$0xff] %v6740_v56   ;;  %v7427_v60 = vpop.f32.mrf.mxu0  ;;  %v7743_v61 = vpop.f32.mrf.mxu1 }
 0x24f   : > { %v3631_v63 = vsel %vm3003_vm12, %v2486_v58, %v3317_v59  ;;  %v3473_v9 = vsel %vm2845_vm13, %v1854_v57, %v3159_v62 }
 0x250   : > { %v1857_v0 = vpop.f32.mrf.mxu0  ;;  %v2489_v2 = vpop.f32.mrf.mxu1 }
 0x251   : > { %vm2846_vm14 = vcmp.ge.f32.partialorder %v1857_v0, 0.0  ;;  %v3160_v5 = vmul.f32 0.2, %v1857_v0  ;;  %vm3004_vm15 = vcmp.ge.f32.partialorder %v2489_v2, 0.0  ;;  %v3318_v6 = vmul.f32 0.2, %v2489_v2 }
 0x252   : > { %v7428_v7 = vpop.f32.mrf.mxu0  ;;  %v7744_v8 = vpop.f32.mrf.mxu1 }
 0x253   : > { %v3474_v10 = vsel %vm2846_vm14, %v1857_v0, %v3160_v5  ;;  %v3632_v11 = vsel %vm3004_vm15, %v2489_v2, %v3318_v6  ;;  %v8056_v0 = vld [vmem:[%s8128_s21 + $0x4b8] sm:$0xff]  }
 0x254   : > { %v6350_v12 = vpack.c.bf16 %v3474_v10, %v3473_v9  ;;  %v6745_v13 = vpack.c.bf16 %v3632_v11, %v3631_v63  ;;  %v1862_v14 = vpop.f32.mrf.mxu0  ;;  %7526 = vmatmul.mubr.bf16.gmra.mxu0 %v8049_v3  ;;  %v2494_v15 = vpop.f32.mrf.mxu1  ;;  %7842 = vmatmul.mubr.bf16.gmra.mxu1 %v8050_v4  ;;  %v8055_v63 = vld [vmem:[%s8128_s21 + $0x240] sm:$0xff]  }
 0x255   : > { %vm3005_vm1 = vcmp.ge.f32.partialorder %v2494_v15, 0.0  ;;  %v3319_v16 = vmul.f32 0.2, %v2494_v15  ;;  %7529 = vmatprep.mubr.msk.bf16.mxu0 %vm8077_vm0, %v8076_v1  ;;  %7845 = vmatprep.mubr.msk.bf16.mxu1 %vm8077_vm0, %v8076_v1  ;;  %v3161_v19 = vmul.f32 0.2, %v1862_v14  ;;  %vm2847_vm2 = vcmp.ge.f32.partialorder %v1862_v14, 0.0 }
 0x256   : > { %6955 = vst [vmem:[%s8312_s6 + $0x160] sm:$0xff] %v6350_v12   ;;  %7034 = vst [vmem:[%s8312_s6 + $0x3d8] sm:$0xff] %v6745_v13   ;;  %v7431_v17 = vpop.f32.mrf.mxu0  ;;  %v7747_v18 = vpop.f32.mrf.mxu1 }
 0x257   : > { %v3633_v20 = vsel %vm3005_vm1, %v2494_v15, %v3319_v16  ;;  %v3475_v29 = vsel %vm2847_vm2, %v1862_v14, %v3161_v19 }
 0x258   : > { %v1865_v21 = vpop.f32.mrf.mxu0  ;;  %v2497_v22 = vpop.f32.mrf.mxu1 }
 0x259   : > { %vm2848_vm3 = vcmp.ge.f32.partialorder %v1865_v21, 0.0  ;;  %v3162_v25 = vmul.f32 0.2, %v1865_v21  ;;  %vm3006_vm4 = vcmp.ge.f32.partialorder %v2497_v22, 0.0  ;;  %v3320_v26 = vmul.f32 0.2, %v2497_v22 }
 0x25a   : > { %v7432_v27 = vpop.f32.mrf.mxu0  ;;  %v7748_v28 = vpop.f32.mrf.mxu1 }
 0x25b   : > { %v3476_v30 = vsel %vm2848_vm3, %v1865_v21, %v3162_v25  ;;  %v3634_v31 = vsel %vm3006_vm4, %v2497_v22, %v3320_v26  ;;  %v8058_v21 = vld [vmem:[%s8128_s21 + $0x4c0] sm:$0xff]  }
 0x25c   : > { %v6355_v32 = vpack.c.bf16 %v3476_v30, %v3475_v29  ;;  %v6750_v33 = vpack.c.bf16 %v3634_v31, %v3633_v20  ;;  %v1870_v34 = vpop.f32.mrf.mxu0  ;;  %7530 = vmatmul.mubr.bf16.gmra.mxu0 %v8051_v23  ;;  %v2502_v35 = vpop.f32.mrf.mxu1  ;;  %7846 = vmatmul.mubr.bf16.gmra.mxu1 %v8052_v24  ;;  %v8057_v20 = vld [vmem:[%s8128_s21 + $0x248] sm:$0xff]  }
 0x25d   : > { %vm3007_vm5 = vcmp.ge.f32.partialorder %v2502_v35, 0.0  ;;  %v3321_v36 = vmul.f32 0.2, %v2502_v35  ;;  %7533 = vmatprep.mubr.msk.bf16.mxu0 %vm8077_vm0, %v8076_v1  ;;  %7849 = vmatprep.mubr.msk.bf16.mxu1 %vm8077_vm0, %v8076_v1  ;;  %v3163_v39 = vmul.f32 0.2, %v1870_v34  ;;  %vm2849_vm6 = vcmp.ge.f32.partialorder %v1870_v34, 0.0 }
 0x25e   : > { %6956 = vst [vmem:[%s8312_s6 + $0x168] sm:$0xff] %v6355_v32   ;;  %7035 = vst [vmem:[%s8312_s6 + $0x3e0] sm:$0xff] %v6750_v33   ;;  %v7435_v37 = vpop.f32.mrf.mxu0  ;;  %v7751_v38 = vpop.f32.mrf.mxu1 }
 0x25f   : > { %v3635_v40 = vsel %vm3007_vm5, %v2502_v35, %v3321_v36  ;;  %v3477_v49 = vsel %vm2849_vm6, %v1870_v34, %v3163_v39 }
 0x260   : > { %v1873_v41 = vpop.f32.mrf.mxu0  ;;  %v2505_v42 = vpop.f32.mrf.mxu1 }
 0x261   : > { %vm2850_vm7 = vcmp.ge.f32.partialorder %v1873_v41, 0.0  ;;  %v3164_v45 = vmul.f32 0.2, %v1873_v41  ;;  %vm3008_vm8 = vcmp.ge.f32.partialorder %v2505_v42, 0.0  ;;  %v3322_v46 = vmul.f32 0.2, %v2505_v42 }
 0x262   : > { %v7436_v47 = vpop.f32.mrf.mxu0  ;;  %v7752_v48 = vpop.f32.mrf.mxu1 }
 0x263   : > { %v3478_v50 = vsel %vm2850_vm7, %v1873_v41, %v3164_v45  ;;  %v3636_v51 = vsel %vm3008_vm8, %v2505_v42, %v3322_v46  ;;  %v8060_v41 = vld [vmem:[%s8128_s21 + $0x4c8] sm:$0xff]  }
 0x264   : > { %v6360_v52 = vpack.c.bf16 %v3478_v50, %v3477_v49  ;;  %v6755_v53 = vpack.c.bf16 %v3636_v51, %v3635_v40  ;;  %v1878_v54 = vpop.f32.mrf.mxu0  ;;  %7534 = vmatmul.mubr.bf16.gmra.mxu0 %v8053_v43  ;;  %v2510_v55 = vpop.f32.mrf.mxu1  ;;  %7850 = vmatmul.mubr.bf16.gmra.mxu1 %v8054_v44  ;;  %v8059_v40 = vld [vmem:[%s8128_s21 + $0x250] sm:$0xff]  }
 0x265   : > { %vm3009_vm9 = vcmp.ge.f32.partialorder %v2510_v55, 0.0  ;;  %v3323_v56 = vmul.f32 0.2, %v2510_v55  ;;  %7537 = vmatprep.mubr.msk.bf16.mxu0 %vm8077_vm0, %v8076_v1  ;;  %7853 = vmatprep.mubr.msk.bf16.mxu1 %vm8077_vm0, %v8076_v1  ;;  %v3165_v59 = vmul.f32 0.2, %v1878_v54  ;;  %vm2851_vm10 = vcmp.ge.f32.partialorder %v1878_v54, 0.0 }
 0x266   : > { %6957 = vst [vmem:[%s8312_s6 + $0x170] sm:$0xff] %v6360_v52   ;;  %7036 = vst [vmem:[%s8312_s6 + $0x3e8] sm:$0xff] %v6755_v53   ;;  %v7439_v57 = vpop.f32.mrf.mxu0  ;;  %v7755_v58 = vpop.f32.mrf.mxu1 }
 0x267   : > { %v3637_v60 = vsel %vm3009_vm9, %v2510_v55, %v3323_v56  ;;  %v3479_v6 = vsel %vm2851_vm10, %v1878_v54, %v3165_v59 }
 0x268   : > { %v1881_v61 = vpop.f32.mrf.mxu0  ;;  %v2513_v62 = vpop.f32.mrf.mxu1 }
 0x269   : > { %vm2852_vm11 = vcmp.ge.f32.partialorder %v1881_v61, 0.0  ;;  %v3166_v2 = vmul.f32 0.2, %v1881_v61  ;;  %vm3010_vm12 = vcmp.ge.f32.partialorder %v2513_v62, 0.0  ;;  %v3324_v3 = vmul.f32 0.2, %v2513_v62 }
 0x26a   : > { %v7440_v4 = vpop.f32.mrf.mxu0  ;;  %v7756_v5 = vpop.f32.mrf.mxu1 }
 0x26b   : > { %v3480_v7 = vsel %vm2852_vm11, %v1881_v61, %v3166_v2  ;;  %v3638_v8 = vsel %vm3010_vm12, %v2513_v62, %v3324_v3  ;;  %v8062_v61 = vld [vmem:[%s8128_s21 + $0x4d0] sm:$0xff]  }
 0x26c   : > { %v6365_v9 = vpack.c.bf16 %v3480_v7, %v3479_v6  ;;  %v6760_v10 = vpack.c.bf16 %v3638_v8, %v3637_v60  ;;  %v1886_v11 = vpop.f32.mrf.mxu0  ;;  %7538 = vmatmul.mubr.bf16.gmra.mxu0 %v8055_v63  ;;  %v2518_v12 = vpop.f32.mrf.mxu1  ;;  %7854 = vmatmul.mubr.bf16.gmra.mxu1 %v8056_v0  ;;  %v8061_v60 = vld [vmem:[%s8128_s21 + $0x258] sm:$0xff]  }
 0x26d   : > { %vm3011_vm13 = vcmp.ge.f32.partialorder %v2518_v12, 0.0  ;;  %v3325_v13 = vmul.f32 0.2, %v2518_v12  ;;  %7541 = vmatprep.mubr.msk.bf16.mxu0 %vm8077_vm0, %v8076_v1  ;;  %7857 = vmatprep.mubr.msk.bf16.mxu1 %vm8077_vm0, %v8076_v1  ;;  %v3167_v16 = vmul.f32 0.2, %v1886_v11  ;;  %vm2853_vm14 = vcmp.ge.f32.partialorder %v1886_v11, 0.0 }
 0x26e   : > { %6958 = vst [vmem:[%s8312_s6 + $0x178] sm:$0xff] %v6365_v9   ;;  %7037 = vst [vmem:[%s8312_s6 + $0x3f0] sm:$0xff] %v6760_v10   ;;  %v7443_v14 = vpop.f32.mrf.mxu0  ;;  %v7759_v15 = vpop.f32.mrf.mxu1 }
 0x26f   : > { %v3639_v17 = vsel %vm3011_vm13, %v2518_v12, %v3325_v13  ;;  %v3481_v26 = vsel %vm2853_vm14, %v1886_v11, %v3167_v16 }
 0x270   : > { %v1889_v18 = vpop.f32.mrf.mxu0  ;;  %v2521_v19 = vpop.f32.mrf.mxu1 }
 0x271   : > { %vm2854_vm15 = vcmp.ge.f32.partialorder %v1889_v18, 0.0  ;;  %v3168_v22 = vmul.f32 0.2, %v1889_v18  ;;  %vm3012_vm1 = vcmp.ge.f32.partialorder %v2521_v19, 0.0  ;;  %v3326_v23 = vmul.f32 0.2, %v2521_v19 }
 0x272   : > { %v7444_v24 = vpop.f32.mrf.mxu0  ;;  %v7760_v25 = vpop.f32.mrf.mxu1 }
 0x273   : > { %v3482_v27 = vsel %vm2854_vm15, %v1889_v18, %v3168_v22  ;;  %v3640_v28 = vsel %vm3012_vm1, %v2521_v19, %v3326_v23  ;;  %v8064_v18 = vld [vmem:[%s8128_s21 + $0x4d8] sm:$0xff]  }
 0x274   : > { %v6370_v29 = vpack.c.bf16 %v3482_v27, %v3481_v26  ;;  %v6765_v30 = vpack.c.bf16 %v3640_v28, %v3639_v17  ;;  %v1894_v31 = vpop.f32.mrf.mxu0  ;;  %7542 = vmatmul.mubr.bf16.gmra.mxu0 %v8057_v20  ;;  %v2526_v32 = vpop.f32.mrf.mxu1  ;;  %7858 = vmatmul.mubr.bf16.gmra.mxu1 %v8058_v21  ;;  %v8063_v17 = vld [vmem:[%s8128_s21 + $0x260] sm:$0xff]  }
 0x275   : > { %vm3013_vm2 = vcmp.ge.f32.partialorder %v2526_v32, 0.0  ;;  %v3327_v33 = vmul.f32 0.2, %v2526_v32  ;;  %7545 = vmatprep.mubr.msk.bf16.mxu0 %vm8077_vm0, %v8076_v1  ;;  %7861 = vmatprep.mubr.msk.bf16.mxu1 %vm8077_vm0, %v8076_v1  ;;  %v3169_v36 = vmul.f32 0.2, %v1894_v31  ;;  %vm2855_vm3 = vcmp.ge.f32.partialorder %v1894_v31, 0.0 }
 0x276   : > { %6959 = vst [vmem:[%s8312_s6 + $0x180] sm:$0xff] %v6370_v29   ;;  %7038 = vst [vmem:[%s8312_s6 + $0x3f8] sm:$0xff] %v6765_v30   ;;  %v7447_v34 = vpop.f32.mrf.mxu0  ;;  %v7763_v35 = vpop.f32.mrf.mxu1 }
 0x277   : > { %v3641_v37 = vsel %vm3013_vm2, %v2526_v32, %v3327_v33  ;;  %v3483_v46 = vsel %vm2855_vm3, %v1894_v31, %v3169_v36 }
 0x278   : > { %v1897_v38 = vpop.f32.mrf.mxu0  ;;  %v2529_v39 = vpop.f32.mrf.mxu1 }
 0x279   : > { %vm2856_vm4 = vcmp.ge.f32.partialorder %v1897_v38, 0.0  ;;  %v3170_v42 = vmul.f32 0.2, %v1897_v38  ;;  %vm3014_vm5 = vcmp.ge.f32.partialorder %v2529_v39, 0.0  ;;  %v3328_v43 = vmul.f32 0.2, %v2529_v39 }
 0x27a   : > { %v7448_v44 = vpop.f32.mrf.mxu0  ;;  %v7764_v45 = vpop.f32.mrf.mxu1 }
 0x27b   : > { %v3484_v47 = vsel %vm2856_vm4, %v1897_v38, %v3170_v42  ;;  %v3642_v48 = vsel %vm3014_vm5, %v2529_v39, %v3328_v43  ;;  %v8066_v38 = vld [vmem:[%s8128_s21 + $0x4e0] sm:$0xff]  }
 0x27c   : > { %v6375_v49 = vpack.c.bf16 %v3484_v47, %v3483_v46  ;;  %v6770_v50 = vpack.c.bf16 %v3642_v48, %v3641_v37  ;;  %v1902_v51 = vpop.f32.mrf.mxu0  ;;  %7546 = vmatmul.mubr.bf16.gmra.mxu0 %v8059_v40  ;;  %v2534_v52 = vpop.f32.mrf.mxu1  ;;  %7862 = vmatmul.mubr.bf16.gmra.mxu1 %v8060_v41  ;;  %v8065_v37 = vld [vmem:[%s8128_s21 + $0x268] sm:$0xff]  }
 0x27d   : > { %vm3015_vm6 = vcmp.ge.f32.partialorder %v2534_v52, 0.0  ;;  %v3329_v53 = vmul.f32 0.2, %v2534_v52  ;;  %7549 = vmatprep.mubr.msk.bf16.mxu0 %vm8077_vm0, %v8076_v1  ;;  %7865 = vmatprep.mubr.msk.bf16.mxu1 %vm8077_vm0, %v8076_v1  ;;  %v3171_v56 = vmul.f32 0.2, %v1902_v51  ;;  %vm2857_vm7 = vcmp.ge.f32.partialorder %v1902_v51, 0.0 }
 0x27e   : > { %6960 = vst [vmem:[%s8312_s6 + $0x188] sm:$0xff] %v6375_v49   ;;  %7039 = vst [vmem:[%s8312_s6 + $0x400] sm:$0xff] %v6770_v50   ;;  %v7451_v54 = vpop.f32.mrf.mxu0  ;;  %v7767_v55 = vpop.f32.mrf.mxu1 }
 0x27f   : > { %v3643_v57 = vsel %vm3015_vm6, %v2534_v52, %v3329_v53  ;;  %v3485_v3 = vsel %vm2857_vm7, %v1902_v51, %v3171_v56 }
 0x280   : > { %v1905_v58 = vpop.f32.mrf.mxu0  ;;  %v2537_v59 = vpop.f32.mrf.mxu1 }
 0x281   : > { %vm2858_vm8 = vcmp.ge.f32.partialorder %v1905_v58, 0.0  ;;  %v3172_v62 = vmul.f32 0.2, %v1905_v58  ;;  %vm3016_vm9 = vcmp.ge.f32.partialorder %v2537_v59, 0.0  ;;  %v3330_v63 = vmul.f32 0.2, %v2537_v59 }
 0x282   : > { %v7452_v0 = vpop.f32.mrf.mxu0  ;;  %v7768_v2 = vpop.f32.mrf.mxu1 }
 0x283   : > { %v3486_v4 = vsel %vm2858_vm8, %v1905_v58, %v3172_v62  ;;  %v3644_v5 = vsel %vm3016_vm9, %v2537_v59, %v3330_v63 }
 0x284   : > { %v6380_v6 = vpack.c.bf16 %v3486_v4, %v3485_v3  ;;  %v6775_v7 = vpack.c.bf16 %v3644_v5, %v3643_v57  ;;  %v1910_v8 = vpop.f32.mrf.mxu0  ;;  %7550 = vmatmul.mubr.bf16.gmra.mxu0 %v8061_v60  ;;  %v2542_v9 = vpop.f32.mrf.mxu1  ;;  %7866 = vmatmul.mubr.bf16.gmra.mxu1 %v8062_v61  ;;  %v8067_v57 = vld [vmem:[%s8128_s21 + $0x270] sm:$0xff]  }
 0x285   : > { %vm3017_vm10 = vcmp.ge.f32.partialorder %v2542_v9, 0.0  ;;  %v3331_v10 = vmul.f32 0.2, %v2542_v9  ;;  %7553 = vmatprep.mubr.msk.bf16.mxu0 %vm8077_vm0, %v8076_v1  ;;  %7869 = vmatprep.mubr.msk.bf16.mxu1 %vm8077_vm0, %v8076_v1  ;;  %v3173_v13 = vmul.f32 0.2, %v1910_v8  ;;  %vm2859_vm11 = vcmp.ge.f32.partialorder %v1910_v8, 0.0 }
 0x286   : > { %6961 = vst [vmem:[%s8312_s6 + $0x190] sm:$0xff] %v6380_v6   ;;  %7040 = vst [vmem:[%s8312_s6 + $0x408] sm:$0xff] %v6775_v7   ;;  %v7455_v11 = vpop.f32.mrf.mxu0  ;;  %v7771_v12 = vpop.f32.mrf.mxu1 }
 0x287   : > { %v3645_v14 = vsel %vm3017_vm10, %v2542_v9, %v3331_v10  ;;  %v3487_v23 = vsel %vm2859_vm11, %v1910_v8, %v3173_v13 }
 0x288   : > { %v1913_v15 = vpop.f32.mrf.mxu0  ;;  %v2545_v16 = vpop.f32.mrf.mxu1 }
 0x289   : > { %vm2860_vm12 = vcmp.ge.f32.partialorder %v1913_v15, 0.0  ;;  %v3174_v19 = vmul.f32 0.2, %v1913_v15  ;;  %vm3018_vm13 = vcmp.ge.f32.partialorder %v2545_v16, 0.0  ;;  %v3332_v20 = vmul.f32 0.2, %v2545_v16 }
 0x28a   : > { %v7456_v21 = vpop.f32.mrf.mxu0  ;;  %v7772_v22 = vpop.f32.mrf.mxu1 }
 0x28b   : > { %v3488_v24 = vsel %vm2860_vm12, %v1913_v15, %v3174_v19  ;;  %v3646_v25 = vsel %vm3018_vm13, %v2545_v16, %v3332_v20 }
 0x28c   : > { %v6385_v26 = vpack.c.bf16 %v3488_v24, %v3487_v23  ;;  %v6780_v27 = vpack.c.bf16 %v3646_v25, %v3645_v14  ;;  %v1918_v28 = vpop.f32.mrf.mxu0  ;;  %7554 = vmatmul.mubr.bf16.gmra.mxu0 %v8063_v17  ;;  %v2550_v29 = vpop.f32.mrf.mxu1  ;;  %7870 = vmatmul.mubr.bf16.gmra.mxu1 %v8064_v18 }
 0x28d   : > { %vm3019_vm14 = vcmp.ge.f32.partialorder %v2550_v29, 0.0  ;;  %v3333_v30 = vmul.f32 0.2, %v2550_v29  ;;  %7557 = vmatprep.mubr.msk.bf16.mxu0 %vm8077_vm0, %v8076_v1  ;;  %7873 = vmatprep.mubr.msk.bf16.mxu1 %vm8077_vm0, %v8076_v1  ;;  %v3175_v33 = vmul.f32 0.2, %v1918_v28  ;;  %vm2861_vm15 = vcmp.ge.f32.partialorder %v1918_v28, 0.0 }
 0x28e   : > { %6962 = vst [vmem:[%s8312_s6 + $0x198] sm:$0xff] %v6385_v26   ;;  %7041 = vst [vmem:[%s8312_s6 + $0x410] sm:$0xff] %v6780_v27   ;;  %v7459_v31 = vpop.f32.mrf.mxu0  ;;  %v7775_v32 = vpop.f32.mrf.mxu1 }
 0x28f   : > { %v3647_v34 = vsel %vm3019_vm14, %v2550_v29, %v3333_v30  ;;  %v3489_v43 = vsel %vm2861_vm15, %v1918_v28, %v3175_v33 }
 0x290   : > { %v1921_v35 = vpop.f32.mrf.mxu0  ;;  %v2553_v36 = vpop.f32.mrf.mxu1 }
 0x291   : > { %vm2862_vm1 = vcmp.ge.f32.partialorder %v1921_v35, 0.0  ;;  %v3176_v39 = vmul.f32 0.2, %v1921_v35  ;;  %vm3020_vm2 = vcmp.ge.f32.partialorder %v2553_v36, 0.0  ;;  %v3334_v40 = vmul.f32 0.2, %v2553_v36 }
 0x292   : > { %v7460_v41 = vpop.f32.mrf.mxu0  ;;  %v7776_v42 = vpop.f32.mrf.mxu1 }
 0x293   : > { %v3490_v44 = vsel %vm2862_vm1, %v1921_v35, %v3176_v39  ;;  %v3648_v45 = vsel %vm3020_vm2, %v2553_v36, %v3334_v40 }
 0x294   : > { %v6390_v46 = vpack.c.bf16 %v3490_v44, %v3489_v43  ;;  %v6785_v47 = vpack.c.bf16 %v3648_v45, %v3647_v34  ;;  %v1926_v48 = vpop.f32.mrf.mxu0  ;;  %7558 = vmatmul.mubr.bf16.gmra.mxu0 %v8065_v37  ;;  %v2558_v49 = vpop.f32.mrf.mxu1  ;;  %7874 = vmatmul.mubr.bf16.gmra.mxu1 %v8066_v38 }
 0x295   : > { %vm3021_vm3 = vcmp.ge.f32.partialorder %v2558_v49, 0.0  ;;  %v3335_v50 = vmul.f32 0.2, %v2558_v49  ;;  %7561 = vmatprep.mubr.msk.bf16.mxu0 %vm8077_vm0, %v8076_v1  ;;  %v3177_v53 = vmul.f32 0.2, %v1926_v48  ;;  %vm2863_vm4 = vcmp.ge.f32.partialorder %v1926_v48, 0.0 }
 0x296   : > { %6963 = vst [vmem:[%s8312_s6 + $0x1a0] sm:$0xff] %v6390_v46   ;;  %7042 = vst [vmem:[%s8312_s6 + $0x418] sm:$0xff] %v6785_v47   ;;  %v7463_v51 = vpop.f32.mrf.mxu0  ;;  %v7779_v52 = vpop.f32.mrf.mxu1 }
 0x297   : > { %v3649_v54 = vsel %vm3021_vm3, %v2558_v49, %v3335_v50  ;;  %v3491_v62 = vsel %vm2863_vm4, %v1926_v48, %v3177_v53 }
 0x298   : > { %v1929_v55 = vpop.f32.mrf.mxu0  ;;  %v2561_v56 = vpop.f32.mrf.mxu1 }
 0x299   : > { %vm2864_vm5 = vcmp.ge.f32.partialorder %v1929_v55, 0.0  ;;  %v3178_v58 = vmul.f32 0.2, %v1929_v55  ;;  %vm3022_vm6 = vcmp.ge.f32.partialorder %v2561_v56, 0.0  ;;  %v3336_v59 = vmul.f32 0.2, %v2561_v56 }
 0x29a   : > { %v7464_v60 = vpop.f32.mrf.mxu0  ;;  %v7780_v61 = vpop.f32.mrf.mxu1 }
 0x29b   : > { %v3492_v1 = vsel %vm2864_vm5, %v1929_v55, %v3178_v58  ;;  %v3650_v63 = vsel %vm3022_vm6, %v2561_v56, %v3336_v59 }
 0x29c   : > { %v6395_v0 = vpack.c.bf16 %v3492_v1, %v3491_v62  ;;  %v6790_v2 = vpack.c.bf16 %v3650_v63, %v3649_v54  ;;  %v1934_v3 = vpop.f32.mrf.mxu0  ;;  %7562 = vmatmul.mubr.bf16.gmra.mxu0 %v8067_v57  ;;  %v2566_v4 = vpop.f32.mrf.mxu1 }
 0x29d   : > { %vm3023_vm0 = vcmp.ge.f32.partialorder %v2566_v4, 0.0  ;;  %v3337_v5 = vmul.f32 0.2, %v2566_v4  ;;  %v3179_v8 = vmul.f32 0.2, %v1934_v3  ;;  %vm2865_vm7 = vcmp.ge.f32.partialorder %v1934_v3, 0.0 }
 0x29e   : > { %6964 = vst [vmem:[%s8312_s6 + $0x1a8] sm:$0xff] %v6395_v0   ;;  %7043 = vst [vmem:[%s8312_s6 + $0x420] sm:$0xff] %v6790_v2   ;;  %v7467_v6 = vpop.f32.mrf.mxu0  ;;  %v7783_v7 = vpop.f32.mrf.mxu1 }
 0x29f   : > { %v3651_v9 = vsel %vm3023_vm0, %v2566_v4, %v3337_v5  ;;  %v3493_v16 = vsel %vm2865_vm7, %v1934_v3, %v3179_v8 }
 0x2a0   : > { %v1937_v10 = vpop.f32.mrf.mxu0  ;;  %v2569_v11 = vpop.f32.mrf.mxu1 }
 0x2a1   : > { %vm2866_vm8 = vcmp.ge.f32.partialorder %v1937_v10, 0.0  ;;  %v3180_v12 = vmul.f32 0.2, %v1937_v10  ;;  %vm3024_vm9 = vcmp.ge.f32.partialorder %v2569_v11, 0.0  ;;  %v3338_v13 = vmul.f32 0.2, %v2569_v11 }
 0x2a2   : > { %v7468_v14 = vpop.f32.mrf.mxu0  ;;  %v7784_v15 = vpop.f32.mrf.mxu1 }
 0x2a3   : > { %v3494_v17 = vsel %vm2866_vm8, %v1937_v10, %v3180_v12  ;;  %v3652_v18 = vsel %vm3024_vm9, %v2569_v11, %v3338_v13 }
 0x2a4   : > { %v6400_v19 = vpack.c.bf16 %v3494_v17, %v3493_v16  ;;  %v6795_v20 = vpack.c.bf16 %v3652_v18, %v3651_v9  ;;  %v1942_v21 = vpop.f32.mrf.mxu0  ;;  %v2574_v22 = vpop.f32.mrf.mxu1 }
 0x2a5   : > { %vm3025_vm10 = vcmp.ge.f32.partialorder %v2574_v22, 0.0  ;;  %v3339_v23 = vmul.f32 0.2, %v2574_v22  ;;  %v3181_v26 = vmul.f32 0.2, %v1942_v21  ;;  %vm2867_vm11 = vcmp.ge.f32.partialorder %v1942_v21, 0.0 }
 0x2a6   : > { %6965 = vst [vmem:[%s8312_s6 + $0x1b0] sm:$0xff] %v6400_v19   ;;  %7044 = vst [vmem:[%s8312_s6 + $0x428] sm:$0xff] %v6795_v20   ;;  %v7471_v24 = vpop.f32.mrf.mxu0  ;;  %v7787_v25 = vpop.f32.mrf.mxu1 }
 0x2a7   : > { %v3653_v27 = vsel %vm3025_vm10, %v2574_v22, %v3339_v23  ;;  %v3495_v34 = vsel %vm2867_vm11, %v1942_v21, %v3181_v26 }
 0x2a8   : > { %v1945_v28 = vpop.f32.mrf.mxu0  ;;  %v2577_v29 = vpop.f32.mrf.mxu1 }
 0x2a9   : > { %vm2868_vm12 = vcmp.ge.f32.partialorder %v1945_v28, 0.0  ;;  %v3182_v30 = vmul.f32 0.2, %v1945_v28  ;;  %vm3026_vm13 = vcmp.ge.f32.partialorder %v2577_v29, 0.0  ;;  %v3340_v31 = vmul.f32 0.2, %v2577_v29 }
 0x2aa   : > { %v7472_v32 = vpop.f32.mrf.mxu0  ;;  %v7788_v33 = vpop.f32.mrf.mxu1 }
 0x2ab   : > { %v3496_v35 = vsel %vm2868_vm12, %v1945_v28, %v3182_v30  ;;  %v3654_v36 = vsel %vm3026_vm13, %v2577_v29, %v3340_v31 }
 0x2ac   : > { %v6405_v37 = vpack.c.bf16 %v3496_v35, %v3495_v34  ;;  %v6800_v38 = vpack.c.bf16 %v3654_v36, %v3653_v27  ;;  %v1950_v39 = vpop.f32.mrf.mxu0  ;;  %v2582_v40 = vpop.f32.mrf.mxu1 }
 0x2ad   : > { %vm3027_vm14 = vcmp.ge.f32.partialorder %v2582_v40, 0.0  ;;  %v3341_v41 = vmul.f32 0.2, %v2582_v40  ;;  %v3183_v44 = vmul.f32 0.2, %v1950_v39  ;;  %vm2869_vm15 = vcmp.ge.f32.partialorder %v1950_v39, 0.0 }
 0x2ae   : > { %6966 = vst [vmem:[%s8312_s6 + $0x1b8] sm:$0xff] %v6405_v37   ;;  %7045 = vst [vmem:[%s8312_s6 + $0x430] sm:$0xff] %v6800_v38   ;;  %v7475_v42 = vpop.f32.mrf.mxu0  ;;  %v7791_v43 = vpop.f32.mrf.mxu1 }
 0x2af   : > { %v3655_v45 = vsel %vm3027_vm14, %v2582_v40, %v3341_v41  ;;  %v3497_v52 = vsel %vm2869_vm15, %v1950_v39, %v3183_v44 }
 0x2b0   : > { %v1953_v46 = vpop.f32.mrf.mxu0  ;;  %v2585_v47 = vpop.f32.mrf.mxu1 }
 0x2b1   : > { %vm2870_vm1 = vcmp.ge.f32.partialorder %v1953_v46, 0.0  ;;  %v3184_v48 = vmul.f32 0.2, %v1953_v46  ;;  %vm3028_vm2 = vcmp.ge.f32.partialorder %v2585_v47, 0.0  ;;  %v3342_v49 = vmul.f32 0.2, %v2585_v47 }
 0x2b2   : > { %v7476_v50 = vpop.f32.mrf.mxu0  ;;  %v7792_v51 = vpop.f32.mrf.mxu1 }
 0x2b3   : > { %v3498_v53 = vsel %vm2870_vm1, %v1953_v46, %v3184_v48  ;;  %v3656_v54 = vsel %vm3028_vm2, %v2585_v47, %v3342_v49 }
 0x2b4   : > { %v6410_v55 = vpack.c.bf16 %v3498_v53, %v3497_v52  ;;  %v6805_v56 = vpack.c.bf16 %v3656_v54, %v3655_v45  ;;  %v1958_v57 = vpop.f32.mrf.mxu0  ;;  %v2590_v58 = vpop.f32.mrf.mxu1 }
 0x2b5   : > { %vm3029_vm3 = vcmp.ge.f32.partialorder %v2590_v58, 0.0  ;;  %v3343_v59 = vmul.f32 0.2, %v2590_v58  ;;  %v3185_v62 = vmul.f32 0.2, %v1958_v57  ;;  %vm2871_vm4 = vcmp.ge.f32.partialorder %v1958_v57, 0.0 }
 0x2b6   : > { %6967 = vst [vmem:[%s8312_s6 + $0x1c0] sm:$0xff] %v6410_v55   ;;  %7046 = vst [vmem:[%s8312_s6 + $0x438] sm:$0xff] %v6805_v56   ;;  %v7479_v60 = vpop.f32.mrf.mxu0  ;;  %v7795_v61 = vpop.f32.mrf.mxu1 }
 0x2b7   : > { %v3657_v1 = vsel %vm3029_vm3, %v2590_v58, %v3343_v59  ;;  %v3499_v6 = vsel %vm2871_vm4, %v1958_v57, %v3185_v62 }
 0x2b8   : > { %v1961_v63 = vpop.f32.mrf.mxu0  ;;  %v2593_v0 = vpop.f32.mrf.mxu1 }
 0x2b9   : > { %vm2872_vm5 = vcmp.ge.f32.partialorder %v1961_v63, 0.0  ;;  %v3186_v2 = vmul.f32 0.2, %v1961_v63  ;;  %vm3030_vm6 = vcmp.ge.f32.partialorder %v2593_v0, 0.0  ;;  %v3344_v3 = vmul.f32 0.2, %v2593_v0 }
 0x2ba   : > { %v7480_v4 = vpop.f32.mrf.mxu0  ;;  %v7796_v5 = vpop.f32.mrf.mxu1 }
 0x2bb   : > { %v3500_v7 = vsel %vm2872_vm5, %v1961_v63, %v3186_v2  ;;  %v3658_v8 = vsel %vm3030_vm6, %v2593_v0, %v3344_v3 }
 0x2bc   : > { %v6415_v9 = vpack.c.bf16 %v3500_v7, %v3499_v6  ;;  %v6810_v10 = vpack.c.bf16 %v3658_v8, %v3657_v1  ;;  %v1966_v11 = vpop.f32.mrf.mxu0  ;;  %v2598_v12 = vpop.f32.mrf.mxu1 }
 0x2bd   : > { %vm3031_vm0 = vcmp.ge.f32.partialorder %v2598_v12, 0.0  ;;  %v3345_v13 = vmul.f32 0.2, %v2598_v12  ;;  %v3187_v16 = vmul.f32 0.2, %v1966_v11  ;;  %vm2873_vm7 = vcmp.ge.f32.partialorder %v1966_v11, 0.0 }
 0x2be   : > { %6968 = vst [vmem:[%s8312_s6 + $0x1c8] sm:$0xff] %v6415_v9   ;;  %7047 = vst [vmem:[%s8312_s6 + $0x440] sm:$0xff] %v6810_v10   ;;  %v7483_v14 = vpop.f32.mrf.mxu0  ;;  %v7799_v15 = vpop.f32.mrf.mxu1 }
 0x2bf   : > { %v3659_v17 = vsel %vm3031_vm0, %v2598_v12, %v3345_v13  ;;  %v3501_v24 = vsel %vm2873_vm7, %v1966_v11, %v3187_v16 }
 0x2c0   : > { %v1969_v18 = vpop.f32.mrf.mxu0  ;;  %v2601_v19 = vpop.f32.mrf.mxu1 }
 0x2c1   : > { %vm2874_vm8 = vcmp.ge.f32.partialorder %v1969_v18, 0.0  ;;  %v3188_v20 = vmul.f32 0.2, %v1969_v18  ;;  %vm3032_vm9 = vcmp.ge.f32.partialorder %v2601_v19, 0.0  ;;  %v3346_v21 = vmul.f32 0.2, %v2601_v19 }
 0x2c2   : > { %v7484_v22 = vpop.f32.mrf.mxu0  ;;  %v7800_v23 = vpop.f32.mrf.mxu1 }
 0x2c3   : > { %v3502_v25 = vsel %vm2874_vm8, %v1969_v18, %v3188_v20  ;;  %v3660_v26 = vsel %vm3032_vm9, %v2601_v19, %v3346_v21 }
 0x2c4   : > { %v6420_v27 = vpack.c.bf16 %v3502_v25, %v3501_v24  ;;  %v6815_v28 = vpack.c.bf16 %v3660_v26, %v3659_v17  ;;  %v1974_v29 = vpop.f32.mrf.mxu0  ;;  %v2606_v30 = vpop.f32.mrf.mxu1 }
 0x2c5   : > { %vm3033_vm10 = vcmp.ge.f32.partialorder %v2606_v30, 0.0  ;;  %v3347_v31 = vmul.f32 0.2, %v2606_v30  ;;  %v3189_v34 = vmul.f32 0.2, %v1974_v29  ;;  %vm2875_vm11 = vcmp.ge.f32.partialorder %v1974_v29, 0.0 }
 0x2c6   : > { %6969 = vst [vmem:[%s8312_s6 + $0x1d0] sm:$0xff] %v6420_v27   ;;  %7048 = vst [vmem:[%s8312_s6 + $0x448] sm:$0xff] %v6815_v28   ;;  %v7487_v32 = vpop.f32.mrf.mxu0  ;;  %v7803_v33 = vpop.f32.mrf.mxu1 }
 0x2c7   : > { %v3661_v35 = vsel %vm3033_vm10, %v2606_v30, %v3347_v31  ;;  %v3503_v42 = vsel %vm2875_vm11, %v1974_v29, %v3189_v34 }
 0x2c8   : > { %v1977_v36 = vpop.f32.mrf.mxu0  ;;  %v2609_v37 = vpop.f32.mrf.mxu1 }
 0x2c9   : > { %vm2876_vm12 = vcmp.ge.f32.partialorder %v1977_v36, 0.0  ;;  %v3190_v38 = vmul.f32 0.2, %v1977_v36  ;;  %vm3034_vm13 = vcmp.ge.f32.partialorder %v2609_v37, 0.0  ;;  %v3348_v39 = vmul.f32 0.2, %v2609_v37 }
 0x2ca   : > { %v7488_v40 = vpop.f32.mrf.mxu0  ;;  %v7804_v41 = vpop.f32.mrf.mxu1 }
 0x2cb   : > { %v3504_v43 = vsel %vm2876_vm12, %v1977_v36, %v3190_v38  ;;  %v3662_v44 = vsel %vm3034_vm13, %v2609_v37, %v3348_v39 }
 0x2cc   : > { %v6425_v45 = vpack.c.bf16 %v3504_v43, %v3503_v42  ;;  %v6820_v46 = vpack.c.bf16 %v3662_v44, %v3661_v35  ;;  %v1982_v47 = vpop.f32.mrf.mxu0  ;;  %v2614_v48 = vpop.f32.mrf.mxu1 }
 0x2cd   : > { %vm3035_vm14 = vcmp.ge.f32.partialorder %v2614_v48, 0.0  ;;  %v3349_v49 = vmul.f32 0.2, %v2614_v48  ;;  %v3191_v52 = vmul.f32 0.2, %v1982_v47  ;;  %vm2877_vm15 = vcmp.ge.f32.partialorder %v1982_v47, 0.0 }
 0x2ce   : > { %6970 = vst [vmem:[%s8312_s6 + $0x1d8] sm:$0xff] %v6425_v45   ;;  %7049 = vst [vmem:[%s8312_s6 + $0x450] sm:$0xff] %v6820_v46   ;;  %v7491_v50 = vpop.f32.mrf.mxu0  ;;  %v7807_v51 = vpop.f32.mrf.mxu1 }
 0x2cf   : > { %v3663_v53 = vsel %vm3035_vm14, %v2614_v48, %v3349_v49  ;;  %v3505_v60 = vsel %vm2877_vm15, %v1982_v47, %v3191_v52 }
 0x2d0   : > { %v1985_v54 = vpop.f32.mrf.mxu0  ;;  %v2617_v55 = vpop.f32.mrf.mxu1 }
 0x2d1   : > { %vm2878_vm1 = vcmp.ge.f32.partialorder %v1985_v54, 0.0  ;;  %v3192_v56 = vmul.f32 0.2, %v1985_v54  ;;  %vm3036_vm2 = vcmp.ge.f32.partialorder %v2617_v55, 0.0  ;;  %v3350_v57 = vmul.f32 0.2, %v2617_v55 }
 0x2d2   : > { %v7492_v58 = vpop.f32.mrf.mxu0  ;;  %v7808_v59 = vpop.f32.mrf.mxu1 }
 0x2d3   : > { %v3506_v61 = vsel %vm2878_vm1, %v1985_v54, %v3192_v56  ;;  %v3664_v62 = vsel %vm3036_vm2, %v2617_v55, %v3350_v57 }
 0x2d4   : > { %v6430_v1 = vpack.c.bf16 %v3506_v61, %v3505_v60  ;;  %v6825_v63 = vpack.c.bf16 %v3664_v62, %v3663_v53  ;;  %v1990_v0 = vpop.f32.mrf.mxu0  ;;  %v2622_v2 = vpop.f32.mrf.mxu1 }
 0x2d5   : > { %vm3037_vm3 = vcmp.ge.f32.partialorder %v2622_v2, 0.0  ;;  %v3351_v3 = vmul.f32 0.2, %v2622_v2  ;;  %v3193_v6 = vmul.f32 0.2, %v1990_v0  ;;  %vm2879_vm4 = vcmp.ge.f32.partialorder %v1990_v0, 0.0 }
 0x2d6   : > { %6971 = vst [vmem:[%s8312_s6 + $0x1e0] sm:$0xff] %v6430_v1   ;;  %7050 = vst [vmem:[%s8312_s6 + $0x458] sm:$0xff] %v6825_v63   ;;  %v7495_v4 = vpop.f32.mrf.mxu0  ;;  %v7811_v5 = vpop.f32.mrf.mxu1 }
 0x2d7   : > { %v3665_v7 = vsel %vm3037_vm3, %v2622_v2, %v3351_v3  ;;  %v3507_v14 = vsel %vm2879_vm4, %v1990_v0, %v3193_v6 }
 0x2d8   : > { %v1993_v8 = vpop.f32.mrf.mxu0  ;;  %v2625_v9 = vpop.f32.mrf.mxu1 }
 0x2d9   : > { %vm2880_vm5 = vcmp.ge.f32.partialorder %v1993_v8, 0.0  ;;  %v3194_v10 = vmul.f32 0.2, %v1993_v8  ;;  %vm3038_vm6 = vcmp.ge.f32.partialorder %v2625_v9, 0.0  ;;  %v3352_v11 = vmul.f32 0.2, %v2625_v9 }
 0x2da   : > { %v7496_v12 = vpop.f32.mrf.mxu0  ;;  %v7812_v13 = vpop.f32.mrf.mxu1 }
 0x2db   : > { %v3508_v15 = vsel %vm2880_vm5, %v1993_v8, %v3194_v10  ;;  %v3666_v16 = vsel %vm3038_vm6, %v2625_v9, %v3352_v11 }
 0x2dc   : > { %v6435_v17 = vpack.c.bf16 %v3508_v15, %v3507_v14  ;;  %v6830_v18 = vpack.c.bf16 %v3666_v16, %v3665_v7  ;;  %v1998_v19 = vpop.f32.mrf.mxu0  ;;  %v2630_v20 = vpop.f32.mrf.mxu1 }
 0x2dd   : > { %vm3039_vm0 = vcmp.ge.f32.partialorder %v2630_v20, 0.0  ;;  %v3353_v21 = vmul.f32 0.2, %v2630_v20  ;;  %v3195_v24 = vmul.f32 0.2, %v1998_v19  ;;  %vm2881_vm7 = vcmp.ge.f32.partialorder %v1998_v19, 0.0 }
 0x2de   : > { %6972 = vst [vmem:[%s8312_s6 + $0x1e8] sm:$0xff] %v6435_v17   ;;  %7051 = vst [vmem:[%s8312_s6 + $0x460] sm:$0xff] %v6830_v18   ;;  %v7499_v22 = vpop.f32.mrf.mxu0  ;;  %v7815_v23 = vpop.f32.mrf.mxu1 }
 0x2df   : > { %v3667_v25 = vsel %vm3039_vm0, %v2630_v20, %v3353_v21  ;;  %v3509_v32 = vsel %vm2881_vm7, %v1998_v19, %v3195_v24 }
 0x2e0   : > { %v2001_v26 = vpop.f32.mrf.mxu0  ;;  %v2633_v27 = vpop.f32.mrf.mxu1 }
 0x2e1   : > { %vm2882_vm8 = vcmp.ge.f32.partialorder %v2001_v26, 0.0  ;;  %v3196_v28 = vmul.f32 0.2, %v2001_v26  ;;  %vm3040_vm9 = vcmp.ge.f32.partialorder %v2633_v27, 0.0  ;;  %v3354_v29 = vmul.f32 0.2, %v2633_v27 }
 0x2e2   : > { %v7500_v30 = vpop.f32.mrf.mxu0  ;;  %v7816_v31 = vpop.f32.mrf.mxu1 }
 0x2e3   : > { %v3510_v33 = vsel %vm2882_vm8, %v2001_v26, %v3196_v28  ;;  %v3668_v34 = vsel %vm3040_vm9, %v2633_v27, %v3354_v29 }
 0x2e4   : > { %v6440_v35 = vpack.c.bf16 %v3510_v33, %v3509_v32  ;;  %v6835_v36 = vpack.c.bf16 %v3668_v34, %v3667_v25  ;;  %v2006_v37 = vpop.f32.mrf.mxu0  ;;  %v2638_v38 = vpop.f32.mrf.mxu1 }
 0x2e5   : > { %vm3041_vm10 = vcmp.ge.f32.partialorder %v2638_v38, 0.0  ;;  %v3355_v39 = vmul.f32 0.2, %v2638_v38  ;;  %v3197_v42 = vmul.f32 0.2, %v2006_v37  ;;  %vm2883_vm11 = vcmp.ge.f32.partialorder %v2006_v37, 0.0 }
 0x2e6   : > { %6973 = vst [vmem:[%s8312_s6 + $0x1f0] sm:$0xff] %v6440_v35   ;;  %7052 = vst [vmem:[%s8312_s6 + $0x468] sm:$0xff] %v6835_v36   ;;  %v7503_v40 = vpop.f32.mrf.mxu0  ;;  %v7819_v41 = vpop.f32.mrf.mxu1 }
 0x2e7   : > { %v3669_v43 = vsel %vm3041_vm10, %v2638_v38, %v3355_v39  ;;  %v3511_v50 = vsel %vm2883_vm11, %v2006_v37, %v3197_v42 }
 0x2e8   : > { %v2009_v44 = vpop.f32.mrf.mxu0  ;;  %v2641_v45 = vpop.f32.mrf.mxu1 }
 0x2e9   : > { %vm2884_vm12 = vcmp.ge.f32.partialorder %v2009_v44, 0.0  ;;  %v3198_v46 = vmul.f32 0.2, %v2009_v44  ;;  %vm3042_vm13 = vcmp.ge.f32.partialorder %v2641_v45, 0.0  ;;  %v3356_v47 = vmul.f32 0.2, %v2641_v45 }
 0x2ea   : > { %v7504_v48 = vpop.f32.mrf.mxu0  ;;  %v7820_v49 = vpop.f32.mrf.mxu1 }
 0x2eb   : > { %v3512_v51 = vsel %vm2884_vm12, %v2009_v44, %v3198_v46  ;;  %v3670_v52 = vsel %vm3042_vm13, %v2641_v45, %v3356_v47 }
 0x2ec   : > { %v6445_v53 = vpack.c.bf16 %v3512_v51, %v3511_v50  ;;  %v6840_v54 = vpack.c.bf16 %v3670_v52, %v3669_v43  ;;  %v2014_v55 = vpop.f32.mrf.mxu0  ;;  %v2646_v56 = vpop.f32.mrf.mxu1 }
 0x2ed   : > { %vm3043_vm14 = vcmp.ge.f32.partialorder %v2646_v56, 0.0  ;;  %v3357_v57 = vmul.f32 0.2, %v2646_v56  ;;  %v3199_v60 = vmul.f32 0.2, %v2014_v55  ;;  %vm2885_vm15 = vcmp.ge.f32.partialorder %v2014_v55, 0.0 }
 0x2ee   : > { %6974 = vst [vmem:[%s8312_s6 + $0x1f8] sm:$0xff] %v6445_v53   ;;  %7053 = vst [vmem:[%s8312_s6 + $0x470] sm:$0xff] %v6840_v54   ;;  %v7507_v58 = vpop.f32.mrf.mxu0  ;;  %v7823_v59 = vpop.f32.mrf.mxu1 }
 0x2ef   : > { %v3671_v61 = vsel %vm3043_vm14, %v2646_v56, %v3357_v57  ;;  %v3513_v4 = vsel %vm2885_vm15, %v2014_v55, %v3199_v60 }
 0x2f0   : > { %v2017_v62 = vpop.f32.mrf.mxu0  ;;  %v2649_v1 = vpop.f32.mrf.mxu1 }
 0x2f1   : > { %vm2886_vm1 = vcmp.ge.f32.partialorder %v2017_v62, 0.0  ;;  %v3200_v63 = vmul.f32 0.2, %v2017_v62  ;;  %vm3044_vm2 = vcmp.ge.f32.partialorder %v2649_v1, 0.0  ;;  %v3358_v0 = vmul.f32 0.2, %v2649_v1 }
 0x2f2   : > { %v7508_v2 = vpop.f32.mrf.mxu0  ;;  %v7824_v3 = vpop.f32.mrf.mxu1 }
 0x2f3   : > { %v3514_v5 = vsel %vm2886_vm1, %v2017_v62, %v3200_v63  ;;  %v3672_v6 = vsel %vm3044_vm2, %v2649_v1, %v3358_v0 }
 0x2f4   : > { %v6450_v7 = vpack.c.bf16 %v3514_v5, %v3513_v4  ;;  %v6845_v8 = vpack.c.bf16 %v3672_v6, %v3671_v61  ;;  %v2022_v9 = vpop.f32.mrf.mxu0  ;;  %v2654_v10 = vpop.f32.mrf.mxu1 }
 0x2f5   : > { %vm3045_vm3 = vcmp.ge.f32.partialorder %v2654_v10, 0.0  ;;  %v3359_v11 = vmul.f32 0.2, %v2654_v10  ;;  %v3201_v14 = vmul.f32 0.2, %v2022_v9  ;;  %vm2887_vm4 = vcmp.ge.f32.partialorder %v2022_v9, 0.0 }
 0x2f6   : > { %6975 = vst [vmem:[%s8312_s6 + $0x200] sm:$0xff] %v6450_v7   ;;  %7054 = vst [vmem:[%s8312_s6 + $0x478] sm:$0xff] %v6845_v8   ;;  %v7511_v12 = vpop.f32.mrf.mxu0  ;;  %v7827_v13 = vpop.f32.mrf.mxu1 }
 0x2f7   : > { %v3673_v15 = vsel %vm3045_vm3, %v2654_v10, %v3359_v11  ;;  %v3515_v22 = vsel %vm2887_vm4, %v2022_v9, %v3201_v14 }
 0x2f8   : > { %v2025_v16 = vpop.f32.mrf.mxu0  ;;  %v2657_v17 = vpop.f32.mrf.mxu1 }
 0x2f9   : > { %vm2888_vm5 = vcmp.ge.f32.partialorder %v2025_v16, 0.0  ;;  %v3202_v18 = vmul.f32 0.2, %v2025_v16  ;;  %vm3046_vm6 = vcmp.ge.f32.partialorder %v2657_v17, 0.0  ;;  %v3360_v19 = vmul.f32 0.2, %v2657_v17 }
 0x2fa   : > { %v7512_v20 = vpop.f32.mrf.mxu0  ;;  %v7828_v21 = vpop.f32.mrf.mxu1 }
 0x2fb   : > { %v3516_v23 = vsel %vm2888_vm5, %v2025_v16, %v3202_v18  ;;  %v3674_v24 = vsel %vm3046_vm6, %v2657_v17, %v3360_v19 }
 0x2fc   : > { %v6455_v25 = vpack.c.bf16 %v3516_v23, %v3515_v22  ;;  %v6850_v26 = vpack.c.bf16 %v3674_v24, %v3673_v15  ;;  %v2030_v27 = vpop.f32.mrf.mxu0  ;;  %v2662_v28 = vpop.f32.mrf.mxu1 }
 0x2fd   : > { %vm3047_vm0 = vcmp.ge.f32.partialorder %v2662_v28, 0.0  ;;  %v3361_v29 = vmul.f32 0.2, %v2662_v28  ;;  %v3203_v32 = vmul.f32 0.2, %v2030_v27  ;;  %vm2889_vm7 = vcmp.ge.f32.partialorder %v2030_v27, 0.0 }
 0x2fe   : > { %6976 = vst [vmem:[%s8312_s6 + $0x208] sm:$0xff] %v6455_v25   ;;  %7055 = vst [vmem:[%s8312_s6 + $0x480] sm:$0xff] %v6850_v26   ;;  %v7515_v30 = vpop.f32.mrf.mxu0  ;;  %v7831_v31 = vpop.f32.mrf.mxu1 }
 0x2ff   : > { %v3675_v33 = vsel %vm3047_vm0, %v2662_v28, %v3361_v29  ;;  %v3517_v40 = vsel %vm2889_vm7, %v2030_v27, %v3203_v32 }
 0x300   : > { %v2033_v34 = vpop.f32.mrf.mxu0  ;;  %v2665_v35 = vpop.f32.mrf.mxu1 }
 0x301   : > { %vm2890_vm8 = vcmp.ge.f32.partialorder %v2033_v34, 0.0  ;;  %v3204_v36 = vmul.f32 0.2, %v2033_v34  ;;  %vm3048_vm9 = vcmp.ge.f32.partialorder %v2665_v35, 0.0  ;;  %v3362_v37 = vmul.f32 0.2, %v2665_v35 }
 0x302   : > { %v7516_v38 = vpop.f32.mrf.mxu0  ;;  %v7832_v39 = vpop.f32.mrf.mxu1 }
 0x303   : > { %v3518_v41 = vsel %vm2890_vm8, %v2033_v34, %v3204_v36  ;;  %v3676_v42 = vsel %vm3048_vm9, %v2665_v35, %v3362_v37 }
 0x304   : > { %v6460_v43 = vpack.c.bf16 %v3518_v41, %v3517_v40  ;;  %v6855_v44 = vpack.c.bf16 %v3676_v42, %v3675_v33  ;;  %v2038_v45 = vpop.f32.mrf.mxu0  ;;  %v2670_v46 = vpop.f32.mrf.mxu1 }
 0x305   : > { %vm3049_vm10 = vcmp.ge.f32.partialorder %v2670_v46, 0.0  ;;  %v3363_v47 = vmul.f32 0.2, %v2670_v46  ;;  %v3205_v50 = vmul.f32 0.2, %v2038_v45  ;;  %vm2891_vm11 = vcmp.ge.f32.partialorder %v2038_v45, 0.0 }
 0x306   : > { %6977 = vst [vmem:[%s8312_s6 + $0x210] sm:$0xff] %v6460_v43   ;;  %7056 = vst [vmem:[%s8312_s6 + $0x488] sm:$0xff] %v6855_v44   ;;  %v7519_v48 = vpop.f32.mrf.mxu0  ;;  %v7835_v49 = vpop.f32.mrf.mxu1 }
 0x307   : > { %v3677_v51 = vsel %vm3049_vm10, %v2670_v46, %v3363_v47  ;;  %v3519_v58 = vsel %vm2891_vm11, %v2038_v45, %v3205_v50 }
 0x308   : > { %v2041_v52 = vpop.f32.mrf.mxu0  ;;  %v2673_v53 = vpop.f32.mrf.mxu1 }
 0x309   : > { %vm2892_vm12 = vcmp.ge.f32.partialorder %v2041_v52, 0.0  ;;  %v3206_v54 = vmul.f32 0.2, %v2041_v52  ;;  %vm3050_vm13 = vcmp.ge.f32.partialorder %v2673_v53, 0.0  ;;  %v3364_v55 = vmul.f32 0.2, %v2673_v53 }
 0x30a   : > { %v7520_v56 = vpop.f32.mrf.mxu0  ;;  %v7836_v57 = vpop.f32.mrf.mxu1 }
 0x30b   : > { %v3520_v59 = vsel %vm2892_vm12, %v2041_v52, %v3206_v54  ;;  %v3678_v60 = vsel %vm3050_vm13, %v2673_v53, %v3364_v55 }
 0x30c   : > { %v6465_v61 = vpack.c.bf16 %v3520_v59, %v3519_v58  ;;  %v6860_v62 = vpack.c.bf16 %v3678_v60, %v3677_v51  ;;  %v2046_v1 = vpop.f32.mrf.mxu0  ;;  %v2678_v63 = vpop.f32.mrf.mxu1 }
 0x30d   : > { %vm3051_vm14 = vcmp.ge.f32.partialorder %v2678_v63, 0.0  ;;  %v3365_v0 = vmul.f32 0.2, %v2678_v63  ;;  %v3207_v4 = vmul.f32 0.2, %v2046_v1  ;;  %vm2893_vm15 = vcmp.ge.f32.partialorder %v2046_v1, 0.0 }
 0x30e   : > { %6978 = vst [vmem:[%s8312_s6 + $0x218] sm:$0xff] %v6465_v61   ;;  %7057 = vst [vmem:[%s8312_s6 + $0x490] sm:$0xff] %v6860_v62   ;;  %v7523_v2 = vpop.f32.mrf.mxu0  ;;  %v7839_v3 = vpop.f32.mrf.mxu1 }
 0x30f   : > { %v3679_v5 = vsel %vm3051_vm14, %v2678_v63, %v3365_v0  ;;  %v3521_v12 = vsel %vm2893_vm15, %v2046_v1, %v3207_v4 }
 0x310   : > { %v2049_v6 = vpop.f32.mrf.mxu0  ;;  %v2681_v7 = vpop.f32.mrf.mxu1 }
 0x311   : > { %vm2894_vm1 = vcmp.ge.f32.partialorder %v2049_v6, 0.0  ;;  %v3208_v8 = vmul.f32 0.2, %v2049_v6  ;;  %vm3052_vm2 = vcmp.ge.f32.partialorder %v2681_v7, 0.0  ;;  %v3366_v9 = vmul.f32 0.2, %v2681_v7 }
 0x312   : > { %v7524_v10 = vpop.f32.mrf.mxu0  ;;  %v7840_v11 = vpop.f32.mrf.mxu1 }
 0x313   : > { %v3522_v13 = vsel %vm2894_vm1, %v2049_v6, %v3208_v8  ;;  %v3680_v14 = vsel %vm3052_vm2, %v2681_v7, %v3366_v9 }
 0x314   : > { %v6470_v15 = vpack.c.bf16 %v3522_v13, %v3521_v12  ;;  %v6865_v16 = vpack.c.bf16 %v3680_v14, %v3679_v5  ;;  %v2054_v17 = vpop.f32.mrf.mxu0  ;;  %v2686_v18 = vpop.f32.mrf.mxu1 }
 0x315   : > { %vm3053_vm3 = vcmp.ge.f32.partialorder %v2686_v18, 0.0  ;;  %v3367_v19 = vmul.f32 0.2, %v2686_v18  ;;  %v3209_v22 = vmul.f32 0.2, %v2054_v17  ;;  %vm2895_vm4 = vcmp.ge.f32.partialorder %v2054_v17, 0.0 }
 0x316   : > { %6979 = vst [vmem:[%s8312_s6 + $0x220] sm:$0xff] %v6470_v15   ;;  %7058 = vst [vmem:[%s8312_s6 + $0x498] sm:$0xff] %v6865_v16   ;;  %v7527_v20 = vpop.f32.mrf.mxu0  ;;  %v7843_v21 = vpop.f32.mrf.mxu1 }
 0x317   : > { %v3681_v23 = vsel %vm3053_vm3, %v2686_v18, %v3367_v19  ;;  %v3523_v30 = vsel %vm2895_vm4, %v2054_v17, %v3209_v22 }
 0x318   : > { %v2057_v24 = vpop.f32.mrf.mxu0  ;;  %v2689_v25 = vpop.f32.mrf.mxu1 }
 0x319   : > { %vm2896_vm5 = vcmp.ge.f32.partialorder %v2057_v24, 0.0  ;;  %v3210_v26 = vmul.f32 0.2, %v2057_v24  ;;  %vm3054_vm6 = vcmp.ge.f32.partialorder %v2689_v25, 0.0  ;;  %v3368_v27 = vmul.f32 0.2, %v2689_v25 }
 0x31a   : > { %v7528_v28 = vpop.f32.mrf.mxu0  ;;  %v7844_v29 = vpop.f32.mrf.mxu1 }
 0x31b   : > { %v3524_v31 = vsel %vm2896_vm5, %v2057_v24, %v3210_v26  ;;  %v3682_v32 = vsel %vm3054_vm6, %v2689_v25, %v3368_v27 }
 0x31c   : > { %v6475_v33 = vpack.c.bf16 %v3524_v31, %v3523_v30  ;;  %v6870_v34 = vpack.c.bf16 %v3682_v32, %v3681_v23  ;;  %v2062_v35 = vpop.f32.mrf.mxu0  ;;  %v2694_v36 = vpop.f32.mrf.mxu1 }
 0x31d   : > { %vm3055_vm0 = vcmp.ge.f32.partialorder %v2694_v36, 0.0  ;;  %v3369_v37 = vmul.f32 0.2, %v2694_v36  ;;  %v3211_v40 = vmul.f32 0.2, %v2062_v35  ;;  %vm2897_vm7 = vcmp.ge.f32.partialorder %v2062_v35, 0.0 }
 0x31e   : > { %6980 = vst [vmem:[%s8312_s6 + $0x228] sm:$0xff] %v6475_v33   ;;  %7059 = vst [vmem:[%s8312_s6 + $0x4a0] sm:$0xff] %v6870_v34   ;;  %v7531_v38 = vpop.f32.mrf.mxu0  ;;  %v7847_v39 = vpop.f32.mrf.mxu1 }
 0x31f   : > { %v3683_v41 = vsel %vm3055_vm0, %v2694_v36, %v3369_v37  ;;  %v3525_v48 = vsel %vm2897_vm7, %v2062_v35, %v3211_v40 }
 0x320   : > { %v2065_v42 = vpop.f32.mrf.mxu0  ;;  %v2697_v43 = vpop.f32.mrf.mxu1 }
 0x321   : > { %vm2898_vm8 = vcmp.ge.f32.partialorder %v2065_v42, 0.0  ;;  %v3212_v44 = vmul.f32 0.2, %v2065_v42  ;;  %vm3056_vm9 = vcmp.ge.f32.partialorder %v2697_v43, 0.0  ;;  %v3370_v45 = vmul.f32 0.2, %v2697_v43 }
 0x322   : > { %v7532_v46 = vpop.f32.mrf.mxu0  ;;  %v7848_v47 = vpop.f32.mrf.mxu1 }
 0x323   : > { %v3526_v49 = vsel %vm2898_vm8, %v2065_v42, %v3212_v44  ;;  %v3684_v50 = vsel %vm3056_vm9, %v2697_v43, %v3370_v45 }
 0x324   : > { %v6480_v51 = vpack.c.bf16 %v3526_v49, %v3525_v48  ;;  %v6875_v52 = vpack.c.bf16 %v3684_v50, %v3683_v41  ;;  %v2070_v53 = vpop.f32.mrf.mxu0  ;;  %v2702_v54 = vpop.f32.mrf.mxu1 }
 0x325   : > { %vm3057_vm10 = vcmp.ge.f32.partialorder %v2702_v54, 0.0  ;;  %v3371_v55 = vmul.f32 0.2, %v2702_v54  ;;  %v3213_v58 = vmul.f32 0.2, %v2070_v53  ;;  %vm2899_vm11 = vcmp.ge.f32.partialorder %v2070_v53, 0.0 }
 0x326   : > { %6981 = vst [vmem:[%s8312_s6 + $0x230] sm:$0xff] %v6480_v51   ;;  %7060 = vst [vmem:[%s8312_s6 + $0x4a8] sm:$0xff] %v6875_v52   ;;  %v7535_v56 = vpop.f32.mrf.mxu0  ;;  %v7851_v57 = vpop.f32.mrf.mxu1 }
 0x327   : > { %v3685_v59 = vsel %vm3057_vm10, %v2702_v54, %v3371_v55  ;;  %v3527_v2 = vsel %vm2899_vm11, %v2070_v53, %v3213_v58 }
 0x328   : > { %v2073_v60 = vpop.f32.mrf.mxu0  ;;  %v2705_v61 = vpop.f32.mrf.mxu1 }
 0x329   : > { %vm2900_vm12 = vcmp.ge.f32.partialorder %v2073_v60, 0.0  ;;  %v3214_v62 = vmul.f32 0.2, %v2073_v60  ;;  %vm3058_vm13 = vcmp.ge.f32.partialorder %v2705_v61, 0.0  ;;  %v3372_v1 = vmul.f32 0.2, %v2705_v61 }
 0x32a   : > { %v7536_v63 = vpop.f32.mrf.mxu0  ;;  %v7852_v0 = vpop.f32.mrf.mxu1 }
 0x32b   : > { %v3528_v3 = vsel %vm2900_vm12, %v2073_v60, %v3214_v62  ;;  %v3686_v4 = vsel %vm3058_vm13, %v2705_v61, %v3372_v1 }
 0x32c   : > { %v6485_v5 = vpack.c.bf16 %v3528_v3, %v3527_v2  ;;  %v6880_v6 = vpack.c.bf16 %v3686_v4, %v3685_v59  ;;  %v2078_v7 = vpop.f32.mrf.mxu0  ;;  %v2710_v8 = vpop.f32.mrf.mxu1 }
 0x32d   : > { %vm3059_vm14 = vcmp.ge.f32.partialorder %v2710_v8, 0.0  ;;  %v3373_v9 = vmul.f32 0.2, %v2710_v8  ;;  %v3215_v12 = vmul.f32 0.2, %v2078_v7  ;;  %vm2901_vm15 = vcmp.ge.f32.partialorder %v2078_v7, 0.0 }
 0x32e   : > { %6982 = vst [vmem:[%s8312_s6 + $0x238] sm:$0xff] %v6485_v5   ;;  %7061 = vst [vmem:[%s8312_s6 + $0x4b0] sm:$0xff] %v6880_v6   ;;  %v7539_v10 = vpop.f32.mrf.mxu0  ;;  %v7855_v11 = vpop.f32.mrf.mxu1 }
 0x32f   : > { %v3687_v13 = vsel %vm3059_vm14, %v2710_v8, %v3373_v9  ;;  %v3529_v20 = vsel %vm2901_vm15, %v2078_v7, %v3215_v12 }
 0x330   : > { %v2081_v14 = vpop.f32.mrf.mxu0  ;;  %v2713_v15 = vpop.f32.mrf.mxu1 }
 0x331   : > { %vm2902_vm1 = vcmp.ge.f32.partialorder %v2081_v14, 0.0  ;;  %v3216_v16 = vmul.f32 0.2, %v2081_v14  ;;  %vm3060_vm2 = vcmp.ge.f32.partialorder %v2713_v15, 0.0  ;;  %v3374_v17 = vmul.f32 0.2, %v2713_v15 }
 0x332   : > { %v7540_v18 = vpop.f32.mrf.mxu0  ;;  %v7856_v19 = vpop.f32.mrf.mxu1 }
 0x333   : > { %v3530_v21 = vsel %vm2902_vm1, %v2081_v14, %v3216_v16  ;;  %v3688_v22 = vsel %vm3060_vm2, %v2713_v15, %v3374_v17 }
 0x334   : > { %v6490_v23 = vpack.c.bf16 %v3530_v21, %v3529_v20  ;;  %v6885_v24 = vpack.c.bf16 %v3688_v22, %v3687_v13  ;;  %v2086_v25 = vpop.f32.mrf.mxu0  ;;  %v2718_v26 = vpop.f32.mrf.mxu1 }
 0x335   : > { %vm3061_vm3 = vcmp.ge.f32.partialorder %v2718_v26, 0.0  ;;  %v3375_v27 = vmul.f32 0.2, %v2718_v26  ;;  %v3217_v30 = vmul.f32 0.2, %v2086_v25  ;;  %vm2903_vm4 = vcmp.ge.f32.partialorder %v2086_v25, 0.0 }
 0x336   : > { %6983 = vst [vmem:[%s8312_s6 + $0x240] sm:$0xff] %v6490_v23   ;;  %7062 = vst [vmem:[%s8312_s6 + $0x4b8] sm:$0xff] %v6885_v24   ;;  %v7543_v28 = vpop.f32.mrf.mxu0  ;;  %v7859_v29 = vpop.f32.mrf.mxu1 }
 0x337   : > { %v3689_v31 = vsel %vm3061_vm3, %v2718_v26, %v3375_v27  ;;  %v3531_v38 = vsel %vm2903_vm4, %v2086_v25, %v3217_v30 }
 0x338   : > { %v2089_v32 = vpop.f32.mrf.mxu0  ;;  %v2721_v33 = vpop.f32.mrf.mxu1 }
 0x339   : > { %vm2904_vm5 = vcmp.ge.f32.partialorder %v2089_v32, 0.0  ;;  %v3218_v34 = vmul.f32 0.2, %v2089_v32  ;;  %vm3062_vm6 = vcmp.ge.f32.partialorder %v2721_v33, 0.0  ;;  %v3376_v35 = vmul.f32 0.2, %v2721_v33 }
 0x33a   : > { %v7544_v36 = vpop.f32.mrf.mxu0  ;;  %v7860_v37 = vpop.f32.mrf.mxu1 }
 0x33b   : > { %v3532_v39 = vsel %vm2904_vm5, %v2089_v32, %v3218_v34  ;;  %v3690_v40 = vsel %vm3062_vm6, %v2721_v33, %v3376_v35 }
 0x33c   : > { %v6495_v41 = vpack.c.bf16 %v3532_v39, %v3531_v38  ;;  %v6890_v42 = vpack.c.bf16 %v3690_v40, %v3689_v31  ;;  %v2094_v43 = vpop.f32.mrf.mxu0  ;;  %v2726_v44 = vpop.f32.mrf.mxu1 }
 0x33d   : > { %vm3063_vm0 = vcmp.ge.f32.partialorder %v2726_v44, 0.0  ;;  %v3377_v45 = vmul.f32 0.2, %v2726_v44  ;;  %v3219_v48 = vmul.f32 0.2, %v2094_v43  ;;  %vm2905_vm7 = vcmp.ge.f32.partialorder %v2094_v43, 0.0 }
 0x33e   : > { %6984 = vst [vmem:[%s8312_s6 + $0x248] sm:$0xff] %v6495_v41   ;;  %7063 = vst [vmem:[%s8312_s6 + $0x4c0] sm:$0xff] %v6890_v42   ;;  %v7547_v46 = vpop.f32.mrf.mxu0  ;;  %v7863_v47 = vpop.f32.mrf.mxu1 }
 0x33f   : > { %v3691_v49 = vsel %vm3063_vm0, %v2726_v44, %v3377_v45  ;;  %v3533_v56 = vsel %vm2905_vm7, %v2094_v43, %v3219_v48 }
 0x340   : > { %v2097_v50 = vpop.f32.mrf.mxu0  ;;  %v2729_v51 = vpop.f32.mrf.mxu1 }
 0x341   : > { %vm2906_vm8 = vcmp.ge.f32.partialorder %v2097_v50, 0.0  ;;  %v3220_v52 = vmul.f32 0.2, %v2097_v50  ;;  %vm3064_vm9 = vcmp.ge.f32.partialorder %v2729_v51, 0.0  ;;  %v3378_v53 = vmul.f32 0.2, %v2729_v51 }
 0x342   : > { %v7548_v54 = vpop.f32.mrf.mxu0  ;;  %v7864_v55 = vpop.f32.mrf.mxu1 }
 0x343   : > { %v3534_v57 = vsel %vm2906_vm8, %v2097_v50, %v3220_v52  ;;  %v3692_v58 = vsel %vm3064_vm9, %v2729_v51, %v3378_v53 }
 0x344   : > { %v6500_v59 = vpack.c.bf16 %v3534_v57, %v3533_v56  ;;  %v6895_v60 = vpack.c.bf16 %v3692_v58, %v3691_v49  ;;  %v2102_v61 = vpop.f32.mrf.mxu0  ;;  %v2734_v62 = vpop.f32.mrf.mxu1 }
 0x345   : > { %vm3065_vm10 = vcmp.ge.f32.partialorder %v2734_v62, 0.0  ;;  %v3379_v1 = vmul.f32 0.2, %v2734_v62  ;;  %v3221_v2 = vmul.f32 0.2, %v2102_v61  ;;  %vm2907_vm11 = vcmp.ge.f32.partialorder %v2102_v61, 0.0 }
 0x346   : > { %6985 = vst [vmem:[%s8312_s6 + $0x250] sm:$0xff] %v6500_v59   ;;  %7064 = vst [vmem:[%s8312_s6 + $0x4c8] sm:$0xff] %v6895_v60   ;;  %v7551_v63 = vpop.f32.mrf.mxu0  ;;  %v7867_v0 = vpop.f32.mrf.mxu1 }
 0x347   : > { %v3693_v3 = vsel %vm3065_vm10, %v2734_v62, %v3379_v1  ;;  %v3535_v10 = vsel %vm2907_vm11, %v2102_v61, %v3221_v2 }
 0x348   : > { %v2105_v4 = vpop.f32.mrf.mxu0  ;;  %v2737_v5 = vpop.f32.mrf.mxu1 }
 0x349   : > { %vm2908_vm12 = vcmp.ge.f32.partialorder %v2105_v4, 0.0  ;;  %v3222_v6 = vmul.f32 0.2, %v2105_v4  ;;  %vm3066_vm13 = vcmp.ge.f32.partialorder %v2737_v5, 0.0  ;;  %v3380_v7 = vmul.f32 0.2, %v2737_v5 }
 0x34a   : > { %v7552_v8 = vpop.f32.mrf.mxu0  ;;  %v7868_v9 = vpop.f32.mrf.mxu1 }
 0x34b   : > { %v3536_v11 = vsel %vm2908_vm12, %v2105_v4, %v3222_v6  ;;  %v3694_v12 = vsel %vm3066_vm13, %v2737_v5, %v3380_v7 }
 0x34c   : > { %v6505_v13 = vpack.c.bf16 %v3536_v11, %v3535_v10  ;;  %v6900_v14 = vpack.c.bf16 %v3694_v12, %v3693_v3  ;;  %v2110_v15 = vpop.f32.mrf.mxu0  ;;  %v2742_v16 = vpop.f32.mrf.mxu1 }
 0x34d   : > { %vm3067_vm14 = vcmp.ge.f32.partialorder %v2742_v16, 0.0  ;;  %v3381_v17 = vmul.f32 0.2, %v2742_v16  ;;  %v3223_v20 = vmul.f32 0.2, %v2110_v15  ;;  %vm2909_vm15 = vcmp.ge.f32.partialorder %v2110_v15, 0.0 }
 0x34e   : > { %6986 = vst [vmem:[%s8312_s6 + $0x258] sm:$0xff] %v6505_v13   ;;  %7065 = vst [vmem:[%s8312_s6 + $0x4d0] sm:$0xff] %v6900_v14   ;;  %v7555_v18 = vpop.f32.mrf.mxu0  ;;  %v7871_v19 = vpop.f32.mrf.mxu1 }
 0x34f   : > { %v3695_v21 = vsel %vm3067_vm14, %v2742_v16, %v3381_v17  ;;  %v3537_v28 = vsel %vm2909_vm15, %v2110_v15, %v3223_v20 }
 0x350   : > { %v2113_v22 = vpop.f32.mrf.mxu0  ;;  %v2745_v23 = vpop.f32.mrf.mxu1 }
 0x351   : > { %vm2910_vm1 = vcmp.ge.f32.partialorder %v2113_v22, 0.0  ;;  %v3224_v24 = vmul.f32 0.2, %v2113_v22  ;;  %vm3068_vm2 = vcmp.ge.f32.partialorder %v2745_v23, 0.0  ;;  %v3382_v25 = vmul.f32 0.2, %v2745_v23 }
 0x352   : > { %v7556_v26 = vpop.f32.mrf.mxu0  ;;  %v7872_v27 = vpop.f32.mrf.mxu1 }
 0x353   : > { %v3538_v29 = vsel %vm2910_vm1, %v2113_v22, %v3224_v24  ;;  %v3696_v30 = vsel %vm3068_vm2, %v2745_v23, %v3382_v25 }
 0x354   : > { %v6510_v31 = vpack.c.bf16 %v3538_v29, %v3537_v28  ;;  %v6905_v32 = vpack.c.bf16 %v3696_v30, %v3695_v21  ;;  %v2118_v33 = vpop.f32.mrf.mxu0  ;;  %v2750_v34 = vpop.f32.mrf.mxu1 }
 0x355   : > { %vm3069_vm3 = vcmp.ge.f32.partialorder %v2750_v34, 0.0  ;;  %v3383_v35 = vmul.f32 0.2, %v2750_v34  ;;  %v3225_v38 = vmul.f32 0.2, %v2118_v33  ;;  %vm2911_vm4 = vcmp.ge.f32.partialorder %v2118_v33, 0.0 }
 0x356   : > { %6987 = vst [vmem:[%s8312_s6 + $0x260] sm:$0xff] %v6510_v31   ;;  %7066 = vst [vmem:[%s8312_s6 + $0x4d8] sm:$0xff] %v6905_v32   ;;  %v7559_v36 = vpop.f32.mrf.mxu0  ;;  %v7875_v37 = vpop.f32.mrf.mxu1 }
 0x357   : > { %v3697_v39 = vsel %vm3069_vm3, %v2750_v34, %v3383_v35  ;;  %v3539_v46 = vsel %vm2911_vm4, %v2118_v33, %v3225_v38 }
 0x358   : > { %v2121_v40 = vpop.f32.mrf.mxu0  ;;  %v2753_v41 = vpop.f32.mrf.mxu1 }
 0x359   : > { %vm2912_vm5 = vcmp.ge.f32.partialorder %v2121_v40, 0.0  ;;  %v3226_v42 = vmul.f32 0.2, %v2121_v40  ;;  %vm3070_vm6 = vcmp.ge.f32.partialorder %v2753_v41, 0.0  ;;  %v3384_v43 = vmul.f32 0.2, %v2753_v41 }
 0x35a   : > { %v7560_v44 = vpop.f32.mrf.mxu0  ;;  %v7876_v45 = vpop.f32.mrf.mxu1 }
 0x35b   : > { %v3540_v47 = vsel %vm2912_vm5, %v2121_v40, %v3226_v42  ;;  %v3698_v48 = vsel %vm3070_vm6, %v2753_v41, %v3384_v43 }
 0x35c   : > { %v6515_v49 = vpack.c.bf16 %v3540_v47, %v3539_v46  ;;  %v6910_v50 = vpack.c.bf16 %v3698_v48, %v3697_v39  ;;  %v2126_v51 = vpop.f32.mrf.mxu0 }
 0x35d   : > { %v3227_v53 = vmul.f32 0.2, %v2126_v51  ;;  %vm2913_vm0 = vcmp.ge.f32.partialorder %v2126_v51, 0.0 }
 0x35e   : > { %6988 = vst [vmem:[%s8312_s6 + $0x268] sm:$0xff] %v6515_v49   ;;  %7067 = vst [vmem:[%s8312_s6 + $0x4e0] sm:$0xff] %v6910_v50   ;;  %v7563_v52 = vpop.f32.mrf.mxu0 }
 0x35f   : > { %v3541_v57 = vsel %vm2913_vm0, %v2126_v51, %v3227_v53 }
 0x360   : > { %v2129_v54 = vpop.f32.mrf.mxu0 }
 0x361   : > { %vm2914_vm7 = vcmp.ge.f32.partialorder %v2129_v54, 0.0  ;;  %v3228_v55 = vmul.f32 0.2, %v2129_v54 }
 0x362   : > { %v7564_v56 = vpop.f32.mrf.mxu0 }
 0x363   : > { %v3542_v58 = vsel %vm2914_vm7, %v2129_v54, %v3228_v55 }
 0x364   : > { %v6520_v59 = vpack.c.bf16 %v3542_v58, %v3541_v57 }
 0x366   : > { %6989 = vst [vmem:[%s8312_s6 + $0x270] sm:$0xff] %v6520_v59  }
 0x367 PF: > { %s12_s9 = sadd.s32 1, %s8074_s9  }
 0x368   : > { %p9_p4 = scmp.ge.s32.totalorder %s12_s9, 4  }
 0x36a   :  { %11 = sbr.rel (!%p9_p4) target bundleno = 1 (0x1), region = 58 }

// kernel: netd_forward.6
= control target key start
LH: loop header
LB: loop body
LE: loop exit
PB: predicated region body
PF: predicated region fallthrough
CT: control target
= control target key end

     0   :  { %s2695_s9 = smov 0   ;;  %s4711_s0 = inlined_call_operand.vmem [shape: bf16[1280,128], index: 0, kind: input, shape index: {}]   ;;  %s4712_s1 = inlined_call_operand.vmem [shape: bf16[128,128], index: 1, kind: input, shape index: {}]   ;;  %s4713_s2 = inlined_call_operand.vmem [shape: bf16[1280,128], index: 2, kind: output, shape index: {}]  }
   0x1 LB: > { %s1998_s10 = sadd.s32 4294967295, %s2678_s9   ;;  %p2002_p0 = scmp.ge.s32.totalorder %s2678_s9, 1  ;;  %s2678_s9 = sphi %s2695_s9, %s12_s9  }
   0x2   : > { %p113_p1 = scmp.lt.s32.totalorder %s2678_s9, 3 }
   0x4   : > { %p114_p2 = pnand %p2002_p0, %p113_p1 }
   0x6   : > { %117 = sbr.rel (%p114_p2) target bundleno = 598 (0x256), region = 28 }
   0xb   : > { %v2622_v0 = vld [vmem:[%s4712_s1 + $0x38] sm:$0xff]   ;;  %s135_s13 = smul.u32 80, %s1998_s10  ;;  %v2623_v1 = vld [vmem:[%s4712_s1 + $0x30] sm:$0xff]   ;;  %v2624_v2 = vld [vmem:[%s4712_s1 + $0x28] sm:$0xff]  }
   0xc   : > { %2502 = vmatprep.subr.bf16.mxu0 %v2622_v0  ;;  %2598 = vmatprep.subr.bf16.mxu1 %v2622_v0  ;;  %v2625_v3 = vld [vmem:[%s4712_s1 + $0x20] sm:$0xff]   ;;  %v2626_v5 = vld [vmem:[%s4712_s1 + $0x18] sm:$0xff]   ;;  %v2627_v6 = vld [vmem:[%s4712_s1 + $0x10] sm:$0xff]  }
   0xd   : > { %p136_p3 = scmp.lt.s32.totalorder %s135_s13, 159  ;;  %2503 = vmatpush3.bf16.msra.mxu0 %v2622_v0  ;;  %2606 = vmatpush3.bf16.msra.mxu1 %v2622_v0  ;;  %v2628_v7 = vld [vmem:[%s4712_s1 + $0x8] sm:$0xff]   ;;  %v2629_v8 = vld [vmem:[%s4712_s1] sm:$0xff]  }
   0xe   : > { %2504 = vmatprep.subr.bf16.mxu0 %v2623_v1  ;;  %2599 = vmatprep.subr.bf16.mxu1 %v2623_v1 }
   0xf   : > { %s5306_s13 = smov (!%p136_p3, %s135_s13), 159 }
  0x10   : > { %s2003_s18 = sshll.u32 %s5306_s13, 2 }
  0x11   : > { %2505 = vmatpush3.bf16.msra.mxu0 %v2623_v1  ;;  %s2723_s23 = scalar_lea.vmem %s4711_s0, %s2003_s18  ;;  %2607 = vmatpush3.bf16.msra.mxu1 %v2623_v1  ;;  %s4550_s6 = scalar_lea.vmem %s4713_s2, %s2003_s18 }
  0x12   : > { %2506 = vmatprep.subr.bf16.mxu0 %v2624_v2  ;;  %v2630_v4 = vld [vmem:[%s2723_s23] sm:$0xff]   ;;  %2600 = vmatprep.subr.bf16.mxu1 %v2624_v2  ;;  %v2631_v9 = vld [vmem:[%s2723_s23 + $0x8] sm:$0xff]   ;;  %v2632_v11 = vld [vmem:[%s2723_s23 + $0x10] sm:$0xff]  }
  0x13   : > { %2518 = vmatprep.mubr.bf16.mxu0 %v2630_v4  ;;  %v2650_v10 = vld [vmem:[%s2723_s23 + $0xa0] sm:$0xff]   ;;  %v2651_v12 = vld [vmem:[%s2723_s23 + $0xa8] sm:$0xff]   ;;  %v2652_v13 = vld [vmem:[%s2723_s23 + $0xb0] sm:$0xff]  }
  0x14   : > { %2558 = vmatprep.mubr.bf16.mxu1 %v2650_v10  ;;  %v2633_v14 = vld [vmem:[%s2723_s23 + $0x18] sm:$0xff]   ;;  %v2634_v15 = vld [vmem:[%s2723_s23 + $0x20] sm:$0xff]   ;;  %v2635_v18 = vld [vmem:[%s2723_s23 + $0x28] sm:$0xff]  }
  0x15   : > { %2507 = vmatpush3.bf16.msra.mxu0 %v2624_v2  ;;  %2608 = vmatpush3.bf16.msra.mxu1 %v2624_v2  ;;  %v2653_v16 = vld [vmem:[%s2723_s23 + $0xb8] sm:$0xff]   ;;  %v2654_v17 = vld [vmem:[%s2723_s23 + $0xc0] sm:$0xff]   ;;  %v2636_v19 = vld [vmem:[%s2723_s23 + $0x30] sm:$0xff]  }
  0x16   : > { %2508 = vmatprep.subr.bf16.mxu0 %v2625_v3  ;;  %2601 = vmatprep.subr.bf16.mxu1 %v2625_v3  ;;  %v2655_v20 = vld [vmem:[%s2723_s23 + $0xc8] sm:$0xff]   ;;  %v2656_v21 = vld [vmem:[%s2723_s23 + $0xd0] sm:$0xff]   ;;  %v2637_v22 = vld [vmem:[%s2723_s23 + $0x38] sm:$0xff]  }
  0x17   : > { %v2657_v23 = vld [vmem:[%s2723_s23 + $0xd8] sm:$0xff]   ;;  %v2638_v24 = vld [vmem:[%s2723_s23 + $0x40] sm:$0xff]   ;;  %v2639_v26 = vld [vmem:[%s2723_s23 + $0x48] sm:$0xff]  }
  0x18   : > { %v2658_v25 = vld [vmem:[%s2723_s23 + $0xe0] sm:$0xff]   ;;  %v2659_v27 = vld [vmem:[%s2723_s23 + $0xe8] sm:$0xff]   ;;  %v2640_v28 = vld [vmem:[%s2723_s23 + $0x50] sm:$0xff]  }
  0x19   : > { %2509 = vmatpush3.bf16.msra.mxu0 %v2625_v3  ;;  %2609 = vmatpush3.bf16.msra.mxu1 %v2625_v3  ;;  %v2660_v29 = vld [vmem:[%s2723_s23 + $0xf0] sm:$0xff]   ;;  %v2641_v30 = vld [vmem:[%s2723_s23 + $0x58] sm:$0xff]   ;;  %v2642_v32 = vld [vmem:[%s2723_s23 + $0x60] sm:$0xff]  }
  0x1a   : > { %2510 = vmatprep.subr.bf16.mxu0 %v2626_v5  ;;  %2602 = vmatprep.subr.bf16.mxu1 %v2626_v5  ;;  %v2661_v31 = vld [vmem:[%s2723_s23 + $0xf8] sm:$0xff]   ;;  %v2662_v33 = vld [vmem:[%s2723_s23 + $0x100] sm:$0xff]   ;;  %v2643_v34 = vld [vmem:[%s2723_s23 + $0x68] sm:$0xff]  }
  0x1b   : > { %v2663_v35 = vld [vmem:[%s2723_s23 + $0x108] sm:$0xff]   ;;  %v2644_v36 = vld [vmem:[%s2723_s23 + $0x70] sm:$0xff]   ;;  %v2645_v38 = vld [vmem:[%s2723_s23 + $0x78] sm:$0xff]  }
  0x1c   : > { %v2664_v37 = vld [vmem:[%s2723_s23 + $0x110] sm:$0xff]   ;;  %v2665_v39 = vld [vmem:[%s2723_s23 + $0x118] sm:$0xff]   ;;  %v2646_v40 = vld [vmem:[%s2723_s23 + $0x80] sm:$0xff]  }
  0x1d   : > { %2511 = vmatpush3.bf16.msra.mxu0 %v2626_v5  ;;  %2610 = vmatpush3.bf16.msra.mxu1 %v2626_v5  ;;  %v2666_v41 = vld [vmem:[%s2723_s23 + $0x120] sm:$0xff]   ;;  %v2647_v42 = vld [vmem:[%s2723_s23 + $0x88] sm:$0xff]   ;;  %v2648_v44 = vld [vmem:[%s2723_s23 + $0x90] sm:$0xff]  }
  0x1e   : > { %2512 = vmatprep.subr.bf16.mxu0 %v2627_v6  ;;  %2603 = vmatprep.subr.bf16.mxu1 %v2627_v6  ;;  %v2667_v43 = vld [vmem:[%s2723_s23 + $0x128] sm:$0xff]   ;;  %v2668_v45 = vld [vmem:[%s2723_s23 + $0x130] sm:$0xff]   ;;  %v2649_v46 = vld [vmem:[%s2723_s23 + $0x98] sm:$0xff]  }
  0x1f   : > { %v2669_v47 = vld [vmem:[%s2723_s23 + $0x138] sm:$0xff]  }
  0x21   : > { %2513 = vmatpush3.bf16.msra.mxu0 %v2627_v6  ;;  %2611 = vmatpush3.bf16.msra.mxu1 %v2627_v6 }
  0x22   : > { %2514 = vmatprep.subr.bf16.mxu0 %v2628_v7  ;;  %2604 = vmatprep.subr.bf16.mxu1 %v2628_v7 }
  0x25   : > { %2515 = vmatpush3.bf16.msra.mxu0 %v2628_v7  ;;  %2612 = vmatpush3.bf16.msra.mxu1 %v2628_v7 }
  0x26   : > { %2516 = vmatprep.subr.bf16.mxu0 %v2629_v8  ;;  %2605 = vmatprep.subr.bf16.mxu1 %v2629_v8 }
  0x29   : > { %2517 = vmatpush3.bf16.msra.mxu0 %v2629_v8  ;;  %2613 = vmatpush3.bf16.msra.mxu1 %v2629_v8 }
  0x2c   : > { %2519 = vmatmul.mubr.bf16.vlgmr.msra.gmra.mxu0 %v2631_v9  ;;  %2559 = vmatmul.mubr.bf16.vlgmr.msra.gmra.mxu1 %v2651_v12 }
  0x2d   : > { %2522 = vmatprep.mubr.bf16.mxu0 %v2632_v11  ;;  %2562 = vmatprep.mubr.bf16.mxu1 %v2652_v13 }
  0x34   : > { %2523 = vmatmul.mubr.bf16.gmra.mxu0 %v2633_v14  ;;  %2563 = vmatmul.mubr.bf16.gmra.mxu1 %v2653_v16 }
  0x35   : > { %2526 = vmatprep.mubr.bf16.mxu0 %v2634_v15  ;;  %2566 = vmatprep.mubr.bf16.mxu1 %v2654_v17 }
  0x3c   : > { %2527 = vmatmul.mubr.bf16.gmra.mxu0 %v2635_v18  ;;  %2567 = vmatmul.mubr.bf16.gmra.mxu1 %v2655_v20 }
  0x3d   : > { %2530 = vmatprep.mubr.bf16.mxu0 %v2636_v19  ;;  %2570 = vmatprep.mubr.bf16.mxu1 %v2656_v21 }
  0x44   : > { %2531 = vmatmul.mubr.bf16.gmra.mxu0 %v2637_v22  ;;  %2571 = vmatmul.mubr.bf16.gmra.mxu1 %v2657_v23 }
  0x45   : > { %2534 = vmatprep.mubr.bf16.mxu0 %v2638_v24  ;;  %2574 = vmatprep.mubr.bf16.mxu1 %v2658_v25 }
  0x4c   : > { %2535 = vmatmul.mubr.bf16.gmra.mxu0 %v2639_v26  ;;  %2575 = vmatmul.mubr.bf16.gmra.mxu1 %v2659_v27 }
  0x4d   : > { %2538 = vmatprep.mubr.bf16.mxu0 %v2640_v28  ;;  %2578 = vmatprep.mubr.bf16.mxu1 %v2660_v29 }
  0x54   : > { %2539 = vmatmul.mubr.bf16.gmra.mxu0 %v2641_v30  ;;  %2579 = vmatmul.mubr.bf16.gmra.mxu1 %v2661_v31 }
  0x55   : > { %2542 = vmatprep.mubr.bf16.mxu0 %v2642_v32  ;;  %2582 = vmatprep.mubr.bf16.mxu1 %v2662_v33 }
  0x5c   : > { %2543 = vmatmul.mubr.bf16.gmra.mxu0 %v2643_v34  ;;  %2583 = vmatmul.mubr.bf16.gmra.mxu1 %v2663_v35 }
  0x5d   : > { %2546 = vmatprep.mubr.bf16.mxu0 %v2644_v36  ;;  %2586 = vmatprep.mubr.bf16.mxu1 %v2664_v37 }
  0x64   : > { %2547 = vmatmul.mubr.bf16.gmra.mxu0 %v2645_v38  ;;  %2587 = vmatmul.mubr.bf16.gmra.mxu1 %v2665_v39 }
  0x65   : > { %2550 = vmatprep.mubr.bf16.mxu0 %v2646_v40  ;;  %2590 = vmatprep.mubr.bf16.mxu1 %v2666_v41 }
  0x6c   : > { %2551 = vmatmul.mubr.bf16.gmra.mxu0 %v2647_v42  ;;  %2591 = vmatmul.mubr.bf16.gmra.mxu1 %v2667_v43 }
  0x6d   : > { %2554 = vmatprep.mubr.bf16.mxu0 %v2648_v44  ;;  %2594 = vmatprep.mubr.bf16.mxu1 %v2668_v45 }
  0x74   : > { %2555 = vmatmul.mubr.bf16.gmra.mxu0 %v2649_v46  ;;  %2595 = vmatmul.mubr.bf16.gmra.mxu1 %v2669_v47 }
  0xec   : > { %v2777_v48 = vpop.f32.mrf.mxu0  ;;  %v2783_v51 = vpop.f32.mrf.mxu1 }
  0xed   : > { %4837 = vst [vmem:[#allocation2_spill] sm:$0xff] %v2783_v51  ;;  %v973_v57 = vmul.f32 %v2777_v48, %v2777_v48 }
  0xee   : > { %v2779_v49 = vpop.f32.mrf.mxu0  ;;  %v2798_v60 = vpop.f32.mrf.mxu1 }
  0xef   : > { %v971_v53 = vmul.f32 %v2779_v49, %v2779_v49  ;;  %4838 = vst [vmem:[#allocation3_spill] sm:$0xff] %v2798_v60 }
  0xf0   : > { %v2781_v50 = vpop.f32.mrf.mxu0  ;;  %v2810_v5 = vpop.f32.mrf.mxu1 }
  0xf1   : > { %v974_v62 = vmul.f32 %v2781_v50, %v2781_v50 }
  0xf2   : > { %v2785_v52 = vpop.f32.mrf.mxu0  ;;  %v2822_v14 = vpop.f32.mrf.mxu1 }
  0xf3   : > { %v885_v54 = vadd.f32 %v2785_v52, %v2779_v49  ;;  %v972_v55 = vmul.f32 %v2785_v52, %v2785_v52  ;;  %4839 = vst [vmem:[#allocation4_spill] sm:$0xff] %v2822_v14 }
  0xf4   : > { %v2793_v56 = vpop.f32.mrf.mxu0  ;;  %v2834_v23 = vpop.f32.mrf.mxu1 }
  0xf5   : > { %v886_v58 = vadd.f32 %v2777_v48, %v885_v54  ;;  %v1051_v59 = vadd.f32 %v972_v55, %v971_v53  ;;  %v977_v11 = vmul.f32 %v2793_v56, %v2793_v56  ;;  %4840 = vst [vmem:[#allocation5_spill] sm:$0xff] %v2834_v23 }
  0xf6   : > { %v2800_v61 = vpop.f32.mrf.mxu0  ;;  %v2846_v32 = vpop.f32.mrf.mxu1 }
  0xf7   : > { %v1052_v63 = vadd.f32 %v1051_v59, %v973_v57  ;;  %v887_v0 = vadd.f32 %v2781_v50, %v886_v58  ;;  %v975_v3 = vmul.f32 %v2800_v61, %v2800_v61  ;;  %4841 = vst [vmem:[#allocation6_spill] sm:$0xff] %v2846_v32 }
  0xf8   : > { %v2805_v1 = vpop.f32.mrf.mxu0  ;;  %v2858_v41 = vpop.f32.mrf.mxu1 }
  0xf9   : > { %v888_v2 = vadd.f32 %v887_v0, %v2800_v61  ;;  %v1053_v4 = vadd.f32 %v1052_v63, %v974_v62  ;;  %v978_v16 = vmul.f32 %v2805_v1, %v2805_v1 }
  0xfa   : > { %v2812_v6 = vpop.f32.mrf.mxu0  ;;  %v2870_v55 = vpop.f32.mrf.mxu1 }
  0xfb   : > { %v1054_v7 = vadd.f32 %v1053_v4, %v975_v3  ;;  %v889_v8 = vadd.f32 %v888_v2, %v2812_v6  ;;  %v976_v9 = vmul.f32 %v2812_v6, %v2812_v6  ;;  %4842 = vst [vmem:[#allocation7_spill] sm:$0xff] %v2870_v55 }
  0xfc   : > { %v2817_v10 = vpop.f32.mrf.mxu0  ;;  %v2882_v4 = vpop.f32.mrf.mxu1 }
  0xfd   : > { %v890_v12 = vadd.f32 %v2793_v56, %v889_v8  ;;  %v1055_v13 = vadd.f32 %v1054_v7, %v976_v9  ;;  %v981_v29 = vmul.f32 %v2817_v10, %v2817_v10  ;;  %4843 = vst [vmem:[#allocation8_spill] sm:$0xff] %v2882_v4 }
  0xfe   : > { %v2824_v15 = vpop.f32.mrf.mxu0 }
  0xff   : > { %v1056_v17 = vadd.f32 %v1055_v13, %v977_v11  ;;  %v891_v18 = vadd.f32 %v2805_v1, %v890_v12  ;;  %v979_v21 = vmul.f32 %v2824_v15, %v2824_v15 }
 0x100   : > { %v2829_v19 = vpop.f32.mrf.mxu0 }
 0x101   : > { %v892_v20 = vadd.f32 %v891_v18, %v2824_v15  ;;  %v1057_v22 = vadd.f32 %v1056_v17, %v978_v16  ;;  %v982_v34 = vmul.f32 %v2829_v19, %v2829_v19  ;;  %v2894_v18 = vpop.f32.mrf.mxu1 }
 0x102   : > { %v2836_v24 = vpop.f32.mrf.mxu0  ;;  %4844 = vst [vmem:[#allocation9_spill] sm:$0xff] %v2894_v18 }
 0x103   : > { %v1058_v25 = vadd.f32 %v1057_v22, %v979_v21  ;;  %v893_v26 = vadd.f32 %v892_v20, %v2836_v24  ;;  %v980_v27 = vmul.f32 %v2836_v24, %v2836_v24 }
 0x104   : > { %v2841_v28 = vpop.f32.mrf.mxu0 }
 0x105   : > { %v894_v30 = vadd.f32 %v2817_v10, %v893_v26  ;;  %v1059_v31 = vadd.f32 %v1058_v25, %v980_v27  ;;  %v985_v47 = vmul.f32 %v2841_v28, %v2841_v28 }
 0x106   : > { %v2848_v33 = vpop.f32.mrf.mxu0 }
 0x107   : > { %v1060_v35 = vadd.f32 %v1059_v31, %v981_v29  ;;  %v895_v36 = vadd.f32 %v2829_v19, %v894_v30  ;;  %v983_v39 = vmul.f32 %v2848_v33, %v2848_v33  ;;  %v2906_v31 = vpop.f32.mrf.mxu1 }
 0x108   : > { %v2853_v37 = vpop.f32.mrf.mxu0 }
 0x109   : > { %v896_v38 = vadd.f32 %v895_v36, %v2848_v33  ;;  %v1061_v40 = vadd.f32 %v1060_v35, %v982_v34  ;;  %v986_v58 = vmul.f32 %v2853_v37, %v2853_v37 }
 0x10a   : > { %v2860_v42 = vpop.f32.mrf.mxu0 }
 0x10b   : > { %v1062_v43 = vadd.f32 %v1061_v40, %v983_v39  ;;  %v897_v44 = vadd.f32 %v896_v38, %v2860_v42  ;;  %v984_v45 = vmul.f32 %v2860_v42, %v2860_v42 }
 0x10c   : > { %v2865_v46 = vpop.f32.mrf.mxu0 }
 0x10d   : > { %v898_v53 = vadd.f32 %v2841_v28, %v897_v44  ;;  %v1063_v54 = vadd.f32 %v1062_v43, %v984_v45  ;;  %v989_v13 = vmul.f32 %v2865_v46, %v2865_v46  ;;  %v2918_v45 = vpop.f32.mrf.mxu1 }
 0x10e   : > { %v2872_v57 = vpop.f32.mrf.mxu0  ;;  %4845 = vst [vmem:[#allocation10_spill] sm:$0xff] %v2918_v45 }
 0x10f   : > { %v1064_v59 = vadd.f32 %v1063_v54, %v985_v47  ;;  %v899_v62 = vadd.f32 %v2853_v37, %v898_v53  ;;  %v987_v2 = vmul.f32 %v2872_v57, %v2872_v57 }
 0x110   : > { %v2877_v63 = vpop.f32.mrf.mxu0 }
 0x111   : > { %v900_v0 = vadd.f32 %v899_v62, %v2872_v57  ;;  %v1065_v3 = vadd.f32 %v1064_v59, %v986_v58  ;;  %v990_v21 = vmul.f32 %v2877_v63, %v2877_v63 }
 0x112   : > { %v2884_v7 = vpop.f32.mrf.mxu0 }
 0x113   : > { %v1066_v8 = vadd.f32 %v1065_v3, %v987_v2  ;;  %v901_v9 = vadd.f32 %v900_v0, %v2884_v7  ;;  %v988_v11 = vmul.f32 %v2884_v7, %v2884_v7  ;;  %v2930_v3 = vpop.f32.mrf.mxu1 }
 0x114   : > { %v2889_v12 = vpop.f32.mrf.mxu0  ;;  %4846 = vst [vmem:[#allocation11_spill] sm:$0xff] %v2930_v3 }
 0x115   : > { %v902_v16 = vadd.f32 %v2865_v46, %v901_v9  ;;  %v1067_v17 = vadd.f32 %v1066_v8, %v988_v11  ;;  %v993_v40 = vmul.f32 %v2889_v12, %v2889_v12 }
 0x116   : > { %v2896_v20 = vpop.f32.mrf.mxu0 }
 0x117   : > { %v1068_v22 = vadd.f32 %v1067_v17, %v989_v13  ;;  %v903_v25 = vadd.f32 %v2877_v63, %v902_v16  ;;  %v991_v29 = vmul.f32 %v2896_v20, %v2896_v20 }
 0x118   : > { %v2901_v26 = vpop.f32.mrf.mxu0 }
 0x119   : > { %v904_v27 = vadd.f32 %v903_v25, %v2896_v20  ;;  %v1069_v30 = vadd.f32 %v1068_v22, %v990_v21  ;;  %v994_v53 = vmul.f32 %v2901_v26, %v2901_v26  ;;  %v2942_v25 = vpop.f32.mrf.mxu1 }
 0x11a   : > { %v2908_v34 = vpop.f32.mrf.mxu0  ;;  %4848 = vst [vmem:[#allocation13_spill] sm:$0xff] %v2942_v25 }
 0x11b   : > { %v1070_v35 = vadd.f32 %v1069_v30, %v991_v29  ;;  %v905_v36 = vadd.f32 %v904_v27, %v2908_v34  ;;  %v992_v38 = vmul.f32 %v2908_v34, %v2908_v34 }
 0x11c   : > { %v2913_v39 = vpop.f32.mrf.mxu0 }
 0x11d   : > { %v906_v43 = vadd.f32 %v2889_v12, %v905_v36  ;;  %v1071_v44 = vadd.f32 %v1070_v35, %v992_v38  ;;  %v997_v17 = vmul.f32 %v2913_v39, %v2913_v39 }
 0x11e   : > { %v2920_v47 = vpop.f32.mrf.mxu0 }
 0x11f   : > { %v1072_v54 = vadd.f32 %v1071_v44, %v993_v40  ;;  %v907_v58 = vadd.f32 %v2901_v26, %v906_v43  ;;  %v995_v0 = vmul.f32 %v2920_v47, %v2920_v47  ;;  %v2954_v44 = vpop.f32.mrf.mxu1 }
 0x120   : > { %v2925_v59 = vpop.f32.mrf.mxu0 }
 0x121   : > { %v908_v62 = vadd.f32 %v907_v58, %v2920_v47  ;;  %v1073_v2 = vadd.f32 %v1072_v54, %v994_v53  ;;  %v998_v29 = vmul.f32 %v2925_v59, %v2925_v59 }
 0x122   : > { %v2932_v8 = vpop.f32.mrf.mxu0 }
 0x123   : > { %v1074_v9 = vadd.f32 %v1073_v2, %v995_v0  ;;  %v909_v11 = vadd.f32 %v908_v62, %v2932_v8  ;;  %v996_v13 = vmul.f32 %v2932_v8, %v2932_v8 }
 0x124   : > { %v2937_v16 = vpop.f32.mrf.mxu0 }
 0x125   : > { %4847 = vst [vmem:[#allocation12_spill] sm:$0xff] %v2937_v16  ;;  %v910_v21 = vadd.f32 %v2913_v39, %v909_v11  ;;  %v1075_v22 = vadd.f32 %v1074_v9, %v996_v13  ;;  %v1001_v2 = vmul.f32 %v2937_v16, %v2937_v16  ;;  %v2966_v13 = vpop.f32.mrf.mxu1 }
 0x126   : > { %v2944_v27 = vpop.f32.mrf.mxu0  ;;  %4853 = vst [vmem:[#allocation18_spill] sm:$0xff] %v2966_v13 }
 0x127   : > { %4849 = vst [vmem:[#allocation14_spill] sm:$0xff] %v2944_v27  ;;  %v1076_v30 = vadd.f32 %v1075_v22, %v997_v17  ;;  %v911_v35 = vadd.f32 %v2925_v59, %v910_v21  ;;  %v999_v40 = vmul.f32 %v2944_v27, %v2944_v27 }
 0x128   : > { %v2949_v36 = vpop.f32.mrf.mxu0 }
 0x129   : > { %4850 = vst [vmem:[#allocation15_spill] sm:$0xff] %v2949_v36  ;;  %v912_v38 = vadd.f32 %v911_v35, %v2944_v27  ;;  %v1077_v43 = vadd.f32 %v1076_v30, %v998_v29  ;;  %v1002_v21 = vmul.f32 %v2949_v36, %v2949_v36 }
 0x12a   : > { %v2956_v53 = vpop.f32.mrf.mxu0 }
 0x12b   : > { %4851 = vst [vmem:[#allocation16_spill] sm:$0xff] %v2956_v53  ;;  %v1078_v54 = vadd.f32 %v1077_v43, %v999_v40  ;;  %v913_v58 = vadd.f32 %v912_v38, %v2956_v53  ;;  %v1000_v62 = vmul.f32 %v2956_v53, %v2956_v53  ;;  %v2978_v43 = vpop.f32.mrf.mxu1 }
 0x12c   : > { %v2961_v0 = vpop.f32.mrf.mxu0  ;;  %4856 = vst [vmem:[#allocation21_spill] sm:$0xff] %v2978_v43 }
 0x12d   : > { %4852 = vst [vmem:[#allocation17_spill] sm:$0xff] %v2961_v0  ;;  %v914_v9 = vadd.f32 %v2937_v16, %v913_v58  ;;  %v1079_v11 = vadd.f32 %v1078_v54, %v1000_v62 }
 0x12e   : > { %v2968_v17 = vpop.f32.mrf.mxu0 }
 0x12f   : > { %4854 = vst [vmem:[#allocation19_spill] sm:$0xff] %v2968_v17  ;;  %v1080_v22 = vadd.f32 %v1079_v11, %v1001_v2  ;;  %v915_v29 = vadd.f32 %v2949_v36, %v914_v9  ;;  %v1003_v38 = vmul.f32 %v2968_v17, %v2968_v17  ;;  %v1005_v9 = vmul.f32 %v2961_v0, %v2961_v0 }
 0x130   : > { %v2973_v30 = vpop.f32.mrf.mxu0 }
 0x131   : > { %4855 = vst [vmem:[#allocation20_spill] sm:$0xff] %v2973_v30  ;;  %v916_v35 = vadd.f32 %v915_v29, %v2968_v17  ;;  %v1081_v40 = vadd.f32 %v1080_v22, %v1002_v21  ;;  %v2990_v17 = vpop.f32.mrf.mxu1  ;;  %v1006_v22 = vmul.f32 %v2973_v30, %v2973_v30 }
 0x132   : > { %v2980_v54 = vpop.f32.mrf.mxu0  ;;  %4859 = vst [vmem:[#allocation24_spill] sm:$0xff] %v2990_v17 }
 0x133   : > { %4857 = vst [vmem:[#allocation22_spill] sm:$0xff] %v2980_v54  ;;  %v1082_v58 = vadd.f32 %v1081_v40, %v1003_v38  ;;  %v917_v62 = vadd.f32 %v916_v35, %v2980_v54  ;;  %v1004_v2 = vmul.f32 %v2980_v54, %v2980_v54 }
 0x134   : > { %v2985_v11 = vpop.f32.mrf.mxu0 }
 0x135   : > { %4858 = vst [vmem:[#allocation23_spill] sm:$0xff] %v2985_v11  ;;  %v918_v29 = vadd.f32 %v2961_v0, %v917_v62  ;;  %v1083_v36 = vadd.f32 %v1082_v58, %v1004_v2  ;;  %v3002_v62 = vpop.f32.mrf.mxu1 }
 0x136   : > { %v2992_v21 = vpop.f32.mrf.mxu0  ;;  %4861 = vst [vmem:[#allocation26_spill] sm:$0xff] %v3002_v62 }
 0x137   : > { %4860 = vst [vmem:[#allocation25_spill] sm:$0xff] %v2992_v21  ;;  %v1084_v38 = vadd.f32 %v1083_v36, %v1005_v9  ;;  %v919_v35 = vadd.f32 %v2973_v30, %v918_v29  ;;  %v1007_v16 = vmul.f32 %v2992_v21, %v2992_v21  ;;  %v1009_v9 = vmul.f32 %v2985_v11, %v2985_v11  ;;  %v3012_v30 = vpop.f32.mrf.mxu1 }
 0x138   : > { %v2997_v40 = vpop.f32.mrf.mxu0  ;;  %4863 = vst [vmem:[#allocation28_spill] sm:$0xff] %v3012_v30 }
 0x139   : > { %v920_v54 = vadd.f32 %v919_v35, %v2992_v21  ;;  %v1085_v53 = vadd.f32 %v1084_v38, %v1006_v22  ;;  %v1010_v22 = vmul.f32 %v2997_v40, %v2997_v40 }
 0x13a   : > { %v3004_v58 = vpop.f32.mrf.mxu0 }
 0x13b   : > { %4862 = vst [vmem:[#allocation27_spill] sm:$0xff] %v3004_v58  ;;  %v1086_v2 = vadd.f32 %v1085_v53, %v1007_v16  ;;  %v921_v0 = vadd.f32 %v920_v54, %v3004_v58  ;;  %v1008_v36 = vmul.f32 %v3004_v58, %v3004_v58  ;;  %v1011_v16 = vmul.f32 %v2798_v60, %v2798_v60  ;;  %v3020_v58 = vpop.f32.mrf.mxu1 }
 0x13c   : > { %4864 = vst [vmem:[#allocation29_spill] sm:$0xff] %v3020_v58 }
 0x13d   : > { %v922_v29 = vadd.f32 %v2985_v11, %v921_v0  ;;  %v1087_v35 = vadd.f32 %v1086_v2, %v1008_v36  ;;  %v1012_v0 = vmul.f32 %v2822_v14, %v2822_v14  ;;  %v1013_v36 = vmul.f32 %v2783_v51, %v2783_v51  ;;  %v4900_v11 = vld [vmem:[#allocation13_spill] sm:$0xff] }
 0x13f   : > { %v923_v38 = vadd.f32 %v2997_v40, %v922_v29  ;;  %v1088_v21 = vadd.f32 %v1087_v35, %v1009_v9  ;;  %v3028_v35 = vpop.f32.mrf.mxu1 }
 0x140   : > { %4865 = vst [vmem:[#allocation30_spill] sm:$0xff] %v3028_v35 }
 0x141   : > { %v1089_v53 = vadd.f32 %v1088_v21, %v1010_v22  ;;  %v924_v54 = vadd.f32 %v923_v38, %v2798_v60  ;;  %v1014_v21 = vmul.f32 %v2810_v5, %v2810_v5 }
 0x143   : > { %v925_v27 = vadd.f32 %v924_v54, %v2822_v14  ;;  %v1090_v2 = vadd.f32 %v1089_v53, %v1011_v16  ;;  %v1015_v14 = vmul.f32 %v2846_v32, %v2846_v32  ;;  %v3036_v53 = vpop.f32.mrf.mxu1 }
 0x144   : > { %4866 = vst [vmem:[#allocation31_spill] sm:$0xff] %v3036_v53 }
 0x145   : > { %v926_v29 = vadd.f32 %v2783_v51, %v925_v27  ;;  %v1091_v9 = vadd.f32 %v1090_v2, %v1012_v0  ;;  %v1016_v0 = vmul.f32 %v2870_v55, %v2870_v55  ;;  %v1017_v2 = vmul.f32 %v2834_v23, %v2834_v23  ;;  %v4902_v51 = vld [vmem:[#allocation24_spill] sm:$0xff] }
 0x147   : > { %v1092_v22 = vadd.f32 %v1091_v9, %v1013_v36  ;;  %v927_v38 = vadd.f32 %v2810_v5, %v926_v29  ;;  %v3044_v9 = vpop.f32.mrf.mxu1 }
 0x148   : > { %4867 = vst [vmem:[#allocation32_spill] sm:$0xff] %v3044_v9 }
 0x149   : > { %v928_v54 = vadd.f32 %v927_v38, %v2846_v32  ;;  %v1093_v16 = vadd.f32 %v1092_v22, %v1014_v21  ;;  %v1018_v38 = vmul.f32 %v2858_v41, %v2858_v41 }
 0x14b   : > { %v1094_v60 = vadd.f32 %v1093_v16, %v1015_v14  ;;  %v929_v27 = vadd.f32 %v928_v54, %v2870_v55  ;;  %v1019_v54 = vmul.f32 %v2894_v18, %v2894_v18  ;;  %v3052_v55 = vpop.f32.mrf.mxu1 }
 0x14c   : > { %4868 = vst [vmem:[#allocation33_spill] sm:$0xff] %v3052_v55 }
 0x14d   : > { %v930_v36 = vadd.f32 %v2834_v23, %v929_v27  ;;  %v1095_v29 = vadd.f32 %v1094_v60, %v1016_v0  ;;  %v1020_v60 = vmul.f32 %v2918_v45, %v2918_v45  ;;  %v1021_v0 = vmul.f32 %v2882_v4, %v2882_v4 }
 0x14f   : > { %v1096_v21 = vadd.f32 %v1095_v29, %v1017_v2  ;;  %v931_v22 = vadd.f32 %v2858_v41, %v930_v36  ;;  %v3060_v29 = vpop.f32.mrf.mxu1 }
 0x150   : > { %4869 = vst [vmem:[#allocation34_spill] sm:$0xff] %v3060_v29 }
 0x151   : > { %v932_v14 = vadd.f32 %v931_v22, %v2894_v18  ;;  %v1097_v16 = vadd.f32 %v1096_v21, %v1018_v38  ;;  %v1022_v22 = vmul.f32 %v2906_v31, %v2906_v31 }
 0x153   : > { %v1098_v32 = vadd.f32 %v1097_v16, %v1019_v54  ;;  %v933_v27 = vadd.f32 %v932_v14, %v2918_v45  ;;  %v1023_v14 = vmul.f32 %v2942_v25, %v2942_v25  ;;  %v3068_v45 = vpop.f32.mrf.mxu1 }
 0x154   : > { %4870 = vst [vmem:[#allocation35_spill] sm:$0xff] %v3068_v45 }
 0x155   : > { %v934_v2 = vadd.f32 %v2882_v4, %v933_v27  ;;  %v1099_v36 = vadd.f32 %v1098_v32, %v1020_v60  ;;  %v1024_v32 = vmul.f32 %v2966_v13, %v2966_v13  ;;  %v1025_v60 = vmul.f32 %v2930_v3, %v2930_v3 }
 0x157   : > { %v1100_v38 = vadd.f32 %v1099_v36, %v1021_v0  ;;  %v935_v21 = vadd.f32 %v2906_v31, %v934_v2  ;;  %v3076_v36 = vpop.f32.mrf.mxu1 }
 0x158   : > { %4871 = vst [vmem:[#allocation36_spill] sm:$0xff] %v3076_v36 }
 0x159   : > { %v936_v54 = vadd.f32 %v935_v21, %v2942_v25  ;;  %v1101_v16 = vadd.f32 %v1100_v38, %v1022_v22  ;;  %v1026_v21 = vmul.f32 %v2954_v44, %v2954_v44 }
 0x15b   : > { %v1102_v18 = vadd.f32 %v1101_v16, %v1023_v14  ;;  %v937_v27 = vadd.f32 %v936_v54, %v2966_v13  ;;  %v1027_v54 = vmul.f32 %v2990_v17, %v2990_v17  ;;  %v3084_v13 = vpop.f32.mrf.mxu1 }
 0x15c   : > { %4872 = vst [vmem:[#allocation37_spill] sm:$0xff] %v3084_v13 }
 0x15d   : > { %v938_v0 = vadd.f32 %v2930_v3, %v937_v27  ;;  %v1103_v2 = vadd.f32 %v1102_v18, %v1024_v32  ;;  %v1028_v18 = vmul.f32 %v3012_v30, %v3012_v30  ;;  %v1029_v32 = vmul.f32 %v2978_v43, %v2978_v43 }
 0x15f   : > { %v1104_v22 = vadd.f32 %v1103_v2, %v1025_v60  ;;  %v939_v38 = vadd.f32 %v2954_v44, %v938_v0  ;;  %v3092_v2 = vpop.f32.mrf.mxu1 }
 0x160   : > { %4873 = vst [vmem:[#allocation38_spill] sm:$0xff] %v3092_v2 }
 0x161   : > { %v940_v14 = vadd.f32 %v939_v38, %v2990_v17  ;;  %v1105_v16 = vadd.f32 %v1104_v22, %v1026_v21  ;;  %v1030_v38 = vmul.f32 %v3002_v62, %v3002_v62 }
 0x163   : > { %v1106_v25 = vadd.f32 %v1105_v16, %v1027_v54  ;;  %v941_v27 = vadd.f32 %v940_v14, %v3012_v30  ;;  %v1031_v14 = vmul.f32 %v3028_v35, %v3028_v35  ;;  %v3100_v30 = vpop.f32.mrf.mxu1 }
 0x164   : > { %4874 = vst [vmem:[#allocation39_spill] sm:$0xff] %v3100_v30 }
 0x165   : > { %v942_v60 = vadd.f32 %v2978_v43, %v941_v27  ;;  %v1107_v0 = vadd.f32 %v1106_v25, %v1028_v18  ;;  %v1032_v25 = vmul.f32 %v3044_v9, %v3044_v9  ;;  %v1033_v18 = vmul.f32 %v3020_v58, %v3020_v58 }
 0x167   : > { %v1108_v21 = vadd.f32 %v1107_v0, %v1029_v32  ;;  %v943_v22 = vadd.f32 %v3002_v62, %v942_v60  ;;  %v3108_v0 = vpop.f32.mrf.mxu1 }
 0x168   : > { %4875 = vst [vmem:[#allocation40_spill] sm:$0xff] %v3108_v0 }
 0x169   : > { %v944_v54 = vadd.f32 %v943_v22, %v3028_v35  ;;  %v1109_v16 = vadd.f32 %v1108_v21, %v1030_v38  ;;  %v1034_v22 = vmul.f32 %v3036_v53, %v3036_v53 }
 0x16b   : > { %v1110_v17 = vadd.f32 %v1109_v16, %v1031_v14  ;;  %v945_v27 = vadd.f32 %v944_v54, %v3044_v9  ;;  %v1035_v54 = vmul.f32 %v3060_v29, %v3060_v29  ;;  %v3116_v9 = vpop.f32.mrf.mxu1 }
 0x16c   : > { %4876 = vst [vmem:[#allocation41_spill] sm:$0xff] %v3116_v9 }
 0x16d   : > { %v946_v32 = vadd.f32 %v3020_v58, %v945_v27  ;;  %v1111_v60 = vadd.f32 %v1110_v17, %v1032_v25  ;;  %v1036_v17 = vmul.f32 %v3076_v36, %v3076_v36  ;;  %v1037_v25 = vmul.f32 %v3052_v55, %v3052_v55 }
 0x16f   : > { %v1112_v38 = vadd.f32 %v1111_v60, %v1033_v18  ;;  %v947_v21 = vadd.f32 %v3036_v53, %v946_v32  ;;  %v3124_v60 = vpop.f32.mrf.mxu1 }
 0x170   : > { %4877 = vst [vmem:[#allocation42_spill] sm:$0xff] %v3124_v60 }
 0x171   : > { %v948_v14 = vadd.f32 %v947_v21, %v3060_v29  ;;  %v1113_v16 = vadd.f32 %v1112_v38, %v1034_v22  ;;  %v1038_v21 = vmul.f32 %v3068_v45, %v3068_v45 }
 0x173   : > { %v1114_v35 = vadd.f32 %v1113_v16, %v1035_v54  ;;  %v949_v27 = vadd.f32 %v948_v14, %v3076_v36  ;;  %v1039_v14 = vmul.f32 %v3092_v2, %v3092_v2  ;;  %v3132_v36 = vpop.f32.mrf.mxu1  ;;  %v4915_v3 = vld [vmem:[#allocation41_spill] sm:$0xff] }
 0x174   : > { %4878 = vst [vmem:[#allocation43_spill] sm:$0xff] %v3132_v36 }
 0x175   : > { %v950_v18 = vadd.f32 %v3052_v55, %v949_v27  ;;  %v1115_v32 = vadd.f32 %v1114_v35, %v1036_v17  ;;  %v1040_v35 = vmul.f32 %v3108_v0, %v3108_v0  ;;  %v1041_v17 = vmul.f32 %v3084_v13, %v3084_v13 }
 0x177   : > { %v1116_v22 = vadd.f32 %v1115_v32, %v1037_v25  ;;  %v951_v38 = vadd.f32 %v3068_v45, %v950_v18  ;;  %v3140_v32 = vpop.f32.mrf.mxu1 }
 0x178   : > { %4879 = vst [vmem:[#allocation44_spill] sm:$0xff] %v3140_v32 }
 0x179   : > { %v952_v54 = vadd.f32 %v951_v38, %v3092_v2  ;;  %v1117_v16 = vadd.f32 %v1116_v22, %v1038_v21  ;;  %v1042_v38 = vmul.f32 %v3100_v30, %v3100_v30 }
 0x17b   : > { %v1118_v29 = vadd.f32 %v1117_v16, %v1039_v14  ;;  %v953_v27 = vadd.f32 %v952_v54, %v3108_v0  ;;  %v1043_v54 = vmul.f32 %v3124_v60, %v3124_v60  ;;  %v3148_v0 = vpop.f32.mrf.mxu1 }
 0x17c   : > { %4880 = vst [vmem:[#allocation45_spill] sm:$0xff] %v3148_v0 }
 0x17d   : > { %v954_v25 = vadd.f32 %v3084_v13, %v953_v27  ;;  %v1119_v18 = vadd.f32 %v1118_v29, %v1040_v35  ;;  %v1044_v29 = vmul.f32 %v3140_v32, %v3140_v32  ;;  %v1045_v35 = vmul.f32 %v3116_v9, %v3116_v9 }
 0x17f   : > { %v1120_v21 = vadd.f32 %v1119_v18, %v1041_v17  ;;  %v955_v22 = vadd.f32 %v3100_v30, %v954_v25  ;;  %v3156_v18 = vpop.f32.mrf.mxu1  ;;  %v4914_v55 = vld [vmem:[#allocation44_spill] sm:$0xff] }
 0x180   : > { %4881 = vst [vmem:[#allocation46_spill] sm:$0xff] %v3156_v18 }
 0x181   : > { %v956_v14 = vadd.f32 %v955_v22, %v3124_v60  ;;  %v1121_v16 = vadd.f32 %v1120_v21, %v1042_v38  ;;  %v1046_v38 = vmul.f32 %v3132_v36, %v3132_v36  ;;  %v3161_v21 = vpop.f32.mrf.mxu1 }
 0x182   : > { %4882 = vst [vmem:[#allocation47_spill] sm:$0xff] %v3161_v21 }
 0x183   : > { %v1122_v2 = vadd.f32 %v1121_v16, %v1043_v54  ;;  %v957_v27 = vadd.f32 %v956_v14, %v3140_v32  ;;  %v1047_v16 = vmul.f32 %v3156_v18, %v3156_v18  ;;  %v3166_v32 = vpop.f32.mrf.mxu1  ;;  %v4919_v43 = vld [vmem:[#allocation45_spill] sm:$0xff] }
 0x184   : > { %4883 = vst [vmem:[#allocation48_spill] sm:$0xff] %v3166_v32 }
 0x185   : > { %v958_v17 = vadd.f32 %v3116_v9, %v957_v27  ;;  %v1123_v25 = vadd.f32 %v1122_v2, %v1044_v29  ;;  %v1048_v29 = vmul.f32 %v3166_v32, %v3166_v32 }
 0x187   : > { %v1124_v22 = vadd.f32 %v1123_v25, %v1045_v35  ;;  %v959_v60 = vadd.f32 %v3132_v36, %v958_v17  ;;  %v1049_v25 = vmul.f32 %v3148_v0, %v3148_v0 }
 0x189   : > { %v960_v14 = vadd.f32 %v959_v60, %v3156_v18  ;;  %v1125_v54 = vadd.f32 %v1124_v22, %v1046_v38  ;;  %v1050_v38 = vmul.f32 %v3161_v21, %v3161_v21 }
 0x18b   : > { %v1126_v27 = vadd.f32 %v1125_v54, %v1047_v16  ;;  %v961_v2 = vadd.f32 %v960_v14, %v3166_v32 }
 0x18d   : > { %v962_v35 = vadd.f32 %v3148_v0, %v961_v2  ;;  %v1127_v17 = vadd.f32 %v1126_v27, %v1048_v29 }
 0x18f   : > { %v963_v60 = vadd.f32 %v3161_v21, %v962_v35  ;;  %v1128_v22 = vadd.f32 %v1127_v17, %v1049_v25 }
 0x191   : > { %v964_v18 = vrot.slane %v963_v60, 4  ;;  %v1129_v36 = vadd.f32 %v1128_v22, %v1050_v38  ;;  %v4894_v22 = vld [vmem:[#allocation3_spill] sm:$0xff] }
 0x193   : > { %v965_v54 = vadd.f32 %v964_v18, %v963_v60  ;;  %v1130_v16 = vrot.slane %v1129_v36, 4  ;;  %v4916_v60 = vld [vmem:[#allocation43_spill] sm:$0xff] }
 0x195   : > { %v966_v14 = vrot.slane %v965_v54, 2  ;;  %v1131_v9 = vadd.f32 %v1130_v16, %v1129_v36  ;;  %v4892_v16 = vld [vmem:[#allocation25_spill] sm:$0xff] }
 0x196   : > { %v4898_v36 = vld [vmem:[#allocation9_spill] sm:$0xff] }
 0x197   : > { %v967_v30 = vadd.f32 %v966_v14, %v965_v54  ;;  %v1132_v32 = vrot.slane %v1131_v9, 2  ;;  %v4889_v14 = vld [vmem:[#allocation22_spill] sm:$0xff]  ;;  %v4920_v54 = vld [vmem:[#allocation47_spill] sm:$0xff] }
 0x199   : > { %v968_v13 = vrot.slane %v967_v30, 1  ;;  %v1133_v2 = vadd.f32 %v1132_v32, %v1131_v9  ;;  %v4917_v32 = vld [vmem:[#allocation46_spill] sm:$0xff] }
 0x19b   : > { %v969_v27 = vadd.f32 %v968_v13, %v967_v30  ;;  %v1134_v29 = vrot.slane %v1133_v2, 1  ;;  %v4896_v13 = vld [vmem:[#allocation6_spill] sm:$0xff] }
 0x19d   : > { %v3177_v45 = vmul.f32 0.0016, %v969_v27  ;;  %v1135_v0 = vadd.f32 %v1134_v29, %v1133_v2  ;;  %v4884_v27 = vld [vmem:[#allocation14_spill] sm:$0xff]  ;;  %v4885_v29 = vld [vmem:[#allocation16_spill] sm:$0xff]  ;;  %v4890_v2 = vld [vmem:[#allocation17_spill] sm:$0xff] }
 0x19f   : > { %v1136_v35 = vmul.f32 0.0016, %v1135_v0  ;;  %v1137_v17 = vmul.f32 %v3177_v45, %v3177_v45  ;;  %v4918_v0 = vld [vmem:[#allocation48_spill] sm:$0xff]  ;;  %v4921_v23 = vsub.f32 %v2779_v49, %v3177_v45  ;;  %v4922_v9 = vsub.f32 %v2785_v52, %v3177_v45 }
 0x1a0   : > { %v4923_v53 = vsub.f32 %v2777_v48, %v3177_v45  ;;  %v4924_v18 = vsub.f32 %v2781_v50, %v3177_v45 }
 0x1a1   : > { %v1138_v25 = vsub.f32 %v1136_v35, %v1137_v17  ;;  %v4886_v35 = vld [vmem:[#allocation12_spill] sm:$0xff]  ;;  %v4887_v17 = vld [vmem:[#allocation15_spill] sm:$0xff] }
 0x1a3   : > { %v1139_v21 = vmax.f32 %v1138_v25, 0.0  ;;  %v4891_v25 = vld [vmem:[#allocation20_spill] sm:$0xff] }
 0x1a5   : > { %v1220_v30 = vadd.f32 1e-05, %v1139_v21  ;;  %v4893_v21 = vld [vmem:[#allocation27_spill] sm:$0xff] }
 0x1a7   : > { %2670 = vrsqrt.f32 %v1220_v30  ;;  %v4888_v30 = vld [vmem:[#allocation19_spill] sm:$0xff] }
 0x1b4   : > { %v3315_v62 = vpop.eup %2670 }
 0x1b5   : > { %v3347_v38 = vmul.f32 %v3315_v62, %v4921_v23  ;;  %v3353_v58 = vmul.f32 %v3315_v62, %v4922_v9  ;;  %v3359_v4 = vmul.f32 %v3315_v62, %v4923_v53  ;;  %v3365_v49 = vmul.f32 %v3315_v62, %v4924_v18 }
 0x1b6   : > { %v4925_v23 = vsub.f32 %v2800_v61, %v3177_v45  ;;  %v4926_v9 = vsub.f32 %v2812_v6, %v3177_v45  ;;  %v4927_v53 = vsub.f32 %v2793_v56, %v3177_v45  ;;  %v4928_v18 = vsub.f32 %v2805_v1, %v3177_v45 }
 0x1b7   : > { %vm1302_vm0 = vcmp.ge.f32.partialorder %v3347_v38, 0.0  ;;  %vm1303_vm1 = vcmp.ge.f32.partialorder %v3353_v58, 0.0  ;;  %vm1304_vm2 = vcmp.ge.f32.partialorder %v3359_v4, 0.0  ;;  %vm1305_vm3 = vcmp.ge.f32.partialorder %v3365_v49, 0.0 }
 0x1b8   : > { %v3371_v52 = vmul.f32 %v3315_v62, %v4925_v23  ;;  %v3377_v48 = vmul.f32 %v3315_v62, %v4926_v9  ;;  %v3383_v50 = vmul.f32 %v3315_v62, %v4927_v53  ;;  %v3389_v61 = vmul.f32 %v3315_v62, %v4928_v18 }
 0x1b9   : > { %v4929_v23 = vsub.f32 %v2824_v15, %v3177_v45  ;;  %v4930_v9 = vsub.f32 %v2836_v24, %v3177_v45  ;;  %v4931_v53 = vsub.f32 %v2817_v10, %v3177_v45  ;;  %v4932_v18 = vsub.f32 %v2829_v19, %v3177_v45 }
 0x1ba   : > { %vm1306_vm4 = vcmp.ge.f32.partialorder %v3371_v52, 0.0  ;;  %vm1307_vm5 = vcmp.ge.f32.partialorder %v3377_v48, 0.0  ;;  %vm1308_vm6 = vcmp.ge.f32.partialorder %v3383_v50, 0.0  ;;  %vm1309_vm7 = vcmp.ge.f32.partialorder %v3389_v61, 0.0 }
 0x1bb   : > { %v3395_v6 = vmul.f32 %v3315_v62, %v4929_v23  ;;  %v3401_v56 = vmul.f32 %v3315_v62, %v4930_v9  ;;  %v3407_v1 = vmul.f32 %v3315_v62, %v4931_v53  ;;  %v3413_v15 = vmul.f32 %v3315_v62, %v4932_v18 }
 0x1bc   : > { %v4933_v23 = vsub.f32 %v2848_v33, %v3177_v45  ;;  %v4934_v9 = vsub.f32 %v2860_v42, %v3177_v45  ;;  %v4935_v53 = vsub.f32 %v2841_v28, %v3177_v45  ;;  %v4936_v18 = vsub.f32 %v2853_v37, %v3177_v45 }
 0x1bd   : > { %vm1310_vm8 = vcmp.ge.f32.partialorder %v3395_v6, 0.0  ;;  %vm1311_vm9 = vcmp.ge.f32.partialorder %v3401_v56, 0.0  ;;  %vm1312_vm10 = vcmp.ge.f32.partialorder %v3407_v1, 0.0  ;;  %vm1313_vm11 = vcmp.ge.f32.partialorder %v3413_v15, 0.0 }
 0x1be   : > { %v3419_v24 = vmul.f32 %v3315_v62, %v4933_v23  ;;  %v3425_v10 = vmul.f32 %v3315_v62, %v4934_v9  ;;  %v3431_v19 = vmul.f32 %v3315_v62, %v4935_v53  ;;  %v3437_v33 = vmul.f32 %v3315_v62, %v4936_v18 }
 0x1bf   : > { %v4937_v23 = vsub.f32 %v2872_v57, %v3177_v45  ;;  %v4938_v9 = vsub.f32 %v2884_v7, %v3177_v45  ;;  %v4939_v53 = vsub.f32 %v2865_v46, %v3177_v45  ;;  %v4940_v18 = vsub.f32 %v2877_v63, %v3177_v45 }
 0x1c0   : > { %vm1314_vm12 = vcmp.ge.f32.partialorder %v3419_v24, 0.0  ;;  %vm1315_vm13 = vcmp.ge.f32.partialorder %v3425_v10, 0.0  ;;  %vm1316_vm14 = vcmp.ge.f32.partialorder %v3431_v19, 0.0  ;;  %vm1317_vm15 = vcmp.ge.f32.partialorder %v3437_v33, 0.0 }
 0x1c1   : > { %v3443_v42 = vmul.f32 %v3315_v62, %v4937_v23  ;;  %v3449_v28 = vmul.f32 %v3315_v62, %v4938_v9  ;;  %v3455_v37 = vmul.f32 %v3315_v62, %v4939_v53  ;;  %v3461_v57 = vmul.f32 %v3315_v62, %v4940_v18 }
 0x1c2   : > { %v4941_v23 = vsub.f32 %v2896_v20, %v3177_v45  ;;  %v4942_v9 = vsub.f32 %v2908_v34, %v3177_v45  ;;  %v4943_v53 = vsub.f32 %v2889_v12, %v3177_v45  ;;  %v4944_v18 = vsub.f32 %v2901_v26, %v3177_v45 }
 0x1c4   : > { %v3467_v7 = vmul.f32 %v3315_v62, %v4941_v23  ;;  %v3473_v46 = vmul.f32 %v3315_v62, %v4942_v9  ;;  %v3479_v63 = vmul.f32 %v3315_v62, %v4943_v53  ;;  %v3485_v20 = vmul.f32 %v3315_v62, %v4944_v18 }
 0x1c5   : > { %v4945_v23 = vsub.f32 %v2920_v47, %v3177_v45  ;;  %v4946_v9 = vsub.f32 %v2932_v8, %v3177_v45  ;;  %v4947_v53 = vsub.f32 %v2913_v39, %v3177_v45  ;;  %v4948_v18 = vsub.f32 %v2925_v59, %v3177_v45 }
 0x1c7   : > { %v3491_v34 = vmul.f32 %v3315_v62, %v4945_v23  ;;  %v3497_v12 = vmul.f32 %v3315_v62, %v4946_v9  ;;  %v3503_v26 = vmul.f32 %v3315_v62, %v4947_v53  ;;  %v3509_v47 = vmul.f32 %v3315_v62, %v4948_v18 }
 0x1c8   : > { %v4949_v23 = vsub.f32 %v4884_v27, %v3177_v45  ;;  %v4950_v9 = vsub.f32 %v4885_v29, %v3177_v45  ;;  %v4951_v53 = vsub.f32 %v4886_v35, %v3177_v45  ;;  %v4952_v18 = vsub.f32 %v4887_v17, %v3177_v45 }
 0x1ca   : > { %v3515_v8 = vmul.f32 %v3315_v62, %v4949_v23  ;;  %v3521_v39 = vmul.f32 %v3315_v62, %v4950_v9  ;;  %v3527_v59 = vmul.f32 %v3315_v62, %v4951_v53  ;;  %v3533_v27 = vmul.f32 %v3315_v62, %v4952_v18 }
 0x1cb   : > { %v4953_v23 = vsub.f32 %v4888_v30, %v3177_v45  ;;  %v4954_v9 = vsub.f32 %v4889_v14, %v3177_v45  ;;  %v4955_v53 = vsub.f32 %v4890_v2, %v3177_v45  ;;  %v4957_v18 = vsub.f32 %v4891_v25, %v3177_v45 }
 0x1cd   : > { %v3539_v29 = vmul.f32 %v3315_v62, %v4953_v23  ;;  %v3545_v35 = vmul.f32 %v3315_v62, %v4954_v9  ;;  %v3551_v17 = vmul.f32 %v3315_v62, %v4955_v53  ;;  %v3557_v30 = vmul.f32 %v3315_v62, %v4957_v18  ;;  %v4961_v53 = vld [vmem:[#allocation23_spill] sm:$0xff] }
 0x1ce   : > { %v4958_v23 = vsub.f32 %v4892_v16, %v3177_v45  ;;  %v4959_v9 = vsub.f32 %v4893_v21, %v3177_v45  ;;  %v4964_v18 = vsub.f32 %v2997_v40, %v3177_v45 }
 0x1cf   : > { %4956 = vst [vmem:[#allocation14_spill] sm:$0xff] %v3551_v17  ;;  %v4962_v17 = vsub.f32 %v4961_v53, %v3177_v45 }
 0x1d0   : > { %v3563_v14 = vmul.f32 %v3315_v62, %v4958_v23  ;;  %v3569_v2 = vmul.f32 %v3315_v62, %v4959_v9  ;;  %v3581_v16 = vmul.f32 %v3315_v62, %v4964_v18  ;;  %v4965_v23 = vsub.f32 %v4894_v22, %v3177_v45  ;;  %v4966_v9 = vld [vmem:[#allocation4_spill] sm:$0xff] }
 0x1d1   : > { %v3575_v25 = vmul.f32 %v3315_v62, %v4962_v17  ;;  %v4969_v17 = vld [vmem:[#allocation2_spill] sm:$0xff]  ;;  %v4972_v18 = vsub.f32 %v2810_v5, %v3177_v45 }
 0x1d2   : > { %4960 = vst [vmem:[#allocation16_spill] sm:$0xff] %v3569_v2  ;;  %v3587_v21 = vmul.f32 %v3315_v62, %v4965_v23  ;;  %v4967_v2 = vsub.f32 %v4966_v9, %v3177_v45  ;;  %v4973_v23 = vsub.f32 %v4896_v13, %v3177_v45 }
 0x1d3   : > { %4963 = vst [vmem:[#allocation12_spill] sm:$0xff] %v3575_v25  ;;  %v4970_v25 = vsub.f32 %v4969_v17, %v3177_v45  ;;  %v3605_v22 = vmul.f32 %v3315_v62, %v4972_v18  ;;  %v4980_v18 = vsub.f32 %v2858_v41, %v3177_v45 }
 0x1d4   : > { %v3593_v53 = vmul.f32 %v3315_v62, %v4967_v2  ;;  %v3611_v9 = vmul.f32 %v3315_v62, %v4973_v23  ;;  %v4974_v2 = vld [vmem:[#allocation7_spill] sm:$0xff]  ;;  %v4981_v23 = vsub.f32 %v4898_v36, %v3177_v45 }
 0x1d5   : > { %v3599_v40 = vmul.f32 %v3315_v62, %v4970_v25  ;;  %v4977_v25 = vld [vmem:[#allocation5_spill] sm:$0xff]  ;;  %v3629_v13 = vmul.f32 %v3315_v62, %v4980_v18  ;;  %v4988_v18 = vsub.f32 %v2906_v31, %v3177_v45 }
 0x1d6   : > { %4968 = vst [vmem:[#allocation15_spill] sm:$0xff] %v3593_v53  ;;  %v4975_v53 = vsub.f32 %v4974_v2, %v3177_v45  ;;  %v3635_v2 = vmul.f32 %v3315_v62, %v4981_v23  ;;  %v4989_v23 = vsub.f32 %v4900_v11, %v3177_v45 }
 0x1d7   : > { %4971 = vst [vmem:[#allocation19_spill] sm:$0xff] %v3599_v40  ;;  %v4978_v40 = vsub.f32 %v4977_v25, %v3177_v45  ;;  %v3653_v36 = vmul.f32 %v3315_v62, %v4988_v18  ;;  %v4996_v18 = vsub.f32 %v2954_v44, %v3177_v45 }
 0x1d8   : > { %v3617_v17 = vmul.f32 %v3315_v62, %v4975_v53  ;;  %v4982_v53 = vld [vmem:[#allocation10_spill] sm:$0xff] }
 0x1d9   : > { %v3623_v5 = vmul.f32 %v3315_v62, %v4978_v40  ;;  %v4985_v40 = vld [vmem:[#allocation8_spill] sm:$0xff]  ;;  %v3677_v11 = vmul.f32 %v3315_v62, %v4996_v18  ;;  %v5006_v18 = vld [vmem:[#allocation26_spill] sm:$0xff] }
 0x1da   : > { %4976 = vst [vmem:[#allocation22_spill] sm:$0xff] %v3617_v17  ;;  %v4983_v17 = vsub.f32 %v4982_v53, %v3177_v45  ;;  %v3659_v53 = vmul.f32 %v3315_v62, %v4989_v23  ;;  %v4998_v23 = vsub.f32 %v4902_v51, %v3177_v45 }
 0x1db   : > { %4979 = vst [vmem:[#allocation17_spill] sm:$0xff] %v3623_v5  ;;  %v4986_v5 = vsub.f32 %v4985_v40, %v3177_v45  ;;  %4997 = vst [vmem:[#allocation6_spill] sm:$0xff] %v3677_v11  ;;  %v5007_v11 = vsub.f32 %v5006_v18, %v3177_v45 }
 0x1dc   : > { %v3641_v25 = vmul.f32 %v3315_v62, %v4983_v17  ;;  %v4990_v17 = vld [vmem:[#allocation18_spill] sm:$0xff] }
 0x1dd   : > { %v3647_v41 = vmul.f32 %v3315_v62, %v4986_v5  ;;  %v4993_v5 = vld [vmem:[#allocation11_spill] sm:$0xff]  ;;  %v3701_v51 = vmul.f32 %v3315_v62, %v5007_v11 }
 0x1de   : > { %4984 = vst [vmem:[#allocation20_spill] sm:$0xff] %v3641_v25  ;;  %v4991_v25 = vsub.f32 %v4990_v17, %v3177_v45  ;;  %v3683_v17 = vmul.f32 %v3315_v62, %v4998_v23  ;;  %v5009_v23 = vld [vmem:[#allocation30_spill] sm:$0xff]  ;;  %v5018_v11 = vld [vmem:[#allocation31_spill] sm:$0xff] }
 0x1df   : > { %4987 = vst [vmem:[#allocation25_spill] sm:$0xff] %v3647_v41  ;;  %v4994_v41 = vsub.f32 %v4993_v5, %v3177_v45  ;;  %5008 = vst [vmem:[#allocation44_spill] sm:$0xff] %v3701_v51  ;;  %v5019_v51 = vsub.f32 %v5018_v11, %v3177_v45 }
 0x1e0   : > { %v3665_v40 = vmul.f32 %v3315_v62, %v4991_v25  ;;  %4999 = vst [vmem:[#allocation9_spill] sm:$0xff] %v3683_v17  ;;  %v5000_v25 = vld [vmem:[#allocation28_spill] sm:$0xff]  ;;  %v5010_v17 = vsub.f32 %v5009_v23, %v3177_v45 }
 0x1e1   : > { %v3671_v31 = vmul.f32 %v3315_v62, %v4994_v41  ;;  %v5003_v41 = vld [vmem:[#allocation21_spill] sm:$0xff]  ;;  %v3725_v23 = vmul.f32 %v3315_v62, %v5019_v51  ;;  %v5030_v51 = vld [vmem:[#allocation35_spill] sm:$0xff] }
 0x1e2   : > { %4992 = vst [vmem:[#allocation27_spill] sm:$0xff] %v3665_v40  ;;  %v5001_v40 = vsub.f32 %v5000_v25, %v3177_v45  ;;  %v3707_v25 = vmul.f32 %v3315_v62, %v5010_v17  ;;  %v5021_v17 = vld [vmem:[#allocation34_spill] sm:$0xff] }
 0x1e3   : > { %4995 = vst [vmem:[#allocation3_spill] sm:$0xff] %v3671_v31  ;;  %v5004_v31 = vsub.f32 %v5003_v41, %v3177_v45  ;;  %5020 = vst [vmem:[#allocation48_spill] sm:$0xff] %v3725_v23  ;;  %v5031_v23 = vsub.f32 %v5030_v51, %v3177_v45 }
 0x1e4   : > { %v3689_v5 = vmul.f32 %v3315_v62, %v5001_v40  ;;  %5011 = vst [vmem:[#allocation41_spill] sm:$0xff] %v3707_v25  ;;  %v5012_v40 = vld [vmem:[#allocation32_spill] sm:$0xff]  ;;  %v5022_v25 = vsub.f32 %v5021_v17, %v3177_v45 }
 0x1e5   : > { %v3695_v44 = vmul.f32 %v3315_v62, %v5004_v31  ;;  %v5015_v31 = vld [vmem:[#allocation29_spill] sm:$0xff]  ;;  %v3749_v17 = vmul.f32 %v3315_v62, %v5031_v23  ;;  %v5040_v23 = vld [vmem:[#allocation39_spill] sm:$0xff] }
 0x1e6   : > { %5002 = vst [vmem:[#allocation13_spill] sm:$0xff] %v3689_v5  ;;  %v5013_v5 = vsub.f32 %v5012_v40, %v3177_v45  ;;  %v3731_v40 = vmul.f32 %v3315_v62, %v5022_v25  ;;  %v5033_v25 = vld [vmem:[#allocation38_spill] sm:$0xff] }
 0x1e7   : > { %5005 = vst [vmem:[#allocation24_spill] sm:$0xff] %v3695_v44  ;;  %v5016_v44 = vsub.f32 %v5015_v31, %v3177_v45  ;;  %5032 = vst [vmem:[#allocation4_spill] sm:$0xff] %v3749_v17  ;;  %v5041_v17 = vsub.f32 %v5040_v23, %v3177_v45 }
 0x1e8   : > { %v3713_v41 = vmul.f32 %v3315_v62, %v5013_v5  ;;  %5023 = vst [vmem:[#allocation45_spill] sm:$0xff] %v3731_v40  ;;  %v5024_v5 = vld [vmem:[#allocation36_spill] sm:$0xff]  ;;  %v5034_v40 = vsub.f32 %v5033_v25, %v3177_v45 }
 0x1e9   : > { %v3719_v18 = vmul.f32 %v3315_v62, %v5016_v44  ;;  %v5027_v44 = vld [vmem:[#allocation33_spill] sm:$0xff]  ;;  %v3773_v25 = vmul.f32 %v3315_v62, %v5041_v17  ;;  %v5050_v17 = vsub.f32 %v4916_v60, %v3177_v45  ;;  %v1382_v60 = vmul.f32 0.2, %v3347_v38 }
 0x1ea   : > { %5014 = vst [vmem:[#allocation43_spill] sm:$0xff] %v3713_v41  ;;  %v5025_v41 = vsub.f32 %v5024_v5, %v3177_v45  ;;  %v3755_v5 = vmul.f32 %v3315_v62, %v5034_v40  ;;  %v5043_v40 = vld [vmem:[#allocation42_spill] sm:$0xff] }
 0x1eb   : > { %5017 = vst [vmem:[#allocation46_spill] sm:$0xff] %v3719_v18  ;;  %v5028_v18 = vsub.f32 %v5027_v44, %v3177_v45  ;;  %5042 = vst [vmem:[#allocation7_spill] sm:$0xff] %v3773_v25 }
 0x1ec   : > { %v3737_v31 = vmul.f32 %v3315_v62, %v5025_v41  ;;  %5035 = vst [vmem:[#allocation2_spill] sm:$0xff] %v3755_v5  ;;  %v5036_v41 = vld [vmem:[#allocation40_spill] sm:$0xff]  ;;  %v5044_v5 = vsub.f32 %v5043_v40, %v3177_v45  ;;  %v3797_v40 = vmul.f32 %v3315_v62, %v5050_v17  ;;  %v1384_v17 = vmul.f32 0.2, %v3359_v4 }
 0x1ed   : > { %v3743_v11 = vmul.f32 %v3315_v62, %v5028_v18  ;;  %v5038_v18 = vld [vmem:[#allocation37_spill] sm:$0xff] }
 0x1ee   : > { %5026 = vst [vmem:[#allocation47_spill] sm:$0xff] %v3737_v31  ;;  %v5037_v31 = vsub.f32 %v5036_v41, %v3177_v45  ;;  %v3779_v41 = vmul.f32 %v3315_v62, %v5044_v5  ;;  %5051 = vst [vmem:[#allocation18_spill] sm:$0xff] %v3797_v40  ;;  %v5052_v5 = vsub.f32 %v4917_v32, %v3177_v45  ;;  %v1390_v40 = vmul.f32 0.2, %v3395_v6 }
 0x1ef   : > { %5029 = vst [vmem:[#allocation23_spill] sm:$0xff] %v3743_v11  ;;  %v5039_v11 = vsub.f32 %v5038_v18, %v3177_v45 }
 0x1f0   : > { %v3761_v44 = vmul.f32 %v3315_v62, %v5037_v31  ;;  %5045 = vst [vmem:[#allocation5_spill] sm:$0xff] %v3779_v41  ;;  %v5046_v31 = vsub.f32 %v4914_v55, %v3177_v45  ;;  %v3803_v55 = vmul.f32 %v3315_v62, %v5052_v5  ;;  %v5058_v5 = vsub.f32 %v4920_v54, %v3177_v45 }
 0x1f1   : > { %v3767_v51 = vmul.f32 %v3315_v62, %v5039_v11  ;;  %v5048_v11 = vsub.f32 %v4915_v3, %v3177_v45  ;;  %v1392_v54 = vmul.f32 0.2, %v3407_v1 }
 0x1f2   : > { %v3785_v18 = vmul.f32 %v3315_v62, %v5046_v31  ;;  %5053 = vst [vmem:[#allocation11_spill] sm:$0xff] %v3803_v55  ;;  %v5054_v31 = vsub.f32 %v4918_v0, %v3177_v45  ;;  %v5056_v0 = vsub.f32 %v4919_v43, %v3177_v45  ;;  %v1385_v43 = vmul.f32 0.2, %v3365_v49 }
 0x1f3   : > { %v3791_v23 = vmul.f32 %v3315_v62, %v5048_v11  ;;  %v1383_v11 = vmul.f32 0.2, %v3353_v58  ;;  %v1389_v55 = vmul.f32 0.2, %v3389_v61  ;;  %v3847_v45 = vsel %vm1302_vm0, %v3347_v38, %v1382_v60 }
 0x1f4   : > { %5047 = vst [vmem:[#allocation10_spill] sm:$0xff] %v3785_v18  ;;  %v3809_v3 = vmul.f32 %v3315_v62, %v5054_v31  ;;  %v3824_v32 = vmul.f32 %v3315_v62, %v5056_v0  ;;  %v3834_v31 = vmul.f32 %v3315_v62, %v5058_v5  ;;  %v1386_v0 = vmul.f32 0.2, %v3371_v52  ;;  %5060 = vst [vmem:[#allocation30_spill] sm:$0xff] %v3847_v45 }
 0x1f5   : > { %5049 = vst [vmem:[#allocation8_spill] sm:$0xff] %v3791_v23  ;;  %v1391_v62 = vmul.f32 0.2, %v3401_v56  ;;  %v1393_v5 = vmul.f32 0.2, %v3413_v15  ;;  %v3867_v45 = vsel %vm1304_vm2, %v3359_v4, %v1384_v17  ;;  %vm1318_vm0 = vcmp.ge.f32.partialorder %v3443_v42, 0.0 }
 0x1f6   : > { %5055 = vst [vmem:[#allocation28_spill] sm:$0xff] %v3809_v3  ;;  %5057 = vst [vmem:[#allocation21_spill] sm:$0xff] %v3824_v32  ;;  %v1387_v32 = vmul.f32 0.2, %v3377_v48  ;;  %v1388_v3 = vmul.f32 0.2, %v3383_v50  ;;  %v3897_v41 = vsel %vm1306_vm4, %v3371_v52, %v1386_v0 }
 0x1f7   : > { %5059 = vst [vmem:[#allocation26_spill] sm:$0xff] %v3834_v31  ;;  %v3856_v31 = vsel %vm1303_vm1, %v3353_v58, %v1383_v11  ;;  %v1394_v23 = vmul.f32 0.2, %v3419_v24  ;;  %v1395_v38 = vmul.f32 0.2, %v3425_v10  ;;  %5062 = vst [vmem:[#allocation29_spill] sm:$0xff] %v3867_v45 }
 0x1f8   : > { %5061 = vst [vmem:[#allocation32_spill] sm:$0xff] %v3856_v31  ;;  %v3862_v60 = vmul.f32 0.2, %v3431_v19  ;;  %v3871_v18 = vmul.f32 0.2, %v3437_v33  ;;  %v3882_v31 = vsel %vm1305_vm3, %v3365_v49, %v1385_v43  ;;  %5064 = vst [vmem:[#allocation34_spill] sm:$0xff] %v3897_v41  ;;  %v3912_v25 = vsel %vm1307_vm5, %v3377_v48, %v1387_v32 }
 0x1f9   : > { %v3874_v58 = vmul.f32 0.2, %v3443_v42  ;;  %v3877_v11 = vmul.f32 0.2, %v3449_v28  ;;  %5063 = vst [vmem:[#allocation31_spill] sm:$0xff] %v3882_v31  ;;  %5066 = vst [vmem:[#allocation33_spill] sm:$0xff] %v3912_v25 }
 0x1fa   : > { %v3886_v4 = vmul.f32 0.2, %v3455_v37  ;;  %v3889_v17 = vmul.f32 0.2, %v3461_v57  ;;  %v3892_v45 = vmul.f32 0.2, %v3467_v7 }
 0x1fb   : > { %v3901_v49 = vmul.f32 0.2, %v3473_v46  ;;  %v3904_v43 = vmul.f32 0.2, %v3479_v63  ;;  %v3907_v31 = vmul.f32 0.2, %v3485_v20 }
 0x1fc   : > { %vm1319_vm1 = vcmp.ge.f32.partialorder %v3449_v28, 0.0  ;;  %v3916_v52 = vmul.f32 0.2, %v3491_v34  ;;  %v3919_v0 = vmul.f32 0.2, %v3497_v12  ;;  %vm1320_vm2 = vcmp.ge.f32.partialorder %v3455_v37, 0.0 }
 0x1fd   : > { %5065 = vst [vmem:[#allocation36_spill] sm:$0xff] %v3907_v31  ;;  %v3922_v41 = vmul.f32 0.2, %v3503_v26  ;;  %v3927_v31 = vsel %vm1308_vm6, %v3383_v50, %v1388_v3  ;;  %v3931_v48 = vmul.f32 0.2, %v3509_v47  ;;  %vm1321_vm3 = vcmp.ge.f32.partialorder %v3461_v57, 0.0 }
 0x1fe   : > { %5068 = vst [vmem:[#allocation38_spill] sm:$0xff] %v3927_v31  ;;  %v3934_v32 = vmul.f32 0.2, %v3515_v8  ;;  %v3937_v25 = vmul.f32 0.2, %v3521_v39  ;;  %vm1322_vm4 = vcmp.ge.f32.partialorder %v3467_v7, 0.0 }
 0x1ff   : > { %5067 = vst [vmem:[#allocation35_spill] sm:$0xff] %v3922_v41  ;;  %v3942_v41 = vsel %vm1309_vm7, %v3389_v61, %v1389_v55  ;;  %v3946_v50 = vmul.f32 0.2, %v3527_v59  ;;  %v3949_v3 = vmul.f32 0.2, %v3533_v27  ;;  %v5076_v55 = vld [vmem:[#allocation14_spill] sm:$0xff] }
 0x200   : > { %5069 = vst [vmem:[#allocation40_spill] sm:$0xff] %v3937_v25  ;;  %5070 = vst [vmem:[#allocation37_spill] sm:$0xff] %v3942_v41  ;;  %v3952_v31 = vmul.f32 0.2, %v3539_v29  ;;  %v3957_v25 = vsel %vm1310_vm8, %v3395_v6, %v1390_v40  ;;  %v3961_v61 = vmul.f32 0.2, %v3545_v35 }
 0x201   : > { %5071 = vst [vmem:[#allocation39_spill] sm:$0xff] %v3946_v50  ;;  %5072 = vst [vmem:[#allocation42_spill] sm:$0xff] %v3949_v3  ;;  %v3964_v41 = vmul.f32 0.2, %v5076_v55  ;;  %v3967_v50 = vmul.f32 0.2, %v3557_v30 }
 0x202   : > { %5073 = vst [vmem:[#allocation49_spill] sm:$0xff] %v3952_v31  ;;  %5074 = vst [vmem:[#allocation50_spill] sm:$0xff] %v3957_v25  ;;  %v3972_v31 = vsel %vm1311_vm9, %v3401_v56, %v1391_v62  ;;  %vm1323_vm5 = vcmp.ge.f32.partialorder %v3473_v46, 0.0  ;;  %v3976_v6 = vmul.f32 0.2, %v3563_v14  ;;  %v5080_v40 = vld [vmem:[#allocation16_spill] sm:$0xff] }
 0x203   : > { %5075 = vst [vmem:[#allocation51_spill] sm:$0xff] %v3961_v61  ;;  %5077 = vst [vmem:[#allocation14_spill] sm:$0xff] %v3967_v50  ;;  %v3979_v25 = vmul.f32 0.2, %v5080_v40  ;;  %v5081_v61 = vld [vmem:[#allocation12_spill] sm:$0xff]  ;;  %v3987_v50 = vsel %vm1312_vm10, %v3407_v1, %v1392_v54  ;;  %vm1324_vm6 = vcmp.ge.f32.partialorder %v3479_v63, 0.0 }
 0x204   : > { %5078 = vst [vmem:[#allocation52_spill] sm:$0xff] %v3972_v31  ;;  %5079 = vst [vmem:[#allocation53_spill] sm:$0xff] %v3976_v6  ;;  %v3982_v3 = vmul.f32 0.2, %v5081_v61  ;;  %v3991_v56 = vmul.f32 0.2, %v3581_v16 }
 0x205   : > { %5083 = vst [vmem:[#allocation12_spill] sm:$0xff] %v3987_v50  ;;  %v3994_v62 = vmul.f32 0.2, %v3587_v21  ;;  %v5085_v31 = vld [vmem:[#allocation15_spill] sm:$0xff]  ;;  %vm1325_vm7 = vcmp.ge.f32.partialorder %v3485_v20, 0.0  ;;  %vm1326_vm8 = vcmp.ge.f32.partialorder %v3491_v34, 0.0 }
 0x206   : > { %5082 = vst [vmem:[#allocation16_spill] sm:$0xff] %v3982_v3  ;;  %5084 = vst [vmem:[#allocation54_spill] sm:$0xff] %v3991_v56  ;;  %v3997_v6 = vmul.f32 0.2, %v5085_v31  ;;  %v4002_v3 = vsel %vm1313_vm11, %v3413_v15, %v1393_v5  ;;  %v5088_v1 = vld [vmem:[#allocation19_spill] sm:$0xff]  ;;  %v5093_v15 = vld [vmem:[#allocation22_spill] sm:$0xff] }
 0x207   : > { %5087 = vst [vmem:[#allocation56_spill] sm:$0xff] %v4002_v3  ;;  %v4006_v54 = vmul.f32 0.2, %v5088_v1  ;;  %v4009_v50 = vmul.f32 0.2, %v3605_v22  ;;  %v5095_v3 = vld [vmem:[#allocation17_spill] sm:$0xff] }
 0x208   : > { %5086 = vst [vmem:[#allocation55_spill] sm:$0xff] %v3997_v6  ;;  %v4012_v56 = vmul.f32 0.2, %v3611_v9  ;;  %v4017_v6 = vsel %vm1314_vm12, %v3419_v24, %v1394_v23  ;;  %v4022_v5 = vmul.f32 0.2, %v5093_v15  ;;  %vm1328_vm10 = vcmp.ge.f32.partialorder %v3503_v26, 0.0 }
 0x209   : > { %5089 = vst [vmem:[#allocation19_spill] sm:$0xff] %v4006_v54  ;;  %5090 = vst [vmem:[#allocation57_spill] sm:$0xff] %v4009_v50  ;;  %v4025_v54 = vmul.f32 0.2, %v5095_v3  ;;  %v4028_v50 = vmul.f32 0.2, %v3629_v13 }
 0x20a   : > { %5091 = vst [vmem:[#allocation58_spill] sm:$0xff] %v4012_v56  ;;  %5092 = vst [vmem:[#allocation59_spill] sm:$0xff] %v4017_v6  ;;  %v4033_v56 = vsel %vm1315_vm13, %v3425_v10, %v1395_v38  ;;  %v4040_v24 = vmul.f32 0.2, %v3635_v2  ;;  %v5100_v23 = vld [vmem:[#allocation20_spill] sm:$0xff]  ;;  %v4052_v10 = vsel %vm1316_vm14, %v3431_v19, %v3862_v60  ;;  %vm1332_vm13 = vcmp.ge.f32.partialorder %v3527_v59, 0.0 }
 0x20b   : > { %5094 = vst [vmem:[#allocation60_spill] sm:$0xff] %v4022_v5  ;;  %5096 = vst [vmem:[#allocation17_spill] sm:$0xff] %v4025_v54  ;;  %v4043_v6 = vmul.f32 0.2, %v5100_v23  ;;  %v4059_v38 = vmul.f32 0.2, %v3653_v36  ;;  %v4071_v19 = vsel %vm1317_vm15, %v3437_v33, %v3871_v18  ;;  %v4090_v33 = vsel %vm1318_vm0, %v3443_v42, %v3874_v58 }
 0x20c   : > { %5097 = vst [vmem:[#allocation61_spill] sm:$0xff] %v4028_v50  ;;  %5098 = vst [vmem:[#allocation62_spill] sm:$0xff] %v4033_v56  ;;  %v5102_v50 = vld [vmem:[#allocation25_spill] sm:$0xff]  ;;  %v4062_v56 = vmul.f32 0.2, %v3659_v53  ;;  %vm1336_vm14 = vcmp.ge.f32.partialorder %v5076_v55, 0.0  ;;  %v4109_v42 = vsel %vm1319_vm1, %v3449_v28, %v3877_v11  ;;  %v4128_v28 = vsel %vm1320_vm2, %v3455_v37, %v3886_v4 }
 0x20d   : > { %5099 = vst [vmem:[#allocation63_spill] sm:$0xff] %v4040_v24  ;;  %5101 = vst [vmem:[#allocation64_spill] sm:$0xff] %v4043_v6  ;;  %v4046_v54 = vmul.f32 0.2, %v5102_v50  ;;  %v5110_v60 = vld [vmem:[#allocation3_spill] sm:$0xff]  ;;  %vm1340_vm15 = vcmp.ge.f32.partialorder %v5081_v61, 0.0  ;;  %v4147_v37 = vsel %vm1321_vm3, %v3461_v57, %v3889_v17  ;;  %v4166_v57 = vsel %vm1322_vm4, %v3467_v7, %v3892_v45 }
 0x20e   : > { %5104 = vst [vmem:[#allocation65_spill] sm:$0xff] %v4052_v10  ;;  %5105 = vst [vmem:[#allocation66_spill] sm:$0xff] %v4059_v38  ;;  %v4078_v10 = vmul.f32 0.2, %v5110_v60  ;;  %v5117_v18 = vld [vmem:[#allocation13_spill] sm:$0xff]  ;;  %vm1344_vm0 = vcmp.ge.f32.partialorder %v5088_v1, 0.0  ;;  %v4185_v7 = vsel %vm1323_vm5, %v3473_v46, %v3901_v49  ;;  %v4204_v46 = vsel %vm1324_vm6, %v3479_v63, %v3904_v43 }
 0x20f   : > { %5103 = vst [vmem:[#allocation25_spill] sm:$0xff] %v4046_v54  ;;  %5106 = vst [vmem:[#allocation67_spill] sm:$0xff] %v4062_v56  ;;  %v5107_v54 = vld [vmem:[#allocation27_spill] sm:$0xff]  ;;  %v5112_v56 = vld [vmem:[#allocation6_spill] sm:$0xff]  ;;  %vm1348_vm1 = vcmp.ge.f32.partialorder %v5095_v3, 0.0  ;;  %vm1352_vm2 = vcmp.ge.f32.partialorder %v5102_v50, 0.0 }
 0x210   : > { %v4065_v6 = vmul.f32 0.2, %v5107_v54  ;;  %5109 = vst [vmem:[#allocation68_spill] sm:$0xff] %v4071_v19  ;;  %5111 = vst [vmem:[#allocation3_spill] sm:$0xff] %v4078_v10  ;;  %v4081_v38 = vmul.f32 0.2, %v5112_v56 }
 0x211   : > { %5116 = vst [vmem:[#allocation69_spill] sm:$0xff] %v4090_v33  ;;  %v4097_v19 = vmul.f32 0.2, %v5117_v18  ;;  %5123 = vst [vmem:[#allocation70_spill] sm:$0xff] %v4109_v42  ;;  %v5124_v58 = vld [vmem:[#allocation41_spill] sm:$0xff]  ;;  %v5131_v11 = vld [vmem:[#allocation48_spill] sm:$0xff] }
 0x212   : > { %5108 = vst [vmem:[#allocation27_spill] sm:$0xff] %v4065_v6  ;;  %5113 = vst [vmem:[#allocation6_spill] sm:$0xff] %v4081_v38  ;;  %v5114_v6 = vld [vmem:[#allocation9_spill] sm:$0xff]  ;;  %v5119_v38 = vld [vmem:[#allocation24_spill] sm:$0xff]  ;;  %v4116_v33 = vmul.f32 0.2, %v5124_v58 }
 0x213   : > { %v4084_v24 = vmul.f32 0.2, %v5114_v6  ;;  %5118 = vst [vmem:[#allocation13_spill] sm:$0xff] %v4097_v19  ;;  %v4100_v10 = vmul.f32 0.2, %v5119_v38  ;;  %5130 = vst [vmem:[#allocation73_spill] sm:$0xff] %v4128_v28 }
 0x214   : > { %5125 = vst [vmem:[#allocation71_spill] sm:$0xff] %v4116_v33  ;;  %v4135_v42 = vmul.f32 0.2, %v5131_v11  ;;  %5137 = vst [vmem:[#allocation74_spill] sm:$0xff] %v4147_v37  ;;  %v5138_v4 = vld [vmem:[#allocation23_spill] sm:$0xff]  ;;  %vm1356_vm3 = vcmp.ge.f32.partialorder %v5110_v60, 0.0 }
 0x215   : > { %5115 = vst [vmem:[#allocation9_spill] sm:$0xff] %v4084_v24  ;;  %5120 = vst [vmem:[#allocation24_spill] sm:$0xff] %v4100_v10  ;;  %v5121_v24 = vld [vmem:[#allocation44_spill] sm:$0xff]  ;;  %v5126_v10 = vld [vmem:[#allocation43_spill] sm:$0xff]  ;;  %v4154_v28 = vmul.f32 0.2, %v5138_v4 }
 0x216   : > { %v4103_v5 = vmul.f32 0.2, %v5121_v24  ;;  %v4119_v19 = vmul.f32 0.2, %v5126_v10  ;;  %5132 = vst [vmem:[#allocation48_spill] sm:$0xff] %v4135_v42  ;;  %5144 = vst [vmem:[#allocation75_spill] sm:$0xff] %v4166_v57 }
 0x217   : > { %5139 = vst [vmem:[#allocation23_spill] sm:$0xff] %v4154_v28  ;;  %v4173_v17 = vmul.f32 0.2, %v3761_v44  ;;  %v4176_v37 = vmul.f32 0.2, %v3767_v51  ;;  %5149 = vst [vmem:[#allocation78_spill] sm:$0xff] %v4185_v7 }
 0x218   : > { %5122 = vst [vmem:[#allocation44_spill] sm:$0xff] %v4103_v5  ;;  %5127 = vst [vmem:[#allocation72_spill] sm:$0xff] %v4119_v19  ;;  %v5128_v5 = vld [vmem:[#allocation46_spill] sm:$0xff]  ;;  %v5133_v19 = vld [vmem:[#allocation45_spill] sm:$0xff]  ;;  %vm1360_vm4 = vcmp.ge.f32.partialorder %v5119_v38, 0.0  ;;  %vm1372_vm11 = vcmp.ge.f32.partialorder %v3767_v51, 0.0 }
 0x219   : > { %v4122_v31 = vmul.f32 0.2, %v5128_v5  ;;  %v4138_v33 = vmul.f32 0.2, %v5133_v19  ;;  %5145 = vst [vmem:[#allocation76_spill] sm:$0xff] %v4173_v17  ;;  %5146 = vst [vmem:[#allocation77_spill] sm:$0xff] %v4176_v37 }
 0x21a   : > { %v5150_v45 = vld [vmem:[#allocation5_spill] sm:$0xff]  ;;  %v5152_v37 = vld [vmem:[#allocation10_spill] sm:$0xff]  ;;  %5156 = vst [vmem:[#allocation79_spill] sm:$0xff] %v4204_v46  ;;  %vm1364_vm5 = vcmp.ge.f32.partialorder %v5128_v5, 0.0  ;;  %v5162_v58 = vld [vmem:[#allocation36_spill] sm:$0xff]  ;;  %vm5172_vm6 = vcmp.ge.f32.partialorder %v3521_v39, 0.0 }
 0x21b   : > { %5129 = vst [vmem:[#allocation46_spill] sm:$0xff] %v4122_v31  ;;  %5134 = vst [vmem:[#allocation45_spill] sm:$0xff] %v4138_v33  ;;  %v5135_v31 = vld [vmem:[#allocation47_spill] sm:$0xff]  ;;  %v5140_v33 = vld [vmem:[#allocation4_spill] sm:$0xff]  ;;  %v4192_v57 = vmul.f32 0.2, %v5150_v45  ;;  %v4223_v63 = vsel %vm1325_vm7, %v3485_v20, %v5162_v58  ;;  %v4239_v20 = vsel %vm1326_vm8, %v3491_v34, %v3916_v52 }
 0x21c   : > { %v4141_v15 = vmul.f32 0.2, %v5135_v31  ;;  %v4157_v42 = vmul.f32 0.2, %v5140_v33  ;;  %v4195_v17 = vmul.f32 0.2, %v5152_v37 }
 0x21d   : > { %5151 = vst [vmem:[#allocation5_spill] sm:$0xff] %v4192_v57  ;;  %v5157_v49 = vld [vmem:[#allocation18_spill] sm:$0xff]  ;;  %v5164_v43 = vld [vmem:[#allocation21_spill] sm:$0xff]  ;;  %vm5166_vm7 = vcmp.ge.f32.partialorder %v3497_v12, 0.0  ;;  %vm5169_vm8 = vcmp.ge.f32.partialorder %v3509_v47, 0.0 }
 0x21e   : > { %5136 = vst [vmem:[#allocation47_spill] sm:$0xff] %v4141_v15  ;;  %5141 = vst [vmem:[#allocation4_spill] sm:$0xff] %v4157_v42  ;;  %v5142_v15 = vld [vmem:[#allocation2_spill] sm:$0xff]  ;;  %v4211_v7 = vmul.f32 0.2, %v5157_v49  ;;  %v4245_v58 = vsel %vm5166_vm7, %v3497_v12, %v3919_v0  ;;  %v4261_v12 = vsel %vm5169_vm8, %v3509_v47, %v3931_v48  ;;  %vm5170_vm7 = vcmp.ge.f32.partialorder %v3515_v8, 0.0 }
 0x21f   : > { %v4160_v23 = vmul.f32 0.2, %v5142_v15  ;;  %5153 = vst [vmem:[#allocation10_spill] sm:$0xff] %v4195_v17  ;;  %v5159_v17 = vld [vmem:[#allocation11_spill] sm:$0xff]  ;;  %v4230_v46 = vmul.f32 0.2, %v5164_v43  ;;  %v4267_v52 = vsel %vm5170_vm7, %v3515_v8, %v3934_v32 }
 0x220   : > { %5158 = vst [vmem:[#allocation18_spill] sm:$0xff] %v4211_v7  ;;  %v4214_v57 = vmul.f32 0.2, %v5159_v17  ;;  %5167 = vst [vmem:[#allocation36_spill] sm:$0xff] %v4245_v58  ;;  %v5171_v0 = vld [vmem:[#allocation40_spill] sm:$0xff]  ;;  %vm1377_vm12 = vcmp.ge.f32.partialorder %v5157_v49, 0.0 }
 0x221   : > { %5143 = vst [vmem:[#allocation2_spill] sm:$0xff] %v4160_v23  ;;  %v5147_v23 = vld [vmem:[#allocation7_spill] sm:$0xff]  ;;  %v4273_v58 = vsel %vm5172_vm6, %v3521_v39, %v5171_v0  ;;  %v5174_v8 = vld [vmem:[#allocation42_spill] sm:$0xff]  ;;  %vm5175_vm7 = vcmp.ge.f32.partialorder %v3533_v27, 0.0  ;;  %v5176_v48 = vld [vmem:[#allocation49_spill] sm:$0xff]  ;;  %vm5177_vm6 = vcmp.ge.f32.partialorder %v3539_v29, 0.0 }
 0x222   : > { %v4179_v42 = vmul.f32 0.2, %v5147_v23  ;;  %5160 = vst [vmem:[#allocation11_spill] sm:$0xff] %v4214_v57  ;;  %v5165_v57 = vld [vmem:[#allocation26_spill] sm:$0xff]  ;;  %v4289_v39 = vsel %vm5175_vm7, %v3533_v27, %v5174_v8  ;;  %v4295_v32 = vsel %vm5177_vm6, %v3539_v29, %v5176_v48  ;;  %vm5179_vm8 = vcmp.ge.f32.partialorder %v3545_v35, 0.0 }
 0x223   : > { %v4233_v7 = vmul.f32 0.2, %v5165_v57  ;;  %vm1381_vm9 = vcmp.ge.f32.partialorder %v5165_v57, 0.0  ;;  %v5180_v27 = vld [vmem:[#allocation14_spill] sm:$0xff]  ;;  %vm5181_vm7 = vcmp.ge.f32.partialorder %v3557_v30, 0.0  ;;  %vm5184_vm6 = vcmp.ge.f32.partialorder %v5080_v40, 0.0 }
 0x224   : > { %5148 = vst [vmem:[#allocation7_spill] sm:$0xff] %v4179_v42  ;;  %v5154_v42 = vld [vmem:[#allocation8_spill] sm:$0xff]  ;;  %v4315_v29 = vsel %vm5181_vm7, %v3557_v30, %v5180_v27  ;;  %v4327_v8 = vsel %vm5184_vm6, %v5080_v40, %v3979_v25  ;;  %v5186_v30 = vld [vmem:[#allocation54_spill] sm:$0xff]  ;;  %vm5188_vm7 = vcmp.ge.f32.partialorder %v3587_v21, 0.0  ;;  %v5189_v25 = vld [vmem:[#allocation55_spill] sm:$0xff]  ;;  %vm5196_vm6 = vcmp.ge.f32.partialorder %v3611_v9, 0.0 }
 0x225   : > { %v4198_v28 = vmul.f32 0.2, %v5154_v42  ;;  %v5190_v40 = vld [vmem:[#allocation15_spill] sm:$0xff] }
 0x227   : > { %5155 = vst [vmem:[#allocation8_spill] sm:$0xff] %v4198_v28  ;;  %v5161_v28 = vld [vmem:[#allocation28_spill] sm:$0xff] }
 0x228   : > { %v4217_v10 = vmul.f32 0.2, %v5161_v28  ;;  %5163 = vst [vmem:[#allocation28_spill] sm:$0xff] %v4223_v63  ;;  %v5168_v63 = vld [vmem:[#allocation35_spill] sm:$0xff] }
 0x229   : > { %v4255_v34 = vsel %vm1328_vm10, %v3503_v26, %v5168_v63  ;;  %vm1376_vm10 = vcmp.ge.f32.partialorder %v5154_v42, 0.0  ;;  %v5173_v26 = vld [vmem:[#allocation39_spill] sm:$0xff] }
 0x22a   : > { %v4283_v47 = vsel %vm1332_vm13, %v3527_v59, %v5173_v26  ;;  %v5178_v63 = vld [vmem:[#allocation51_spill] sm:$0xff]  ;;  %vm1380_vm13 = vcmp.ge.f32.partialorder %v5164_v43, 0.0  ;;  %v4309_v59 = vsel %vm1336_vm14, %v5076_v55, %v3964_v41  ;;  %v5182_v26 = vld [vmem:[#allocation53_spill] sm:$0xff]  ;;  %v5185_v41 = vld [vmem:[#allocation16_spill] sm:$0xff]  ;;  %vm5187_vm14 = vcmp.ge.f32.partialorder %v3581_v16, 0.0 }
 0x22b   : > { %v4301_v0 = vsel %vm5179_vm8, %v3545_v35, %v5178_v63  ;;  %vm5183_vm8 = vcmp.ge.f32.partialorder %v3563_v14, 0.0  ;;  %v4333_v55 = vsel %vm1340_vm15, %v5081_v61, %v5185_v41  ;;  %v4339_v48 = vsel %vm5187_vm14, %v3581_v16, %v5186_v30  ;;  %v5192_v61 = vld [vmem:[#allocation19_spill] sm:$0xff]  ;;  %v5193_v16 = vld [vmem:[#allocation57_spill] sm:$0xff]  ;;  %v5197_v41 = vld [vmem:[#allocation60_spill] sm:$0xff] }
 0x22c   : > { %v4321_v35 = vsel %vm5183_vm8, %v3563_v14, %v5182_v26  ;;  %v4345_v14 = vsel %vm5188_vm7, %v3587_v21, %v3994_v62  ;;  %vm5191_vm8 = vcmp.ge.f32.partialorder %v5190_v40, 0.0  ;;  %v4357_v27 = vsel %vm1344_vm0, %v5088_v1, %v5192_v61  ;;  %v5195_v21 = vld [vmem:[#allocation58_spill] sm:$0xff]  ;;  %v5200_v1 = vld [vmem:[#allocation17_spill] sm:$0xff] }
 0x22d   : > { %v4351_v63 = vsel %vm5191_vm8, %v5190_v40, %v5189_v25  ;;  %vm5194_vm15 = vcmp.ge.f32.partialorder %v3605_v22, 0.0  ;;  %v4369_v62 = vsel %vm5196_vm6, %v3611_v9, %v5195_v21  ;;  %v5198_v30 = vld [vmem:[#allocation22_spill] sm:$0xff]  ;;  %v4381_v40 = vsel %vm1348_vm1, %v5095_v3, %v5200_v1  ;;  %v5203_v9 = vld [vmem:[#allocation63_spill] sm:$0xff]  ;;  %v5205_v21 = vld [vmem:[#allocation64_spill] sm:$0xff] }
 0x22e   : > { %v4363_v26 = vsel %vm5194_vm15, %v3605_v22, %v5193_v16  ;;  %vm5199_vm14 = vcmp.ge.f32.partialorder %v5198_v30, 0.0  ;;  %v5201_v22 = vld [vmem:[#allocation61_spill] sm:$0xff]  ;;  %vm5202_vm0 = vcmp.ge.f32.partialorder %v3629_v13, 0.0  ;;  %vm5204_vm7 = vcmp.ge.f32.partialorder %v3635_v2, 0.0 }
 0x22f   : > { %v4375_v25 = vsel %vm5199_vm14, %v5198_v30, %v5197_v41  ;;  %v4387_v61 = vsel %vm5202_vm0, %v3629_v13, %v5201_v22  ;;  %v4393_v16 = vsel %vm5204_vm7, %v3635_v2, %v5203_v9  ;;  %v5206_v41 = vld [vmem:[#allocation20_spill] sm:$0xff]  ;;  %v5208_v3 = vld [vmem:[#allocation25_spill] sm:$0xff]  ;;  %v5209_v13 = vld [vmem:[#allocation66_spill] sm:$0xff]  ;;  %vm5210_vm1 = vcmp.ge.f32.partialorder %v3653_v36, 0.0 }
 0x230   : > { %vm5207_vm8 = vcmp.ge.f32.partialorder %v5206_v41, 0.0  ;;  %v4405_v1 = vsel %vm1352_vm2, %v5102_v50, %v5208_v3  ;;  %v4411_v22 = vsel %vm5210_vm1, %v3653_v36, %v5209_v13  ;;  %v5211_v2 = vld [vmem:[#allocation67_spill] sm:$0xff]  ;;  %vm5212_vm15 = vcmp.ge.f32.partialorder %v3659_v53, 0.0  ;;  %v5216_v36 = vld [vmem:[#allocation6_spill] sm:$0xff] }
 0x231   : > { %v4399_v30 = vsel %vm5207_vm8, %v5206_v41, %v5205_v21  ;;  %v4417_v9 = vsel %vm5212_vm15, %v3659_v53, %v5211_v2  ;;  %v5213_v21 = vld [vmem:[#allocation27_spill] sm:$0xff]  ;;  %vm5214_vm6 = vcmp.ge.f32.partialorder %v5107_v54, 0.0  ;;  %vm5217_vm2 = vcmp.ge.f32.partialorder %v5112_v56, 0.0  ;;  %v5218_v53 = vld [vmem:[#allocation9_spill] sm:$0xff] }
 0x232   : > { %v4423_v41 = vsel %vm5214_vm6, %v5107_v54, %v5213_v21  ;;  %v5215_v50 = vld [vmem:[#allocation3_spill] sm:$0xff]  ;;  %v4435_v13 = vsel %vm5217_vm2, %v5112_v56, %v5216_v36  ;;  %vm5219_vm14 = vcmp.ge.f32.partialorder %v5114_v6, 0.0  ;;  %v5221_v54 = vld [vmem:[#allocation13_spill] sm:$0xff]  ;;  %vm5222_vm0 = vcmp.ge.f32.partialorder %v5117_v18, 0.0  ;;  %v5225_v56 = vld [vmem:[#allocation44_spill] sm:$0xff] }
 0x233   : > { %v4429_v3 = vsel %vm1356_vm3, %v5110_v60, %v5215_v50  ;;  %v4441_v2 = vsel %vm5219_vm14, %v5114_v6, %v5218_v53  ;;  %v4447_v21 = vsel %vm5222_vm0, %v5117_v18, %v5221_v54  ;;  %v5224_v60 = vld [vmem:[#allocation24_spill] sm:$0xff]  ;;  %vm5226_vm3 = vcmp.ge.f32.partialorder %v5121_v24, 0.0  ;;  %v5227_v6 = vld [vmem:[#allocation71_spill] sm:$0xff]  ;;  %v5228_v53 = vld [vmem:[#allocation41_spill] sm:$0xff] }
 0x234   : > { %5220 = vst [vmem:[#allocation21_spill] sm:$0xff] %v4441_v2  ;;  %5223 = vst [vmem:[#allocation26_spill] sm:$0xff] %v4447_v21  ;;  %v4453_v50 = vsel %vm1360_vm4, %v5119_v38, %v5224_v60  ;;  %v4459_v36 = vsel %vm5226_vm3, %v5121_v24, %v5225_v56  ;;  %vm5229_vm7 = vcmp.ge.f32.partialorder %v5228_v53, 0.0  ;;  %v5230_v18 = vld [vmem:[#allocation72_spill] sm:$0xff]  ;;  %v5231_v54 = vld [vmem:[#allocation43_spill] sm:$0xff]  ;;  %vm5235_vm4 = vcmp.ge.f32.partialorder %v5131_v11, 0.0 }
 0x235   : > { %v4465_v2 = vsel %vm5229_vm7, %v5228_v53, %v5227_v6  ;;  %vm5232_vm8 = vcmp.ge.f32.partialorder %v5231_v54, 0.0  ;;  %v5233_v38 = vld [vmem:[#allocation46_spill] sm:$0xff]  ;;  %v5234_v24 = vld [vmem:[#allocation48_spill] sm:$0xff]  ;;  %v5236_v6 = vld [vmem:[#allocation45_spill] sm:$0xff]  ;;  %vm5237_vm1 = vcmp.ge.f32.partialorder %v5133_v19, 0.0  ;;  %vm5239_vm15 = vcmp.ge.f32.partialorder %v5135_v31, 0.0 }
 0x236   : > { %v4471_v21 = vsel %vm5232_vm8, %v5231_v54, %v5230_v18  ;;  %v4477_v60 = vsel %vm1364_vm5, %v5128_v5, %v5233_v38  ;;  %v4483_v56 = vsel %vm5235_vm4, %v5131_v11, %v5234_v24  ;;  %v4489_v53 = vsel %vm5237_vm1, %v5133_v19, %v5236_v6  ;;  %v5238_v18 = vld [vmem:[#allocation47_spill] sm:$0xff]  ;;  %v5242_v11 = vld [vmem:[#allocation4_spill] sm:$0xff]  ;;  %v5244_v19 = vld [vmem:[#allocation2_spill] sm:$0xff] }
 0x237   : > { %v4495_v54 = vsel %vm5239_vm15, %v5135_v31, %v5238_v18  ;;  %v5240_v5 = vld [vmem:[#allocation23_spill] sm:$0xff]  ;;  %vm5241_vm5 = vcmp.ge.f32.partialorder %v5138_v4, 0.0  ;;  %vm5243_vm6 = vcmp.ge.f32.partialorder %v5140_v33, 0.0  ;;  %vm5245_vm2 = vcmp.ge.f32.partialorder %v5142_v15, 0.0  ;;  %v5246_v31 = vld [vmem:[#allocation76_spill] sm:$0xff] }
 0x238   : > { %v4501_v38 = vsel %vm5241_vm5, %v5138_v4, %v5240_v5  ;;  %v4507_v24 = vsel %vm5243_vm6, %v5140_v33, %v5242_v11  ;;  %v4513_v6 = vsel %vm5245_vm2, %v5142_v15, %v5244_v19  ;;  %vm5247_vm14 = vcmp.ge.f32.partialorder %v3761_v44, 0.0  ;;  %v5248_v4 = vld [vmem:[#allocation77_spill] sm:$0xff]  ;;  %v5249_v33 = vld [vmem:[#allocation7_spill] sm:$0xff] }
 0x239   : > { %v4519_v18 = vsel %vm5247_vm14, %v3761_v44, %v5246_v31  ;;  %v4525_v5 = vsel %vm1372_vm11, %v3767_v51, %v5248_v4  ;;  %vm5250_vm0 = vcmp.ge.f32.partialorder %v5147_v23, 0.0  ;;  %v5252_v15 = vld [vmem:[#allocation5_spill] sm:$0xff]  ;;  %vm5253_vm3 = vcmp.ge.f32.partialorder %v5150_v45, 0.0  ;;  %v5255_v44 = vld [vmem:[#allocation10_spill] sm:$0xff]  ;;  %v5258_v51 = vld [vmem:[#allocation8_spill] sm:$0xff] }
 0x23a   : > { %v4531_v11 = vsel %vm5250_vm0, %v5147_v23, %v5249_v33  ;;  %v4537_v19 = vsel %vm5253_vm3, %v5150_v45, %v5252_v15  ;;  %vm5256_vm7 = vcmp.ge.f32.partialorder %v5152_v37, 0.0  ;;  %v4556_v23 = vsel %vm1376_vm10, %v5154_v42, %v5258_v51  ;;  %v5260_v45 = vld [vmem:[#allocation18_spill] sm:$0xff]  ;;  %v5262_v4 = vld [vmem:[#allocation11_spill] sm:$0xff] }
 0x23b   : > { %5251 = vst [vmem:[#allocation35_spill] sm:$0xff] %v4531_v11  ;;  %5254 = vst [vmem:[#allocation40_spill] sm:$0xff] %v4537_v19  ;;  %v4543_v31 = vsel %vm5256_vm7, %v5152_v37, %v5255_v44  ;;  %v4562_v37 = vsel %vm1377_vm12, %v5157_v49, %v5260_v45  ;;  %vm5263_vm11 = vcmp.ge.f32.partialorder %v5159_v17, 0.0  ;;  %vm5265_vm8 = vcmp.ge.f32.partialorder %v5161_v28, 0.0  ;;  %v5269_v49 = vld [vmem:[#allocation30_spill] sm:$0xff]  ;;  %v5270_v44 = vld [vmem:[#allocation32_spill] sm:$0xff] }
 0x23c   : > { %5257 = vst [vmem:[#allocation39_spill] sm:$0xff] %v4543_v31  ;;  %5259 = vst [vmem:[#allocation42_spill] sm:$0xff] %v4556_v23  ;;  %v4568_v33 = vsel %vm5263_vm11, %v5159_v17, %v5262_v4  ;;  %v4574_v15 = vsel %vm5265_vm8, %v5161_v28, %v4217_v10  ;;  %v4580_v42 = vsel %vm1380_vm13, %v5164_v43, %v4230_v46  ;;  %v5271_v10 = vld [vmem:[#allocation29_spill] sm:$0xff]  ;;  %v5272_v28 = vld [vmem:[#allocation31_spill] sm:$0xff] }
 0x23d   : > { %5261 = vst [vmem:[#allocation49_spill] sm:$0xff] %v4562_v37  ;;  %5264 = vst [vmem:[#allocation51_spill] sm:$0xff] %v4568_v33  ;;  %v4586_v17 = vsel %vm1381_vm9, %v5165_v57, %v4233_v7  ;;  %v2218_v51 = vpack.c.bf16 %v5270_v44, %v5269_v49  ;;  %v2223_v45 = vpack.c.bf16 %v5272_v28, %v5271_v10  ;;  %v5273_v4 = vld [vmem:[#allocation34_spill] sm:$0xff]  ;;  %v5276_v46 = vld [vmem:[#allocation37_spill] sm:$0xff] }
 0x23e   : > { %5266 = vst [vmem:[#allocation14_spill] sm:$0xff] %v4574_v15  ;;  %5267 = vst [vmem:[#allocation53_spill] sm:$0xff] %v4580_v42  ;;  %v5274_v15 = vld [vmem:[#allocation33_spill] sm:$0xff]  ;;  %v5275_v37 = vld [vmem:[#allocation38_spill] sm:$0xff] }
 0x23f   : > { %5268 = vst [vmem:[#allocation16_spill] sm:$0xff] %v4586_v17  ;;  %v2228_v33 = vpack.c.bf16 %v5274_v15, %v5273_v4  ;;  %v2233_v43 = vpack.c.bf16 %v5276_v46, %v5275_v37  ;;  %v5277_v42 = vld [vmem:[#allocation50_spill] sm:$0xff]  ;;  %v5278_v23 = vld [vmem:[#allocation52_spill] sm:$0xff]  ;;  %2219 = vst [vmem:[%s4550_s6] sm:$0xff] %v2218_v51  }
 0x240   : > { %v2238_v31 = vpack.c.bf16 %v5278_v23, %v5277_v42  ;;  %v5279_v19 = vld [vmem:[#allocation12_spill] sm:$0xff]  ;;  %2415 = vst [vmem:[%s4550_s6 + $0x8] sm:$0xff] %v2223_v45   ;;  %v5281_v7 = vld [vmem:[#allocation59_spill] sm:$0xff]  ;;  %v5282_v49 = vld [vmem:[#allocation62_spill] sm:$0xff] }
 0x241   : > { %v5280_v11 = vld [vmem:[#allocation56_spill] sm:$0xff]  ;;  %v2248_v44 = vpack.c.bf16 %v5282_v49, %v5281_v7  ;;  %v5283_v10 = vld [vmem:[#allocation65_spill] sm:$0xff]  ;;  %v5286_v37 = vld [vmem:[#allocation70_spill] sm:$0xff]  ;;  %2416 = vst [vmem:[%s4550_s6 + $0x10] sm:$0xff] %v2228_v33   ;;  %v2293_v33 = vpack.c.bf16 %v4289_v39, %v4283_v47  ;;  %v2323_v47 = vpack.c.bf16 %v4363_v26, %v4357_v27  ;;  %v2328_v39 = vpack.c.bf16 %v4375_v25, %v4369_v62 }
 0x242   : > { %v2243_v57 = vpack.c.bf16 %v5280_v11, %v5279_v19  ;;  %v5284_v15 = vld [vmem:[#allocation68_spill] sm:$0xff]  ;;  %v5285_v4 = vld [vmem:[#allocation69_spill] sm:$0xff]  ;;  %v5288_v23 = vld [vmem:[#allocation74_spill] sm:$0xff]  ;;  %2417 = vst [vmem:[%s4550_s6 + $0x18] sm:$0xff] %v2233_v43   ;;  %v2373_v27 = vpack.c.bf16 %v4483_v56, %v4477_v60  ;;  %v2378_v26 = vpack.c.bf16 %v4495_v54, %v4489_v53  ;;  %v2383_v62 = vpack.c.bf16 %v4507_v24, %v4501_v38 }
 0x243   : > { %v2253_v28 = vpack.c.bf16 %v5284_v15, %v5283_v10  ;;  %v2258_v46 = vpack.c.bf16 %v5286_v37, %v5285_v4  ;;  %v5287_v17 = vld [vmem:[#allocation73_spill] sm:$0xff]  ;;  %2418 = vst [vmem:[%s4550_s6 + $0x20] sm:$0xff] %v2238_v31   ;;  %v5289_v11 = vld [vmem:[#allocation75_spill] sm:$0xff]  ;;  %v5290_v19 = vld [vmem:[#allocation78_spill] sm:$0xff]  ;;  %v2288_v31 = vpack.c.bf16 %v4273_v58, %v4267_v52  ;;  %v2308_v58 = vpack.c.bf16 %v4327_v8, %v4321_v35 }
 0x244   : > { %v2263_v42 = vpack.c.bf16 %v5288_v23, %v5287_v17  ;;  %2419 = vst [vmem:[%s4550_s6 + $0x28] sm:$0xff] %v2243_v57   ;;  %v2268_v51 = vpack.c.bf16 %v5290_v19, %v5289_v11  ;;  %v5291_v45 = vld [vmem:[#allocation79_spill] sm:$0xff]  ;;  %v5292_v7 = vld [vmem:[#allocation28_spill] sm:$0xff]  ;;  %v2283_v17 = vpack.c.bf16 %v4261_v12, %v4255_v34  ;;  %2420 = vst [vmem:[%s4550_s6 + $0x30] sm:$0xff] %v2248_v44  }
 0x245   : > { %v2273_v49 = vpack.c.bf16 %v5292_v7, %v5291_v45  ;;  %v5293_v10 = vld [vmem:[#allocation36_spill] sm:$0xff]  ;;  %2421 = vst [vmem:[%s4550_s6 + $0x38] sm:$0xff] %v2253_v28   ;;  %2422 = vst [vmem:[%s4550_s6 + $0x40] sm:$0xff] %v2258_v46   ;;  %v2303_v34 = vpack.c.bf16 %v4315_v29, %v4309_v59  ;;  %v2313_v12 = vpack.c.bf16 %v4339_v48, %v4333_v55  ;;  %v5294_v8 = vld [vmem:[#allocation21_spill] sm:$0xff] }
 0x246   : > { %v2278_v15 = vpack.c.bf16 %v5293_v10, %v4239_v20  ;;  %2423 = vst [vmem:[%s4550_s6 + $0x48] sm:$0xff] %v2263_v42   ;;  %v2298_v20 = vpack.c.bf16 %v4301_v0, %v4295_v32  ;;  %2424 = vst [vmem:[%s4550_s6 + $0x50] sm:$0xff] %v2268_v51   ;;  %v2318_v52 = vpack.c.bf16 %v4351_v63, %v4345_v14  ;;  %v5295_v55 = vld [vmem:[#allocation26_spill] sm:$0xff] }
 0x247   : > { %2425 = vst [vmem:[%s4550_s6 + $0x58] sm:$0xff] %v2273_v49   ;;  %2427 = vst [vmem:[%s4550_s6 + $0x68] sm:$0xff] %v2283_v17   ;;  %v2333_v32 = vpack.c.bf16 %v4387_v61, %v4381_v40  ;;  %v2338_v0 = vpack.c.bf16 %v4399_v30, %v4393_v16  ;;  %v2343_v59 = vpack.c.bf16 %v4411_v22, %v4405_v1  ;;  %v5296_v40 = vld [vmem:[#allocation35_spill] sm:$0xff]  ;;  %v5297_v16 = vld [vmem:[#allocation40_spill] sm:$0xff] }
 0x248   : > { %2426 = vst [vmem:[%s4550_s6 + $0x60] sm:$0xff] %v2278_v15   ;;  %2428 = vst [vmem:[%s4550_s6 + $0x70] sm:$0xff] %v2288_v31   ;;  %v2348_v29 = vpack.c.bf16 %v4423_v41, %v4417_v9  ;;  %v2353_v35 = vpack.c.bf16 %v4435_v13, %v4429_v3  ;;  %v2358_v48 = vpack.c.bf16 %v5295_v55, %v5294_v8  ;;  %v5298_v30 = vld [vmem:[#allocation39_spill] sm:$0xff]  ;;  %v5299_v22 = vld [vmem:[#allocation42_spill] sm:$0xff] }
 0x249   : > { %2429 = vst [vmem:[%s4550_s6 + $0x78] sm:$0xff] %v2293_v33   ;;  %2430 = vst [vmem:[%s4550_s6 + $0x80] sm:$0xff] %v2298_v20   ;;  %v2363_v14 = vpack.c.bf16 %v4459_v36, %v4453_v50  ;;  %v2368_v63 = vpack.c.bf16 %v4471_v21, %v4465_v2  ;;  %v2388_v25 = vpack.c.bf16 %v4519_v18, %v4513_v6  ;;  %v5300_v9 = vld [vmem:[#allocation49_spill] sm:$0xff]  ;;  %v5301_v3 = vld [vmem:[#allocation51_spill] sm:$0xff] }
 0x24a   : > { %2431 = vst [vmem:[%s4550_s6 + $0x88] sm:$0xff] %v2303_v34   ;;  %2432 = vst [vmem:[%s4550_s6 + $0x90] sm:$0xff] %v2308_v58   ;;  %v2393_v61 = vpack.c.bf16 %v5296_v40, %v4525_v5  ;;  %v2398_v1 = vpack.c.bf16 %v5298_v30, %v5297_v16  ;;  %v2403_v41 = vpack.c.bf16 %v5300_v9, %v5299_v22  ;;  %v5302_v13 = vld [vmem:[#allocation14_spill] sm:$0xff]  ;;  %v5303_v21 = vld [vmem:[#allocation53_spill] sm:$0xff] }
 0x24b   : > { %2433 = vst [vmem:[%s4550_s6 + $0x98] sm:$0xff] %v2313_v12   ;;  %2434 = vst [vmem:[%s4550_s6 + $0xa0] sm:$0xff] %v2318_v52   ;;  %v2408_v2 = vpack.c.bf16 %v5302_v13, %v5301_v3  ;;  %v5304_v50 = vld [vmem:[#allocation16_spill] sm:$0xff] }
 0x24c   : > { %2435 = vst [vmem:[%s4550_s6 + $0xa8] sm:$0xff] %v2323_v47   ;;  %2436 = vst [vmem:[%s4550_s6 + $0xb0] sm:$0xff] %v2328_v39   ;;  %v2413_v36 = vpack.c.bf16 %v5304_v50, %v5303_v21 }
 0x24d   : > { %2437 = vst [vmem:[%s4550_s6 + $0xb8] sm:$0xff] %v2333_v32   ;;  %2438 = vst [vmem:[%s4550_s6 + $0xc0] sm:$0xff] %v2338_v0  }
 0x24e   : > { %2439 = vst [vmem:[%s4550_s6 + $0xc8] sm:$0xff] %v2343_v59   ;;  %2440 = vst [vmem:[%s4550_s6 + $0xd0] sm:$0xff] %v2348_v29  }
 0x24f   : > { %2441 = vst [vmem:[%s4550_s6 + $0xd8] sm:$0xff] %v2353_v35   ;;  %2442 = vst [vmem:[%s4550_s6 + $0xe0] sm:$0xff] %v2358_v48  }
 0x250   : > { %2443 = vst [vmem:[%s4550_s6 + $0xe8] sm:$0xff] %v2363_v14   ;;  %2444 = vst [vmem:[%s4550_s6 + $0xf0] sm:$0xff] %v2368_v63  }
 0x251   : > { %2445 = vst [vmem:[%s4550_s6 + $0xf8] sm:$0xff] %v2373_v27   ;;  %2446 = vst [vmem:[%s4550_s6 + $0x100] sm:$0xff] %v2378_v26  }
 0x252   : > { %2447 = vst [vmem:[%s4550_s6 + $0x108] sm:$0xff] %v2383_v62   ;;  %2448 = vst [vmem:[%s4550_s6 + $0x110] sm:$0xff] %v2388_v25  }
 0x253   : > { %2449 = vst [vmem:[%s4550_s6 + $0x118] sm:$0xff] %v2393_v61   ;;  %2450 = vst [vmem:[%s4550_s6 + $0x120] sm:$0xff] %v2398_v1  }
 0x254   : > { %2451 = vst [vmem:[%s4550_s6 + $0x128] sm:$0xff] %v2403_v41   ;;  %2452 = vst [vmem:[%s4550_s6 + $0x130] sm:$0xff] %v2408_v2  }
 0x255   : > { %2453 = vst [vmem:[%s4550_s6 + $0x138] sm:$0xff] %v2413_v36  }
 0x256 PF: > { %s12_s9 = sadd.s32 1, %s2678_s9  }
 0x257   : > { %p9_p4 = scmp.ge.s32.totalorder %s12_s9, 4  }
 0x259   :  { %11 = sbr.rel (!%p9_p4) target bundleno = 1 (0x1), region = 58 }

// kernel: netd_forward.7
= control target key start
LH: loop header
LB: loop body
LE: loop exit
PB: predicated region body
PF: predicated region fallthrough
CT: control target
= control target key end

     0   :  { %s1567_s9 = smov 0   ;;  %s1846_s0 = inlined_call_operand.vmem [shape: bf16[288,512], index: 0, kind: input, shape index: {}]   ;;  %s1847_s1 = inlined_call_operand.vmem [shape: bf16[512,128], index: 1, kind: input, shape index: {}]   ;;  %s1848_s2 = inlined_call_operand.vmem [shape: bf16[288,128], index: 2, kind: output, shape index: {}]  }
   0x1 LB: > { %s1140_s10 = sadd.s32 4294967295, %s1550_s9   ;;  %p1144_p0 = scmp.ge.s32.totalorder %s1550_s9, 1  ;;  %s1550_s9 = sphi %s1567_s9, %s12_s9  }
   0x2   : > { %p114_p1 = scmp.lt.s32.totalorder %s1550_s9, 3 }
   0x4   : > { %p115_p2 = pnand %p1144_p0, %p114_p1 }
   0x5   : > { %s137_s15 = smul.u32 (!%p115_p2), 18, %s1140_s10 }
   0x6   : > { %118 = sbr.rel (%p115_p2) target bundleno = 376 (0x178), region = 28 }
   0x7   : > { %p138_p3 = scmp.lt.s32.totalorder (!%p115_p2), %s137_s15, 35 }
   0xb   : > { %v1456_v0 = vld [vmem:[%s1847_s1 + $0x78] sm:$0xff]   ;;  %v1460_v4 = vld [vmem:[%s1847_s1 + $0x70] sm:$0xff]   ;;  %v1464_v8 = vld [vmem:[%s1847_s1 + $0x68] sm:$0xff]   ;;  %s1854_s15 = smov (!%p138_p3, %s137_s15), 35 }
   0xc   : > { %v1457_v1 = vld [vmem:[%s1847_s1 + $0xf8] sm:$0xff]   ;;  %1308 = vmatprep.subr.bf16.mxu0 %v1456_v0  ;;  %v1461_v5 = vld [vmem:[%s1847_s1 + $0xf0] sm:$0xff]   ;;  %v1465_v9 = vld [vmem:[%s1847_s1 + $0xe8] sm:$0xff]   ;;  %s1236_s13 = sshll.u32 %s1854_s15, 4  ;;  %s1147_s27 = sshll.u32 %s1854_s15, 2 }
   0xd   : > { %v1458_v2 = vld [vmem:[%s1847_s1 + $0x38] sm:$0xff]   ;;  %1378 = vmatprep.subr.bf16.mxu1 %v1457_v1  ;;  %v1462_v6 = vld [vmem:[%s1847_s1 + $0x30] sm:$0xff]   ;;  %v1466_v10 = vld [vmem:[%s1847_s1 + $0x28] sm:$0xff]   ;;  %s1673_s23 = scalar_lea.vmem %s1846_s0, %s1236_s13  ;;  %s148_s30 = scalar_lea.vmem %s1848_s2, %s1147_s27 }
   0xe   : > { %v1459_v3 = vld [vmem:[%s1847_s1 + $0xb8] sm:$0xff]   ;;  %1309 = vmatpush3.bf16.msra.mxu0 %v1458_v2  ;;  %v1463_v7 = vld [vmem:[%s1847_s1 + $0xb0] sm:$0xff]   ;;  %v1467_v11 = vld [vmem:[%s1847_s1 + $0xa8] sm:$0xff]  }
   0xf   : > { %1379 = vmatpush3.bf16.msra.mxu1 %v1459_v3  ;;  %1310 = vmatprep.subr.bf16.mxu0 %v1460_v4  ;;  %v1468_v12 = vld [vmem:[%s1847_s1 + $0x60] sm:$0xff]   ;;  %v1472_v16 = vld [vmem:[%s1847_s1 + $0x58] sm:$0xff]   ;;  %v1476_v20 = vld [vmem:[%s1847_s1 + $0x50] sm:$0xff]  }
  0x10   : > { %1380 = vmatprep.subr.bf16.mxu1 %v1461_v5  ;;  %v1469_v13 = vld [vmem:[%s1847_s1 + $0xe0] sm:$0xff]   ;;  %v1473_v17 = vld [vmem:[%s1847_s1 + $0xd8] sm:$0xff]   ;;  %v1477_v21 = vld [vmem:[%s1847_s1 + $0xd0] sm:$0xff]  }
  0x11   : > { %v1470_v14 = vld [vmem:[%s1847_s1 + $0x20] sm:$0xff]   ;;  %v1474_v18 = vld [vmem:[%s1847_s1 + $0x18] sm:$0xff]   ;;  %v1478_v22 = vld [vmem:[%s1847_s1 + $0x10] sm:$0xff]  }
  0x12   : > { %1311 = vmatpush3.bf16.msra.mxu0 %v1462_v6  ;;  %v1471_v15 = vld [vmem:[%s1847_s1 + $0xa0] sm:$0xff]   ;;  %v1475_v19 = vld [vmem:[%s1847_s1 + $0x98] sm:$0xff]   ;;  %v1479_v23 = vld [vmem:[%s1847_s1 + $0x90] sm:$0xff]  }
  0x13   : > { %1381 = vmatpush3.bf16.msra.mxu1 %v1463_v7  ;;  %1312 = vmatprep.subr.bf16.mxu0 %v1464_v8  ;;  %v1480_v24 = vld [vmem:[%s1847_s1 + $0x48] sm:$0xff]   ;;  %v1484_v28 = vld [vmem:[%s1847_s1 + $0x40] sm:$0xff]  }
  0x14   : > { %1382 = vmatprep.subr.bf16.mxu1 %v1465_v9  ;;  %v1481_v25 = vld [vmem:[%s1847_s1 + $0xc8] sm:$0xff]   ;;  %v1485_v29 = vld [vmem:[%s1847_s1 + $0xc0] sm:$0xff]  }
  0x15   : > { %v1482_v26 = vld [vmem:[%s1847_s1 + $0x8] sm:$0xff]   ;;  %v1486_v30 = vld [vmem:[%s1847_s1] sm:$0xff]  }
  0x16   : > { %1313 = vmatpush3.bf16.msra.mxu0 %v1466_v10  ;;  %v1483_v27 = vld [vmem:[%s1847_s1 + $0x88] sm:$0xff]   ;;  %v1487_v31 = vld [vmem:[%s1847_s1 + $0x80] sm:$0xff]  }
  0x17   : > { %1383 = vmatpush3.bf16.msra.mxu1 %v1467_v11  ;;  %1314 = vmatprep.subr.bf16.mxu0 %v1468_v12  ;;  %v1488_v32 = vld [vmem:[%s1673_s23] ss:$16 sps:$4 sm:$0xff]   ;;  %v1490_v33 = vld [vmem:[%s1673_s23 + $0x4] ss:$16 sps:$4 sm:$0xff]   ;;  %v1491_v34 = vld [vmem:[%s1673_s23 + $0x8] ss:$16 sps:$4 sm:$0xff]  }
  0x18   : > { %1384 = vmatprep.subr.bf16.mxu1 %v1469_v13  ;;  %v1493_v35 = vld [vmem:[%s1673_s23 + $0xc] ss:$16 sps:$4 sm:$0xff]   ;;  %655 = vmatprep.mubr.bf16.mxu0 %v1490_v33  ;;  %v1494_v36 = vld [vmem:[%s1673_s23 + $0x24] ss:$16 sps:$4 sm:$0xff]   ;;  %v1498_v38 = vld [vmem:[%s1673_s23 + $0x20] ss:$16 sps:$4 sm:$0xff]  }
  0x19   : > { %760 = vmatprep.mubr.bf16.mxu1 %v1493_v35  ;;  %v1496_v37 = vld [vmem:[%s1673_s23 + $0x2c] ss:$16 sps:$4 sm:$0xff]   ;;  %v1499_v39 = vld [vmem:[%s1673_s23 + $0x28] ss:$16 sps:$4 sm:$0xff]   ;;  %v1500_v40 = vld [vmem:[%s1673_s23 + $0x44] ss:$16 sps:$4 sm:$0xff]  }
  0x1a   : > { %1315 = vmatpush3.bf16.msra.mxu0 %v1470_v14  ;;  %v1502_v41 = vld [vmem:[%s1673_s23 + $0x4c] ss:$16 sps:$4 sm:$0xff]   ;;  %v1504_v42 = vld [vmem:[%s1673_s23 + $0x40] ss:$16 sps:$4 sm:$0xff]   ;;  %v1505_v43 = vld [vmem:[%s1673_s23 + $0x48] ss:$16 sps:$4 sm:$0xff]  }
  0x1b   : > { %1385 = vmatpush3.bf16.msra.mxu1 %v1471_v15  ;;  %1316 = vmatprep.subr.bf16.mxu0 %v1472_v16  ;;  %v1506_v44 = vld [vmem:[%s1673_s23 + $0x64] ss:$16 sps:$4 sm:$0xff]   ;;  %v1508_v45 = vld [vmem:[%s1673_s23 + $0x6c] ss:$16 sps:$4 sm:$0xff]   ;;  %v1510_v46 = vld [vmem:[%s1673_s23 + $0x60] ss:$16 sps:$4 sm:$0xff]  }
  0x1c   : > { %1386 = vmatprep.subr.bf16.mxu1 %v1473_v17  ;;  %v1511_v47 = vld [vmem:[%s1673_s23 + $0x68] ss:$16 sps:$4 sm:$0xff]   ;;  %v1512_v48 = vld [vmem:[%s1673_s23 + $0x84] ss:$16 sps:$4 sm:$0xff]   ;;  %v1514_v49 = vld [vmem:[%s1673_s23 + $0x8c] ss:$16 sps:$4 sm:$0xff]  }
  0x1d   : > { %v1516_v50 = vld [vmem:[%s1673_s23 + $0x80] ss:$16 sps:$4 sm:$0xff]   ;;  %v1517_v51 = vld [vmem:[%s1673_s23 + $0x88] ss:$16 sps:$4 sm:$0xff]   ;;  %v1518_v52 = vld [vmem:[%s1673_s23 + $0xa4] ss:$16 sps:$4 sm:$0xff]  }
  0x1e   : > { %1317 = vmatpush3.bf16.msra.mxu0 %v1474_v18  ;;  %v1520_v53 = vld [vmem:[%s1673_s23 + $0xac] ss:$16 sps:$4 sm:$0xff]   ;;  %v1522_v54 = vld [vmem:[%s1673_s23 + $0xa0] ss:$16 sps:$4 sm:$0xff]   ;;  %v1523_v55 = vld [vmem:[%s1673_s23 + $0xa8] ss:$16 sps:$4 sm:$0xff]  }
  0x1f   : > { %1387 = vmatpush3.bf16.msra.mxu1 %v1475_v19  ;;  %1318 = vmatprep.subr.bf16.mxu0 %v1476_v20  ;;  %v1524_v56 = vld [vmem:[%s1673_s23 + $0xc4] ss:$16 sps:$4 sm:$0xff]   ;;  %v1526_v57 = vld [vmem:[%s1673_s23 + $0xcc] ss:$16 sps:$4 sm:$0xff]   ;;  %v1528_v58 = vld [vmem:[%s1673_s23 + $0xc0] ss:$16 sps:$4 sm:$0xff]  }
  0x20   : > { %1388 = vmatprep.subr.bf16.mxu1 %v1477_v21  ;;  %v1529_v59 = vld [vmem:[%s1673_s23 + $0xc8] ss:$16 sps:$4 sm:$0xff]   ;;  %v1530_v60 = vld [vmem:[%s1673_s23 + $0xe4] ss:$16 sps:$4 sm:$0xff]   ;;  %v1532_v61 = vld [vmem:[%s1673_s23 + $0xec] ss:$16 sps:$4 sm:$0xff]  }
  0x21   : > { %v1534_v62 = vld [vmem:[%s1673_s23 + $0xe0] ss:$16 sps:$4 sm:$0xff]   ;;  %v1535_v63 = vld [vmem:[%s1673_s23 + $0xe8] ss:$16 sps:$4 sm:$0xff]   ;;  %v1536_v0 = vld [vmem:[%s1673_s23 + $0x104] ss:$16 sps:$4 sm:$0xff]  }
  0x22   : > { %1319 = vmatpush3.bf16.msra.mxu0 %v1478_v22  ;;  %v1538_v1 = vld [vmem:[%s1673_s23 + $0x10c] ss:$16 sps:$4 sm:$0xff]   ;;  %v1540_v2 = vld [vmem:[%s1673_s23 + $0x100] ss:$16 sps:$4 sm:$0xff]   ;;  %v1541_v3 = vld [vmem:[%s1673_s23 + $0x108] ss:$16 sps:$4 sm:$0xff]  }
  0x23   : > { %1389 = vmatpush3.bf16.msra.mxu1 %v1479_v23  ;;  %1320 = vmatprep.subr.bf16.mxu0 %v1480_v24 }
  0x24   : > { %1390 = vmatprep.subr.bf16.mxu1 %v1481_v25 }
  0x26   : > { %1321 = vmatpush3.bf16.msra.mxu0 %v1482_v26 }
  0x27   : > { %1391 = vmatpush3.bf16.msra.mxu1 %v1483_v27  ;;  %1322 = vmatprep.subr.bf16.mxu0 %v1484_v28 }
  0x28   : > { %1392 = vmatprep.subr.bf16.mxu1 %v1485_v29 }
  0x2a   : > { %1323 = vmatpush3.bf16.msra.mxu0 %v1486_v30 }
  0x2b   : > { %1393 = vmatpush3.bf16.msra.mxu1 %v1487_v31 }
  0x2d   : > { %656 = vmatmul.mubr.bf16.vlgmr.msra.gmra.mxu0 %v1488_v32 }
  0x2e   : > { %761 = vmatmul.mubr.bf16.vlgmr.msra.gmra.mxu1 %v1491_v34  ;;  %663 = vmatprep.mubr.bf16.mxu0 %v1494_v36 }
  0x2f   : > { %768 = vmatprep.mubr.bf16.mxu1 %v1496_v37 }
  0x35   : > { %664 = vmatmul.mubr.bf16.gmra.mxu0 %v1498_v38 }
  0x36   : > { %769 = vmatmul.mubr.bf16.gmra.mxu1 %v1499_v39  ;;  %671 = vmatprep.mubr.bf16.mxu0 %v1500_v40 }
  0x37   : > { %776 = vmatprep.mubr.bf16.mxu1 %v1502_v41 }
  0x3d   : > { %672 = vmatmul.mubr.bf16.gmra.mxu0 %v1504_v42 }
  0x3e   : > { %777 = vmatmul.mubr.bf16.gmra.mxu1 %v1505_v43  ;;  %679 = vmatprep.mubr.bf16.mxu0 %v1506_v44 }
  0x3f   : > { %784 = vmatprep.mubr.bf16.mxu1 %v1508_v45 }
  0x45   : > { %680 = vmatmul.mubr.bf16.gmra.mxu0 %v1510_v46 }
  0x46   : > { %785 = vmatmul.mubr.bf16.gmra.mxu1 %v1511_v47  ;;  %687 = vmatprep.mubr.bf16.mxu0 %v1512_v48 }
  0x47   : > { %792 = vmatprep.mubr.bf16.mxu1 %v1514_v49 }
  0x4d   : > { %688 = vmatmul.mubr.bf16.gmra.mxu0 %v1516_v50 }
  0x4e   : > { %793 = vmatmul.mubr.bf16.gmra.mxu1 %v1517_v51  ;;  %695 = vmatprep.mubr.bf16.mxu0 %v1518_v52 }
  0x4f   : > { %800 = vmatprep.mubr.bf16.mxu1 %v1520_v53 }
  0x55   : > { %696 = vmatmul.mubr.bf16.gmra.mxu0 %v1522_v54 }
  0x56   : > { %801 = vmatmul.mubr.bf16.gmra.mxu1 %v1523_v55  ;;  %703 = vmatprep.mubr.bf16.mxu0 %v1524_v56 }
  0x57   : > { %808 = vmatprep.mubr.bf16.mxu1 %v1526_v57 }
  0x5d   : > { %704 = vmatmul.mubr.bf16.gmra.mxu0 %v1528_v58 }
  0x5e   : > { %809 = vmatmul.mubr.bf16.gmra.mxu1 %v1529_v59  ;;  %711 = vmatprep.mubr.bf16.mxu0 %v1530_v60 }
  0x5f   : > { %816 = vmatprep.mubr.bf16.mxu1 %v1532_v61 }
  0x65   : > { %712 = vmatmul.mubr.bf16.gmra.mxu0 %v1534_v62 }
  0x66   : > { %817 = vmatmul.mubr.bf16.gmra.mxu1 %v1535_v63  ;;  %719 = vmatprep.mubr.bf16.mxu0 %v1536_v0 }
  0x67   : > { %824 = vmatprep.mubr.bf16.mxu1 %v1538_v1 }
  0x6d   : > { %720 = vmatmul.mubr.bf16.gmra.mxu0 %v1540_v2 }
  0x6e   : > { %825 = vmatmul.mubr.bf16.gmra.mxu1 %v1541_v3 }
  0xed   : > { %v1324_v4 = vpop.f32.mrf.mxu0 }
  0xee   : > { %v1394_v5 = vpop.f32.mrf.mxu1 }
  0xef   : > { %v1325_v6 = vpop.f32.mrf.mxu0 }
  0xf0   : > { %v1395_v7 = vpop.f32.mrf.mxu1  ;;  %v1326_v40 = vadd.f32 %v1325_v6, %v1324_v4 }
  0xf1   : > { %v1327_v8 = vpop.f32.mrf.mxu0  ;;  %v1396_v41 = vadd.f32 %v1395_v7, %v1394_v5 }
  0xf2   : > { %v1397_v9 = vpop.f32.mrf.mxu1 }
  0xf3   : > { %v1328_v10 = vpop.f32.mrf.mxu0  ;;  %v1719_v51 = vadd.f32 %v1396_v41, %v1326_v40 }
  0xf4   : > { %v1398_v11 = vpop.f32.mrf.mxu1  ;;  %v1329_v36 = vadd.f32 %v1328_v10, %v1327_v8 }
  0xf5   : > { %v1330_v12 = vpop.f32.mrf.mxu0  ;;  %v1399_v37 = vadd.f32 %v1398_v11, %v1397_v9  ;;  %v857_v63 = vmul.f32 %v1719_v51, %v1719_v51 }
  0xf6   : > { %v1400_v13 = vpop.f32.mrf.mxu1 }
  0xf7   : > { %v1331_v14 = vpop.f32.mrf.mxu0  ;;  %v1717_v46 = vadd.f32 %v1399_v37, %v1329_v36 }
  0xf8   : > { %v1401_v15 = vpop.f32.mrf.mxu1  ;;  %v1332_v42 = vadd.f32 %v1331_v14, %v1330_v12 }
  0xf9   : > { %v1333_v16 = vpop.f32.mrf.mxu0  ;;  %v1402_v43 = vadd.f32 %v1401_v15, %v1400_v13  ;;  %v858_v57 = vmul.f32 %v1717_v46, %v1717_v46  ;;  %v833_v6 = vadd.f32 %v1717_v46, %v1719_v51 }
  0xfa   : > { %v1403_v17 = vpop.f32.mrf.mxu1 }
  0xfb   : > { %v1334_v18 = vpop.f32.mrf.mxu0  ;;  %v1721_v52 = vadd.f32 %v1402_v43, %v1332_v42  ;;  %v875_v7 = vadd.f32 %v858_v57, %v857_v63 }
  0xfc   : > { %v1404_v19 = vpop.f32.mrf.mxu1  ;;  %v1335_v47 = vadd.f32 %v1334_v18, %v1333_v16 }
  0xfd   : > { %v1336_v20 = vpop.f32.mrf.mxu0  ;;  %v1405_v48 = vadd.f32 %v1404_v19, %v1403_v17  ;;  %v859_v0 = vmul.f32 %v1721_v52, %v1721_v52  ;;  %v834_v14 = vadd.f32 %v833_v6, %v1721_v52 }
  0xfe   : > { %v1406_v21 = vpop.f32.mrf.mxu1 }
  0xff   : > { %v1337_v22 = vpop.f32.mrf.mxu0  ;;  %v1725_v58 = vadd.f32 %v1405_v48, %v1335_v47  ;;  %v876_v15 = vadd.f32 %v875_v7, %v859_v0 }
 0x100   : > { %v1407_v23 = vpop.f32.mrf.mxu1  ;;  %v1338_v53 = vadd.f32 %v1337_v22, %v1336_v20 }
 0x101   : > { %v1339_v24 = vpop.f32.mrf.mxu0  ;;  %v1408_v54 = vadd.f32 %v1407_v23, %v1406_v21  ;;  %v860_v8 = vmul.f32 %v1725_v58, %v1725_v58  ;;  %v835_v22 = vadd.f32 %v834_v14, %v1725_v58 }
 0x102   : > { %v1409_v25 = vpop.f32.mrf.mxu1 }
 0x103   : > { %v1340_v26 = vpop.f32.mrf.mxu0  ;;  %v1731_v1 = vadd.f32 %v1408_v54, %v1338_v53  ;;  %v877_v23 = vadd.f32 %v876_v15, %v860_v8 }
 0x104   : > { %v1410_v27 = vpop.f32.mrf.mxu1  ;;  %v1341_v60 = vadd.f32 %v1340_v26, %v1339_v24 }
 0x105   : > { %v1342_v28 = vpop.f32.mrf.mxu0  ;;  %v1411_v61 = vadd.f32 %v1410_v27, %v1409_v25  ;;  %v861_v16 = vmul.f32 %v1731_v1, %v1731_v1 }
 0x106   : > { %v1412_v29 = vpop.f32.mrf.mxu1 }
 0x107   : > { %v1343_v30 = vpop.f32.mrf.mxu0  ;;  %v1737_v10 = vadd.f32 %v1411_v61, %v1341_v60 }
 0x108   : > { %v1413_v31 = vpop.f32.mrf.mxu1  ;;  %v1344_v3 = vadd.f32 %v1343_v30, %v1342_v28  ;;  %v836_v30 = vadd.f32 %v835_v22, %v1731_v1 }
 0x109   : > { %v1345_v32 = vpop.f32.mrf.mxu0  ;;  %v1414_v4 = vadd.f32 %v1413_v31, %v1412_v29  ;;  %v862_v25 = vmul.f32 %v1737_v10, %v1737_v10  ;;  %v878_v31 = vadd.f32 %v877_v23, %v861_v16 }
 0x10a   : > { %v1415_v33 = vpop.f32.mrf.mxu1 }
 0x10b   : > { %v1346_v34 = vpop.f32.mrf.mxu0  ;;  %v1742_v18 = vadd.f32 %v1414_v4, %v1344_v3  ;;  %v879_v40 = vadd.f32 %v878_v31, %v862_v25 }
 0x10c   : > { %v1416_v35 = vpop.f32.mrf.mxu1  ;;  %v1347_v11 = vadd.f32 %v1346_v34, %v1345_v32 }
 0x10d   : > { %v1348_v38 = vpop.f32.mrf.mxu0  ;;  %v1417_v12 = vadd.f32 %v1416_v35, %v1415_v33  ;;  %v863_v33 = vmul.f32 %v1742_v18, %v1742_v18 }
 0x10e   : > { %v1418_v39 = vpop.f32.mrf.mxu1 }
 0x10f   : > { %v1349_v44 = vpop.f32.mrf.mxu0  ;;  %v1747_v26 = vadd.f32 %v1417_v12, %v1347_v11 }
 0x110   : > { %v1419_v45 = vpop.f32.mrf.mxu1  ;;  %v1350_v19 = vadd.f32 %v1349_v44, %v1348_v38  ;;  %v837_v38 = vadd.f32 %v836_v30, %v1737_v10 }
 0x111   : > { %v1351_v49 = vpop.f32.mrf.mxu0  ;;  %v1420_v20 = vadd.f32 %v1419_v45, %v1418_v39  ;;  %v864_v41 = vmul.f32 %v1747_v26, %v1747_v26 }
 0x112   : > { %v1421_v50 = vpop.f32.mrf.mxu1  ;;  %v838_v44 = vadd.f32 %v837_v38, %v1742_v18 }
 0x113   : > { %v1352_v55 = vpop.f32.mrf.mxu0  ;;  %v1752_v34 = vadd.f32 %v1420_v20, %v1350_v19 }
 0x114   : > { %v1422_v56 = vpop.f32.mrf.mxu1  ;;  %v1353_v27 = vadd.f32 %v1352_v55, %v1351_v49  ;;  %v880_v49 = vadd.f32 %v879_v40, %v863_v33  ;;  %v839_v55 = vadd.f32 %v838_v44, %v1747_v26 }
 0x115   : > { %v1354_v59 = vpop.f32.mrf.mxu0  ;;  %v1423_v28 = vadd.f32 %v1422_v56, %v1421_v50  ;;  %v865_v50 = vmul.f32 %v1752_v34, %v1752_v34 }
 0x116   : > { %v1424_v62 = vpop.f32.mrf.mxu1  ;;  %v881_v60 = vadd.f32 %v880_v49, %v864_v41  ;;  %v840_v63 = vadd.f32 %v839_v55, %v1752_v34 }
 0x117   : > { %v1355_v2 = vpop.f32.mrf.mxu0  ;;  %v1757_v42 = vadd.f32 %v1423_v28, %v1353_v27 }
 0x118   : > { %v1425_v5 = vpop.f32.mrf.mxu1  ;;  %v1356_v35 = vadd.f32 %v1355_v2, %v1354_v59 }
 0x119   : > { %v1357_v9 = vpop.f32.mrf.mxu0  ;;  %v1426_v36 = vadd.f32 %v1425_v5, %v1424_v62  ;;  %v866_v61 = vmul.f32 %v1757_v42, %v1757_v42  ;;  %v882_v5 = vadd.f32 %v881_v60, %v865_v50  ;;  %v841_v8 = vadd.f32 %v840_v63, %v1757_v42 }
 0x11a   : > { %v1427_v13 = vpop.f32.mrf.mxu1 }
 0x11b   : > { %v1358_v17 = vpop.f32.mrf.mxu0  ;;  %v1762_v53 = vadd.f32 %v1426_v36, %v1356_v35  ;;  %v883_v14 = vadd.f32 %v882_v5, %v866_v61 }
 0x11c   : > { %v1428_v21 = vpop.f32.mrf.mxu1  ;;  %v1359_v45 = vadd.f32 %v1358_v17, %v1357_v9 }
 0x11d   : > { %v1360_v24 = vpop.f32.mrf.mxu0  ;;  %v1429_v47 = vadd.f32 %v1428_v21, %v1427_v13  ;;  %v867_v6 = vmul.f32 %v1762_v53, %v1762_v53  ;;  %v842_v16 = vadd.f32 %v841_v8, %v1762_v53 }
 0x11e   : > { %v1430_v29 = vpop.f32.mrf.mxu1 }
 0x11f   : > { %v1361_v32 = vpop.f32.mrf.mxu0  ;;  %v1768_v0 = vadd.f32 %v1429_v47, %v1359_v45  ;;  %v884_v21 = vadd.f32 %v883_v14, %v867_v6 }
 0x120   : > { %v1431_v37 = vpop.f32.mrf.mxu1  ;;  %v1362_v56 = vadd.f32 %v1361_v32, %v1360_v24 }
 0x121   : > { %v1363_v39 = vpop.f32.mrf.mxu0  ;;  %v1432_v57 = vadd.f32 %v1431_v37, %v1430_v29  ;;  %v868_v17 = vmul.f32 %v1768_v0, %v1768_v0  ;;  %v843_v24 = vadd.f32 %v842_v16, %v1768_v0 }
 0x122   : > { %v1433_v43 = vpop.f32.mrf.mxu1 }
 0x123   : > { %v1364_v48 = vpop.f32.mrf.mxu0  ;;  %v1773_v9 = vadd.f32 %v1432_v57, %v1362_v56  ;;  %v885_v31 = vadd.f32 %v884_v21, %v868_v17 }
 0x124   : > { %v1434_v54 = vpop.f32.mrf.mxu1  ;;  %v1365_v2 = vadd.f32 %v1364_v48, %v1363_v39 }
 0x125   : > { %v1366_v59 = vpop.f32.mrf.mxu0  ;;  %v1435_v3 = vadd.f32 %v1434_v54, %v1433_v43  ;;  %v869_v25 = vmul.f32 %v1773_v9, %v1773_v9  ;;  %v844_v32 = vadd.f32 %v843_v24, %v1773_v9 }
 0x126   : > { %v1436_v62 = vpop.f32.mrf.mxu1 }
 0x127   : > { %v1367_v4 = vpop.f32.mrf.mxu0  ;;  %v1778_v19 = vadd.f32 %v1435_v3, %v1365_v2  ;;  %v886_v39 = vadd.f32 %v885_v31, %v869_v25 }
 0x128   : > { %v1437_v7 = vpop.f32.mrf.mxu1  ;;  %v1368_v11 = vadd.f32 %v1367_v4, %v1366_v59 }
 0x129   : > { %v1438_v12 = vadd.f32 %v1437_v7, %v1436_v62  ;;  %v1369_v13 = vpop.f32.mrf.mxu0  ;;  %v870_v33 = vmul.f32 %v1778_v19, %v1778_v19  ;;  %v845_v40 = vadd.f32 %v844_v32, %v1778_v19 }
 0x12a   : > { %v1439_v15 = vpop.f32.mrf.mxu1 }
 0x12b   : > { %v1370_v20 = vpop.f32.mrf.mxu0  ;;  %v1783_v27 = vadd.f32 %v1438_v12, %v1368_v11  ;;  %v887_v47 = vadd.f32 %v886_v39, %v870_v33 }
 0x12c   : > { %v1371_v22 = vadd.f32 %v1370_v20, %v1369_v13  ;;  %v1440_v23 = vpop.f32.mrf.mxu1 }
 0x12d   : > { %v1441_v28 = vadd.f32 %v1440_v23, %v1439_v15  ;;  %v1372_v29 = vpop.f32.mrf.mxu0  ;;  %v871_v41 = vmul.f32 %v1783_v27, %v1783_v27  ;;  %v846_v48 = vadd.f32 %v845_v40, %v1783_v27 }
 0x12e   : > { %v1442_v30 = vpop.f32.mrf.mxu1 }
 0x12f   : > { %v1788_v35 = vadd.f32 %v1441_v28, %v1371_v22  ;;  %v1373_v36 = vpop.f32.mrf.mxu0  ;;  %v888_v57 = vadd.f32 %v887_v47, %v871_v41 }
 0x130   : > { %v1374_v37 = vadd.f32 %v1373_v36, %v1372_v29  ;;  %v1443_v38 = vpop.f32.mrf.mxu1 }
 0x131   : > { %v1444_v43 = vadd.f32 %v1443_v38, %v1442_v30  ;;  %v1375_v44 = vpop.f32.mrf.mxu0  ;;  %v872_v49 = vmul.f32 %v1788_v35, %v1788_v35  ;;  %v847_v59 = vadd.f32 %v846_v48, %v1788_v35 }
 0x132   : > { %v1445_v45 = vpop.f32.mrf.mxu1 }
 0x133   : > { %v1796_v50 = vadd.f32 %v1444_v43, %v1374_v37  ;;  %v1376_v54 = vpop.f32.mrf.mxu0  ;;  %v889_v62 = vadd.f32 %v888_v57, %v872_v49 }
 0x134   : > { %v1377_v55 = vadd.f32 %v1376_v54, %v1375_v44  ;;  %v1446_v56 = vpop.f32.mrf.mxu1 }
 0x135   : > { %v873_v60 = vmul.f32 %v1796_v50, %v1796_v50  ;;  %v1447_v61 = vadd.f32 %v1446_v56, %v1445_v45  ;;  %v848_v63 = vadd.f32 %v847_v59, %v1796_v50 }
 0x137   : > { %v830_v2 = vadd.f32 %v1447_v61, %v1377_v55  ;;  %v890_v3 = vadd.f32 %v889_v62, %v873_v60 }
 0x139   : > { %v849_v4 = vadd.f32 %v848_v63, %v830_v2  ;;  %v874_v5 = vmul.f32 %v830_v2, %v830_v2 }
 0x13b   : > { %v850_v6 = vrot.slane %v849_v4, 4  ;;  %v891_v7 = vadd.f32 %v890_v3, %v874_v5 }
 0x13d   : > { %v851_v8 = vadd.f32 %v850_v6, %v849_v4  ;;  %v892_v11 = vrot.slane %v891_v7, 4 }
 0x13f   : > { %v852_v12 = vrot.slane %v851_v8, 2  ;;  %v893_v13 = vadd.f32 %v892_v11, %v891_v7 }
 0x141   : > { %v853_v14 = vadd.f32 %v852_v12, %v851_v8  ;;  %v894_v15 = vrot.slane %v893_v13, 2 }
 0x143   : > { %v854_v16 = vrot.slane %v853_v14, 1  ;;  %v895_v17 = vadd.f32 %v894_v15, %v893_v13 }
 0x145   : > { %v855_v20 = vadd.f32 %v854_v16, %v853_v14  ;;  %v896_v21 = vrot.slane %v895_v17, 1 }
 0x147   : > { %v856_v22 = vmul.f32 0.0069444445, %v855_v20  ;;  %v897_v23 = vadd.f32 %v896_v21, %v895_v17 }
 0x149   : > { %v898_v24 = vmul.f32 0.0069444445, %v897_v23  ;;  %v899_v25 = vmul.f32 %v856_v22, %v856_v22  ;;  %v902_v31 = vsub.f32 %v1719_v51, %v856_v22  ;;  %v903_v32 = vsub.f32 %v1717_v46, %v856_v22 }
 0x14a   : > { %v904_v33 = vsub.f32 %v1721_v52, %v856_v22  ;;  %v905_v36 = vsub.f32 %v1725_v58, %v856_v22  ;;  %v906_v37 = vsub.f32 %v1731_v1, %v856_v22  ;;  %v907_v38 = vsub.f32 %v1737_v10, %v856_v22 }
 0x14b   : > { %v900_v28 = vsub.f32 %v898_v24, %v899_v25  ;;  %v908_v39 = vsub.f32 %v1742_v18, %v856_v22  ;;  %v909_v40 = vsub.f32 %v1747_v26, %v856_v22  ;;  %v910_v41 = vsub.f32 %v1752_v34, %v856_v22 }
 0x14c   : > { %v911_v43 = vsub.f32 %v1757_v42, %v856_v22  ;;  %v912_v51 = vsub.f32 %v1762_v53, %v856_v22  ;;  %v913_v46 = vsub.f32 %v1768_v0, %v856_v22  ;;  %v914_v52 = vsub.f32 %v1773_v9, %v856_v22 }
 0x14d   : > { %v901_v29 = vmax.f32 %v900_v28, 0.0  ;;  %v915_v58 = vsub.f32 %v1778_v19, %v856_v22  ;;  %v916_v1 = vsub.f32 %v1783_v27, %v856_v22  ;;  %v917_v10 = vsub.f32 %v1788_v35, %v856_v22 }
 0x14e   : > { %v918_v18 = vsub.f32 %v1796_v50, %v856_v22  ;;  %v919_v26 = vsub.f32 %v830_v2, %v856_v22 }
 0x14f   : > { %v920_v30 = vadd.f32 1e-05, %v901_v29 }
 0x151   : > { %1542 = vrsqrt.f32 %v920_v30 }
 0x15e   : > { %v1543_v44 = vpop.eup %1542 }
 0x15f   : > { %v922_v45 = vmul.f32 %v1543_v44, %v902_v31  ;;  %v923_v34 = vmul.f32 %v1543_v44, %v903_v32  ;;  %v924_v47 = vmul.f32 %v1543_v44, %v904_v33  ;;  %v925_v42 = vmul.f32 %v1543_v44, %v905_v36 }
 0x160   : > { %v926_v48 = vmul.f32 %v1543_v44, %v906_v37  ;;  %v927_v53 = vmul.f32 %v1543_v44, %v907_v38  ;;  %v928_v49 = vmul.f32 %v1543_v44, %v908_v39  ;;  %v929_v0 = vmul.f32 %v1543_v44, %v909_v40 }
 0x161   : > { %v930_v54 = vmul.f32 %v1543_v44, %v910_v41  ;;  %v931_v9 = vmul.f32 %v1543_v44, %v911_v43  ;;  %v932_v55 = vmul.f32 %v1543_v44, %v912_v51  ;;  %v933_v19 = vmul.f32 %v1543_v44, %v913_v46 }
 0x162   : > { %v934_v56 = vmul.f32 %v1543_v44, %v914_v52  ;;  %v935_v57 = vmul.f32 %v1543_v44, %v915_v58  ;;  %v936_v27 = vmul.f32 %v1543_v44, %v916_v1  ;;  %v937_v59 = vmul.f32 %v1543_v44, %v917_v10 }
 0x163   : > { %v938_v35 = vmul.f32 %v1543_v44, %v918_v18  ;;  %v939_v50 = vmul.f32 %v1543_v44, %v919_v26  ;;  %vm942_vm2 = vcmp.ge.f32.partialorder %v924_v47, 0.0  ;;  %vm943_vm3 = vcmp.ge.f32.partialorder %v925_v42, 0.0 }
 0x164   : > { %vm944_vm4 = vcmp.ge.f32.partialorder %v926_v48, 0.0  ;;  %vm945_vm5 = vcmp.ge.f32.partialorder %v927_v53, 0.0  ;;  %vm946_vm6 = vcmp.ge.f32.partialorder %v928_v49, 0.0  ;;  %vm947_vm7 = vcmp.ge.f32.partialorder %v929_v0, 0.0 }
 0x165   : > { %vm949_vm9 = vcmp.ge.f32.partialorder %v931_v9, 0.0  ;;  %vm950_vm10 = vcmp.ge.f32.partialorder %v932_v55, 0.0  ;;  %vm951_vm11 = vcmp.ge.f32.partialorder %v933_v19, 0.0  ;;  %vm952_vm12 = vcmp.ge.f32.partialorder %v934_v56, 0.0 }
 0x166   : > { %vm954_vm14 = vcmp.ge.f32.partialorder %v936_v27, 0.0  ;;  %vm955_vm15 = vcmp.ge.f32.partialorder %v937_v59, 0.0  ;;  %vm956_vm0 = vcmp.ge.f32.partialorder %v938_v35, 0.0  ;;  %vm957_vm1 = vcmp.ge.f32.partialorder %v939_v50, 0.0 }
 0x167   : > { %v958_v60 = vmul.f32 0.2, %v922_v45  ;;  %v959_v61 = vmul.f32 0.2, %v923_v34  ;;  %v960_v62 = vmul.f32 0.2, %v924_v47 }
 0x168   : > { %v961_v63 = vmul.f32 0.2, %v925_v42  ;;  %v962_v2 = vmul.f32 0.2, %v926_v48  ;;  %v963_v3 = vmul.f32 0.2, %v927_v53 }
 0x169   : > { %v964_v4 = vmul.f32 0.2, %v928_v49  ;;  %v965_v5 = vmul.f32 0.2, %v929_v0  ;;  %v966_v6 = vmul.f32 0.2, %v930_v54  ;;  %v978_v17 = vsel %vm942_vm2, %v924_v47, %v960_v62 }
 0x16a   : > { %vm1849_vm8 = vcmp.ge.f32.partialorder %v922_v45, 0.0  ;;  %v967_v8 = vmul.f32 0.2, %v931_v9  ;;  %v968_v11 = vmul.f32 0.2, %v932_v55  ;;  %vm1850_vm13 = vcmp.ge.f32.partialorder %v923_v34, 0.0 }
 0x16b   : > { %v976_v7 = vsel %vm1849_vm8, %v922_v45, %v958_v60  ;;  %v969_v12 = vmul.f32 0.2, %v933_v19  ;;  %v977_v13 = vsel %vm1850_vm13, %v923_v34, %v959_v61  ;;  %v970_v14 = vmul.f32 0.2, %v934_v56 }
 0x16c   : > { %v971_v15 = vmul.f32 0.2, %v935_v57  ;;  %v972_v16 = vmul.f32 0.2, %v936_v27  ;;  %v973_v20 = vmul.f32 0.2, %v937_v59  ;;  %v979_v23 = vsel %vm943_vm3, %v925_v42, %v961_v63 }
 0x16d   : > { %v974_v21 = vmul.f32 0.2, %v938_v35  ;;  %v975_v22 = vmul.f32 0.2, %v939_v50  ;;  %v980_v24 = vsel %vm944_vm4, %v926_v48, %v962_v2  ;;  %v981_v25 = vsel %vm945_vm5, %v927_v53, %v963_v3 }
 0x16e   : > { %v982_v28 = vsel %vm946_vm6, %v928_v49, %v964_v4  ;;  %v983_v29 = vsel %vm947_vm7, %v929_v0, %v965_v5  ;;  %vm1851_vm8 = vcmp.ge.f32.partialorder %v930_v54, 0.0  ;;  %v985_v31 = vsel %vm949_vm9, %v931_v9, %v967_v8 }
 0x16f   : > { %v984_v30 = vsel %vm1851_vm8, %v930_v54, %v966_v6  ;;  %v986_v32 = vsel %vm950_vm10, %v932_v55, %v968_v11  ;;  %v987_v33 = vsel %vm951_vm11, %v933_v19, %v969_v12  ;;  %v988_v36 = vsel %vm952_vm12, %v934_v56, %v970_v14 }
 0x170   : > { %vm1852_vm2 = vcmp.ge.f32.partialorder %v935_v57, 0.0  ;;  %v990_v38 = vsel %vm954_vm14, %v936_v27, %v972_v16  ;;  %v991_v39 = vsel %vm955_vm15, %v937_v59, %v973_v20  ;;  %v992_v40 = vsel %vm956_vm0, %v938_v35, %v974_v21 }
 0x171   : > { %v989_v37 = vsel %vm1852_vm2, %v935_v57, %v971_v15  ;;  %v993_v41 = vsel %vm957_vm1, %v939_v50, %v975_v22  ;;  %v1258_v43 = vpack.c.bf16 %v977_v13, %v976_v7  ;;  %v1263_v51 = vpack.c.bf16 %v979_v23, %v978_v17 }
 0x172   : > { %v1268_v46 = vpack.c.bf16 %v981_v25, %v980_v24  ;;  %v1273_v52 = vpack.c.bf16 %v983_v29, %v982_v28  ;;  %v1278_v58 = vpack.c.bf16 %v985_v31, %v984_v30  ;;  %v1283_v44 = vpack.c.bf16 %v987_v33, %v986_v32 }
 0x173   : > { %1259 = vst [vmem:[%s148_s30] sm:$0xff] %v1258_v43   ;;  %1300 = vst [vmem:[%s148_s30 + $0x8] sm:$0xff] %v1263_v51   ;;  %v1288_v1 = vpack.c.bf16 %v989_v37, %v988_v36  ;;  %v1293_v10 = vpack.c.bf16 %v991_v39, %v990_v38  ;;  %v1298_v18 = vpack.c.bf16 %v993_v41, %v992_v40 }
 0x174   : > { %1301 = vst [vmem:[%s148_s30 + $0x10] sm:$0xff] %v1268_v46   ;;  %1302 = vst [vmem:[%s148_s30 + $0x18] sm:$0xff] %v1273_v52  }
 0x175   : > { %1303 = vst [vmem:[%s148_s30 + $0x20] sm:$0xff] %v1278_v58   ;;  %1304 = vst [vmem:[%s148_s30 + $0x28] sm:$0xff] %v1283_v44  }
 0x176   : > { %1305 = vst [vmem:[%s148_s30 + $0x30] sm:$0xff] %v1288_v1   ;;  %1306 = vst [vmem:[%s148_s30 + $0x38] sm:$0xff] %v1293_v10  }
 0x177   : > { %1307 = vst [vmem:[%s148_s30 + $0x40] sm:$0xff] %v1298_v18  }
 0x178 PF: > { %s12_s9 = sadd.s32 1, %s1550_s9  }
 0x179   : > { %p9_p4 = scmp.ge.s32.totalorder %s12_s9, 4  }
 0x17b   :  { %11 = sbr.rel (!%p9_p4) target bundleno = 1 (0x1), region = 58 }

// kernel: netd_forward.8
= control target key start
LH: loop header
LB: loop body
LE: loop exit
PB: predicated region body
PF: predicated region fallthrough
CT: control target
= control target key end

     0   :  { %s1428_s9 = smov 0   ;;  %s1678_s0 = inlined_call_operand.vmem [shape: bf16[32,1152], index: 0, kind: input, shape index: {}]   ;;  %s1679_s1 = inlined_call_operand.vmem [shape: bf16[1152,128], index: 1, kind: input, shape index: {}]   ;;  %s1680_s2 = inlined_call_operand.vmem [shape: bf16[32,128], index: 2, kind: output, shape index: {}]  }
   0x1 LB: > { %s1087_s10 = sadd.s32 4294967295, %s1409_s9   ;;  %p1091_p0 = scmp.ge.s32.totalorder %s1409_s9, 1  ;;  %s1409_s9 = sphi %s1428_s9, %s12_s9  }
   0x2   : > { %p114_p1 = scmp.lt.s32.totalorder %s1409_s9, 3 }
   0x4   : > { %p115_p2 = pnand %p1091_p0, %p114_p1 }
   0x5   : > { %s1092_s15 = sshll.u32 (!%p115_p2), %s1087_s10, 1 }
   0x6   : > { %118 = sbr.rel (%p115_p2) target bundleno = 354 (0x162), region = 28  ;;  %p138_p3 = scmp.lt.s32.totalorder (!%p115_p2), %s1092_s15, 3 }
   0xb   : > { %v1316_v0 = vld [vmem:[%s1679_s1 + $0x78] sm:$0xff]   ;;  %v1320_v4 = vld [vmem:[%s1679_s1 + $0x70] sm:$0xff]   ;;  %v1324_v8 = vld [vmem:[%s1679_s1 + $0x68] sm:$0xff]   ;;  %s1682_s15 = smov (!%p138_p3, %s1092_s15), 3  ;;  %vm1412_vm0 = vmmov 0  }
   0xc   : > { %v1317_v1 = vld [vmem:[%s1679_s1 + $0xf8] sm:$0xff]   ;;  %1188 = vmatprep.subr.bf16.mxu0 %v1316_v0  ;;  %v1321_v5 = vld [vmem:[%s1679_s1 + $0xf0] sm:$0xff]   ;;  %v1325_v9 = vld [vmem:[%s1679_s1 + $0xe8] sm:$0xff]   ;;  %s1305_s11 = smul.u32 36, %s1682_s15 }
   0xd   : > { %v1318_v2 = vld [vmem:[%s1679_s1 + $0x38] sm:$0xff]   ;;  %1210 = vmatprep.subr.bf16.mxu1 %v1317_v1  ;;  %v1322_v6 = vld [vmem:[%s1679_s1 + $0x30] sm:$0xff]   ;;  %v1326_v10 = vld [vmem:[%s1679_s1 + $0x28] sm:$0xff]  }
   0xe   : > { %v1319_v3 = vld [vmem:[%s1679_s1 + $0xb8] sm:$0xff]   ;;  %1189 = vmatpush3.bf16.msra.mxu0 %v1318_v2  ;;  %v1323_v7 = vld [vmem:[%s1679_s1 + $0xb0] sm:$0xff]   ;;  %v1327_v11 = vld [vmem:[%s1679_s1 + $0xa8] sm:$0xff]   ;;  %s1534_s23 = scalar_lea.vmem %s1678_s0, %s1305_s11 }
   0xf   : > { %1211 = vmatpush3.bf16.msra.mxu1 %v1319_v3  ;;  %1190 = vmatprep.subr.bf16.mxu0 %v1320_v4  ;;  %v1328_v12 = vld [vmem:[%s1679_s1 + $0x60] sm:$0xff]   ;;  %v1332_v16 = vld [vmem:[%s1679_s1 + $0x58] sm:$0xff]   ;;  %v1336_v20 = vld [vmem:[%s1679_s1 + $0x50] sm:$0xff]  }
  0x10   : > { %1212 = vmatprep.subr.bf16.mxu1 %v1321_v5  ;;  %v1329_v13 = vld [vmem:[%s1679_s1 + $0xe0] sm:$0xff]   ;;  %v1333_v17 = vld [vmem:[%s1679_s1 + $0xd8] sm:$0xff]   ;;  %v1337_v21 = vld [vmem:[%s1679_s1 + $0xd0] sm:$0xff]  }
  0x11   : > { %v1330_v14 = vld [vmem:[%s1679_s1 + $0x20] sm:$0xff]   ;;  %v1334_v18 = vld [vmem:[%s1679_s1 + $0x18] sm:$0xff]   ;;  %v1338_v22 = vld [vmem:[%s1679_s1 + $0x10] sm:$0xff]  }
  0x12   : > { %1191 = vmatpush3.bf16.msra.mxu0 %v1322_v6  ;;  %v1331_v15 = vld [vmem:[%s1679_s1 + $0xa0] sm:$0xff]   ;;  %v1335_v19 = vld [vmem:[%s1679_s1 + $0x98] sm:$0xff]   ;;  %v1339_v23 = vld [vmem:[%s1679_s1 + $0x90] sm:$0xff]   ;;  %v1411_v6 = vmov 0.0  }
  0x13   : > { %1213 = vmatpush3.bf16.msra.mxu1 %v1323_v7  ;;  %1192 = vmatprep.subr.bf16.mxu0 %v1324_v8  ;;  %v1340_v24 = vld [vmem:[%s1679_s1 + $0x48] sm:$0xff]   ;;  %v1344_v28 = vld [vmem:[%s1679_s1 + $0x40] sm:$0xff]   ;;  %v1354_v36 = vld [vmem:[%s1679_s1 + $0x178] sm:$0xff]  }
  0x14   : > { %1214 = vmatprep.subr.bf16.mxu1 %v1325_v9  ;;  %v1341_v25 = vld [vmem:[%s1679_s1 + $0xc8] sm:$0xff]   ;;  %v1345_v29 = vld [vmem:[%s1679_s1 + $0xc0] sm:$0xff]   ;;  %v1355_v37 = vld [vmem:[%s1679_s1 + $0x138] sm:$0xff]  }
  0x15   : > { %v1342_v26 = vld [vmem:[%s1679_s1 + $0x8] sm:$0xff]   ;;  %v1346_v30 = vld [vmem:[%s1679_s1] sm:$0xff]   ;;  %v1356_v38 = vld [vmem:[%s1679_s1 + $0x1f8] sm:$0xff]  }
  0x16   : > { %1193 = vmatpush3.bf16.msra.mxu0 %v1326_v10  ;;  %v1343_v27 = vld [vmem:[%s1679_s1 + $0x88] sm:$0xff]   ;;  %v1347_v31 = vld [vmem:[%s1679_s1 + $0x80] sm:$0xff]   ;;  %v1357_v39 = vld [vmem:[%s1679_s1 + $0x1b8] sm:$0xff]  }
  0x17   : > { %1215 = vmatpush3.bf16.msra.mxu1 %v1327_v11  ;;  %1194 = vmatprep.subr.bf16.mxu0 %v1328_v12  ;;  %v1348_v32 = vld [vmem:[%s1534_s23] ss:$36 sps:$4 sm:$0xff]   ;;  %v1351_v34 = vld [vmem:[%s1534_s23 + $0x8] ss:$36 sps:$4 sm:$0xff]   ;;  %v1358_v40 = vld [vmem:[%s1679_s1 + $0x170] sm:$0xff]  }
  0x18   : > { %1216 = vmatprep.subr.bf16.mxu1 %v1329_v13  ;;  %v1350_v33 = vld [vmem:[%s1534_s23 + $0x4] ss:$36 sps:$4 sm:$0xff]   ;;  %v1353_v35 = vld [vmem:[%s1534_s23 + $0xc] ss:$36 sps:$4 sm:$0xff]   ;;  %v1370_v52 = vld [vmem:[%s1679_s1 + $0x158] sm:$0xff]  }
  0x19   : > { %815 = vmatprep.mubr.bf16.mxu0 %v1350_v33  ;;  %856 = vmatprep.mubr.bf16.mxu1 %v1353_v35  ;;  %v1359_v41 = vld [vmem:[%s1679_s1 + $0x130] sm:$0xff]   ;;  %v1362_v44 = vld [vmem:[%s1679_s1 + $0x168] sm:$0xff]   ;;  %v1366_v48 = vld [vmem:[%s1679_s1 + $0x160] sm:$0xff]  }
  0x1a   : > { %1195 = vmatpush3.bf16.msra.mxu0 %v1330_v14  ;;  %v1360_v42 = vld [vmem:[%s1679_s1 + $0x1f0] sm:$0xff]   ;;  %v1363_v45 = vld [vmem:[%s1679_s1 + $0x128] sm:$0xff]   ;;  %v1367_v49 = vld [vmem:[%s1679_s1 + $0x120] sm:$0xff]  }
  0x1b   : > { %1217 = vmatpush3.bf16.msra.mxu1 %v1331_v15  ;;  %1196 = vmatprep.subr.bf16.mxu0 %v1332_v16  ;;  %v1361_v43 = vld [vmem:[%s1679_s1 + $0x1b0] sm:$0xff]   ;;  %v1364_v46 = vld [vmem:[%s1679_s1 + $0x1e8] sm:$0xff]   ;;  %v1368_v50 = vld [vmem:[%s1679_s1 + $0x1e0] sm:$0xff]  }
  0x1c   : > { %1218 = vmatprep.subr.bf16.mxu1 %v1333_v17  ;;  %v1365_v47 = vld [vmem:[%s1679_s1 + $0x1a8] sm:$0xff]   ;;  %v1369_v51 = vld [vmem:[%s1679_s1 + $0x1a0] sm:$0xff]   ;;  %v1371_v53 = vld [vmem:[%s1679_s1 + $0x118] sm:$0xff]  }
  0x1d   : > { %v1372_v54 = vld [vmem:[%s1679_s1 + $0x1d8] sm:$0xff]   ;;  %v1374_v56 = vld [vmem:[%s1679_s1 + $0x150] sm:$0xff]   ;;  %v1378_v60 = vld [vmem:[%s1679_s1 + $0x148] sm:$0xff]  }
  0x1e   : > { %1197 = vmatpush3.bf16.msra.mxu0 %v1334_v18  ;;  %v1373_v55 = vld [vmem:[%s1679_s1 + $0x198] sm:$0xff]   ;;  %v1375_v57 = vld [vmem:[%s1679_s1 + $0x110] sm:$0xff]   ;;  %v1379_v61 = vld [vmem:[%s1679_s1 + $0x108] sm:$0xff]  }
  0x1f   : > { %1219 = vmatpush3.bf16.msra.mxu1 %v1335_v19  ;;  %1198 = vmatprep.subr.bf16.mxu0 %v1336_v20  ;;  %v1376_v58 = vld [vmem:[%s1679_s1 + $0x1d0] sm:$0xff]   ;;  %v1380_v62 = vld [vmem:[%s1679_s1 + $0x1c8] sm:$0xff]   ;;  %v1382_v0 = vld [vmem:[%s1679_s1 + $0x140] sm:$0xff]  }
  0x20   : > { %1220 = vmatprep.subr.bf16.mxu1 %v1337_v21  ;;  %v1377_v59 = vld [vmem:[%s1679_s1 + $0x190] sm:$0xff]   ;;  %v1381_v63 = vld [vmem:[%s1679_s1 + $0x188] sm:$0xff]   ;;  %v1383_v1 = vld [vmem:[%s1679_s1 + $0x100] sm:$0xff]  }
  0x21   : > { %v1384_v2 = vld [vmem:[%s1679_s1 + $0x1c0] sm:$0xff]   ;;  %v1385_v3 = vld [vmem:[%s1534_s23 + $0x10] ss:$36 sps:$4 sm:$0xff]   ;;  %v1389_v7 = vld [vmem:[%s1534_s23 + $0x18] ss:$36 sps:$4 sm:$0xff]  }
  0x22   : > { %1199 = vmatpush3.bf16.msra.mxu0 %v1338_v22  ;;  %v1387_v4 = vld [vmem:[%s1534_s23 + $0x14] ss:$36 sps:$4 sm:$0xff]   ;;  %v1388_v5 = vld [vmem:[%s1679_s1 + $0x180] sm:$0xff]   ;;  %v1394_v11 = vld [vmem:[%s1679_s1 + $0x228] sm:$0xff]  }
  0x23   : > { %1221 = vmatpush3.bf16.msra.mxu1 %v1339_v23  ;;  %1200 = vmatprep.subr.bf16.mxu0 %v1340_v24  ;;  %v1391_v8 = vld [vmem:[%s1534_s23 + $0x1c] ss:$36 sps:$4 sm:$0xff]   ;;  %v1393_v10 = vld [vmem:[%s1679_s1 + $0x230] sm:$0xff]   ;;  %v1398_v15 = vld [vmem:[%s1679_s1 + $0x208] sm:$0xff]  }
  0x24   : > { %1222 = vmatprep.subr.bf16.mxu1 %v1341_v25  ;;  %v1392_v9 = vld [vmem:[%s1679_s1 + $0x238] sm:$0xff]   ;;  %v1395_v12 = vld [vmem:[%s1679_s1 + $0x220] sm:$0xff]   ;;  %v1397_v14 = vld [vmem:[%s1679_s1 + $0x210] sm:$0xff]  }
  0x25   : > { %v1396_v13 = vld [vmem:[%s1679_s1 + $0x218] sm:$0xff]   ;;  %v1399_v16 = vld [vmem:[%s1679_s1 + $0x200] sm:$0xff]  }
  0x26   : > { %1201 = vmatpush3.bf16.msra.mxu0 %v1342_v26  ;;  %v1400_v17 = vld [vmem:[%s1534_s23 + $0x20] ss:$36 sps:$4 sm:$0xff]   ;;  %s1095_s23 = sshll.u32 %s1682_s15, 2 }
  0x27   : > { %1223 = vmatpush3.bf16.msra.mxu1 %v1343_v27  ;;  %1202 = vmatprep.subr.bf16.mxu0 %v1344_v28  ;;  %s148_s6 = scalar_lea.vmem %s1680_s2, %s1095_s23 }
  0x28   : > { %1224 = vmatprep.subr.bf16.mxu1 %v1345_v29 }
  0x2a   : > { %1203 = vmatpush3.bf16.msra.mxu0 %v1346_v30 }
  0x2b   : > { %1225 = vmatpush3.bf16.msra.mxu1 %v1347_v31  ;;  %1232 = vmatprep.subr.bf16.mxu0 %v1354_v36 }
  0x2c   : > { %1254 = vmatprep.subr.bf16.mxu1 %v1356_v38 }
  0x2d   : > { %816 = vmatmul.mubr.bf16.vlgmr.msra.gmra.mxu0 %v1348_v32 }
  0x2e   : > { %857 = vmatmul.mubr.bf16.vlgmr.msra.gmra.mxu1 %v1351_v34  ;;  %1233 = vmatpush3.bf16.msra.mxu0 %v1355_v37 }
  0x2f   : > { %1255 = vmatpush3.bf16.msra.mxu1 %v1357_v39  ;;  %1234 = vmatprep.subr.bf16.mxu0 %v1358_v40 }
  0x30   : > { %1256 = vmatprep.subr.bf16.mxu1 %v1360_v42  ;;  %897 = vmatprep.mubr.bf16.mxu0 %v1387_v4 }
  0x31   : > { %938 = vmatprep.mubr.bf16.mxu1 %v1391_v8 }
  0x32   : > { %1235 = vmatpush3.bf16.msra.mxu0 %v1359_v41 }
  0x33   : > { %1257 = vmatpush3.bf16.msra.mxu1 %v1361_v43  ;;  %1236 = vmatprep.subr.bf16.mxu0 %v1362_v44 }
  0x34   : > { %1258 = vmatprep.subr.bf16.mxu1 %v1364_v46 }
  0x36   : > { %1237 = vmatpush3.bf16.msra.mxu0 %v1363_v45 }
  0x37   : > { %1259 = vmatpush3.bf16.msra.mxu1 %v1365_v47  ;;  %1238 = vmatprep.subr.bf16.mxu0 %v1366_v48 }
  0x38   : > { %1260 = vmatprep.subr.bf16.mxu1 %v1368_v50 }
  0x3a   : > { %1239 = vmatpush3.bf16.msra.mxu0 %v1367_v49 }
  0x3b   : > { %1261 = vmatpush3.bf16.msra.mxu1 %v1369_v51  ;;  %1240 = vmatprep.subr.bf16.mxu0 %v1370_v52 }
  0x3c   : > { %1262 = vmatprep.subr.bf16.mxu1 %v1372_v54 }
  0x3e   : > { %1241 = vmatpush3.bf16.msra.mxu0 %v1371_v53 }
  0x3f   : > { %1263 = vmatpush3.bf16.msra.mxu1 %v1373_v55  ;;  %1242 = vmatprep.subr.bf16.mxu0 %v1374_v56 }
  0x40   : > { %1264 = vmatprep.subr.bf16.mxu1 %v1376_v58 }
  0x42   : > { %1243 = vmatpush3.bf16.msra.mxu0 %v1375_v57 }
  0x43   : > { %1265 = vmatpush3.bf16.msra.mxu1 %v1377_v59  ;;  %1244 = vmatprep.subr.bf16.mxu0 %v1378_v60 }
  0x44   : > { %1266 = vmatprep.subr.bf16.mxu1 %v1380_v62 }
  0x46   : > { %1245 = vmatpush3.bf16.msra.mxu0 %v1379_v61 }
  0x47   : > { %1267 = vmatpush3.bf16.msra.mxu1 %v1381_v63  ;;  %1246 = vmatprep.subr.bf16.mxu0 %v1382_v0 }
  0x48   : > { %1268 = vmatprep.subr.bf16.mxu1 %v1384_v2 }
  0x4a   : > { %1247 = vmatpush3.bf16.msra.mxu0 %v1383_v1 }
  0x4b   : > { %1285 = vmatprep.subr.bf16.mxu0 %v1411_v6  ;;  %1269 = vmatpush3.bf16.msra.mxu1 %v1388_v5 }
  0x4d   : > { %898 = vmatmul.mubr.bf16.vlgmr.msra.gmra.mxu0 %v1385_v3 }
  0x4e   : > { %1301 = vmatprep.mubr.msk.bf16.mxu0 %vm1412_vm0, %v1411_v6  ;;  %1286 = vmatpush3.bf16.msra.mxu0 %v1392_v9 }
  0x4f   : > { %939 = vmatmul.mubr.bf16.vlgmr.msra.gmra.mxu1 %v1389_v7  ;;  %1287 = vmatprep.subr.bf16.mxu0 %v1411_v6 }
  0x52   : > { %1288 = vmatpush3.bf16.msra.mxu0 %v1393_v10 }
  0x53   : > { %1289 = vmatprep.subr.bf16.mxu0 %v1411_v6 }
  0x56   : > { %1290 = vmatpush3.bf16.msra.mxu0 %v1394_v11 }
  0x57   : > { %1291 = vmatprep.subr.bf16.mxu0 %v1411_v6 }
  0x5a   : > { %1292 = vmatpush3.bf16.msra.mxu0 %v1395_v12 }
  0x5b   : > { %1293 = vmatprep.subr.bf16.mxu0 %v1411_v6 }
  0x5e   : > { %1294 = vmatpush3.bf16.msra.mxu0 %v1396_v13 }
  0x5f   : > { %1295 = vmatprep.subr.bf16.mxu0 %v1411_v6 }
  0x62   : > { %1296 = vmatpush3.bf16.msra.mxu0 %v1397_v14 }
  0x63   : > { %1297 = vmatprep.subr.bf16.mxu0 %v1411_v6 }
  0x66   : > { %1298 = vmatpush3.bf16.msra.mxu0 %v1398_v15 }
  0x67   : > { %1299 = vmatprep.subr.bf16.mxu0 %v1411_v6 }
  0x6a   : > { %1300 = vmatpush3.bf16.msra.mxu0 %v1399_v16 }
  0x6d   : > { %1302 = vmatmul.mubr.bf16.vlgmr.msra.gmra.mxu0 %v1400_v17 }
  0xed   : > { %v1204_v18 = vpop.f32.mrf.mxu0 }
  0xee   : > { %v1226_v19 = vpop.f32.mrf.mxu1 }
  0xef   : > { %v1205_v20 = vpop.f32.mrf.mxu0 }
  0xf0   : > { %v1227_v21 = vpop.f32.mrf.mxu1  ;;  %v1206_v31 = vadd.f32 %v1205_v20, %v1204_v18 }
  0xf1   : > { %v1207_v22 = vpop.f32.mrf.mxu0  ;;  %v1228_v32 = vadd.f32 %v1227_v21, %v1226_v19 }
  0xf2   : > { %v1229_v23 = vpop.f32.mrf.mxu1 }
  0xf3   : > { %v1208_v24 = vpop.f32.mrf.mxu0  ;;  %v859_v38 = vadd.f32 %v1228_v32, %v1206_v31 }
  0xf4   : > { %v1230_v26 = vpop.f32.mrf.mxu1  ;;  %v1209_v35 = vadd.f32 %v1208_v24, %v1207_v22 }
  0xf5   : > { %v1231_v36 = vadd.f32 %v1230_v26, %v1229_v23 }
  0xf7   : > { %v862_v41 = vadd.f32 %v1231_v36, %v1209_v35 }
 0x10d   : > { %v1248_v25 = vpop.f32.mrf.mxu0 }
 0x10f   : > { %v1249_v27 = vpop.f32.mrf.mxu0  ;;  %v1270_v28 = vpop.f32.mrf.mxu1 }
 0x110   : > { %v1250_v37 = vadd.f32 %v1249_v27, %v1248_v25 }
 0x111   : > { %v1251_v29 = vpop.f32.mrf.mxu0  ;;  %v1271_v30 = vpop.f32.mrf.mxu1 }
 0x112   : > { %v900_v42 = vadd.f32 %v1250_v37, %v859_v38  ;;  %v1272_v43 = vadd.f32 %v1271_v30, %v1270_v28 }
 0x113   : > { %v1252_v33 = vpop.f32.mrf.mxu0  ;;  %v1273_v34 = vpop.f32.mrf.mxu1 }
 0x114   : > { %v1253_v39 = vadd.f32 %v1252_v33, %v1251_v29  ;;  %v941_v47 = vadd.f32 %v1272_v43, %v900_v42 }
 0x115   : > { %v1274_v40 = vpop.f32.mrf.mxu1 }
 0x116   : > { %v903_v44 = vadd.f32 %v1253_v39, %v862_v41  ;;  %v1275_v45 = vadd.f32 %v1274_v40, %v1273_v34 }
 0x118   : > { %v944_v50 = vadd.f32 %v1275_v45, %v903_v44 }
 0x12d   : > { %v981_v46 = vpop.f32.mrf.mxu0 }
 0x12e   : > { %v982_v49 = vadd.f32 %v981_v46, %v941_v47 }
 0x12f   : > { %v1303_v48 = vpop.f32.mrf.mxu0 }
 0x130   : > { %v996_v54 = vmul.f32 %v982_v49, %v982_v49 }
 0x131   : > { %v984_v51 = vpop.f32.mrf.mxu0 }
 0x132   : > { %v985_v52 = vadd.f32 %v984_v51, %v944_v50 }
 0x133   : > { %v1304_v53 = vpop.f32.mrf.mxu0 }
 0x134   : > { %v988_v55 = vadd.f32 %v985_v52, %v982_v49  ;;  %v997_v56 = vmul.f32 %v985_v52, %v985_v52 }
 0x136   : > { %v989_v57 = vrot.slane %v988_v55, 4  ;;  %v998_v58 = vadd.f32 %v997_v56, %v996_v54 }
 0x138   : > { %v990_v59 = vadd.f32 %v989_v57, %v988_v55  ;;  %v999_v60 = vrot.slane %v998_v58, 4 }
 0x13a   : > { %v991_v61 = vrot.slane %v990_v59, 2  ;;  %v1000_v62 = vadd.f32 %v999_v60, %v998_v58 }
 0x13c   : > { %v992_v63 = vadd.f32 %v991_v61, %v990_v59  ;;  %v1001_v0 = vrot.slane %v1000_v62, 2 }
 0x13e   : > { %v993_v1 = vrot.slane %v992_v63, 1  ;;  %v1002_v2 = vadd.f32 %v1001_v0, %v1000_v62 }
 0x140   : > { %v994_v3 = vadd.f32 %v993_v1, %v992_v63  ;;  %v1003_v4 = vrot.slane %v1002_v2, 1 }
 0x142   : > { %v995_v5 = vmul.f32 0.0625, %v994_v3  ;;  %v1004_v6 = vadd.f32 %v1003_v4, %v1002_v2 }
 0x144   : > { %v1005_v7 = vmul.f32 0.0625, %v1004_v6  ;;  %v1006_v8 = vmul.f32 %v995_v5, %v995_v5  ;;  %v1009_v12 = vsub.f32 %v982_v49, %v995_v5  ;;  %v1010_v13 = vsub.f32 %v985_v52, %v995_v5 }
 0x146   : > { %v1007_v9 = vsub.f32 %v1005_v7, %v1006_v8 }
 0x148   : > { %v1008_v10 = vmax.f32 %v1007_v9, 0.0 }
 0x14a   : > { %v1011_v11 = vadd.f32 1e-05, %v1008_v10 }
 0x14c   : > { %1401 = vrsqrt.f32 %v1011_v11 }
 0x159   : > { %v1402_v14 = vpop.eup %1401 }
 0x15a   : > { %v1013_v15 = vmul.f32 %v1402_v14, %v1009_v12  ;;  %v1014_v16 = vmul.f32 %v1402_v14, %v1010_v13 }
 0x15c   : > { %vm1015_vm1 = vcmp.ge.f32.partialorder %v1013_v15, 0.0  ;;  %vm1016_vm2 = vcmp.ge.f32.partialorder %v1014_v16, 0.0  ;;  %v1017_v17 = vmul.f32 0.2, %v1013_v15  ;;  %v1018_v18 = vmul.f32 0.2, %v1014_v16 }
 0x15e   : > { %v1019_v19 = vsel %vm1015_vm1, %v1013_v15, %v1017_v17  ;;  %v1020_v20 = vsel %vm1016_vm2, %v1014_v16, %v1018_v18 }
 0x15f   : > { %v1186_v21 = vpack.c.bf16 %v1020_v20, %v1019_v19 }
 0x161   : > { %1187 = vst [vmem:[%s148_s6] sm:$0xff] %v1186_v21  }
 0x162 PF: > { %s12_s9 = sadd.s32 1, %s1409_s9  }
 0x163   : > { %p9_p4 = scmp.ge.s32.totalorder %s12_s9, 4  }
 0x165   :  { %11 = sbr.rel (!%p9_p4) target bundleno = 1 (0x1), region = 58 }

// kernel: netd_forward.9
= control target key start
LH: loop header
LB: loop body
LE: loop exit
PB: predicated region body
PF: predicated region fallthrough
CT: control target
= control target key end

     0   :  { %s1221_s9 = smov 0   ;;  %s1446_s0 = inlined_call_operand.vmem [shape: bf16[32,1024], index: 0, kind: input, shape index: {}]   ;;  %s1447_s1 = inlined_call_operand.vmem [shape: bf16[1024,128], index: 1, kind: input, shape index: {}]   ;;  %s1448_s2 = inlined_call_operand.vmem [shape: f32[32,128], index: 2, kind: output, shape index: {}]  }
   0x1 LB: > { %s945_s10 = sadd.s32 4294967295, %s1204_s9   ;;  %p949_p0 = scmp.ge.s32.totalorder %s1204_s9, 1  ;;  %s1204_s9 = sphi %s1221_s9, %s12_s9  }
   0x2   : > { %p114_p1 = scmp.lt.s32.totalorder %s1204_s9, 3 }
   0x4   : > { %p115_p2 = pnand %p949_p0, %p114_p1 }
   0x5   : > { %s950_s17 = sshll.u32 (!%p115_p2), %s945_s10, 1 }
   0x6   : > { %118 = sbr.rel (%p115_p2) target bundleno = 317 (0x13d), region = 28  ;;  %p138_p3 = scmp.lt.s32.totalorder (!%p115_p2), %s950_s17, 3 }
   0xb   : > { %v1126_v0 = vld [vmem:[%s1447_s1 + $0x78] sm:$0xff]   ;;  %v1130_v4 = vld [vmem:[%s1447_s1 + $0x70] sm:$0xff]   ;;  %v1134_v8 = vld [vmem:[%s1447_s1 + $0x68] sm:$0xff]   ;;  %s1450_s17 = smov (!%p138_p3, %s950_s17), 3 }
   0xc   : > { %v1127_v1 = vld [vmem:[%s1447_s1 + $0xf8] sm:$0xff]   ;;  %1030 = vmatprep.subr.bf16.mxu0 %v1126_v0  ;;  %v1131_v5 = vld [vmem:[%s1447_s1 + $0xf0] sm:$0xff]   ;;  %v1135_v9 = vld [vmem:[%s1447_s1 + $0xe8] sm:$0xff]   ;;  %s1029_s13 = sshll.u32 %s1450_s17, 5 }
   0xd   : > { %v1128_v2 = vld [vmem:[%s1447_s1 + $0x38] sm:$0xff]   ;;  %1052 = vmatprep.subr.bf16.mxu1 %v1127_v1  ;;  %v1132_v6 = vld [vmem:[%s1447_s1 + $0x30] sm:$0xff]   ;;  %v1136_v10 = vld [vmem:[%s1447_s1 + $0x28] sm:$0xff]   ;;  %s1327_s23 = scalar_lea.vmem %s1446_s0, %s1029_s13 }
   0xe   : > { %v1129_v3 = vld [vmem:[%s1447_s1 + $0xb8] sm:$0xff]   ;;  %1031 = vmatpush3.bf16.msra.mxu0 %v1128_v2  ;;  %v1133_v7 = vld [vmem:[%s1447_s1 + $0xb0] sm:$0xff]   ;;  %v1137_v11 = vld [vmem:[%s1447_s1 + $0xa8] sm:$0xff]  }
   0xf   : > { %1053 = vmatpush3.bf16.msra.mxu1 %v1129_v3  ;;  %1032 = vmatprep.subr.bf16.mxu0 %v1130_v4  ;;  %v1138_v12 = vld [vmem:[%s1447_s1 + $0x60] sm:$0xff]   ;;  %v1142_v16 = vld [vmem:[%s1447_s1 + $0x58] sm:$0xff]   ;;  %v1146_v20 = vld [vmem:[%s1447_s1 + $0x50] sm:$0xff]  }
  0x10   : > { %1054 = vmatprep.subr.bf16.mxu1 %v1131_v5  ;;  %v1139_v13 = vld [vmem:[%s1447_s1 + $0xe0] sm:$0xff]   ;;  %v1143_v17 = vld [vmem:[%s1447_s1 + $0xd8] sm:$0xff]   ;;  %v1147_v21 = vld [vmem:[%s1447_s1 + $0xd0] sm:$0xff]  }
  0x11   : > { %v1140_v14 = vld [vmem:[%s1447_s1 + $0x20] sm:$0xff]   ;;  %v1144_v18 = vld [vmem:[%s1447_s1 + $0x18] sm:$0xff]   ;;  %v1148_v22 = vld [vmem:[%s1447_s1 + $0x10] sm:$0xff]  }
  0x12   : > { %1033 = vmatpush3.bf16.msra.mxu0 %v1132_v6  ;;  %v1141_v15 = vld [vmem:[%s1447_s1 + $0xa0] sm:$0xff]   ;;  %v1145_v19 = vld [vmem:[%s1447_s1 + $0x98] sm:$0xff]   ;;  %v1149_v23 = vld [vmem:[%s1447_s1 + $0x90] sm:$0xff]  }
  0x13   : > { %1055 = vmatpush3.bf16.msra.mxu1 %v1133_v7  ;;  %1034 = vmatprep.subr.bf16.mxu0 %v1134_v8  ;;  %v1150_v24 = vld [vmem:[%s1447_s1 + $0x48] sm:$0xff]   ;;  %v1154_v28 = vld [vmem:[%s1447_s1 + $0x40] sm:$0xff]   ;;  %v1158_v40 = vld [vmem:[%s1447_s1 + $0x178] sm:$0xff]  }
  0x14   : > { %1056 = vmatprep.subr.bf16.mxu1 %v1135_v9  ;;  %v1151_v25 = vld [vmem:[%s1447_s1 + $0xc8] sm:$0xff]   ;;  %v1155_v29 = vld [vmem:[%s1447_s1 + $0xc0] sm:$0xff]   ;;  %v1159_v41 = vld [vmem:[%s1447_s1 + $0x1f8] sm:$0xff]  }
  0x15   : > { %v1152_v26 = vld [vmem:[%s1447_s1 + $0x8] sm:$0xff]   ;;  %v1156_v30 = vld [vmem:[%s1447_s1] sm:$0xff]   ;;  %v1160_v42 = vld [vmem:[%s1447_s1 + $0x138] sm:$0xff]  }
  0x16   : > { %1035 = vmatpush3.bf16.msra.mxu0 %v1136_v10  ;;  %v1153_v27 = vld [vmem:[%s1447_s1 + $0x88] sm:$0xff]   ;;  %v1157_v31 = vld [vmem:[%s1447_s1 + $0x80] sm:$0xff]   ;;  %v1161_v43 = vld [vmem:[%s1447_s1 + $0x1b8] sm:$0xff]  }
  0x17   : > { %1057 = vmatpush3.bf16.msra.mxu1 %v1137_v11  ;;  %1036 = vmatprep.subr.bf16.mxu0 %v1138_v12  ;;  %v151_v32 = vld [vmem:[%s1327_s23] sm:$0xff]  ;;  %v152_v34 = vld [vmem:[%s1327_s23 + $0x8] sm:$0xff]  ;;  %v1162_v44 = vld [vmem:[%s1447_s1 + $0x170] sm:$0xff]  }
  0x18   : > { %1058 = vmatprep.subr.bf16.mxu1 %v1139_v13  ;;  %v155_v33 = vld [vmem:[%s1327_s23 + $0x20] sm:$0xff]  ;;  %v156_v37 = vld [vmem:[%s1327_s23 + $0x28] sm:$0xff]  ;;  %v1163_v45 = vld [vmem:[%s1447_s1 + $0x1f0] sm:$0xff]  }
  0x19   : > { %v955_v35 = vcombine.low %v151_v32, %v155_v33  ;;  %v956_v36 = vcombine.high %v151_v32, %v155_v33  ;;  %v957_v38 = vcombine.low %v152_v34, %v156_v37  ;;  %v958_v39 = vcombine.high %v152_v34, %v156_v37  ;;  %v1164_v46 = vld [vmem:[%s1447_s1 + $0x130] sm:$0xff]   ;;  %v1166_v48 = vld [vmem:[%s1447_s1 + $0x168] sm:$0xff]   ;;  %v1170_v52 = vld [vmem:[%s1447_s1 + $0x160] sm:$0xff]  }
  0x1a   : > { %1037 = vmatpush3.bf16.msra.mxu0 %v1140_v14  ;;  %v1165_v47 = vld [vmem:[%s1447_s1 + $0x1b0] sm:$0xff]   ;;  %v1167_v49 = vld [vmem:[%s1447_s1 + $0x1e8] sm:$0xff]   ;;  %v1171_v53 = vld [vmem:[%s1447_s1 + $0x1e0] sm:$0xff]  }
  0x1b   : > { %1059 = vmatpush3.bf16.msra.mxu1 %v1141_v15  ;;  %1038 = vmatprep.subr.bf16.mxu0 %v1142_v16  ;;  %v1168_v50 = vld [vmem:[%s1447_s1 + $0x128] sm:$0xff]   ;;  %v1172_v54 = vld [vmem:[%s1447_s1 + $0x120] sm:$0xff]   ;;  %v1174_v56 = vld [vmem:[%s1447_s1 + $0x158] sm:$0xff]  }
  0x1c   : > { %1060 = vmatprep.subr.bf16.mxu1 %v1143_v17  ;;  %743 = vmatprep.mubr.bf16.mxu0 %v956_v36  ;;  %v1169_v51 = vld [vmem:[%s1447_s1 + $0x1a8] sm:$0xff]   ;;  %v1173_v55 = vld [vmem:[%s1447_s1 + $0x1a0] sm:$0xff]   ;;  %v1175_v57 = vld [vmem:[%s1447_s1 + $0x1d8] sm:$0xff]  }
  0x1d   : > { %784 = vmatprep.mubr.bf16.mxu1 %v958_v39  ;;  %v1176_v58 = vld [vmem:[%s1447_s1 + $0x118] sm:$0xff]   ;;  %v1178_v60 = vld [vmem:[%s1447_s1 + $0x150] sm:$0xff]   ;;  %v1182_v0 = vld [vmem:[%s1447_s1 + $0x148] sm:$0xff]  }
  0x1e   : > { %1039 = vmatpush3.bf16.msra.mxu0 %v1144_v18  ;;  %v1177_v59 = vld [vmem:[%s1447_s1 + $0x198] sm:$0xff]   ;;  %v1179_v61 = vld [vmem:[%s1447_s1 + $0x1d0] sm:$0xff]   ;;  %v1183_v1 = vld [vmem:[%s1447_s1 + $0x1c8] sm:$0xff]  }
  0x1f   : > { %1061 = vmatpush3.bf16.msra.mxu1 %v1145_v19  ;;  %1040 = vmatprep.subr.bf16.mxu0 %v1146_v20  ;;  %v1180_v62 = vld [vmem:[%s1447_s1 + $0x110] sm:$0xff]   ;;  %v1184_v2 = vld [vmem:[%s1447_s1 + $0x108] sm:$0xff]   ;;  %v1186_v4 = vld [vmem:[%s1447_s1 + $0x140] sm:$0xff]  }
  0x20   : > { %1062 = vmatprep.subr.bf16.mxu1 %v1147_v21  ;;  %v1181_v63 = vld [vmem:[%s1447_s1 + $0x190] sm:$0xff]   ;;  %v1185_v3 = vld [vmem:[%s1447_s1 + $0x188] sm:$0xff]   ;;  %v1187_v5 = vld [vmem:[%s1447_s1 + $0x1c0] sm:$0xff]  }
  0x21   : > { %v1188_v6 = vld [vmem:[%s1447_s1 + $0x100] sm:$0xff]   ;;  %v153_v8 = vld [vmem:[%s1327_s23 + $0x10] sm:$0xff]  ;;  %v154_v12 = vld [vmem:[%s1327_s23 + $0x18] sm:$0xff] }
  0x22   : > { %1041 = vmatpush3.bf16.msra.mxu0 %v1148_v22  ;;  %v1189_v7 = vld [vmem:[%s1447_s1 + $0x180] sm:$0xff]   ;;  %v157_v9 = vld [vmem:[%s1327_s23 + $0x30] sm:$0xff]  ;;  %v158_v13 = vld [vmem:[%s1327_s23 + $0x38] sm:$0xff]  ;;  %s954_s23 = sshll.u32 %s1450_s17, 3 }
  0x23   : > { %1063 = vmatpush3.bf16.msra.mxu1 %v1149_v23  ;;  %1042 = vmatprep.subr.bf16.mxu0 %v1150_v24  ;;  %v959_v10 = vcombine.low %v153_v8, %v157_v9  ;;  %v960_v11 = vcombine.high %v153_v8, %v157_v9  ;;  %v961_v14 = vcombine.low %v154_v12, %v158_v13  ;;  %s148_s18 = scalar_lea.vmem %s1448_s2, %s954_s23 }
  0x24   : > { %1064 = vmatprep.subr.bf16.mxu1 %v1151_v25  ;;  %v962_v15 = vcombine.high %v154_v12, %v158_v13 }
  0x26   : > { %1043 = vmatpush3.bf16.msra.mxu0 %v1152_v26 }
  0x27   : > { %1065 = vmatpush3.bf16.msra.mxu1 %v1153_v27  ;;  %1044 = vmatprep.subr.bf16.mxu0 %v1154_v28 }
  0x28   : > { %1066 = vmatprep.subr.bf16.mxu1 %v1155_v29 }
  0x2a   : > { %1045 = vmatpush3.bf16.msra.mxu0 %v1156_v30 }
  0x2b   : > { %1067 = vmatpush3.bf16.msra.mxu1 %v1157_v31  ;;  %1074 = vmatprep.subr.bf16.mxu0 %v1158_v40 }
  0x2c   : > { %1096 = vmatprep.subr.bf16.mxu1 %v1159_v41 }
  0x2d   : > { %744 = vmatmul.mubr.bf16.vlgmr.msra.gmra.mxu0 %v955_v35 }
  0x2e   : > { %785 = vmatmul.mubr.bf16.vlgmr.msra.gmra.mxu1 %v957_v38  ;;  %1075 = vmatpush3.bf16.msra.mxu0 %v1160_v42 }
  0x2f   : > { %1097 = vmatpush3.bf16.msra.mxu1 %v1161_v43  ;;  %1076 = vmatprep.subr.bf16.mxu0 %v1162_v44 }
  0x30   : > { %1098 = vmatprep.subr.bf16.mxu1 %v1163_v45  ;;  %825 = vmatprep.mubr.bf16.mxu0 %v960_v11 }
  0x31   : > { %866 = vmatprep.mubr.bf16.mxu1 %v962_v15 }
  0x32   : > { %1077 = vmatpush3.bf16.msra.mxu0 %v1164_v46 }
  0x33   : > { %1099 = vmatpush3.bf16.msra.mxu1 %v1165_v47  ;;  %1078 = vmatprep.subr.bf16.mxu0 %v1166_v48 }
  0x34   : > { %1100 = vmatprep.subr.bf16.mxu1 %v1167_v49 }
  0x36   : > { %1079 = vmatpush3.bf16.msra.mxu0 %v1168_v50 }
  0x37   : > { %1101 = vmatpush3.bf16.msra.mxu1 %v1169_v51  ;;  %1080 = vmatprep.subr.bf16.mxu0 %v1170_v52 }
  0x38   : > { %1102 = vmatprep.subr.bf16.mxu1 %v1171_v53 }
  0x3a   : > { %1081 = vmatpush3.bf16.msra.mxu0 %v1172_v54 }
  0x3b   : > { %1103 = vmatpush3.bf16.msra.mxu1 %v1173_v55  ;;  %1082 = vmatprep.subr.bf16.mxu0 %v1174_v56 }
  0x3c   : > { %1104 = vmatprep.subr.bf16.mxu1 %v1175_v57 }
  0x3e   : > { %1083 = vmatpush3.bf16.msra.mxu0 %v1176_v58 }
  0x3f   : > { %1105 = vmatpush3.bf16.msra.mxu1 %v1177_v59  ;;  %1084 = vmatprep.subr.bf16.mxu0 %v1178_v60 }
  0x40   : > { %1106 = vmatprep.subr.bf16.mxu1 %v1179_v61 }
  0x42   : > { %1085 = vmatpush3.bf16.msra.mxu0 %v1180_v62 }
  0x43   : > { %1107 = vmatpush3.bf16.msra.mxu1 %v1181_v63  ;;  %1086 = vmatprep.subr.bf16.mxu0 %v1182_v0 }
  0x44   : > { %1108 = vmatprep.subr.bf16.mxu1 %v1183_v1 }
  0x46   : > { %1087 = vmatpush3.bf16.msra.mxu0 %v1184_v2 }
  0x47   : > { %1109 = vmatpush3.bf16.msra.mxu1 %v1185_v3  ;;  %1088 = vmatprep.subr.bf16.mxu0 %v1186_v4 }
  0x48   : > { %1110 = vmatprep.subr.bf16.mxu1 %v1187_v5 }
  0x4a   : > { %1089 = vmatpush3.bf16.msra.mxu0 %v1188_v6 }
  0x4b   : > { %1111 = vmatpush3.bf16.msra.mxu1 %v1189_v7 }
  0x4d   : > { %826 = vmatmul.mubr.bf16.vlgmr.msra.gmra.mxu0 %v959_v10 }
  0x4e   : > { %867 = vmatmul.mubr.bf16.vlgmr.msra.gmra.mxu1 %v961_v14 }
  0xed   : > { %v1046_v16 = vpop.f32.mrf.mxu0 }
  0xee   : > { %v1068_v17 = vpop.f32.mrf.mxu1 }
  0xef   : > { %v1047_v18 = vpop.f32.mrf.mxu0 }
  0xf0   : > { %v1069_v19 = vpop.f32.mrf.mxu1  ;;  %v1048_v23 = vadd.f32 %v1047_v18, %v1046_v16 }
  0xf1   : > { %v1049_v20 = vpop.f32.mrf.mxu0  ;;  %v1070_v24 = vadd.f32 %v1069_v19, %v1068_v17 }
  0xf2   : > { %v1071_v21 = vpop.f32.mrf.mxu1 }
  0xf3   : > { %v1050_v22 = vpop.f32.mrf.mxu0  ;;  %v787_v29 = vadd.f32 %v1070_v24, %v1048_v23 }
  0xf4   : > { %v1072_v25 = vpop.f32.mrf.mxu1  ;;  %v1051_v30 = vadd.f32 %v1050_v22, %v1049_v20 }
  0xf5   : > { %v1073_v31 = vadd.f32 %v1072_v25, %v1071_v21 }
  0xf7   : > { %v790_v39 = vadd.f32 %v1073_v31, %v1051_v30 }
 0x10d   : > { %v1090_v26 = vpop.f32.mrf.mxu0 }
 0x10e   : > { %v1112_v27 = vpop.f32.mrf.mxu1 }
 0x10f   : > { %v1091_v28 = vpop.f32.mrf.mxu0 }
 0x110   : > { %v1092_v32 = vadd.f32 %v1091_v28, %v1090_v26  ;;  %v1113_v33 = vpop.f32.mrf.mxu1 }
 0x111   : > { %v1093_v34 = vpop.f32.mrf.mxu0  ;;  %v1114_v36 = vadd.f32 %v1113_v33, %v1112_v27 }
 0x112   : > { %v828_v35 = vadd.f32 %v1092_v32, %v787_v29  ;;  %v1115_v37 = vpop.f32.mrf.mxu1 }
 0x113   : > { %v1094_v38 = vpop.f32.mrf.mxu0 }
 0x114   : > { %v869_v40 = vadd.f32 %v1114_v36, %v828_v35  ;;  %v1095_v41 = vadd.f32 %v1094_v38, %v1093_v34  ;;  %v1116_v42 = vpop.f32.mrf.mxu1 }
 0x115   : > { %v1117_v45 = vadd.f32 %v1116_v42, %v1115_v37 }
 0x116   : > { %v875_v43 = vsub.f32 0.0, %v869_v40  ;;  %v831_v44 = vadd.f32 %v1095_v41, %v790_v39 }
 0x118   : > { %v877_v46 = vmul.f32 1.442695, %v875_v43  ;;  %v872_v47 = vadd.f32 %v1117_v45, %v831_v44 }
 0x11a   : > { %1190 = vpow2.f32 %v877_v46  ;;  %v876_v48 = vsub.f32 0.0, %v872_v47 }
 0x11c   : > { %v879_v49 = vmul.f32 1.442695, %v876_v48 }
 0x11e   : > { %1192 = vpow2.f32 %v879_v49 }
 0x127   : > { %v1191_v50 = vpop.eup %1190 }
 0x128   : > { %v881_v51 = vadd.f32 1.0, %v1191_v50 }
 0x12a   : > { %1194 = vrcp.f32 %v881_v51 }
 0x12b   : > { %v1193_v52 = vpop.eup %1192 }
 0x12c   : > { %v882_v53 = vadd.f32 1.0, %v1193_v52 }
 0x12e   : > { %1196 = vrcp.f32 %v882_v53 }
 0x137   : > { %v1195_v54 = vpop.eup %1194 }
 0x138   : > { %887 = vst [vmem:[%s148_s18] sm:$0xff] %v1195_v54 }
 0x13b   : > { %v1197_v55 = vpop.eup %1196 }
 0x13c   : > { %888 = vst [vmem:[%s148_s18 + $0x8] sm:$0xff] %v1197_v55 }
 0x13d PF: > { %s12_s9 = sadd.s32 1, %s1204_s9  }
 0x13e   : > { %p9_p4 = scmp.ge.s32.totalorder %s12_s9, 4  }
 0x140   :  { %11 = sbr.rel (!%p9_p4) target bundleno = 1 (0x1), region = 58 }

</bundles_post_ra>
